<compile_context>
chip_gen: v5e
topology: v5e:2x2
jax: 0.10.0
libtpu: 0.0.40
codegen_flags: <defaults>
</compile_context>

<pallas_src>
import math

import jax
import jax.numpy as jnp
from jax import lax
from jax.experimental import pallas as pl
from jax.experimental.pallas import tpu as pltpu

# ---- model hyper-params (small, consistent with the module's forward) ----
D_MODEL = 32
NHEAD = 4
HEAD_DIM = D_MODEL // NHEAD
DIM_FF = 64
NUM_LAYERS = 2
SEQ = 8
BATCH = 2
LN_EPS = 1e-5

assert D_MODEL % NHEAD == 0

_WEIGHT_ORDER = (
    "sa_wq", "sa_bq", "sa_wk", "sa_bk", "sa_wv", "sa_bv", "sa_wo", "sa_bo",
    "ca_wq", "ca_bq", "ca_wk", "ca_bk", "ca_wv", "ca_bv", "ca_wo", "ca_bo",
    "w1", "b1", "w2", "b2",
    "n1g", "n1b", "n2g", "n2b", "n3g", "n3b",
)


# =====================  in-kernel building blocks  =====================

def _layer_norm(y, g, b):
    mean = jnp.mean(y, axis=-1, keepdims=True)
    var = jnp.mean(jnp.square(y - mean), axis=-1, keepdims=True)
    return (y - mean) * lax.rsqrt(var + LN_EPS) * g + b


def _mha(xq, xk, xv, wq, bq, wk, bk, wv, bv, wo, bo):
    """Multi-head attention on one batch element; heads = leading batch dim.

    xq: (Sq, D), xk/xv: (Sk, D); wq/wk/wv: (H, D, hd); bq/bk/bv: (H, 1, hd);
    wo: (H, hd, D); bo: (1, D).  Returns (Sq, D) float32.
    """
    nheads, _, hd = wq.shape
    scale = 1.0 / math.sqrt(hd)
    xq3 = jnp.broadcast_to(xq[None], (nheads,) + xq.shape)
    xk3 = jnp.broadcast_to(xk[None], (nheads,) + xk.shape)
    xv3 = jnp.broadcast_to(xv[None], (nheads,) + xv.shape)
    # head-batched projections (standard contraction orientation)
    q = jnp.einsum("hsd,hde->hse", xq3, wq, preferred_element_type=jnp.float32) + bq
    k = jnp.einsum("hsd,hde->hse", xk3, wk, preferred_element_type=jnp.float32) + bk
    v = jnp.einsum("hsd,hde->hse", xv3, wv, preferred_element_type=jnp.float32) + bv
    # scores + softmax (EUP reciprocal)
    s = jnp.einsum("hqe,hke->hqk", q * scale, k, preferred_element_type=jnp.float32)
    s = s - jnp.max(s, axis=-1, keepdims=True)
    p = jnp.exp(s)
    p = p * pl.reciprocal(jnp.sum(p, axis=-1, keepdims=True), approx=True)
    # AV and per-head output projection, summed over heads (+ output bias)
    o = jnp.einsum("hqk,hke->hqe", p, v, preferred_element_type=jnp.float32)
    proj = jnp.einsum("hqe,hed->hqd", o, wo, preferred_element_type=jnp.float32)
    return jnp.sum(proj, axis=0) + bo


def _ffn(x, w1, b1, w2, b2):
    # linear2(relu(linear1(x)))  (dropout is identity in eval mode)
    h = jnp.dot(x, w1, preferred_element_type=jnp.float32) + b1
    h = jnp.maximum(h, 0.0)
    return jnp.dot(h, w2, preferred_element_type=jnp.float32) + b2


def _make_layer_kernel(batch: int, with_input_norm: bool):
    """Fused DETR decoder layer (post-norm, eval) for one view; grid axis = view."""

    def kernel(*refs):
        out_ref = refs[-1]
        ins = refs[:-1]
        tgt_ref, mem_ref, qpos_ref, kpos_ref = ins[:4]
        idx = 4
        if with_input_norm:
            tng, tnb, mng, mnb = (ins[4][...], ins[5][...], ins[6][...], ins[7][...])
            idx = 8
        (sa_wq, sa_bq, sa_wk, sa_bk, sa_wv, sa_bv, sa_wo, sa_bo,
         ca_wq, ca_bq, ca_wk, ca_bk, ca_wv, ca_bv, ca_wo, ca_bo,
         w1, b1, w2, b2,
         n1g, n1b, n2g, n2b, n3g, n3b) = [r[...] for r in ins[idx:]]

        for b in range(batch):                       # B=2 -> unrolled at trace time
            tgt = tgt_ref[b].astype(jnp.float32)     # (S, D)
            mem = mem_ref[b].astype(jnp.float32)     # (S, D)
            qp = qpos_ref[b].astype(jnp.float32)
            kp = kpos_ref[b].astype(jnp.float32)

            if with_input_norm:                      # module-level norm1/norm2 (layer 0)
                tgt = _layer_norm(tgt, tng, tnb)
                mem = _layer_norm(mem, mng, mnb)

            # --- self-attention: q = k = tgt + query_pos, v = tgt ---
            qin = tgt + qp
            sa = _mha(qin, qin, tgt,
                      sa_wq, sa_bq, sa_wk, sa_bk, sa_wv, sa_bv, sa_wo, sa_bo)
            tgt = _layer_norm(tgt + sa, n1g, n1b)

            # --- cross-attention: q = tgt + query_pos, k = memory + pos, v = memory ---
            ca = _mha(tgt + qp, mem + kp, mem,
                      ca_wq, ca_bq, ca_wk, ca_bk, ca_wv, ca_bv, ca_wo, ca_bo)
            tgt = _layer_norm(tgt + ca, n2g, n2b)

            # --- FFN ---
            ff = _ffn(tgt, w1, b1, w2, b2)
            tgt = _layer_norm(tgt + ff, n3g, n3b)

            out_ref[b] = tgt.astype(out_ref.dtype)

    return kernel


# =====================  pallas_call wrapper  =====================

def _pick(shape):
    """BlockSpec for an array stacked along a leading view dim: grid step v takes block v."""
    nz = (0,) * len(shape)

    def imap(v):
        return (v,) + nz

    return pl.BlockSpec((None,) + tuple(shape), imap)


def _pick_other(shape):
    """Same, but grid step v takes the OTHER view's block (1 - v)."""
    nz = (0,) * len(shape)

    def imap(v):
        return (1 - v,) + nz

    return pl.BlockSpec((None,) + tuple(shape), imap)


def _fused_layer(x, pos, lp, input_norm):
    """One two-view decoder layer; both view updates in a single pallas_call.

    x, pos      : (2, B, S, D) stacked [CC, MLO]
    lp          : dict of direction-stacked weights (leading dim 2: [CC<-MLO, MLO<-CC])
    input_norm  : None, or (gamma, beta) each (2, 1, D) -- module-level norm1/norm2.
    """
    V, B, S, D = x.shape
    with_norm = input_norm is not None

    inputs = [x, x, pos, pos]
    in_specs = [_pick((B, S, D)), _pick_other((B, S, D)),
                _pick((B, S, D)), _pick_other((B, S, D))]
    if with_norm:
        g, bt = input_norm
        inputs += [g, bt, g, bt]
        in_specs += [_pick((1, D)), _pick((1, D)),
                     _pick_other((1, D)), _pick_other((1, D))]
    for name in _WEIGHT_ORDER:
        w = lp[name]
        inputs.append(w)
        in_specs.append(_pick(w.shape[1:]))

    return pl.pallas_call(
        _make_layer_kernel(B, with_norm),
        out_shape=jax.ShapeDtypeStruct((V, B, S, D), x.dtype),
        grid=(V,),
        in_specs=in_specs,
        out_specs=_pick((B, S, D)),
        compiler_params=pltpu.CompilerParams(
            # The two views are independent within a layer -> v7x shards them across
            # its 2 TensorCores; on v5e/v6e this is just a 2-step sequential loop.
            dimension_semantics=("parallel",)),
    )(*inputs)


# =====================  parameter preparation (host side, once)  =====================

def _prep_attn(p):
    D, H, hd = D_MODEL, NHEAD, HEAD_DIM

    def heads(w):  # (D, D) slice of in_proj_weight (rows = out) -> (H, D, hd)
        return jnp.transpose(w.reshape(H, hd, D), (0, 2, 1))

    in_w, in_b = p["in_w"], p["in_b"]
    return dict(
        wq=heads(in_w[:D]), wk=heads(in_w[D:2 * D]), wv=heads(in_w[2 * D:]),
        bq=in_b[:D].reshape(H, 1, hd),
        bk=in_b[D:2 * D].reshape(H, 1, hd),
        bv=in_b[2 * D:].reshape(H, 1, hd),
        wo=p["out_w"].T.reshape(H, hd, D),      # [h, e, d]
        bo=p["out_b"].reshape(1, D),
    )


def _prep_layer(p):
    d = {}
    for k, v in _prep_attn(p["self_attn"]).items():
        d["sa_" + k] = v
    for k, v in _prep_attn(p["cross_attn"]).items():
        d["ca_" + k] = v
    d["w1"] = p["lin1_w"].T                     # (D, DIM_FF)  pre-transposed
    d["b1"] = p["lin1_b"].reshape(1, -1)
    d["w2"] = p["lin2_w"].T                     # (DIM_FF, D)  pre-transposed
    d["b2"] = p["lin2_b"].reshape(1, -1)
    for i, nm in ((1, "n1"), (2, "n2"), (3, "n3")):
        d[nm + "g"] = p["norm%d_w" % i].reshape(1, -1)
        d[nm + "b"] = p["norm%d_b" % i].reshape(1, -1)
    return d


def prepare_params(params):
    """Convert PyTorch-layout params to kernel layout, stacking the two directions."""
    layers = []
    for i in range(NUM_LAYERS):
        a = _prep_layer(params["layers_cc_mlo"][i])   # updates CC (memory = MLO)
        b = _prep_layer(params["layers_mlo_cc"][i])   # updates MLO (memory = CC)
        layers.append({k: jnp.stack([a[k], b[k]], axis=0) for k in a})
    prep = {"layers": layers}
    if params.get("norm1_w") is not None:             # module-level norm1 (CC) / norm2 (MLO)
        prep["in_norm_g"] = jnp.stack(
            [params["norm1_w"], params["norm2_w"]], 0).reshape(2, 1, D_MODEL)
        prep["in_norm_b"] = jnp.stack(
            [params["norm1_b"], params["norm2_b"]], 0).reshape(2, 1, D_MODEL)
    return prep


# =====================  forward pass  =====================

def twoview_transformer_decoder(prepared, roi_CC, roi_MLO,
                                CC_mask=None, MLO_mask=None,
                                CC_key_padding_mask=None, MLO_key_padding_mask=None,
                                MLO_pos=None, CC_pos=None):
    # TODO(synk): attn masks / key_padding_masks are not applied (None in this example).
    cc_pos = CC_pos if CC_pos is not None else jnp.zeros_like(roi_CC)
    mlo_pos = MLO_pos if MLO_pos is not None else jnp.zeros_like(roi_MLO)

    # (S, B, D) x 2 views  ->  (view, B, S, D) stacked [CC, MLO]
    x = jnp.transpose(jnp.stack([roi_CC, roi_MLO], axis=0), (0, 2, 1, 3))
    pos = jnp.transpose(jnp.stack([cc_pos, mlo_pos], axis=0), (0, 2, 1, 3))

    in_norm = None
    if "in_norm_g" in prepared:
        in_norm = (prepared["in_norm_g"], prepared["in_norm_b"])

    for i, lp in enumerate(prepared["layers"]):
        x = _fused_layer(x, pos, lp, in_norm if i == 0 else None)

    out = jnp.transpose(x, (0, 2, 1, 3))        # back to (view, S, B, D)
    return out[0], out[1]


# =====================  pure-JAX reference (for validation only)  =====================

def _ref_ln(x, g, b):
    m = x.mean(-1, keepdims=True)
    v = ((x - m) ** 2).mean(-1, keepdims=True)
    return (x - m) / jnp.sqrt(v + LN_EPS) * g + b


def _ref_mha(xq, xk, xv, p):
    D, H, hd = D_MODEL, NHEAD, HEAD_DIM
    q = xq @ p["in_w"][:D].T + p["in_b"][:D]
    k = xk @ p["in_w"][D:2 * D].T + p["in_b"][D:2 * D]
    v = xv @ p["in_w"][2 * D:].T + p["in_b"][2 * D:]

    def split(x):
        return x.reshape(x.shape[0], x.shape[1], H, hd).transpose(0, 2, 1, 3)

    q, k, v = split(q), split(k), split(v)
    s = (q / math.sqrt(hd)) @ k.transpose(0, 1, 3, 2)
    a = jax.nn.softmax(s, axis=-1)
    o = (a @ v).transpose(0, 2, 1, 3).reshape(xq.shape[0], xq.shape[1], D)
    return o @ p["out_w"].T + p["out_b"]


def _ref_layer(p, tgt, memory, query_pos, pos):
    q = tgt + query_pos
    sa = _ref_mha(q, q, tgt, p["self_attn"])
    tgt = _ref_ln(tgt + sa, p["norm1_w"], p["norm1_b"])
    ca = _ref_mha(tgt + query_pos, memory + pos, memory, p["cross_attn"])
    tgt = _ref_ln(tgt + ca, p["norm2_w"], p["norm2_b"])
    ff = jnp.maximum(tgt @ p["lin1_w"].T + p["lin1_b"], 0.0) @ p["lin2_w"].T + p["lin2_b"]
    return _ref_ln(tgt + ff, p["norm3_w"], p["norm3_b"])


def _ref_forward(params, roi_CC, roi_MLO, MLO_pos, CC_pos):
    t = lambda a: jnp.transpose(a, (1, 0, 2))
    cc, mlo, ccp, mlop = t(roi_CC), t(roi_MLO), t(CC_pos), t(MLO_pos)
    if params.get("norm1_w") is not None:
        cc = _ref_ln(cc, params["norm1_w"], params["norm1_b"])
        mlo = _ref_ln(mlo, params["norm2_w"], params["norm2_b"])
    for i in range(NUM_LAYERS):
        cc1 = _ref_layer(params["layers_cc_mlo"][i], cc, mlo, ccp, mlop)
        mlo1 = _ref_layer(params["layers_mlo_cc"][i], mlo, cc, mlop, ccp)
        cc, mlo = cc1, mlo1
    return t(cc), t(mlo)


# =====================  deterministic parameter init  =====================

def _init_attn_params(key):
    k1, k2, k3, k4 = jax.random.split(key, 4)
    return dict(
        in_w=jax.random.normal(k1, (3 * D_MODEL, D_MODEL), jnp.float32) * 0.05,
        in_b=jax.random.normal(k2, (3 * D_MODEL,), jnp.float32) * 0.02,
        out_w=jax.random.normal(k3, (D_MODEL, D_MODEL), jnp.float32) * 0.05,
        out_b=jax.random.normal(k4, (D_MODEL,), jnp.float32) * 0.02,
    )


def _init_layer_params(key):
    ks = jax.random.split(key, 6)
    return dict(
        self_attn=_init_attn_params(ks[0]),
        cross_attn=_init_attn_params(ks[1]),
        lin1_w=jax.random.normal(ks[2], (DIM_FF, D_MODEL), jnp.float32) * 0.05,
        lin1_b=jax.random.normal(ks[3], (DIM_FF,), jnp.float32) * 0.02,
        lin2_w=jax.random.normal(ks[4], (D_MODEL, DIM_FF), jnp.float32) * 0.05,
        lin2_b=jax.random.normal(ks[5], (D_MODEL,), jnp.float32) * 0.02,
        norm1_w=jnp.ones((D_MODEL,), jnp.float32), norm1_b=jnp.zeros((D_MODEL,), jnp.float32),
        norm2_w=jnp.ones((D_MODEL,), jnp.float32), norm2_b=jnp.zeros((D_MODEL,), jnp.float32),
        norm3_w=jnp.ones((D_MODEL,), jnp.float32), norm3_b=jnp.zeros((D_MODEL,), jnp.float32),
    )


def init_params(key):
    k_cc, k_mlo = jax.random.split(key, 2)
    return dict(
        layers_cc_mlo=[_init_layer_params(k) for k in jax.random.split(k_cc, NUM_LAYERS)],
        layers_mlo_cc=[_init_layer_params(k) for k in jax.random.split(k_mlo, NUM_LAYERS)],
        norm1_w=jnp.ones((D_MODEL,), jnp.float32), norm1_b=jnp.zeros((D_MODEL,), jnp.float32),
        norm2_w=jnp.ones((D_MODEL,), jnp.float32), norm2_b=jnp.zeros((D_MODEL,), jnp.float32),
    )


# =====================  main  =====================

if __name__ == "__main__":
    key = jax.random.PRNGKey(0)
    kp, k1, k2, k3, k4 = jax.random.split(key, 5)

    raw_params = init_params(kp)
    prepared = prepare_params(raw_params)   # one-time weight re-layout / stacking

    roi_CC = jax.random.normal(k1, (SEQ, BATCH, D_MODEL), jnp.float32)
    roi_MLO = jax.random.normal(k2, (SEQ, BATCH, D_MODEL), jnp.float32)
    CC_pos = jax.random.normal(k3, (SEQ, BATCH, D_MODEL), jnp.float32) * 0.1
    MLO_pos = jax.random.normal(k4, (SEQ, BATCH, D_MODEL), jnp.float32) * 0.1

    fwd = jax.jit(lambda p, cc, mlo, mp, cp: twoview_transformer_decoder(
        p, cc, mlo, MLO_pos=mp, CC_pos=cp))
    out_cc, out_mlo = fwd(prepared, roi_CC, roi_MLO, MLO_pos, CC_pos)
    jax.block_until_ready((out_cc, out_mlo))

    assert out_cc.shape == (SEQ, BATCH, D_MODEL)
    assert out_mlo.shape == (SEQ, BATCH, D_MODEL)
    assert bool(jnp.all(jnp.isfinite(out_cc))) and bool(jnp.all(jnp.isfinite(out_mlo)))

    # Validate against a pure-JAX reference of the PyTorch module.
    # Loose tolerance: the kernel's softmax uses the approximate EUP reciprocal.
    ref_cc, ref_mlo = _ref_forward(raw_params, roi_CC, roi_MLO, MLO_pos, CC_pos)
    assert bool(jnp.allclose(out_cc, ref_cc, atol=5e-2, rtol=5e-2))
    assert bool(jnp.allclose(out_mlo, ref_mlo, atol=5e-2, rtol=5e-2))

    print("KERNEL_OK")
</pallas_src>

<mosaic_0001>
module attributes {stable_mosaic.version = 11 : i64} {
  func.func @kernel(%arg0: i32, %arg1: memref<1x2x8x32xf32, #tpu.memory_space<vmem>>, %arg2: memref<1x2x8x32xf32, #tpu.memory_space<vmem>>, %arg3: memref<1x2x8x32xf32, #tpu.memory_space<vmem>>, %arg4: memref<1x2x8x32xf32, #tpu.memory_space<vmem>>, %arg5: memref<1x1x32xf32, #tpu.memory_space<vmem>>, %arg6: memref<1x1x32xf32, #tpu.memory_space<vmem>>, %arg7: memref<1x1x32xf32, #tpu.memory_space<vmem>>, %arg8: memref<1x1x32xf32, #tpu.memory_space<vmem>>, %arg9: memref<1x4x32x8xf32, #tpu.memory_space<vmem>>, %arg10: memref<1x4x1x8xf32, #tpu.memory_space<vmem>>, %arg11: memref<1x4x32x8xf32, #tpu.memory_space<vmem>>, %arg12: memref<1x4x1x8xf32, #tpu.memory_space<vmem>>, %arg13: memref<1x4x32x8xf32, #tpu.memory_space<vmem>>, %arg14: memref<1x4x1x8xf32, #tpu.memory_space<vmem>>, %arg15: memref<1x4x8x32xf32, #tpu.memory_space<vmem>>, %arg16: memref<1x1x32xf32, #tpu.memory_space<vmem>>, %arg17: memref<1x4x32x8xf32, #tpu.memory_space<vmem>>, %arg18: memref<1x4x1x8xf32, #tpu.memory_space<vmem>>, %arg19: memref<1x4x32x8xf32, #tpu.memory_space<vmem>>, %arg20: memref<1x4x1x8xf32, #tpu.memory_space<vmem>>, %arg21: memref<1x4x32x8xf32, #tpu.memory_space<vmem>>, %arg22: memref<1x4x1x8xf32, #tpu.memory_space<vmem>>, %arg23: memref<1x4x8x32xf32, #tpu.memory_space<vmem>>, %arg24: memref<1x1x32xf32, #tpu.memory_space<vmem>>, %arg25: memref<1x32x64xf32, #tpu.memory_space<vmem>>, %arg26: memref<1x1x64xf32, #tpu.memory_space<vmem>>, %arg27: memref<1x64x32xf32, #tpu.memory_space<vmem>>, %arg28: memref<1x1x32xf32, #tpu.memory_space<vmem>>, %arg29: memref<1x1x32xf32, #tpu.memory_space<vmem>>, %arg30: memref<1x1x32xf32, #tpu.memory_space<vmem>>, %arg31: memref<1x1x32xf32, #tpu.memory_space<vmem>>, %arg32: memref<1x1x32xf32, #tpu.memory_space<vmem>>, %arg33: memref<1x1x32xf32, #tpu.memory_space<vmem>>, %arg34: memref<1x1x32xf32, #tpu.memory_space<vmem>>, %arg35: memref<1x2x8x32xf32, #tpu.memory_space<vmem>>) attributes {dimension_semantics = [#tpu.dimension_semantics<parallel>], iteration_bounds = array<i64: 2>, scalar_prefetch = 0 : i64, scratch_operands = 0 : i64, tpu.core_type = #tpu.core_type<tc>, window_params = [{transform_indices = @transform_0, window_bounds = array<i64: 1, 2, 8, 32>}, {transform_indices = @transform_1, window_bounds = array<i64: 1, 2, 8, 32>}, {transform_indices = @transform_2, window_bounds = array<i64: 1, 2, 8, 32>}, {transform_indices = @transform_3, window_bounds = array<i64: 1, 2, 8, 32>}, {transform_indices = @transform_4, window_bounds = array<i64: 1, 1, 32>}, {transform_indices = @transform_5, window_bounds = array<i64: 1, 1, 32>}, {transform_indices = @transform_6, window_bounds = array<i64: 1, 1, 32>}, {transform_indices = @transform_7, window_bounds = array<i64: 1, 1, 32>}, {transform_indices = @transform_8, window_bounds = array<i64: 1, 4, 32, 8>}, {transform_indices = @transform_9, window_bounds = array<i64: 1, 4, 1, 8>}, {transform_indices = @transform_10, window_bounds = array<i64: 1, 4, 32, 8>}, {transform_indices = @transform_11, window_bounds = array<i64: 1, 4, 1, 8>}, {transform_indices = @transform_12, window_bounds = array<i64: 1, 4, 32, 8>}, {transform_indices = @transform_13, window_bounds = array<i64: 1, 4, 1, 8>}, {transform_indices = @transform_14, window_bounds = array<i64: 1, 4, 8, 32>}, {transform_indices = @transform_15, window_bounds = array<i64: 1, 1, 32>}, {transform_indices = @transform_16, window_bounds = array<i64: 1, 4, 32, 8>}, {transform_indices = @transform_17, window_bounds = array<i64: 1, 4, 1, 8>}, {transform_indices = @transform_18, window_bounds = array<i64: 1, 4, 32, 8>}, {transform_indices = @transform_19, window_bounds = array<i64: 1, 4, 1, 8>}, {transform_indices = @transform_20, window_bounds = array<i64: 1, 4, 32, 8>}, {transform_indices = @transform_21, window_bounds = array<i64: 1, 4, 1, 8>}, {transform_indices = @transform_22, window_bounds = array<i64: 1, 4, 8, 32>}, {transform_indices = @transform_23, window_bounds = array<i64: 1, 1, 32>}, {transform_indices = @transform_24, window_bounds = array<i64: 1, 32, 64>}, {transform_indices = @transform_25, window_bounds = array<i64: 1, 1, 64>}, {transform_indices = @transform_26, window_bounds = array<i64: 1, 64, 32>}, {transform_indices = @transform_27, window_bounds = array<i64: 1, 1, 32>}, {transform_indices = @transform_28, window_bounds = array<i64: 1, 1, 32>}, {transform_indices = @transform_29, window_bounds = array<i64: 1, 1, 32>}, {transform_indices = @transform_30, window_bounds = array<i64: 1, 1, 32>}, {transform_indices = @transform_31, window_bounds = array<i64: 1, 1, 32>}, {transform_indices = @transform_32, window_bounds = array<i64: 1, 1, 32>}, {transform_indices = @transform_33, window_bounds = array<i64: 1, 1, 32>}, {transform_indices = @transform_34, window_bounds = array<i64: 1, 2, 8, 32>}]} {
    %c0 = arith.constant 0 : index
    %c0_0 = arith.constant 0 : index
    %c0_1 = arith.constant 0 : index
    %0 = vector.load %arg5[%c0, %c0_0, %c0_1] : memref<1x1x32xf32, #tpu.memory_space<vmem>>, vector<1x1x32xf32>
    %1 = vector.shape_cast %0 : vector<1x1x32xf32> to vector<1x32xf32>
    %c0_2 = arith.constant 0 : index
    %c0_3 = arith.constant 0 : index
    %c0_4 = arith.constant 0 : index
    %2 = vector.load %arg6[%c0_2, %c0_3, %c0_4] : memref<1x1x32xf32, #tpu.memory_space<vmem>>, vector<1x1x32xf32>
    %3 = vector.shape_cast %2 : vector<1x1x32xf32> to vector<1x32xf32>
    %c0_5 = arith.constant 0 : index
    %c0_6 = arith.constant 0 : index
    %c0_7 = arith.constant 0 : index
    %4 = vector.load %arg7[%c0_5, %c0_6, %c0_7] : memref<1x1x32xf32, #tpu.memory_space<vmem>>, vector<1x1x32xf32>
    %5 = vector.shape_cast %4 : vector<1x1x32xf32> to vector<1x32xf32>
    %c0_8 = arith.constant 0 : index
    %c0_9 = arith.constant 0 : index
    %c0_10 = arith.constant 0 : index
    %6 = vector.load %arg8[%c0_8, %c0_9, %c0_10] : memref<1x1x32xf32, #tpu.memory_space<vmem>>, vector<1x1x32xf32>
    %7 = vector.shape_cast %6 : vector<1x1x32xf32> to vector<1x32xf32>
    %c0_11 = arith.constant 0 : index
    %c0_12 = arith.constant 0 : index
    %c0_13 = arith.constant 0 : index
    %c0_14 = arith.constant 0 : index
    %8 = vector.load %arg9[%c0_11, %c0_12, %c0_13, %c0_14] : memref<1x4x32x8xf32, #tpu.memory_space<vmem>>, vector<1x4x32x8xf32>
    %9 = vector.shape_cast %8 : vector<1x4x32x8xf32> to vector<4x32x8xf32>
    %c0_15 = arith.constant 0 : index
    %c0_16 = arith.constant 0 : index
    %c0_17 = arith.constant 0 : index
    %c0_18 = arith.constant 0 : index
    %10 = vector.load %arg10[%c0_15, %c0_16, %c0_17, %c0_18] : memref<1x4x1x8xf32, #tpu.memory_space<vmem>>, vector<1x4x1x8xf32>
    %11 = vector.shape_cast %10 : vector<1x4x1x8xf32> to vector<4x1x8xf32>
    %c0_19 = arith.constant 0 : index
    %c0_20 = arith.constant 0 : index
    %c0_21 = arith.constant 0 : index
    %c0_22 = arith.constant 0 : index
    %12 = vector.load %arg11[%c0_19, %c0_20, %c0_21, %c0_22] : memref<1x4x32x8xf32, #tpu.memory_space<vmem>>, vector<1x4x32x8xf32>
    %13 = vector.shape_cast %12 : vector<1x4x32x8xf32> to vector<4x32x8xf32>
    %c0_23 = arith.constant 0 : index
    %c0_24 = arith.constant 0 : index
    %c0_25 = arith.constant 0 : index
    %c0_26 = arith.constant 0 : index
    %14 = vector.load %arg12[%c0_23, %c0_24, %c0_25, %c0_26] : memref<1x4x1x8xf32, #tpu.memory_space<vmem>>, vector<1x4x1x8xf32>
    %15 = vector.shape_cast %14 : vector<1x4x1x8xf32> to vector<4x1x8xf32>
    %c0_27 = arith.constant 0 : index
    %c0_28 = arith.constant 0 : index
    %c0_29 = arith.constant 0 : index
    %c0_30 = arith.constant 0 : index
    %16 = vector.load %arg13[%c0_27, %c0_28, %c0_29, %c0_30] : memref<1x4x32x8xf32, #tpu.memory_space<vmem>>, vector<1x4x32x8xf32>
    %17 = vector.shape_cast %16 : vector<1x4x32x8xf32> to vector<4x32x8xf32>
    %c0_31 = arith.constant 0 : index
    %c0_32 = arith.constant 0 : index
    %c0_33 = arith.constant 0 : index
    %c0_34 = arith.constant 0 : index
    %18 = vector.load %arg14[%c0_31, %c0_32, %c0_33, %c0_34] : memref<1x4x1x8xf32, #tpu.memory_space<vmem>>, vector<1x4x1x8xf32>
    %19 = vector.shape_cast %18 : vector<1x4x1x8xf32> to vector<4x1x8xf32>
    %c0_35 = arith.constant 0 : index
    %c0_36 = arith.constant 0 : index
    %c0_37 = arith.constant 0 : index
    %c0_38 = arith.constant 0 : index
    %20 = vector.load %arg15[%c0_35, %c0_36, %c0_37, %c0_38] : memref<1x4x8x32xf32, #tpu.memory_space<vmem>>, vector<1x4x8x32xf32>
    %21 = vector.shape_cast %20 : vector<1x4x8x32xf32> to vector<4x8x32xf32>
    %c0_39 = arith.constant 0 : index
    %c0_40 = arith.constant 0 : index
    %c0_41 = arith.constant 0 : index
    %22 = vector.load %arg16[%c0_39, %c0_40, %c0_41] : memref<1x1x32xf32, #tpu.memory_space<vmem>>, vector<1x1x32xf32>
    %23 = vector.shape_cast %22 : vector<1x1x32xf32> to vector<1x32xf32>
    %c0_42 = arith.constant 0 : index
    %c0_43 = arith.constant 0 : index
    %c0_44 = arith.constant 0 : index
    %c0_45 = arith.constant 0 : index
    %24 = vector.load %arg17[%c0_42, %c0_43, %c0_44, %c0_45] : memref<1x4x32x8xf32, #tpu.memory_space<vmem>>, vector<1x4x32x8xf32>
    %25 = vector.shape_cast %24 : vector<1x4x32x8xf32> to vector<4x32x8xf32>
    %c0_46 = arith.constant 0 : index
    %c0_47 = arith.constant 0 : index
    %c0_48 = arith.constant 0 : index
    %c0_49 = arith.constant 0 : index
    %26 = vector.load %arg18[%c0_46, %c0_47, %c0_48, %c0_49] : memref<1x4x1x8xf32, #tpu.memory_space<vmem>>, vector<1x4x1x8xf32>
    %27 = vector.shape_cast %26 : vector<1x4x1x8xf32> to vector<4x1x8xf32>
    %c0_50 = arith.constant 0 : index
    %c0_51 = arith.constant 0 : index
    %c0_52 = arith.constant 0 : index
    %c0_53 = arith.constant 0 : index
    %28 = vector.load %arg19[%c0_50, %c0_51, %c0_52, %c0_53] : memref<1x4x32x8xf32, #tpu.memory_space<vmem>>, vector<1x4x32x8xf32>
    %29 = vector.shape_cast %28 : vector<1x4x32x8xf32> to vector<4x32x8xf32>
    %c0_54 = arith.constant 0 : index
    %c0_55 = arith.constant 0 : index
    %c0_56 = arith.constant 0 : index
    %c0_57 = arith.constant 0 : index
    %30 = vector.load %arg20[%c0_54, %c0_55, %c0_56, %c0_57] : memref<1x4x1x8xf32, #tpu.memory_space<vmem>>, vector<1x4x1x8xf32>
    %31 = vector.shape_cast %30 : vector<1x4x1x8xf32> to vector<4x1x8xf32>
    %c0_58 = arith.constant 0 : index
    %c0_59 = arith.constant 0 : index
    %c0_60 = arith.constant 0 : index
    %c0_61 = arith.constant 0 : index
    %32 = vector.load %arg21[%c0_58, %c0_59, %c0_60, %c0_61] : memref<1x4x32x8xf32, #tpu.memory_space<vmem>>, vector<1x4x32x8xf32>
    %33 = vector.shape_cast %32 : vector<1x4x32x8xf32> to vector<4x32x8xf32>
    %c0_62 = arith.constant 0 : index
    %c0_63 = arith.constant 0 : index
    %c0_64 = arith.constant 0 : index
    %c0_65 = arith.constant 0 : index
    %34 = vector.load %arg22[%c0_62, %c0_63, %c0_64, %c0_65] : memref<1x4x1x8xf32, #tpu.memory_space<vmem>>, vector<1x4x1x8xf32>
    %35 = vector.shape_cast %34 : vector<1x4x1x8xf32> to vector<4x1x8xf32>
    %c0_66 = arith.constant 0 : index
    %c0_67 = arith.constant 0 : index
    %c0_68 = arith.constant 0 : index
    %c0_69 = arith.constant 0 : index
    %36 = vector.load %arg23[%c0_66, %c0_67, %c0_68, %c0_69] : memref<1x4x8x32xf32, #tpu.memory_space<vmem>>, vector<1x4x8x32xf32>
    %37 = vector.shape_cast %36 : vector<1x4x8x32xf32> to vector<4x8x32xf32>
    %c0_70 = arith.constant 0 : index
    %c0_71 = arith.constant 0 : index
    %c0_72 = arith.constant 0 : index
    %38 = vector.load %arg24[%c0_70, %c0_71, %c0_72] : memref<1x1x32xf32, #tpu.memory_space<vmem>>, vector<1x1x32xf32>
    %39 = vector.shape_cast %38 : vector<1x1x32xf32> to vector<1x32xf32>
    %c0_73 = arith.constant 0 : index
    %c0_74 = arith.constant 0 : index
    %c0_75 = arith.constant 0 : index
    %40 = vector.load %arg25[%c0_73, %c0_74, %c0_75] : memref<1x32x64xf32, #tpu.memory_space<vmem>>, vector<1x32x64xf32>
    %41 = vector.shape_cast %40 : vector<1x32x64xf32> to vector<32x64xf32>
    %c0_76 = arith.constant 0 : index
    %c0_77 = arith.constant 0 : index
    %c0_78 = arith.constant 0 : index
    %42 = vector.load %arg26[%c0_76, %c0_77, %c0_78] : memref<1x1x64xf32, #tpu.memory_space<vmem>>, vector<1x1x64xf32>
    %43 = vector.shape_cast %42 : vector<1x1x64xf32> to vector<1x64xf32>
    %c0_79 = arith.constant 0 : index
    %c0_80 = arith.constant 0 : index
    %c0_81 = arith.constant 0 : index
    %44 = vector.load %arg27[%c0_79, %c0_80, %c0_81] : memref<1x64x32xf32, #tpu.memory_space<vmem>>, vector<1x64x32xf32>
    %45 = vector.shape_cast %44 : vector<1x64x32xf32> to vector<64x32xf32>
    %c0_82 = arith.constant 0 : index
    %c0_83 = arith.constant 0 : index
    %c0_84 = arith.constant 0 : index
    %46 = vector.load %arg28[%c0_82, %c0_83, %c0_84] : memref<1x1x32xf32, #tpu.memory_space<vmem>>, vector<1x1x32xf32>
    %47 = vector.shape_cast %46 : vector<1x1x32xf32> to vector<1x32xf32>
    %c0_85 = arith.constant 0 : index
    %c0_86 = arith.constant 0 : index
    %c0_87 = arith.constant 0 : index
    %48 = vector.load %arg29[%c0_85, %c0_86, %c0_87] : memref<1x1x32xf32, #tpu.memory_space<vmem>>, vector<1x1x32xf32>
    %49 = vector.shape_cast %48 : vector<1x1x32xf32> to vector<1x32xf32>
    %c0_88 = arith.constant 0 : index
    %c0_89 = arith.constant 0 : index
    %c0_90 = arith.constant 0 : index
    %50 = vector.load %arg30[%c0_88, %c0_89, %c0_90] : memref<1x1x32xf32, #tpu.memory_space<vmem>>, vector<1x1x32xf32>
    %51 = vector.shape_cast %50 : vector<1x1x32xf32> to vector<1x32xf32>
    %c0_91 = arith.constant 0 : index
    %c0_92 = arith.constant 0 : index
    %c0_93 = arith.constant 0 : index
    %52 = vector.load %arg31[%c0_91, %c0_92, %c0_93] : memref<1x1x32xf32, #tpu.memory_space<vmem>>, vector<1x1x32xf32>
    %53 = vector.shape_cast %52 : vector<1x1x32xf32> to vector<1x32xf32>
    %c0_94 = arith.constant 0 : index
    %c0_95 = arith.constant 0 : index
    %c0_96 = arith.constant 0 : index
    %54 = vector.load %arg32[%c0_94, %c0_95, %c0_96] : memref<1x1x32xf32, #tpu.memory_space<vmem>>, vector<1x1x32xf32>
    %55 = vector.shape_cast %54 : vector<1x1x32xf32> to vector<1x32xf32>
    %c0_97 = arith.constant 0 : index
    %c0_98 = arith.constant 0 : index
    %c0_99 = arith.constant 0 : index
    %56 = vector.load %arg33[%c0_97, %c0_98, %c0_99] : memref<1x1x32xf32, #tpu.memory_space<vmem>>, vector<1x1x32xf32>
    %57 = vector.shape_cast %56 : vector<1x1x32xf32> to vector<1x32xf32>
    %c0_100 = arith.constant 0 : index
    %c0_101 = arith.constant 0 : index
    %c0_102 = arith.constant 0 : index
    %58 = vector.load %arg34[%c0_100, %c0_101, %c0_102] : memref<1x1x32xf32, #tpu.memory_space<vmem>>, vector<1x1x32xf32>
    %59 = vector.shape_cast %58 : vector<1x1x32xf32> to vector<1x32xf32>
    %c0_103 = arith.constant 0 : index
    %c0_104 = arith.constant 0 : index
    %c0_105 = arith.constant 0 : index
    %c0_106 = arith.constant 0 : index
    %60 = vector.load %arg1[%c0_103, %c0_104, %c0_105, %c0_106] : memref<1x2x8x32xf32, #tpu.memory_space<vmem>>, vector<1x1x8x32xf32>
    %61 = vector.shape_cast %60 : vector<1x1x8x32xf32> to vector<8x32xf32>
    %c0_107 = arith.constant 0 : index
    %c0_108 = arith.constant 0 : index
    %c0_109 = arith.constant 0 : index
    %c0_110 = arith.constant 0 : index
    %62 = vector.load %arg2[%c0_107, %c0_108, %c0_109, %c0_110] : memref<1x2x8x32xf32, #tpu.memory_space<vmem>>, vector<1x1x8x32xf32>
    %63 = vector.shape_cast %62 : vector<1x1x8x32xf32> to vector<8x32xf32>
    %c0_111 = arith.constant 0 : index
    %c0_112 = arith.constant 0 : index
    %c0_113 = arith.constant 0 : index
    %c0_114 = arith.constant 0 : index
    %64 = vector.load %arg3[%c0_111, %c0_112, %c0_113, %c0_114] : memref<1x2x8x32xf32, #tpu.memory_space<vmem>>, vector<1x1x8x32xf32>
    %65 = vector.shape_cast %64 : vector<1x1x8x32xf32> to vector<8x32xf32>
    %c0_115 = arith.constant 0 : index
    %c0_116 = arith.constant 0 : index
    %c0_117 = arith.constant 0 : index
    %c0_118 = arith.constant 0 : index
    %66 = vector.load %arg4[%c0_115, %c0_116, %c0_117, %c0_118] : memref<1x2x8x32xf32, #tpu.memory_space<vmem>>, vector<1x1x8x32xf32>
    %67 = vector.shape_cast %66 : vector<1x1x8x32xf32> to vector<8x32xf32>
    %cst = arith.constant dense<0.000000e+00> : vector<8xf32>
    %68 = vector.multi_reduction <add>, %61, %cst [1] : vector<8x32xf32> to vector<8xf32>
    %69 = vector.shape_cast %68 : vector<8xf32> to vector<8x1xf32>
    %cst_119 = arith.constant 3.200000e+01 : f32
    %70 = vector.broadcast %cst_119 : f32 to vector<8x1xf32>
    %71 = arith.divf %69, %70 : vector<8x1xf32>
    %72 = vector.broadcast %71 : vector<8x1xf32> to vector<8x32xf32>
    %73 = arith.subf %61, %72 : vector<8x32xf32>
    %74 = arith.mulf %73, %73 : vector<8x32xf32>
    %cst_120 = arith.constant dense<0.000000e+00> : vector<8xf32>
    %75 = vector.multi_reduction <add>, %74, %cst_120 [1] : vector<8x32xf32> to vector<8xf32>
    %76 = vector.shape_cast %75 : vector<8xf32> to vector<8x1xf32>
    %cst_121 = arith.constant 3.200000e+01 : f32
    %77 = vector.broadcast %cst_121 : f32 to vector<8x1xf32>
    %78 = arith.divf %76, %77 : vector<8x1xf32>
    %79 = vector.broadcast %71 : vector<8x1xf32> to vector<8x32xf32>
    %80 = arith.subf %61, %79 : vector<8x32xf32>
    %cst_122 = arith.constant 9.99999974E-6 : f32
    %81 = vector.broadcast %cst_122 : f32 to vector<8x1xf32>
    %82 = arith.addf %78, %81 : vector<8x1xf32>
    %83 = math.rsqrt %82 : vector<8x1xf32>
    %84 = vector.broadcast %83 : vector<8x1xf32> to vector<8x32xf32>
    %85 = arith.mulf %80, %84 : vector<8x32xf32>
    %86 = vector.broadcast %1 : vector<1x32xf32> to vector<8x32xf32>
    %87 = arith.mulf %85, %86 : vector<8x32xf32>
    %88 = vector.broadcast %3 : vector<1x32xf32> to vector<8x32xf32>
    %89 = arith.addf %87, %88 : vector<8x32xf32>
    %cst_123 = arith.constant dense<0.000000e+00> : vector<8xf32>
    %90 = vector.multi_reduction <add>, %63, %cst_123 [1] : vector<8x32xf32> to vector<8xf32>
    %91 = vector.shape_cast %90 : vector<8xf32> to vector<8x1xf32>
    %cst_124 = arith.constant 3.200000e+01 : f32
    %92 = vector.broadcast %cst_124 : f32 to vector<8x1xf32>
    %93 = arith.divf %91, %92 : vector<8x1xf32>
    %94 = vector.broadcast %93 : vector<8x1xf32> to vector<8x32xf32>
    %95 = arith.subf %63, %94 : vector<8x32xf32>
    %96 = arith.mulf %95, %95 : vector<8x32xf32>
    %cst_125 = arith.constant dense<0.000000e+00> : vector<8xf32>
    %97 = vector.multi_reduction <add>, %96, %cst_125 [1] : vector<8x32xf32> to vector<8xf32>
    %98 = vector.shape_cast %97 : vector<8xf32> to vector<8x1xf32>
    %cst_126 = arith.constant 3.200000e+01 : f32
    %99 = vector.broadcast %cst_126 : f32 to vector<8x1xf32>
    %100 = arith.divf %98, %99 : vector<8x1xf32>
    %101 = vector.broadcast %93 : vector<8x1xf32> to vector<8x32xf32>
    %102 = arith.subf %63, %101 : vector<8x32xf32>
    %cst_127 = arith.constant 9.99999974E-6 : f32
    %103 = vector.broadcast %cst_127 : f32 to vector<8x1xf32>
    %104 = arith.addf %100, %103 : vector<8x1xf32>
    %105 = math.rsqrt %104 : vector<8x1xf32>
    %106 = vector.broadcast %105 : vector<8x1xf32> to vector<8x32xf32>
    %107 = arith.mulf %102, %106 : vector<8x32xf32>
    %108 = vector.broadcast %5 : vector<1x32xf32> to vector<8x32xf32>
    %109 = arith.mulf %107, %108 : vector<8x32xf32>
    %110 = vector.broadcast %7 : vector<1x32xf32> to vector<8x32xf32>
    %111 = arith.addf %109, %110 : vector<8x32xf32>
    %112 = arith.addf %89, %65 : vector<8x32xf32>
    %113 = vector.shape_cast %112 : vector<8x32xf32> to vector<1x8x32xf32>
    %114 = vector.shape_cast %113 : vector<1x8x32xf32> to vector<1x8x32xf32>
    %115 = vector.broadcast %114 : vector<1x8x32xf32> to vector<4x8x32xf32>
    %116 = vector.shape_cast %112 : vector<8x32xf32> to vector<1x8x32xf32>
    %117 = vector.shape_cast %116 : vector<1x8x32xf32> to vector<1x8x32xf32>
    %118 = vector.broadcast %117 : vector<1x8x32xf32> to vector<4x8x32xf32>
    %119 = vector.shape_cast %89 : vector<8x32xf32> to vector<1x8x32xf32>
    %120 = vector.shape_cast %119 : vector<1x8x32xf32> to vector<1x8x32xf32>
    %121 = vector.broadcast %120 : vector<1x8x32xf32> to vector<4x8x32xf32>
    "tpu.trace_start"() <{level = 10 : i32, message = "hsd,hde->hse"}> : () -> ()
    %cst_128 = arith.constant dense<0.000000e+00> : vector<4x8x8xf32>
    %122 = tpu.matmul %115, %9, %cst_128 {dimension_numbers = #tpu.dot_dimension_numbers<[2], [1], [1], [2], [0, 0, 0, 1, 1, 2], [0], [0]>} : vector<4x8x32xf32>, vector<4x32x8xf32>, vector<4x8x8xf32> -> vector<4x8x8xf32>
    "tpu.trace_stop"() : () -> ()
    %123 = vector.broadcast %11 : vector<4x1x8xf32> to vector<4x8x8xf32>
    %124 = arith.addf %122, %123 : vector<4x8x8xf32>
    "tpu.trace_start"() <{level = 10 : i32, message = "hsd,hde->hse"}> : () -> ()
    %cst_129 = arith.constant dense<0.000000e+00> : vector<4x8x8xf32>
    %125 = tpu.matmul %118, %13, %cst_129 {dimension_numbers = #tpu.dot_dimension_numbers<[2], [1], [1], [2], [0, 0, 0, 1, 1, 2], [0], [0]>} : vector<4x8x32xf32>, vector<4x32x8xf32>, vector<4x8x8xf32> -> vector<4x8x8xf32>
    "tpu.trace_stop"() : () -> ()
    %126 = vector.broadcast %15 : vector<4x1x8xf32> to vector<4x8x8xf32>
    %127 = arith.addf %125, %126 : vector<4x8x8xf32>
    "tpu.trace_start"() <{level = 10 : i32, message = "hsd,hde->hse"}> : () -> ()
    %cst_130 = arith.constant dense<0.000000e+00> : vector<4x8x8xf32>
    %128 = tpu.matmul %121, %17, %cst_130 {dimension_numbers = #tpu.dot_dimension_numbers<[2], [1], [1], [2], [0, 0, 0, 1, 1, 2], [0], [0]>} : vector<4x8x32xf32>, vector<4x32x8xf32>, vector<4x8x8xf32> -> vector<4x8x8xf32>
    "tpu.trace_stop"() : () -> ()
    %129 = vector.broadcast %19 : vector<4x1x8xf32> to vector<4x8x8xf32>
    %130 = arith.addf %128, %129 : vector<4x8x8xf32>
    %cst_131 = arith.constant 0.353553385 : f32
    %131 = vector.broadcast %cst_131 : f32 to vector<4x8x8xf32>
    %132 = arith.mulf %124, %131 : vector<4x8x8xf32>
    "tpu.trace_start"() <{level = 10 : i32, message = "hqe,hke->hqk"}> : () -> ()
    %cst_132 = arith.constant dense<0.000000e+00> : vector<4x8x8xf32>
    %133 = tpu.matmul %132, %127, %cst_132 {dimension_numbers = #tpu.dot_dimension_numbers<[2], [2], [1], [1], [0, 0, 0, 1, 1, 1], [0], [0]>} : vector<4x8x8xf32>, vector<4x8x8xf32>, vector<4x8x8xf32> -> vector<4x8x8xf32>
    "tpu.trace_stop"() : () -> ()
    %cst_133 = arith.constant dense<0xFF800000> : vector<4x8xf32>
    %134 = vector.multi_reduction <maximumf>, %133, %cst_133 [2] : vector<4x8x8xf32> to vector<4x8xf32>
    %135 = vector.shape_cast %134 : vector<4x8xf32> to vector<4x8x1xf32>
    %136 = vector.broadcast %135 : vector<4x8x1xf32> to vector<4x8x8xf32>
    %137 = arith.subf %133, %136 : vector<4x8x8xf32>
    %138 = math.exp %137 : vector<4x8x8xf32>
    %cst_134 = arith.constant dense<0.000000e+00> : vector<4x8xf32>
    %139 = vector.multi_reduction <add>, %138, %cst_134 [2] : vector<4x8x8xf32> to vector<4x8xf32>
    %140 = vector.shape_cast %139 : vector<4x8xf32> to vector<4x8x1xf32>
    %141 = tpu.reciprocal %140 {approx = true} : vector<4x8x1xf32> -> vector<4x8x1xf32>
    %142 = vector.broadcast %141 : vector<4x8x1xf32> to vector<4x8x8xf32>
    %143 = arith.mulf %138, %142 : vector<4x8x8xf32>
    "tpu.trace_start"() <{level = 10 : i32, message = "hqk,hke->hqe"}> : () -> ()
    %cst_135 = arith.constant dense<0.000000e+00> : vector<4x8x8xf32>
    %144 = tpu.matmul %143, %130, %cst_135 {dimension_numbers = #tpu.dot_dimension_numbers<[2], [1], [1], [2], [0, 0, 0, 1, 1, 2], [0], [0]>} : vector<4x8x8xf32>, vector<4x8x8xf32>, vector<4x8x8xf32> -> vector<4x8x8xf32>
    "tpu.trace_stop"() : () -> ()
    "tpu.trace_start"() <{level = 10 : i32, message = "hqe,hed->hqd"}> : () -> ()
    %cst_136 = arith.constant dense<0.000000e+00> : vector<4x8x32xf32>
    %145 = tpu.matmul %144, %21, %cst_136 {dimension_numbers = #tpu.dot_dimension_numbers<[2], [1], [1], [2], [0, 0, 0, 1, 1, 2], [0], [0]>} : vector<4x8x8xf32>, vector<4x8x32xf32>, vector<4x8x32xf32> -> vector<4x8x32xf32>
    "tpu.trace_stop"() : () -> ()
    %cst_137 = arith.constant dense<0.000000e+00> : vector<8x32xf32>
    %146 = vector.multi_reduction <add>, %145, %cst_137 [0] : vector<4x8x32xf32> to vector<8x32xf32>
    %147 = vector.broadcast %23 : vector<1x32xf32> to vector<8x32xf32>
    %148 = arith.addf %146, %147 : vector<8x32xf32>
    %149 = arith.addf %89, %148 : vector<8x32xf32>
    %cst_138 = arith.constant dense<0.000000e+00> : vector<8xf32>
    %150 = vector.multi_reduction <add>, %149, %cst_138 [1] : vector<8x32xf32> to vector<8xf32>
    %151 = vector.shape_cast %150 : vector<8xf32> to vector<8x1xf32>
    %cst_139 = arith.constant 3.200000e+01 : f32
    %152 = vector.broadcast %cst_139 : f32 to vector<8x1xf32>
    %153 = arith.divf %151, %152 : vector<8x1xf32>
    %154 = vector.broadcast %153 : vector<8x1xf32> to vector<8x32xf32>
    %155 = arith.subf %149, %154 : vector<8x32xf32>
    %156 = arith.mulf %155, %155 : vector<8x32xf32>
    %cst_140 = arith.constant dense<0.000000e+00> : vector<8xf32>
    %157 = vector.multi_reduction <add>, %156, %cst_140 [1] : vector<8x32xf32> to vector<8xf32>
    %158 = vector.shape_cast %157 : vector<8xf32> to vector<8x1xf32>
    %cst_141 = arith.constant 3.200000e+01 : f32
    %159 = vector.broadcast %cst_141 : f32 to vector<8x1xf32>
    %160 = arith.divf %158, %159 : vector<8x1xf32>
    %161 = vector.broadcast %153 : vector<8x1xf32> to vector<8x32xf32>
    %162 = arith.subf %149, %161 : vector<8x32xf32>
    %cst_142 = arith.constant 9.99999974E-6 : f32
    %163 = vector.broadcast %cst_142 : f32 to vector<8x1xf32>
    %164 = arith.addf %160, %163 : vector<8x1xf32>
    %165 = math.rsqrt %164 : vector<8x1xf32>
    %166 = vector.broadcast %165 : vector<8x1xf32> to vector<8x32xf32>
    %167 = arith.mulf %162, %166 : vector<8x32xf32>
    %168 = vector.broadcast %49 : vector<1x32xf32> to vector<8x32xf32>
    %169 = arith.mulf %167, %168 : vector<8x32xf32>
    %170 = vector.broadcast %51 : vector<1x32xf32> to vector<8x32xf32>
    %171 = arith.addf %169, %170 : vector<8x32xf32>
    %172 = arith.addf %171, %65 : vector<8x32xf32>
    %173 = arith.addf %111, %67 : vector<8x32xf32>
    %174 = vector.shape_cast %172 : vector<8x32xf32> to vector<1x8x32xf32>
    %175 = vector.shape_cast %174 : vector<1x8x32xf32> to vector<1x8x32xf32>
    %176 = vector.broadcast %175 : vector<1x8x32xf32> to vector<4x8x32xf32>
    %177 = vector.shape_cast %173 : vector<8x32xf32> to vector<1x8x32xf32>
    %178 = vector.shape_cast %177 : vector<1x8x32xf32> to vector<1x8x32xf32>
    %179 = vector.broadcast %178 : vector<1x8x32xf32> to vector<4x8x32xf32>
    %180 = vector.shape_cast %111 : vector<8x32xf32> to vector<1x8x32xf32>
    %181 = vector.shape_cast %180 : vector<1x8x32xf32> to vector<1x8x32xf32>
    %182 = vector.broadcast %181 : vector<1x8x32xf32> to vector<4x8x32xf32>
    "tpu.trace_start"() <{level = 10 : i32, message = "hsd,hde->hse"}> : () -> ()
    %cst_143 = arith.constant dense<0.000000e+00> : vector<4x8x8xf32>
    %183 = tpu.matmul %176, %25, %cst_143 {dimension_numbers = #tpu.dot_dimension_numbers<[2], [1], [1], [2], [0, 0, 0, 1, 1, 2], [0], [0]>} : vector<4x8x32xf32>, vector<4x32x8xf32>, vector<4x8x8xf32> -> vector<4x8x8xf32>
    "tpu.trace_stop"() : () -> ()
    %184 = vector.broadcast %27 : vector<4x1x8xf32> to vector<4x8x8xf32>
    %185 = arith.addf %183, %184 : vector<4x8x8xf32>
    "tpu.trace_start"() <{level = 10 : i32, message = "hsd,hde->hse"}> : () -> ()
    %cst_144 = arith.constant dense<0.000000e+00> : vector<4x8x8xf32>
    %186 = tpu.matmul %179, %29, %cst_144 {dimension_numbers = #tpu.dot_dimension_numbers<[2], [1], [1], [2], [0, 0, 0, 1, 1, 2], [0], [0]>} : vector<4x8x32xf32>, vector<4x32x8xf32>, vector<4x8x8xf32> -> vector<4x8x8xf32>
    "tpu.trace_stop"() : () -> ()
    %187 = vector.broadcast %31 : vector<4x1x8xf32> to vector<4x8x8xf32>
    %188 = arith.addf %186, %187 : vector<4x8x8xf32>
    "tpu.trace_start"() <{level = 10 : i32, message = "hsd,hde->hse"}> : () -> ()
    %cst_145 = arith.constant dense<0.000000e+00> : vector<4x8x8xf32>
    %189 = tpu.matmul %182, %33, %cst_145 {dimension_numbers = #tpu.dot_dimension_numbers<[2], [1], [1], [2], [0, 0, 0, 1, 1, 2], [0], [0]>} : vector<4x8x32xf32>, vector<4x32x8xf32>, vector<4x8x8xf32> -> vector<4x8x8xf32>
    "tpu.trace_stop"() : () -> ()
    %190 = vector.broadcast %35 : vector<4x1x8xf32> to vector<4x8x8xf32>
    %191 = arith.addf %189, %190 : vector<4x8x8xf32>
    %cst_146 = arith.constant 0.353553385 : f32
    %192 = vector.broadcast %cst_146 : f32 to vector<4x8x8xf32>
    %193 = arith.mulf %185, %192 : vector<4x8x8xf32>
    "tpu.trace_start"() <{level = 10 : i32, message = "hqe,hke->hqk"}> : () -> ()
    %cst_147 = arith.constant dense<0.000000e+00> : vector<4x8x8xf32>
    %194 = tpu.matmul %193, %188, %cst_147 {dimension_numbers = #tpu.dot_dimension_numbers<[2], [2], [1], [1], [0, 0, 0, 1, 1, 1], [0], [0]>} : vector<4x8x8xf32>, vector<4x8x8xf32>, vector<4x8x8xf32> -> vector<4x8x8xf32>
    "tpu.trace_stop"() : () -> ()
    %cst_148 = arith.constant dense<0xFF800000> : vector<4x8xf32>
    %195 = vector.multi_reduction <maximumf>, %194, %cst_148 [2] : vector<4x8x8xf32> to vector<4x8xf32>
    %196 = vector.shape_cast %195 : vector<4x8xf32> to vector<4x8x1xf32>
    %197 = vector.broadcast %196 : vector<4x8x1xf32> to vector<4x8x8xf32>
    %198 = arith.subf %194, %197 : vector<4x8x8xf32>
    %199 = math.exp %198 : vector<4x8x8xf32>
    %cst_149 = arith.constant dense<0.000000e+00> : vector<4x8xf32>
    %200 = vector.multi_reduction <add>, %199, %cst_149 [2] : vector<4x8x8xf32> to vector<4x8xf32>
    %201 = vector.shape_cast %200 : vector<4x8xf32> to vector<4x8x1xf32>
    %202 = tpu.reciprocal %201 {approx = true} : vector<4x8x1xf32> -> vector<4x8x1xf32>
    %203 = vector.broadcast %202 : vector<4x8x1xf32> to vector<4x8x8xf32>
    %204 = arith.mulf %199, %203 : vector<4x8x8xf32>
    "tpu.trace_start"() <{level = 10 : i32, message = "hqk,hke->hqe"}> : () -> ()
    %cst_150 = arith.constant dense<0.000000e+00> : vector<4x8x8xf32>
    %205 = tpu.matmul %204, %191, %cst_150 {dimension_numbers = #tpu.dot_dimension_numbers<[2], [1], [1], [2], [0, 0, 0, 1, 1, 2], [0], [0]>} : vector<4x8x8xf32>, vector<4x8x8xf32>, vector<4x8x8xf32> -> vector<4x8x8xf32>
    "tpu.trace_stop"() : () -> ()
    "tpu.trace_start"() <{level = 10 : i32, message = "hqe,hed->hqd"}> : () -> ()
    %cst_151 = arith.constant dense<0.000000e+00> : vector<4x8x32xf32>
    %206 = tpu.matmul %205, %37, %cst_151 {dimension_numbers = #tpu.dot_dimension_numbers<[2], [1], [1], [2], [0, 0, 0, 1, 1, 2], [0], [0]>} : vector<4x8x8xf32>, vector<4x8x32xf32>, vector<4x8x32xf32> -> vector<4x8x32xf32>
    "tpu.trace_stop"() : () -> ()
    %cst_152 = arith.constant dense<0.000000e+00> : vector<8x32xf32>
    %207 = vector.multi_reduction <add>, %206, %cst_152 [0] : vector<4x8x32xf32> to vector<8x32xf32>
    %208 = vector.broadcast %39 : vector<1x32xf32> to vector<8x32xf32>
    %209 = arith.addf %207, %208 : vector<8x32xf32>
    %210 = arith.addf %171, %209 : vector<8x32xf32>
    %cst_153 = arith.constant dense<0.000000e+00> : vector<8xf32>
    %211 = vector.multi_reduction <add>, %210, %cst_153 [1] : vector<8x32xf32> to vector<8xf32>
    %212 = vector.shape_cast %211 : vector<8xf32> to vector<8x1xf32>
    %cst_154 = arith.constant 3.200000e+01 : f32
    %213 = vector.broadcast %cst_154 : f32 to vector<8x1xf32>
    %214 = arith.divf %212, %213 : vector<8x1xf32>
    %215 = vector.broadcast %214 : vector<8x1xf32> to vector<8x32xf32>
    %216 = arith.subf %210, %215 : vector<8x32xf32>
    %217 = arith.mulf %216, %216 : vector<8x32xf32>
    %cst_155 = arith.constant dense<0.000000e+00> : vector<8xf32>
    %218 = vector.multi_reduction <add>, %217, %cst_155 [1] : vector<8x32xf32> to vector<8xf32>
    %219 = vector.shape_cast %218 : vector<8xf32> to vector<8x1xf32>
    %cst_156 = arith.constant 3.200000e+01 : f32
    %220 = vector.broadcast %cst_156 : f32 to vector<8x1xf32>
    %221 = arith.divf %219, %220 : vector<8x1xf32>
    %222 = vector.broadcast %214 : vector<8x1xf32> to vector<8x32xf32>
    %223 = arith.subf %210, %222 : vector<8x32xf32>
    %cst_157 = arith.constant 9.99999974E-6 : f32
    %224 = vector.broadcast %cst_157 : f32 to vector<8x1xf32>
    %225 = arith.addf %221, %224 : vector<8x1xf32>
    %226 = math.rsqrt %225 : vector<8x1xf32>
    %227 = vector.broadcast %226 : vector<8x1xf32> to vector<8x32xf32>
    %228 = arith.mulf %223, %227 : vector<8x32xf32>
    %229 = vector.broadcast %53 : vector<1x32xf32> to vector<8x32xf32>
    %230 = arith.mulf %228, %229 : vector<8x32xf32>
    %231 = vector.broadcast %55 : vector<1x32xf32> to vector<8x32xf32>
    %232 = arith.addf %230, %231 : vector<8x32xf32>
    %cst_158 = arith.constant dense<0.000000e+00> : vector<8x64xf32>
    %233 = tpu.matmul %232, %41, %cst_158 {dimension_numbers = #tpu.dot_dimension_numbers<[1], [0], [0], [1], [0, 0, 1, 1], [], []>} : vector<8x32xf32>, vector<32x64xf32>, vector<8x64xf32> -> vector<8x64xf32>
    %234 = vector.broadcast %43 : vector<1x64xf32> to vector<8x64xf32>
    %235 = arith.addf %233, %234 : vector<8x64xf32>
    %cst_159 = arith.constant 0.000000e+00 : f32
    %236 = vector.broadcast %cst_159 : f32 to vector<8x64xf32>
    %237 = arith.maximumf %235, %236 : vector<8x64xf32>
    %cst_160 = arith.constant dense<0.000000e+00> : vector<8x32xf32>
    %238 = tpu.matmul %237, %45, %cst_160 {dimension_numbers = #tpu.dot_dimension_numbers<[1], [0], [0], [1], [0, 0, 1, 1], [], []>} : vector<8x64xf32>, vector<64x32xf32>, vector<8x32xf32> -> vector<8x32xf32>
    %239 = vector.broadcast %47 : vector<1x32xf32> to vector<8x32xf32>
    %240 = arith.addf %238, %239 : vector<8x32xf32>
    %241 = arith.addf %232, %240 : vector<8x32xf32>
    %cst_161 = arith.constant dense<0.000000e+00> : vector<8xf32>
    %242 = vector.multi_reduction <add>, %241, %cst_161 [1] : vector<8x32xf32> to vector<8xf32>
    %243 = vector.shape_cast %242 : vector<8xf32> to vector<8x1xf32>
    %cst_162 = arith.constant 3.200000e+01 : f32
    %244 = vector.broadcast %cst_162 : f32 to vector<8x1xf32>
    %245 = arith.divf %243, %244 : vector<8x1xf32>
    %246 = vector.broadcast %245 : vector<8x1xf32> to vector<8x32xf32>
    %247 = arith.subf %241, %246 : vector<8x32xf32>
    %248 = arith.mulf %247, %247 : vector<8x32xf32>
    %cst_163 = arith.constant dense<0.000000e+00> : vector<8xf32>
    %249 = vector.multi_reduction <add>, %248, %cst_163 [1] : vector<8x32xf32> to vector<8xf32>
    %250 = vector.shape_cast %249 : vector<8xf32> to vector<8x1xf32>
    %cst_164 = arith.constant 3.200000e+01 : f32
    %251 = vector.broadcast %cst_164 : f32 to vector<8x1xf32>
    %252 = arith.divf %250, %251 : vector<8x1xf32>
    %253 = vector.broadcast %245 : vector<8x1xf32> to vector<8x32xf32>
    %254 = arith.subf %241, %253 : vector<8x32xf32>
    %cst_165 = arith.constant 9.99999974E-6 : f32
    %255 = vector.broadcast %cst_165 : f32 to vector<8x1xf32>
    %256 = arith.addf %252, %255 : vector<8x1xf32>
    %257 = math.rsqrt %256 : vector<8x1xf32>
    %258 = vector.broadcast %257 : vector<8x1xf32> to vector<8x32xf32>
    %259 = arith.mulf %254, %258 : vector<8x32xf32>
    %260 = vector.broadcast %57 : vector<1x32xf32> to vector<8x32xf32>
    %261 = arith.mulf %259, %260 : vector<8x32xf32>
    %262 = vector.broadcast %59 : vector<1x32xf32> to vector<8x32xf32>
    %263 = arith.addf %261, %262 : vector<8x32xf32>
    %c0_166 = arith.constant 0 : index
    %c0_167 = arith.constant 0 : index
    %c0_168 = arith.constant 0 : index
    %c0_169 = arith.constant 0 : index
    %264 = vector.load %arg35[%c0_166, %c0_167, %c0_168, %c0_169] : memref<1x2x8x32xf32, #tpu.memory_space<vmem>>, vector<1x1x8x32xf32>
    %265 = vector.shape_cast %264 : vector<1x1x8x32xf32> to vector<8x32xf32>
    %266 = vector.shape_cast %263 : vector<8x32xf32> to vector<1x1x8x32xf32>
    tpu.vector_store %arg35[%c0_166, %c0_167, %c0_168, %c0_169], %266 {strides = array<i32>} : memref<1x2x8x32xf32, #tpu.memory_space<vmem>>, vector<1x1x8x32xf32>,
    %c0_170 = arith.constant 0 : index
    %c1 = arith.constant 1 : index
    %c0_171 = arith.constant 0 : index
    %c0_172 = arith.constant 0 : index
    %267 = vector.load %arg1[%c0_170, %c1, %c0_171, %c0_172] : memref<1x2x8x32xf32, #tpu.memory_space<vmem>>, vector<1x1x8x32xf32>
    %268 = vector.shape_cast %267 : vector<1x1x8x32xf32> to vector<8x32xf32>
    %c0_173 = arith.constant 0 : index
    %c1_174 = arith.constant 1 : index
    %c0_175 = arith.constant 0 : index
    %c0_176 = arith.constant 0 : index
    %269 = vector.load %arg2[%c0_173, %c1_174, %c0_175, %c0_176] : memref<1x2x8x32xf32, #tpu.memory_space<vmem>>, vector<1x1x8x32xf32>
    %270 = vector.shape_cast %269 : vector<1x1x8x32xf32> to vector<8x32xf32>
    %c0_177 = arith.constant 0 : index
    %c1_178 = arith.constant 1 : index
    %c0_179 = arith.constant 0 : index
    %c0_180 = arith.constant 0 : index
    %271 = vector.load %arg3[%c0_177, %c1_178, %c0_179, %c0_180] : memref<1x2x8x32xf32, #tpu.memory_space<vmem>>, vector<1x1x8x32xf32>
    %272 = vector.shape_cast %271 : vector<1x1x8x32xf32> to vector<8x32xf32>
    %c0_181 = arith.constant 0 : index
    %c1_182 = arith.constant 1 : index
    %c0_183 = arith.constant 0 : index
    %c0_184 = arith.constant 0 : index
    %273 = vector.load %arg4[%c0_181, %c1_182, %c0_183, %c0_184] : memref<1x2x8x32xf32, #tpu.memory_space<vmem>>, vector<1x1x8x32xf32>
    %274 = vector.shape_cast %273 : vector<1x1x8x32xf32> to vector<8x32xf32>
    %cst_185 = arith.constant dense<0.000000e+00> : vector<8xf32>
    %275 = vector.multi_reduction <add>, %268, %cst_185 [1] : vector<8x32xf32> to vector<8xf32>
    %276 = vector.shape_cast %275 : vector<8xf32> to vector<8x1xf32>
    %cst_186 = arith.constant 3.200000e+01 : f32
    %277 = vector.broadcast %cst_186 : f32 to vector<8x1xf32>
    %278 = arith.divf %276, %277 : vector<8x1xf32>
    %279 = vector.broadcast %278 : vector<8x1xf32> to vector<8x32xf32>
    %280 = arith.subf %268, %279 : vector<8x32xf32>
    %281 = arith.mulf %280, %280 : vector<8x32xf32>
    %cst_187 = arith.constant dense<0.000000e+00> : vector<8xf32>
    %282 = vector.multi_reduction <add>, %281, %cst_187 [1] : vector<8x32xf32> to vector<8xf32>
    %283 = vector.shape_cast %282 : vector<8xf32> to vector<8x1xf32>
    %cst_188 = arith.constant 3.200000e+01 : f32
    %284 = vector.broadcast %cst_188 : f32 to vector<8x1xf32>
    %285 = arith.divf %283, %284 : vector<8x1xf32>
    %286 = vector.broadcast %278 : vector<8x1xf32> to vector<8x32xf32>
    %287 = arith.subf %268, %286 : vector<8x32xf32>
    %cst_189 = arith.constant 9.99999974E-6 : f32
    %288 = vector.broadcast %cst_189 : f32 to vector<8x1xf32>
    %289 = arith.addf %285, %288 : vector<8x1xf32>
    %290 = math.rsqrt %289 : vector<8x1xf32>
    %291 = vector.broadcast %290 : vector<8x1xf32> to vector<8x32xf32>
    %292 = arith.mulf %287, %291 : vector<8x32xf32>
    %293 = vector.broadcast %1 : vector<1x32xf32> to vector<8x32xf32>
    %294 = arith.mulf %292, %293 : vector<8x32xf32>
    %295 = vector.broadcast %3 : vector<1x32xf32> to vector<8x32xf32>
    %296 = arith.addf %294, %295 : vector<8x32xf32>
    %cst_190 = arith.constant dense<0.000000e+00> : vector<8xf32>
    %297 = vector.multi_reduction <add>, %270, %cst_190 [1] : vector<8x32xf32> to vector<8xf32>
    %298 = vector.shape_cast %297 : vector<8xf32> to vector<8x1xf32>
    %cst_191 = arith.constant 3.200000e+01 : f32
    %299 = vector.broadcast %cst_191 : f32 to vector<8x1xf32>
    %300 = arith.divf %298, %299 : vector<8x1xf32>
    %301 = vector.broadcast %300 : vector<8x1xf32> to vector<8x32xf32>
    %302 = arith.subf %270, %301 : vector<8x32xf32>
    %303 = arith.mulf %302, %302 : vector<8x32xf32>
    %cst_192 = arith.constant dense<0.000000e+00> : vector<8xf32>
    %304 = vector.multi_reduction <add>, %303, %cst_192 [1] : vector<8x32xf32> to vector<8xf32>
    %305 = vector.shape_cast %304 : vector<8xf32> to vector<8x1xf32>
    %cst_193 = arith.constant 3.200000e+01 : f32
    %306 = vector.broadcast %cst_193 : f32 to vector<8x1xf32>
    %307 = arith.divf %305, %306 : vector<8x1xf32>
    %308 = vector.broadcast %300 : vector<8x1xf32> to vector<8x32xf32>
    %309 = arith.subf %270, %308 : vector<8x32xf32>
    %cst_194 = arith.constant 9.99999974E-6 : f32
    %310 = vector.broadcast %cst_194 : f32 to vector<8x1xf32>
    %311 = arith.addf %307, %310 : vector<8x1xf32>
    %312 = math.rsqrt %311 : vector<8x1xf32>
    %313 = vector.broadcast %312 : vector<8x1xf32> to vector<8x32xf32>
    %314 = arith.mulf %309, %313 : vector<8x32xf32>
    %315 = vector.broadcast %5 : vector<1x32xf32> to vector<8x32xf32>
    %316 = arith.mulf %314, %315 : vector<8x32xf32>
    %317 = vector.broadcast %7 : vector<1x32xf32> to vector<8x32xf32>
    %318 = arith.addf %316, %317 : vector<8x32xf32>
    %319 = arith.addf %296, %272 : vector<8x32xf32>
    %320 = vector.shape_cast %319 : vector<8x32xf32> to vector<1x8x32xf32>
    %321 = vector.shape_cast %320 : vector<1x8x32xf32> to vector<1x8x32xf32>
    %322 = vector.broadcast %321 : vector<1x8x32xf32> to vector<4x8x32xf32>
    %323 = vector.shape_cast %319 : vector<8x32xf32> to vector<1x8x32xf32>
    %324 = vector.shape_cast %323 : vector<1x8x32xf32> to vector<1x8x32xf32>
    %325 = vector.broadcast %324 : vector<1x8x32xf32> to vector<4x8x32xf32>
    %326 = vector.shape_cast %296 : vector<8x32xf32> to vector<1x8x32xf32>
    %327 = vector.shape_cast %326 : vector<1x8x32xf32> to vector<1x8x32xf32>
    %328 = vector.broadcast %327 : vector<1x8x32xf32> to vector<4x8x32xf32>
    "tpu.trace_start"() <{level = 10 : i32, message = "hsd,hde->hse"}> : () -> ()
    %cst_195 = arith.constant dense<0.000000e+00> : vector<4x8x8xf32>
    %329 = tpu.matmul %322, %9, %cst_195 {dimension_numbers = #tpu.dot_dimension_numbers<[2], [1], [1], [2], [0, 0, 0, 1, 1, 2], [0], [0]>} : vector<4x8x32xf32>, vector<4x32x8xf32>, vector<4x8x8xf32> -> vector<4x8x8xf32>
    "tpu.trace_stop"() : () -> ()
    %330 = vector.broadcast %11 : vector<4x1x8xf32> to vector<4x8x8xf32>
    %331 = arith.addf %329, %330 : vector<4x8x8xf32>
    "tpu.trace_start"() <{level = 10 : i32, message = "hsd,hde->hse"}> : () -> ()
    %cst_196 = arith.constant dense<0.000000e+00> : vector<4x8x8xf32>
    %332 = tpu.matmul %325, %13, %cst_196 {dimension_numbers = #tpu.dot_dimension_numbers<[2], [1], [1], [2], [0, 0, 0, 1, 1, 2], [0], [0]>} : vector<4x8x32xf32>, vector<4x32x8xf32>, vector<4x8x8xf32> -> vector<4x8x8xf32>
    "tpu.trace_stop"() : () -> ()
    %333 = vector.broadcast %15 : vector<4x1x8xf32> to vector<4x8x8xf32>
    %334 = arith.addf %332, %333 : vector<4x8x8xf32>
    "tpu.trace_start"() <{level = 10 : i32, message = "hsd,hde->hse"}> : () -> ()
    %cst_197 = arith.constant dense<0.000000e+00> : vector<4x8x8xf32>
    %335 = tpu.matmul %328, %17, %cst_197 {dimension_numbers = #tpu.dot_dimension_numbers<[2], [1], [1], [2], [0, 0, 0, 1, 1, 2], [0], [0]>} : vector<4x8x32xf32>, vector<4x32x8xf32>, vector<4x8x8xf32> -> vector<4x8x8xf32>
    "tpu.trace_stop"() : () -> ()
    %336 = vector.broadcast %19 : vector<4x1x8xf32> to vector<4x8x8xf32>
    %337 = arith.addf %335, %336 : vector<4x8x8xf32>
    %cst_198 = arith.constant 0.353553385 : f32
    %338 = vector.broadcast %cst_198 : f32 to vector<4x8x8xf32>
    %339 = arith.mulf %331, %338 : vector<4x8x8xf32>
    "tpu.trace_start"() <{level = 10 : i32, message = "hqe,hke->hqk"}> : () -> ()
    %cst_199 = arith.constant dense<0.000000e+00> : vector<4x8x8xf32>
    %340 = tpu.matmul %339, %334, %cst_199 {dimension_numbers = #tpu.dot_dimension_numbers<[2], [2], [1], [1], [0, 0, 0, 1, 1, 1], [0], [0]>} : vector<4x8x8xf32>, vector<4x8x8xf32>, vector<4x8x8xf32> -> vector<4x8x8xf32>
    "tpu.trace_stop"() : () -> ()
    %cst_200 = arith.constant dense<0xFF800000> : vector<4x8xf32>
    %341 = vector.multi_reduction <maximumf>, %340, %cst_200 [2] : vector<4x8x8xf32> to vector<4x8xf32>
    %342 = vector.shape_cast %341 : vector<4x8xf32> to vector<4x8x1xf32>
    %343 = vector.broadcast %342 : vector<4x8x1xf32> to vector<4x8x8xf32>
    %344 = arith.subf %340, %343 : vector<4x8x8xf32>
    %345 = math.exp %344 : vector<4x8x8xf32>
    %cst_201 = arith.constant dense<0.000000e+00> : vector<4x8xf32>
    %346 = vector.multi_reduction <add>, %345, %cst_201 [2] : vector<4x8x8xf32> to vector<4x8xf32>
    %347 = vector.shape_cast %346 : vector<4x8xf32> to vector<4x8x1xf32>
    %348 = tpu.reciprocal %347 {approx = true} : vector<4x8x1xf32> -> vector<4x8x1xf32>
    %349 = vector.broadcast %348 : vector<4x8x1xf32> to vector<4x8x8xf32>
    %350 = arith.mulf %345, %349 : vector<4x8x8xf32>
    "tpu.trace_start"() <{level = 10 : i32, message = "hqk,hke->hqe"}> : () -> ()
    %cst_202 = arith.constant dense<0.000000e+00> : vector<4x8x8xf32>
    %351 = tpu.matmul %350, %337, %cst_202 {dimension_numbers = #tpu.dot_dimension_numbers<[2], [1], [1], [2], [0, 0, 0, 1, 1, 2], [0], [0]>} : vector<4x8x8xf32>, vector<4x8x8xf32>, vector<4x8x8xf32> -> vector<4x8x8xf32>
    "tpu.trace_stop"() : () -> ()
    "tpu.trace_start"() <{level = 10 : i32, message = "hqe,hed->hqd"}> : () -> ()
    %cst_203 = arith.constant dense<0.000000e+00> : vector<4x8x32xf32>
    %352 = tpu.matmul %351, %21, %cst_203 {dimension_numbers = #tpu.dot_dimension_numbers<[2], [1], [1], [2], [0, 0, 0, 1, 1, 2], [0], [0]>} : vector<4x8x8xf32>, vector<4x8x32xf32>, vector<4x8x32xf32> -> vector<4x8x32xf32>
    "tpu.trace_stop"() : () -> ()
    %cst_204 = arith.constant dense<0.000000e+00> : vector<8x32xf32>
    %353 = vector.multi_reduction <add>, %352, %cst_204 [0] : vector<4x8x32xf32> to vector<8x32xf32>
    %354 = vector.broadcast %23 : vector<1x32xf32> to vector<8x32xf32>
    %355 = arith.addf %353, %354 : vector<8x32xf32>
    %356 = arith.addf %296, %355 : vector<8x32xf32>
    %cst_205 = arith.constant dense<0.000000e+00> : vector<8xf32>
    %357 = vector.multi_reduction <add>, %356, %cst_205 [1] : vector<8x32xf32> to vector<8xf32>
    %358 = vector.shape_cast %357 : vector<8xf32> to vector<8x1xf32>
    %cst_206 = arith.constant 3.200000e+01 : f32
    %359 = vector.broadcast %cst_206 : f32 to vector<8x1xf32>
    %360 = arith.divf %358, %359 : vector<8x1xf32>
    %361 = vector.broadcast %360 : vector<8x1xf32> to vector<8x32xf32>
    %362 = arith.subf %356, %361 : vector<8x32xf32>
    %363 = arith.mulf %362, %362 : vector<8x32xf32>
    %cst_207 = arith.constant dense<0.000000e+00> : vector<8xf32>
    %364 = vector.multi_reduction <add>, %363, %cst_207 [1] : vector<8x32xf32> to vector<8xf32>
    %365 = vector.shape_cast %364 : vector<8xf32> to vector<8x1xf32>
    %cst_208 = arith.constant 3.200000e+01 : f32
    %366 = vector.broadcast %cst_208 : f32 to vector<8x1xf32>
    %367 = arith.divf %365, %366 : vector<8x1xf32>
    %368 = vector.broadcast %360 : vector<8x1xf32> to vector<8x32xf32>
    %369 = arith.subf %356, %368 : vector<8x32xf32>
    %cst_209 = arith.constant 9.99999974E-6 : f32
    %370 = vector.broadcast %cst_209 : f32 to vector<8x1xf32>
    %371 = arith.addf %367, %370 : vector<8x1xf32>
    %372 = math.rsqrt %371 : vector<8x1xf32>
    %373 = vector.broadcast %372 : vector<8x1xf32> to vector<8x32xf32>
    %374 = arith.mulf %369, %373 : vector<8x32xf32>
    %375 = vector.broadcast %49 : vector<1x32xf32> to vector<8x32xf32>
    %376 = arith.mulf %374, %375 : vector<8x32xf32>
    %377 = vector.broadcast %51 : vector<1x32xf32> to vector<8x32xf32>
    %378 = arith.addf %376, %377 : vector<8x32xf32>
    %379 = arith.addf %378, %272 : vector<8x32xf32>
    %380 = arith.addf %318, %274 : vector<8x32xf32>
    %381 = vector.shape_cast %379 : vector<8x32xf32> to vector<1x8x32xf32>
    %382 = vector.shape_cast %381 : vector<1x8x32xf32> to vector<1x8x32xf32>
    %383 = vector.broadcast %382 : vector<1x8x32xf32> to vector<4x8x32xf32>
    %384 = vector.shape_cast %380 : vector<8x32xf32> to vector<1x8x32xf32>
    %385 = vector.shape_cast %384 : vector<1x8x32xf32> to vector<1x8x32xf32>
    %386 = vector.broadcast %385 : vector<1x8x32xf32> to vector<4x8x32xf32>
    %387 = vector.shape_cast %318 : vector<8x32xf32> to vector<1x8x32xf32>
    %388 = vector.shape_cast %387 : vector<1x8x32xf32> to vector<1x8x32xf32>
    %389 = vector.broadcast %388 : vector<1x8x32xf32> to vector<4x8x32xf32>
    "tpu.trace_start"() <{level = 10 : i32, message = "hsd,hde->hse"}> : () -> ()
    %cst_210 = arith.constant dense<0.000000e+00> : vector<4x8x8xf32>
    %390 = tpu.matmul %383, %25, %cst_210 {dimension_numbers = #tpu.dot_dimension_numbers<[2], [1], [1], [2], [0, 0, 0, 1, 1, 2], [0], [0]>} : vector<4x8x32xf32>, vector<4x32x8xf32>, vector<4x8x8xf32> -> vector<4x8x8xf32>
    "tpu.trace_stop"() : () -> ()
    %391 = vector.broadcast %27 : vector<4x1x8xf32> to vector<4x8x8xf32>
    %392 = arith.addf %390, %391 : vector<4x8x8xf32>
    "tpu.trace_start"() <{level = 10 : i32, message = "hsd,hde->hse"}> : () -> ()
    %cst_211 = arith.constant dense<0.000000e+00> : vector<4x8x8xf32>
    %393 = tpu.matmul %386, %29, %cst_211 {dimension_numbers = #tpu.dot_dimension_numbers<[2], [1], [1], [2], [0, 0, 0, 1, 1, 2], [0], [0]>} : vector<4x8x32xf32>, vector<4x32x8xf32>, vector<4x8x8xf32> -> vector<4x8x8xf32>
    "tpu.trace_stop"() : () -> ()
    %394 = vector.broadcast %31 : vector<4x1x8xf32> to vector<4x8x8xf32>
    %395 = arith.addf %393, %394 : vector<4x8x8xf32>
    "tpu.trace_start"() <{level = 10 : i32, message = "hsd,hde->hse"}> : () -> ()
    %cst_212 = arith.constant dense<0.000000e+00> : vector<4x8x8xf32>
    %396 = tpu.matmul %389, %33, %cst_212 {dimension_numbers = #tpu.dot_dimension_numbers<[2], [1], [1], [2], [0, 0, 0, 1, 1, 2], [0], [0]>} : vector<4x8x32xf32>, vector<4x32x8xf32>, vector<4x8x8xf32> -> vector<4x8x8xf32>
    "tpu.trace_stop"() : () -> ()
    %397 = vector.broadcast %35 : vector<4x1x8xf32> to vector<4x8x8xf32>
    %398 = arith.addf %396, %397 : vector<4x8x8xf32>
    %cst_213 = arith.constant 0.353553385 : f32
    %399 = vector.broadcast %cst_213 : f32 to vector<4x8x8xf32>
    %400 = arith.mulf %392, %399 : vector<4x8x8xf32>
    "tpu.trace_start"() <{level = 10 : i32, message = "hqe,hke->hqk"}> : () -> ()
    %cst_214 = arith.constant dense<0.000000e+00> : vector<4x8x8xf32>
    %401 = tpu.matmul %400, %395, %cst_214 {dimension_numbers = #tpu.dot_dimension_numbers<[2], [2], [1], [1], [0, 0, 0, 1, 1, 1], [0], [0]>} : vector<4x8x8xf32>, vector<4x8x8xf32>, vector<4x8x8xf32> -> vector<4x8x8xf32>
    "tpu.trace_stop"() : () -> ()
    %cst_215 = arith.constant dense<0xFF800000> : vector<4x8xf32>
    %402 = vector.multi_reduction <maximumf>, %401, %cst_215 [2] : vector<4x8x8xf32> to vector<4x8xf32>
    %403 = vector.shape_cast %402 : vector<4x8xf32> to vector<4x8x1xf32>
    %404 = vector.broadcast %403 : vector<4x8x1xf32> to vector<4x8x8xf32>
    %405 = arith.subf %401, %404 : vector<4x8x8xf32>
    %406 = math.exp %405 : vector<4x8x8xf32>
    %cst_216 = arith.constant dense<0.000000e+00> : vector<4x8xf32>
    %407 = vector.multi_reduction <add>, %406, %cst_216 [2] : vector<4x8x8xf32> to vector<4x8xf32>
    %408 = vector.shape_cast %407 : vector<4x8xf32> to vector<4x8x1xf32>
    %409 = tpu.reciprocal %408 {approx = true} : vector<4x8x1xf32> -> vector<4x8x1xf32>
    %410 = vector.broadcast %409 : vector<4x8x1xf32> to vector<4x8x8xf32>
    %411 = arith.mulf %406, %410 : vector<4x8x8xf32>
    "tpu.trace_start"() <{level = 10 : i32, message = "hqk,hke->hqe"}> : () -> ()
    %cst_217 = arith.constant dense<0.000000e+00> : vector<4x8x8xf32>
    %412 = tpu.matmul %411, %398, %cst_217 {dimension_numbers = #tpu.dot_dimension_numbers<[2], [1], [1], [2], [0, 0, 0, 1, 1, 2], [0], [0]>} : vector<4x8x8xf32>, vector<4x8x8xf32>, vector<4x8x8xf32> -> vector<4x8x8xf32>
    "tpu.trace_stop"() : () -> ()
    "tpu.trace_start"() <{level = 10 : i32, message = "hqe,hed->hqd"}> : () -> ()
    %cst_218 = arith.constant dense<0.000000e+00> : vector<4x8x32xf32>
    %413 = tpu.matmul %412, %37, %cst_218 {dimension_numbers = #tpu.dot_dimension_numbers<[2], [1], [1], [2], [0, 0, 0, 1, 1, 2], [0], [0]>} : vector<4x8x8xf32>, vector<4x8x32xf32>, vector<4x8x32xf32> -> vector<4x8x32xf32>
    "tpu.trace_stop"() : () -> ()
    %cst_219 = arith.constant dense<0.000000e+00> : vector<8x32xf32>
    %414 = vector.multi_reduction <add>, %413, %cst_219 [0] : vector<4x8x32xf32> to vector<8x32xf32>
    %415 = vector.broadcast %39 : vector<1x32xf32> to vector<8x32xf32>
    %416 = arith.addf %414, %415 : vector<8x32xf32>
    %417 = arith.addf %378, %416 : vector<8x32xf32>
    %cst_220 = arith.constant dense<0.000000e+00> : vector<8xf32>
    %418 = vector.multi_reduction <add>, %417, %cst_220 [1] : vector<8x32xf32> to vector<8xf32>
    %419 = vector.shape_cast %418 : vector<8xf32> to vector<8x1xf32>
    %cst_221 = arith.constant 3.200000e+01 : f32
    %420 = vector.broadcast %cst_221 : f32 to vector<8x1xf32>
    %421 = arith.divf %419, %420 : vector<8x1xf32>
    %422 = vector.broadcast %421 : vector<8x1xf32> to vector<8x32xf32>
    %423 = arith.subf %417, %422 : vector<8x32xf32>
    %424 = arith.mulf %423, %423 : vector<8x32xf32>
    %cst_222 = arith.constant dense<0.000000e+00> : vector<8xf32>
    %425 = vector.multi_reduction <add>, %424, %cst_222 [1] : vector<8x32xf32> to vector<8xf32>
    %426 = vector.shape_cast %425 : vector<8xf32> to vector<8x1xf32>
    %cst_223 = arith.constant 3.200000e+01 : f32
    %427 = vector.broadcast %cst_223 : f32 to vector<8x1xf32>
    %428 = arith.divf %426, %427 : vector<8x1xf32>
    %429 = vector.broadcast %421 : vector<8x1xf32> to vector<8x32xf32>
    %430 = arith.subf %417, %429 : vector<8x32xf32>
    %cst_224 = arith.constant 9.99999974E-6 : f32
    %431 = vector.broadcast %cst_224 : f32 to vector<8x1xf32>
    %432 = arith.addf %428, %431 : vector<8x1xf32>
    %433 = math.rsqrt %432 : vector<8x1xf32>
    %434 = vector.broadcast %433 : vector<8x1xf32> to vector<8x32xf32>
    %435 = arith.mulf %430, %434 : vector<8x32xf32>
    %436 = vector.broadcast %53 : vector<1x32xf32> to vector<8x32xf32>
    %437 = arith.mulf %435, %436 : vector<8x32xf32>
    %438 = vector.broadcast %55 : vector<1x32xf32> to vector<8x32xf32>
    %439 = arith.addf %437, %438 : vector<8x32xf32>
    %cst_225 = arith.constant dense<0.000000e+00> : vector<8x64xf32>
    %440 = tpu.matmul %439, %41, %cst_225 {dimension_numbers = #tpu.dot_dimension_numbers<[1], [0], [0], [1], [0, 0, 1, 1], [], []>} : vector<8x32xf32>, vector<32x64xf32>, vector<8x64xf32> -> vector<8x64xf32>
    %441 = vector.broadcast %43 : vector<1x64xf32> to vector<8x64xf32>
    %442 = arith.addf %440, %441 : vector<8x64xf32>
    %cst_226 = arith.constant 0.000000e+00 : f32
    %443 = vector.broadcast %cst_226 : f32 to vector<8x64xf32>
    %444 = arith.maximumf %442, %443 : vector<8x64xf32>
    %cst_227 = arith.constant dense<0.000000e+00> : vector<8x32xf32>
    %445 = tpu.matmul %444, %45, %cst_227 {dimension_numbers = #tpu.dot_dimension_numbers<[1], [0], [0], [1], [0, 0, 1, 1], [], []>} : vector<8x64xf32>, vector<64x32xf32>, vector<8x32xf32> -> vector<8x32xf32>
    %446 = vector.broadcast %47 : vector<1x32xf32> to vector<8x32xf32>
    %447 = arith.addf %445, %446 : vector<8x32xf32>
    %448 = arith.addf %439, %447 : vector<8x32xf32>
    %cst_228 = arith.constant dense<0.000000e+00> : vector<8xf32>
    %449 = vector.multi_reduction <add>, %448, %cst_228 [1] : vector<8x32xf32> to vector<8xf32>
    %450 = vector.shape_cast %449 : vector<8xf32> to vector<8x1xf32>
    %cst_229 = arith.constant 3.200000e+01 : f32
    %451 = vector.broadcast %cst_229 : f32 to vector<8x1xf32>
    %452 = arith.divf %450, %451 : vector<8x1xf32>
    %453 = vector.broadcast %452 : vector<8x1xf32> to vector<8x32xf32>
    %454 = arith.subf %448, %453 : vector<8x32xf32>
    %455 = arith.mulf %454, %454 : vector<8x32xf32>
    %cst_230 = arith.constant dense<0.000000e+00> : vector<8xf32>
    %456 = vector.multi_reduction <add>, %455, %cst_230 [1] : vector<8x32xf32> to vector<8xf32>
    %457 = vector.shape_cast %456 : vector<8xf32> to vector<8x1xf32>
    %cst_231 = arith.constant 3.200000e+01 : f32
    %458 = vector.broadcast %cst_231 : f32 to vector<8x1xf32>
    %459 = arith.divf %457, %458 : vector<8x1xf32>
    %460 = vector.broadcast %452 : vector<8x1xf32> to vector<8x32xf32>
    %461 = arith.subf %448, %460 : vector<8x32xf32>
    %cst_232 = arith.constant 9.99999974E-6 : f32
    %462 = vector.broadcast %cst_232 : f32 to vector<8x1xf32>
    %463 = arith.addf %459, %462 : vector<8x1xf32>
    %464 = math.rsqrt %463 : vector<8x1xf32>
    %465 = vector.broadcast %464 : vector<8x1xf32> to vector<8x32xf32>
    %466 = arith.mulf %461, %465 : vector<8x32xf32>
    %467 = vector.broadcast %57 : vector<1x32xf32> to vector<8x32xf32>
    %468 = arith.mulf %466, %467 : vector<8x32xf32>
    %469 = vector.broadcast %59 : vector<1x32xf32> to vector<8x32xf32>
    %470 = arith.addf %468, %469 : vector<8x32xf32>
    %c0_233 = arith.constant 0 : index
    %c1_234 = arith.constant 1 : index
    %c0_235 = arith.constant 0 : index
    %c0_236 = arith.constant 0 : index
    %471 = vector.load %arg35[%c0_233, %c1_234, %c0_235, %c0_236] : memref<1x2x8x32xf32, #tpu.memory_space<vmem>>, vector<1x1x8x32xf32>
    %472 = vector.shape_cast %471 : vector<1x1x8x32xf32> to vector<8x32xf32>
    %473 = vector.shape_cast %470 : vector<8x32xf32> to vector<1x1x8x32xf32>
    tpu.vector_store %arg35[%c0_233, %c1_234, %c0_235, %c0_236], %473 {strides = array<i32>} : memref<1x2x8x32xf32, #tpu.memory_space<vmem>>, vector<1x1x8x32xf32>,
    return
  }
  func.func @transform_0(%arg0: i32) -> (i32, i32, i32, i32) {
    %c0_i32 = arith.constant 0 : i32
    %c0_i32_0 = arith.constant 0 : i32
    %c0_i32_1 = arith.constant 0 : i32
    %c0_i32_2 = arith.constant 0 : i32
    return %arg0, %c0_i32, %c0_i32_0, %c0_i32_1 : i32, i32, i32, i32
  }
  func.func @transform_1(%arg0: i32) -> (i32, i32, i32, i32) {
    %c1_i32 = arith.constant 1 : i32
    %0 = arith.subi %c1_i32, %arg0 : i32
    %c0_i32 = arith.constant 0 : i32
    %c0_i32_0 = arith.constant 0 : i32
    %c0_i32_1 = arith.constant 0 : i32
    %c0_i32_2 = arith.constant 0 : i32
    return %0, %c0_i32, %c0_i32_0, %c0_i32_1 : i32, i32, i32, i32
  }
  func.func @transform_2(%arg0: i32) -> (i32, i32, i32, i32) {
    %c0_i32 = arith.constant 0 : i32
    %c0_i32_0 = arith.constant 0 : i32
    %c0_i32_1 = arith.constant 0 : i32
    %c0_i32_2 = arith.constant 0 : i32
    return %arg0, %c0_i32, %c0_i32_0, %c0_i32_1 : i32, i32, i32, i32
  }
  func.func @transform_3(%arg0: i32) -> (i32, i32, i32, i32) {
    %c1_i32 = arith.constant 1 : i32
    %0 = arith.subi %c1_i32, %arg0 : i32
    %c0_i32 = arith.constant 0 : i32
    %c0_i32_0 = arith.constant 0 : i32
    %c0_i32_1 = arith.constant 0 : i32
    %c0_i32_2 = arith.constant 0 : i32
    return %0, %c0_i32, %c0_i32_0, %c0_i32_1 : i32, i32, i32, i32
  }
  func.func @transform_4(%arg0: i32) -> (i32, i32, i32) {
    %c0_i32 = arith.constant 0 : i32
    %c0_i32_0 = arith.constant 0 : i32
    %c0_i32_1 = arith.constant 0 : i32
    return %arg0, %c0_i32, %c0_i32_0 : i32, i32, i32
  }
  func.func @transform_5(%arg0: i32) -> (i32, i32, i32) {
    %c0_i32 = arith.constant 0 : i32
    %c0_i32_0 = arith.constant 0 : i32
    %c0_i32_1 = arith.constant 0 : i32
    return %arg0, %c0_i32, %c0_i32_0 : i32, i32, i32
  }
  func.func @transform_6(%arg0: i32) -> (i32, i32, i32) {
    %c1_i32 = arith.constant 1 : i32
    %0 = arith.subi %c1_i32, %arg0 : i32
    %c0_i32 = arith.constant 0 : i32
    %c0_i32_0 = arith.constant 0 : i32
    %c0_i32_1 = arith.constant 0 : i32
    return %0, %c0_i32, %c0_i32_0 : i32, i32, i32
  }
  func.func @transform_7(%arg0: i32) -> (i32, i32, i32) {
    %c1_i32 = arith.constant 1 : i32
    %0 = arith.subi %c1_i32, %arg0 : i32
    %c0_i32 = arith.constant 0 : i32
    %c0_i32_0 = arith.constant 0 : i32
    %c0_i32_1 = arith.constant 0 : i32
    return %0, %c0_i32, %c0_i32_0 : i32, i32, i32
  }
  func.func @transform_8(%arg0: i32) -> (i32, i32, i32, i32) {
    %c0_i32 = arith.constant 0 : i32
    %c0_i32_0 = arith.constant 0 : i32
    %c0_i32_1 = arith.constant 0 : i32
    %c0_i32_2 = arith.constant 0 : i32
    return %arg0, %c0_i32, %c0_i32_0, %c0_i32_1 : i32, i32, i32, i32
  }
  func.func @transform_9(%arg0: i32) -> (i32, i32, i32, i32) {
    %c0_i32 = arith.constant 0 : i32
    %c0_i32_0 = arith.constant 0 : i32
    %c0_i32_1 = arith.constant 0 : i32
    %c0_i32_2 = arith.constant 0 : i32
    return %arg0, %c0_i32, %c0_i32_0, %c0_i32_1 : i32, i32, i32, i32
  }
  func.func @transform_10(%arg0: i32) -> (i32, i32, i32, i32) {
    %c0_i32 = arith.constant 0 : i32
    %c0_i32_0 = arith.constant 0 : i32
    %c0_i32_1 = arith.constant 0 : i32
    %c0_i32_2 = arith.constant 0 : i32
    return %arg0, %c0_i32, %c0_i32_0, %c0_i32_1 : i32, i32, i32, i32
  }
  func.func @transform_11(%arg0: i32) -> (i32, i32, i32, i32) {
    %c0_i32 = arith.constant 0 : i32
    %c0_i32_0 = arith.constant 0 : i32
    %c0_i32_1 = arith.constant 0 : i32
    %c0_i32_2 = arith.constant 0 : i32
    return %arg0, %c0_i32, %c0_i32_0, %c0_i32_1 : i32, i32, i32, i32
  }
  func.func @transform_12(%arg0: i32) -> (i32, i32, i32, i32) {
    %c0_i32 = arith.constant 0 : i32
    %c0_i32_0 = arith.constant 0 : i32
    %c0_i32_1 = arith.constant 0 : i32
    %c0_i32_2 = arith.constant 0 : i32
    return %arg0, %c0_i32, %c0_i32_0, %c0_i32_1 : i32, i32, i32, i32
  }
  func.func @transform_13(%arg0: i32) -> (i32, i32, i32, i32) {
    %c0_i32 = arith.constant 0 : i32
    %c0_i32_0 = arith.constant 0 : i32
    %c0_i32_1 = arith.constant 0 : i32
    %c0_i32_2 = arith.constant 0 : i32
    return %arg0, %c0_i32, %c0_i32_0, %c0_i32_1 : i32, i32, i32, i32
  }
  func.func @transform_14(%arg0: i32) -> (i32, i32, i32, i32) {
    %c0_i32 = arith.constant 0 : i32
    %c0_i32_0 = arith.constant 0 : i32
    %c0_i32_1 = arith.constant 0 : i32
    %c0_i32_2 = arith.constant 0 : i32
    return %arg0, %c0_i32, %c0_i32_0, %c0_i32_1 : i32, i32, i32, i32
  }
  func.func @transform_15(%arg0: i32) -> (i32, i32, i32) {
    %c0_i32 = arith.constant 0 : i32
    %c0_i32_0 = arith.constant 0 : i32
    %c0_i32_1 = arith.constant 0 : i32
    return %arg0, %c0_i32, %c0_i32_0 : i32, i32, i32
  }
  func.func @transform_16(%arg0: i32) -> (i32, i32, i32, i32) {
    %c0_i32 = arith.constant 0 : i32
    %c0_i32_0 = arith.constant 0 : i32
    %c0_i32_1 = arith.constant 0 : i32
    %c0_i32_2 = arith.constant 0 : i32
    return %arg0, %c0_i32, %c0_i32_0, %c0_i32_1 : i32, i32, i32, i32
  }
  func.func @transform_17(%arg0: i32) -> (i32, i32, i32, i32) {
    %c0_i32 = arith.constant 0 : i32
    %c0_i32_0 = arith.constant 0 : i32
    %c0_i32_1 = arith.constant 0 : i32
    %c0_i32_2 = arith.constant 0 : i32
    return %arg0, %c0_i32, %c0_i32_0, %c0_i32_1 : i32, i32, i32, i32
  }
  func.func @transform_18(%arg0: i32) -> (i32, i32, i32, i32) {
    %c0_i32 = arith.constant 0 : i32
    %c0_i32_0 = arith.constant 0 : i32
    %c0_i32_1 = arith.constant 0 : i32
    %c0_i32_2 = arith.constant 0 : i32
    return %arg0, %c0_i32, %c0_i32_0, %c0_i32_1 : i32, i32, i32, i32
  }
  func.func @transform_19(%arg0: i32) -> (i32, i32, i32, i32) {
    %c0_i32 = arith.constant 0 : i32
    %c0_i32_0 = arith.constant 0 : i32
    %c0_i32_1 = arith.constant 0 : i32
    %c0_i32_2 = arith.constant 0 : i32
    return %arg0, %c0_i32, %c0_i32_0, %c0_i32_1 : i32, i32, i32, i32
  }
  func.func @transform_20(%arg0: i32) -> (i32, i32, i32, i32) {
    %c0_i32 = arith.constant 0 : i32
    %c0_i32_0 = arith.constant 0 : i32
    %c0_i32_1 = arith.constant 0 : i32
    %c0_i32_2 = arith.constant 0 : i32
    return %arg0, %c0_i32, %c0_i32_0, %c0_i32_1 : i32, i32, i32, i32
  }
  func.func @transform_21(%arg0: i32) -> (i32, i32, i32, i32) {
    %c0_i32 = arith.constant 0 : i32
    %c0_i32_0 = arith.constant 0 : i32
    %c0_i32_1 = arith.constant 0 : i32
    %c0_i32_2 = arith.constant 0 : i32
    return %arg0, %c0_i32, %c0_i32_0, %c0_i32_1 : i32, i32, i32, i32
  }
  func.func @transform_22(%arg0: i32) -> (i32, i32, i32, i32) {
    %c0_i32 = arith.constant 0 : i32
    %c0_i32_0 = arith.constant 0 : i32
    %c0_i32_1 = arith.constant 0 : i32
    %c0_i32_2 = arith.constant 0 : i32
    return %arg0, %c0_i32, %c0_i32_0, %c0_i32_1 : i32, i32, i32, i32
  }
  func.func @transform_23(%arg0: i32) -> (i32, i32, i32) {
    %c0_i32 = arith.constant 0 : i32
    %c0_i32_0 = arith.constant 0 : i32
    %c0_i32_1 = arith.constant 0 : i32
    return %arg0, %c0_i32, %c0_i32_0 : i32, i32, i32
  }
  func.func @transform_24(%arg0: i32) -> (i32, i32, i32) {
    %c0_i32 = arith.constant 0 : i32
    %c0_i32_0 = arith.constant 0 : i32
    %c0_i32_1 = arith.constant 0 : i32
    return %arg0, %c0_i32, %c0_i32_0 : i32, i32, i32
  }
  func.func @transform_25(%arg0: i32) -> (i32, i32, i32) {
    %c0_i32 = arith.constant 0 : i32
    %c0_i32_0 = arith.constant 0 : i32
    %c0_i32_1 = arith.constant 0 : i32
    return %arg0, %c0_i32, %c0_i32_0 : i32, i32, i32
  }
  func.func @transform_26(%arg0: i32) -> (i32, i32, i32) {
    %c0_i32 = arith.constant 0 : i32
    %c0_i32_0 = arith.constant 0 : i32
    %c0_i32_1 = arith.constant 0 : i32
    return %arg0, %c0_i32, %c0_i32_0 : i32, i32, i32
  }
  func.func @transform_27(%arg0: i32) -> (i32, i32, i32) {
    %c0_i32 = arith.constant 0 : i32
    %c0_i32_0 = arith.constant 0 : i32
    %c0_i32_1 = arith.constant 0 : i32
    return %arg0, %c0_i32, %c0_i32_0 : i32, i32, i32
  }
  func.func @transform_28(%arg0: i32) -> (i32, i32, i32) {
    %c0_i32 = arith.constant 0 : i32
    %c0_i32_0 = arith.constant 0 : i32
    %c0_i32_1 = arith.constant 0 : i32
    return %arg0, %c0_i32, %c0_i32_0 : i32, i32, i32
  }
  func.func @transform_29(%arg0: i32) -> (i32, i32, i32) {
    %c0_i32 = arith.constant 0 : i32
    %c0_i32_0 = arith.constant 0 : i32
    %c0_i32_1 = arith.constant 0 : i32
    return %arg0, %c0_i32, %c0_i32_0 : i32, i32, i32
  }
  func.func @transform_30(%arg0: i32) -> (i32, i32, i32) {
    %c0_i32 = arith.constant 0 : i32
    %c0_i32_0 = arith.constant 0 : i32
    %c0_i32_1 = arith.constant 0 : i32
    return %arg0, %c0_i32, %c0_i32_0 : i32, i32, i32
  }
  func.func @transform_31(%arg0: i32) -> (i32, i32, i32) {
    %c0_i32 = arith.constant 0 : i32
    %c0_i32_0 = arith.constant 0 : i32
    %c0_i32_1 = arith.constant 0 : i32
    return %arg0, %c0_i32, %c0_i32_0 : i32, i32, i32
  }
  func.func @transform_32(%arg0: i32) -> (i32, i32, i32) {
    %c0_i32 = arith.constant 0 : i32
    %c0_i32_0 = arith.constant 0 : i32
    %c0_i32_1 = arith.constant 0 : i32
    return %arg0, %c0_i32, %c0_i32_0 : i32, i32, i32
  }
  func.func @transform_33(%arg0: i32) -> (i32, i32, i32) {
    %c0_i32 = arith.constant 0 : i32
    %c0_i32_0 = arith.constant 0 : i32
    %c0_i32_1 = arith.constant 0 : i32
    return %arg0, %c0_i32, %c0_i32_0 : i32, i32, i32
  }
  func.func @transform_34(%arg0: i32) -> (i32, i32, i32, i32) {
    %c0_i32 = arith.constant 0 : i32
    %c0_i32_0 = arith.constant 0 : i32
    %c0_i32_1 = arith.constant 0 : i32
    %c0_i32_2 = arith.constant 0 : i32
    return %arg0, %c0_i32, %c0_i32_0, %c0_i32_1 : i32, i32, i32, i32
  }
}

module attributes {stable_mosaic.version = 11 : i64} {
  func.func @kernel(%arg0: i32, %arg1: memref<1x2x8x32xf32, #tpu.memory_space<vmem>>, %arg2: memref<1x2x8x32xf32, #tpu.memory_space<vmem>>, %arg3: memref<1x2x8x32xf32, #tpu.memory_space<vmem>>, %arg4: memref<1x2x8x32xf32, #tpu.memory_space<vmem>>, %arg5: memref<1x4x32x8xf32, #tpu.memory_space<vmem>>, %arg6: memref<1x4x1x8xf32, #tpu.memory_space<vmem>>, %arg7: memref<1x4x32x8xf32, #tpu.memory_space<vmem>>, %arg8: memref<1x4x1x8xf32, #tpu.memory_space<vmem>>, %arg9: memref<1x4x32x8xf32, #tpu.memory_space<vmem>>, %arg10: memref<1x4x1x8xf32, #tpu.memory_space<vmem>>, %arg11: memref<1x4x8x32xf32, #tpu.memory_space<vmem>>, %arg12: memref<1x1x32xf32, #tpu.memory_space<vmem>>, %arg13: memref<1x4x32x8xf32, #tpu.memory_space<vmem>>, %arg14: memref<1x4x1x8xf32, #tpu.memory_space<vmem>>, %arg15: memref<1x4x32x8xf32, #tpu.memory_space<vmem>>, %arg16: memref<1x4x1x8xf32, #tpu.memory_space<vmem>>, %arg17: memref<1x4x32x8xf32, #tpu.memory_space<vmem>>, %arg18: memref<1x4x1x8xf32, #tpu.memory_space<vmem>>, %arg19: memref<1x4x8x32xf32, #tpu.memory_space<vmem>>, %arg20: memref<1x1x32xf32, #tpu.memory_space<vmem>>, %arg21: memref<1x32x64xf32, #tpu.memory_space<vmem>>, %arg22: memref<1x1x64xf32, #tpu.memory_space<vmem>>, %arg23: memref<1x64x32xf32, #tpu.memory_space<vmem>>, %arg24: memref<1x1x32xf32, #tpu.memory_space<vmem>>, %arg25: memref<1x1x32xf32, #tpu.memory_space<vmem>>, %arg26: memref<1x1x32xf32, #tpu.memory_space<vmem>>, %arg27: memref<1x1x32xf32, #tpu.memory_space<vmem>>, %arg28: memref<1x1x32xf32, #tpu.memory_space<vmem>>, %arg29: memref<1x1x32xf32, #tpu.memory_space<vmem>>, %arg30: memref<1x1x32xf32, #tpu.memory_space<vmem>>, %arg31: memref<1x2x8x32xf32, #tpu.memory_space<vmem>>) attributes {dimension_semantics = [#tpu.dimension_semantics<parallel>], iteration_bounds = array<i64: 2>, scalar_prefetch = 0 : i64, scratch_operands = 0 : i64, tpu.core_type = #tpu.core_type<tc>, window_params = [{transform_indices = @transform_0, window_bounds = array<i64: 1, 2, 8, 32>}, {transform_indices = @transform_1, window_bounds = array<i64: 1, 2, 8, 32>}, {transform_indices = @transform_2, window_bounds = array<i64: 1, 2, 8, 32>}, {transform_indices = @transform_3, window_bounds = array<i64: 1, 2, 8, 32>}, {transform_indices = @transform_4, window_bounds = array<i64: 1, 4, 32, 8>}, {transform_indices = @transform_5, window_bounds = array<i64: 1, 4, 1, 8>}, {transform_indices = @transform_6, window_bounds = array<i64: 1, 4, 32, 8>}, {transform_indices = @transform_7, window_bounds = array<i64: 1, 4, 1, 8>}, {transform_indices = @transform_8, window_bounds = array<i64: 1, 4, 32, 8>}, {transform_indices = @transform_9, window_bounds = array<i64: 1, 4, 1, 8>}, {transform_indices = @transform_10, window_bounds = array<i64: 1, 4, 8, 32>}, {transform_indices = @transform_11, window_bounds = array<i64: 1, 1, 32>}, {transform_indices = @transform_12, window_bounds = array<i64: 1, 4, 32, 8>}, {transform_indices = @transform_13, window_bounds = array<i64: 1, 4, 1, 8>}, {transform_indices = @transform_14, window_bounds = array<i64: 1, 4, 32, 8>}, {transform_indices = @transform_15, window_bounds = array<i64: 1, 4, 1, 8>}, {transform_indices = @transform_16, window_bounds = array<i64: 1, 4, 32, 8>}, {transform_indices = @transform_17, window_bounds = array<i64: 1, 4, 1, 8>}, {transform_indices = @transform_18, window_bounds = array<i64: 1, 4, 8, 32>}, {transform_indices = @transform_19, window_bounds = array<i64: 1, 1, 32>}, {transform_indices = @transform_20, window_bounds = array<i64: 1, 32, 64>}, {transform_indices = @transform_21, window_bounds = array<i64: 1, 1, 64>}, {transform_indices = @transform_22, window_bounds = array<i64: 1, 64, 32>}, {transform_indices = @transform_23, window_bounds = array<i64: 1, 1, 32>}, {transform_indices = @transform_24, window_bounds = array<i64: 1, 1, 32>}, {transform_indices = @transform_25, window_bounds = array<i64: 1, 1, 32>}, {transform_indices = @transform_26, window_bounds = array<i64: 1, 1, 32>}, {transform_indices = @transform_27, window_bounds = array<i64: 1, 1, 32>}, {transform_indices = @transform_28, window_bounds = array<i64: 1, 1, 32>}, {transform_indices = @transform_29, window_bounds = array<i64: 1, 1, 32>}, {transform_indices = @transform_30, window_bounds = array<i64: 1, 2, 8, 32>}]} {
    %c0 = arith.constant 0 : index
    %c0_0 = arith.constant 0 : index
    %c0_1 = arith.constant 0 : index
    %c0_2 = arith.constant 0 : index
    %0 = vector.load %arg5[%c0, %c0_0, %c0_1, %c0_2] : memref<1x4x32x8xf32, #tpu.memory_space<vmem>>, vector<1x4x32x8xf32>
    %1 = vector.shape_cast %0 : vector<1x4x32x8xf32> to vector<4x32x8xf32>
    %c0_3 = arith.constant 0 : index
    %c0_4 = arith.constant 0 : index
    %c0_5 = arith.constant 0 : index
    %c0_6 = arith.constant 0 : index
    %2 = vector.load %arg6[%c0_3, %c0_4, %c0_5, %c0_6] : memref<1x4x1x8xf32, #tpu.memory_space<vmem>>, vector<1x4x1x8xf32>
    %3 = vector.shape_cast %2 : vector<1x4x1x8xf32> to vector<4x1x8xf32>
    %c0_7 = arith.constant 0 : index
    %c0_8 = arith.constant 0 : index
    %c0_9 = arith.constant 0 : index
    %c0_10 = arith.constant 0 : index
    %4 = vector.load %arg7[%c0_7, %c0_8, %c0_9, %c0_10] : memref<1x4x32x8xf32, #tpu.memory_space<vmem>>, vector<1x4x32x8xf32>
    %5 = vector.shape_cast %4 : vector<1x4x32x8xf32> to vector<4x32x8xf32>
    %c0_11 = arith.constant 0 : index
    %c0_12 = arith.constant 0 : index
    %c0_13 = arith.constant 0 : index
    %c0_14 = arith.constant 0 : index
    %6 = vector.load %arg8[%c0_11, %c0_12, %c0_13, %c0_14] : memref<1x4x1x8xf32, #tpu.memory_space<vmem>>, vector<1x4x1x8xf32>
    %7 = vector.shape_cast %6 : vector<1x4x1x8xf32> to vector<4x1x8xf32>
    %c0_15 = arith.constant 0 : index
    %c0_16 = arith.constant 0 : index
    %c0_17 = arith.constant 0 : index
    %c0_18 = arith.constant 0 : index
    %8 = vector.load %arg9[%c0_15, %c0_16, %c0_17, %c0_18] : memref<1x4x32x8xf32, #tpu.memory_space<vmem>>, vector<1x4x32x8xf32>
    %9 = vector.shape_cast %8 : vector<1x4x32x8xf32> to vector<4x32x8xf32>
    %c0_19 = arith.constant 0 : index
    %c0_20 = arith.constant 0 : index
    %c0_21 = arith.constant 0 : index
    %c0_22 = arith.constant 0 : index
    %10 = vector.load %arg10[%c0_19, %c0_20, %c0_21, %c0_22] : memref<1x4x1x8xf32, #tpu.memory_space<vmem>>, vector<1x4x1x8xf32>
    %11 = vector.shape_cast %10 : vector<1x4x1x8xf32> to vector<4x1x8xf32>
    %c0_23 = arith.constant 0 : index
    %c0_24 = arith.constant 0 : index
    %c0_25 = arith.constant 0 : index
    %c0_26 = arith.constant 0 : index
    %12 = vector.load %arg11[%c0_23, %c0_24, %c0_25, %c0_26] : memref<1x4x8x32xf32, #tpu.memory_space<vmem>>, vector<1x4x8x32xf32>
    %13 = vector.shape_cast %12 : vector<1x4x8x32xf32> to vector<4x8x32xf32>
    %c0_27 = arith.constant 0 : index
    %c0_28 = arith.constant 0 : index
    %c0_29 = arith.constant 0 : index
    %14 = vector.load %arg12[%c0_27, %c0_28, %c0_29] : memref<1x1x32xf32, #tpu.memory_space<vmem>>, vector<1x1x32xf32>
    %15 = vector.shape_cast %14 : vector<1x1x32xf32> to vector<1x32xf32>
    %c0_30 = arith.constant 0 : index
    %c0_31 = arith.constant 0 : index
    %c0_32 = arith.constant 0 : index
    %c0_33 = arith.constant 0 : index
    %16 = vector.load %arg13[%c0_30, %c0_31, %c0_32, %c0_33] : memref<1x4x32x8xf32, #tpu.memory_space<vmem>>, vector<1x4x32x8xf32>
    %17 = vector.shape_cast %16 : vector<1x4x32x8xf32> to vector<4x32x8xf32>
    %c0_34 = arith.constant 0 : index
    %c0_35 = arith.constant 0 : index
    %c0_36 = arith.constant 0 : index
    %c0_37 = arith.constant 0 : index
    %18 = vector.load %arg14[%c0_34, %c0_35, %c0_36, %c0_37] : memref<1x4x1x8xf32, #tpu.memory_space<vmem>>, vector<1x4x1x8xf32>
    %19 = vector.shape_cast %18 : vector<1x4x1x8xf32> to vector<4x1x8xf32>
    %c0_38 = arith.constant 0 : index
    %c0_39 = arith.constant 0 : index
    %c0_40 = arith.constant 0 : index
    %c0_41 = arith.constant 0 : index
    %20 = vector.load %arg15[%c0_38, %c0_39, %c0_40, %c0_41] : memref<1x4x32x8xf32, #tpu.memory_space<vmem>>, vector<1x4x32x8xf32>
    %21 = vector.shape_cast %20 : vector<1x4x32x8xf32> to vector<4x32x8xf32>
    %c0_42 = arith.constant 0 : index
    %c0_43 = arith.constant 0 : index
    %c0_44 = arith.constant 0 : index
    %c0_45 = arith.constant 0 : index
    %22 = vector.load %arg16[%c0_42, %c0_43, %c0_44, %c0_45] : memref<1x4x1x8xf32, #tpu.memory_space<vmem>>, vector<1x4x1x8xf32>
    %23 = vector.shape_cast %22 : vector<1x4x1x8xf32> to vector<4x1x8xf32>
    %c0_46 = arith.constant 0 : index
    %c0_47 = arith.constant 0 : index
    %c0_48 = arith.constant 0 : index
    %c0_49 = arith.constant 0 : index
    %24 = vector.load %arg17[%c0_46, %c0_47, %c0_48, %c0_49] : memref<1x4x32x8xf32, #tpu.memory_space<vmem>>, vector<1x4x32x8xf32>
    %25 = vector.shape_cast %24 : vector<1x4x32x8xf32> to vector<4x32x8xf32>
    %c0_50 = arith.constant 0 : index
    %c0_51 = arith.constant 0 : index
    %c0_52 = arith.constant 0 : index
    %c0_53 = arith.constant 0 : index
    %26 = vector.load %arg18[%c0_50, %c0_51, %c0_52, %c0_53] : memref<1x4x1x8xf32, #tpu.memory_space<vmem>>, vector<1x4x1x8xf32>
    %27 = vector.shape_cast %26 : vector<1x4x1x8xf32> to vector<4x1x8xf32>
    %c0_54 = arith.constant 0 : index
    %c0_55 = arith.constant 0 : index
    %c0_56 = arith.constant 0 : index
    %c0_57 = arith.constant 0 : index
    %28 = vector.load %arg19[%c0_54, %c0_55, %c0_56, %c0_57] : memref<1x4x8x32xf32, #tpu.memory_space<vmem>>, vector<1x4x8x32xf32>
    %29 = vector.shape_cast %28 : vector<1x4x8x32xf32> to vector<4x8x32xf32>
    %c0_58 = arith.constant 0 : index
    %c0_59 = arith.constant 0 : index
    %c0_60 = arith.constant 0 : index
    %30 = vector.load %arg20[%c0_58, %c0_59, %c0_60] : memref<1x1x32xf32, #tpu.memory_space<vmem>>, vector<1x1x32xf32>
    %31 = vector.shape_cast %30 : vector<1x1x32xf32> to vector<1x32xf32>
    %c0_61 = arith.constant 0 : index
    %c0_62 = arith.constant 0 : index
    %c0_63 = arith.constant 0 : index
    %32 = vector.load %arg21[%c0_61, %c0_62, %c0_63] : memref<1x32x64xf32, #tpu.memory_space<vmem>>, vector<1x32x64xf32>
    %33 = vector.shape_cast %32 : vector<1x32x64xf32> to vector<32x64xf32>
    %c0_64 = arith.constant 0 : index
    %c0_65 = arith.constant 0 : index
    %c0_66 = arith.constant 0 : index
    %34 = vector.load %arg22[%c0_64, %c0_65, %c0_66] : memref<1x1x64xf32, #tpu.memory_space<vmem>>, vector<1x1x64xf32>
    %35 = vector.shape_cast %34 : vector<1x1x64xf32> to vector<1x64xf32>
    %c0_67 = arith.constant 0 : index
    %c0_68 = arith.constant 0 : index
    %c0_69 = arith.constant 0 : index
    %36 = vector.load %arg23[%c0_67, %c0_68, %c0_69] : memref<1x64x32xf32, #tpu.memory_space<vmem>>, vector<1x64x32xf32>
    %37 = vector.shape_cast %36 : vector<1x64x32xf32> to vector<64x32xf32>
    %c0_70 = arith.constant 0 : index
    %c0_71 = arith.constant 0 : index
    %c0_72 = arith.constant 0 : index
    %38 = vector.load %arg24[%c0_70, %c0_71, %c0_72] : memref<1x1x32xf32, #tpu.memory_space<vmem>>, vector<1x1x32xf32>
    %39 = vector.shape_cast %38 : vector<1x1x32xf32> to vector<1x32xf32>
    %c0_73 = arith.constant 0 : index
    %c0_74 = arith.constant 0 : index
    %c0_75 = arith.constant 0 : index
    %40 = vector.load %arg25[%c0_73, %c0_74, %c0_75] : memref<1x1x32xf32, #tpu.memory_space<vmem>>, vector<1x1x32xf32>
    %41 = vector.shape_cast %40 : vector<1x1x32xf32> to vector<1x32xf32>
    %c0_76 = arith.constant 0 : index
    %c0_77 = arith.constant 0 : index
    %c0_78 = arith.constant 0 : index
    %42 = vector.load %arg26[%c0_76, %c0_77, %c0_78] : memref<1x1x32xf32, #tpu.memory_space<vmem>>, vector<1x1x32xf32>
    %43 = vector.shape_cast %42 : vector<1x1x32xf32> to vector<1x32xf32>
    %c0_79 = arith.constant 0 : index
    %c0_80 = arith.constant 0 : index
    %c0_81 = arith.constant 0 : index
    %44 = vector.load %arg27[%c0_79, %c0_80, %c0_81] : memref<1x1x32xf32, #tpu.memory_space<vmem>>, vector<1x1x32xf32>
    %45 = vector.shape_cast %44 : vector<1x1x32xf32> to vector<1x32xf32>
    %c0_82 = arith.constant 0 : index
    %c0_83 = arith.constant 0 : index
    %c0_84 = arith.constant 0 : index
    %46 = vector.load %arg28[%c0_82, %c0_83, %c0_84] : memref<1x1x32xf32, #tpu.memory_space<vmem>>, vector<1x1x32xf32>
    %47 = vector.shape_cast %46 : vector<1x1x32xf32> to vector<1x32xf32>
    %c0_85 = arith.constant 0 : index
    %c0_86 = arith.constant 0 : index
    %c0_87 = arith.constant 0 : index
    %48 = vector.load %arg29[%c0_85, %c0_86, %c0_87] : memref<1x1x32xf32, #tpu.memory_space<vmem>>, vector<1x1x32xf32>
    %49 = vector.shape_cast %48 : vector<1x1x32xf32> to vector<1x32xf32>
    %c0_88 = arith.constant 0 : index
    %c0_89 = arith.constant 0 : index
    %c0_90 = arith.constant 0 : index
    %50 = vector.load %arg30[%c0_88, %c0_89, %c0_90] : memref<1x1x32xf32, #tpu.memory_space<vmem>>, vector<1x1x32xf32>
    %51 = vector.shape_cast %50 : vector<1x1x32xf32> to vector<1x32xf32>
    %c0_91 = arith.constant 0 : index
    %c0_92 = arith.constant 0 : index
    %c0_93 = arith.constant 0 : index
    %c0_94 = arith.constant 0 : index
    %52 = vector.load %arg1[%c0_91, %c0_92, %c0_93, %c0_94] : memref<1x2x8x32xf32, #tpu.memory_space<vmem>>, vector<1x1x8x32xf32>
    %53 = vector.shape_cast %52 : vector<1x1x8x32xf32> to vector<8x32xf32>
    %c0_95 = arith.constant 0 : index
    %c0_96 = arith.constant 0 : index
    %c0_97 = arith.constant 0 : index
    %c0_98 = arith.constant 0 : index
    %54 = vector.load %arg2[%c0_95, %c0_96, %c0_97, %c0_98] : memref<1x2x8x32xf32, #tpu.memory_space<vmem>>, vector<1x1x8x32xf32>
    %55 = vector.shape_cast %54 : vector<1x1x8x32xf32> to vector<8x32xf32>
    %c0_99 = arith.constant 0 : index
    %c0_100 = arith.constant 0 : index
    %c0_101 = arith.constant 0 : index
    %c0_102 = arith.constant 0 : index
    %56 = vector.load %arg3[%c0_99, %c0_100, %c0_101, %c0_102] : memref<1x2x8x32xf32, #tpu.memory_space<vmem>>, vector<1x1x8x32xf32>
    %57 = vector.shape_cast %56 : vector<1x1x8x32xf32> to vector<8x32xf32>
    %c0_103 = arith.constant 0 : index
    %c0_104 = arith.constant 0 : index
    %c0_105 = arith.constant 0 : index
    %c0_106 = arith.constant 0 : index
    %58 = vector.load %arg4[%c0_103, %c0_104, %c0_105, %c0_106] : memref<1x2x8x32xf32, #tpu.memory_space<vmem>>, vector<1x1x8x32xf32>
    %59 = vector.shape_cast %58 : vector<1x1x8x32xf32> to vector<8x32xf32>
    %60 = arith.addf %53, %57 : vector<8x32xf32>
    %61 = vector.shape_cast %60 : vector<8x32xf32> to vector<1x8x32xf32>
    %62 = vector.shape_cast %61 : vector<1x8x32xf32> to vector<1x8x32xf32>
    %63 = vector.broadcast %62 : vector<1x8x32xf32> to vector<4x8x32xf32>
    %64 = vector.shape_cast %60 : vector<8x32xf32> to vector<1x8x32xf32>
    %65 = vector.shape_cast %64 : vector<1x8x32xf32> to vector<1x8x32xf32>
    %66 = vector.broadcast %65 : vector<1x8x32xf32> to vector<4x8x32xf32>
    %67 = vector.shape_cast %53 : vector<8x32xf32> to vector<1x8x32xf32>
    %68 = vector.shape_cast %67 : vector<1x8x32xf32> to vector<1x8x32xf32>
    %69 = vector.broadcast %68 : vector<1x8x32xf32> to vector<4x8x32xf32>
    "tpu.trace_start"() <{level = 10 : i32, message = "hsd,hde->hse"}> : () -> ()
    %cst = arith.constant dense<0.000000e+00> : vector<4x8x8xf32>
    %70 = tpu.matmul %63, %1, %cst {dimension_numbers = #tpu.dot_dimension_numbers<[2], [1], [1], [2], [0, 0, 0, 1, 1, 2], [0], [0]>} : vector<4x8x32xf32>, vector<4x32x8xf32>, vector<4x8x8xf32> -> vector<4x8x8xf32>
    "tpu.trace_stop"() : () -> ()
    %71 = vector.broadcast %3 : vector<4x1x8xf32> to vector<4x8x8xf32>
    %72 = arith.addf %70, %71 : vector<4x8x8xf32>
    "tpu.trace_start"() <{level = 10 : i32, message = "hsd,hde->hse"}> : () -> ()
    %cst_107 = arith.constant dense<0.000000e+00> : vector<4x8x8xf32>
    %73 = tpu.matmul %66, %5, %cst_107 {dimension_numbers = #tpu.dot_dimension_numbers<[2], [1], [1], [2], [0, 0, 0, 1, 1, 2], [0], [0]>} : vector<4x8x32xf32>, vector<4x32x8xf32>, vector<4x8x8xf32> -> vector<4x8x8xf32>
    "tpu.trace_stop"() : () -> ()
    %74 = vector.broadcast %7 : vector<4x1x8xf32> to vector<4x8x8xf32>
    %75 = arith.addf %73, %74 : vector<4x8x8xf32>
    "tpu.trace_start"() <{level = 10 : i32, message = "hsd,hde->hse"}> : () -> ()
    %cst_108 = arith.constant dense<0.000000e+00> : vector<4x8x8xf32>
    %76 = tpu.matmul %69, %9, %cst_108 {dimension_numbers = #tpu.dot_dimension_numbers<[2], [1], [1], [2], [0, 0, 0, 1, 1, 2], [0], [0]>} : vector<4x8x32xf32>, vector<4x32x8xf32>, vector<4x8x8xf32> -> vector<4x8x8xf32>
    "tpu.trace_stop"() : () -> ()
    %77 = vector.broadcast %11 : vector<4x1x8xf32> to vector<4x8x8xf32>
    %78 = arith.addf %76, %77 : vector<4x8x8xf32>
    %cst_109 = arith.constant 0.353553385 : f32
    %79 = vector.broadcast %cst_109 : f32 to vector<4x8x8xf32>
    %80 = arith.mulf %72, %79 : vector<4x8x8xf32>
    "tpu.trace_start"() <{level = 10 : i32, message = "hqe,hke->hqk"}> : () -> ()
    %cst_110 = arith.constant dense<0.000000e+00> : vector<4x8x8xf32>
    %81 = tpu.matmul %80, %75, %cst_110 {dimension_numbers = #tpu.dot_dimension_numbers<[2], [2], [1], [1], [0, 0, 0, 1, 1, 1], [0], [0]>} : vector<4x8x8xf32>, vector<4x8x8xf32>, vector<4x8x8xf32> -> vector<4x8x8xf32>
    "tpu.trace_stop"() : () -> ()
    %cst_111 = arith.constant dense<0xFF800000> : vector<4x8xf32>
    %82 = vector.multi_reduction <maximumf>, %81, %cst_111 [2] : vector<4x8x8xf32> to vector<4x8xf32>
    %83 = vector.shape_cast %82 : vector<4x8xf32> to vector<4x8x1xf32>
    %84 = vector.broadcast %83 : vector<4x8x1xf32> to vector<4x8x8xf32>
    %85 = arith.subf %81, %84 : vector<4x8x8xf32>
    %86 = math.exp %85 : vector<4x8x8xf32>
    %cst_112 = arith.constant dense<0.000000e+00> : vector<4x8xf32>
    %87 = vector.multi_reduction <add>, %86, %cst_112 [2] : vector<4x8x8xf32> to vector<4x8xf32>
    %88 = vector.shape_cast %87 : vector<4x8xf32> to vector<4x8x1xf32>
    %89 = tpu.reciprocal %88 {approx = true} : vector<4x8x1xf32> -> vector<4x8x1xf32>
    %90 = vector.broadcast %89 : vector<4x8x1xf32> to vector<4x8x8xf32>
    %91 = arith.mulf %86, %90 : vector<4x8x8xf32>
    "tpu.trace_start"() <{level = 10 : i32, message = "hqk,hke->hqe"}> : () -> ()
    %cst_113 = arith.constant dense<0.000000e+00> : vector<4x8x8xf32>
    %92 = tpu.matmul %91, %78, %cst_113 {dimension_numbers = #tpu.dot_dimension_numbers<[2], [1], [1], [2], [0, 0, 0, 1, 1, 2], [0], [0]>} : vector<4x8x8xf32>, vector<4x8x8xf32>, vector<4x8x8xf32> -> vector<4x8x8xf32>
    "tpu.trace_stop"() : () -> ()
    "tpu.trace_start"() <{level = 10 : i32, message = "hqe,hed->hqd"}> : () -> ()
    %cst_114 = arith.constant dense<0.000000e+00> : vector<4x8x32xf32>
    %93 = tpu.matmul %92, %13, %cst_114 {dimension_numbers = #tpu.dot_dimension_numbers<[2], [1], [1], [2], [0, 0, 0, 1, 1, 2], [0], [0]>} : vector<4x8x8xf32>, vector<4x8x32xf32>, vector<4x8x32xf32> -> vector<4x8x32xf32>
    "tpu.trace_stop"() : () -> ()
    %cst_115 = arith.constant dense<0.000000e+00> : vector<8x32xf32>
    %94 = vector.multi_reduction <add>, %93, %cst_115 [0] : vector<4x8x32xf32> to vector<8x32xf32>
    %95 = vector.broadcast %15 : vector<1x32xf32> to vector<8x32xf32>
    %96 = arith.addf %94, %95 : vector<8x32xf32>
    %97 = arith.addf %53, %96 : vector<8x32xf32>
    %cst_116 = arith.constant dense<0.000000e+00> : vector<8xf32>
    %98 = vector.multi_reduction <add>, %97, %cst_116 [1] : vector<8x32xf32> to vector<8xf32>
    %99 = vector.shape_cast %98 : vector<8xf32> to vector<8x1xf32>
    %cst_117 = arith.constant 3.200000e+01 : f32
    %100 = vector.broadcast %cst_117 : f32 to vector<8x1xf32>
    %101 = arith.divf %99, %100 : vector<8x1xf32>
    %102 = vector.broadcast %101 : vector<8x1xf32> to vector<8x32xf32>
    %103 = arith.subf %97, %102 : vector<8x32xf32>
    %104 = arith.mulf %103, %103 : vector<8x32xf32>
    %cst_118 = arith.constant dense<0.000000e+00> : vector<8xf32>
    %105 = vector.multi_reduction <add>, %104, %cst_118 [1] : vector<8x32xf32> to vector<8xf32>
    %106 = vector.shape_cast %105 : vector<8xf32> to vector<8x1xf32>
    %cst_119 = arith.constant 3.200000e+01 : f32
    %107 = vector.broadcast %cst_119 : f32 to vector<8x1xf32>
    %108 = arith.divf %106, %107 : vector<8x1xf32>
    %109 = vector.broadcast %101 : vector<8x1xf32> to vector<8x32xf32>
    %110 = arith.subf %97, %109 : vector<8x32xf32>
    %cst_120 = arith.constant 9.99999974E-6 : f32
    %111 = vector.broadcast %cst_120 : f32 to vector<8x1xf32>
    %112 = arith.addf %108, %111 : vector<8x1xf32>
    %113 = math.rsqrt %112 : vector<8x1xf32>
    %114 = vector.broadcast %113 : vector<8x1xf32> to vector<8x32xf32>
    %115 = arith.mulf %110, %114 : vector<8x32xf32>
    %116 = vector.broadcast %41 : vector<1x32xf32> to vector<8x32xf32>
    %117 = arith.mulf %115, %116 : vector<8x32xf32>
    %118 = vector.broadcast %43 : vector<1x32xf32> to vector<8x32xf32>
    %119 = arith.addf %117, %118 : vector<8x32xf32>
    %120 = arith.addf %119, %57 : vector<8x32xf32>
    %121 = arith.addf %55, %59 : vector<8x32xf32>
    %122 = vector.shape_cast %120 : vector<8x32xf32> to vector<1x8x32xf32>
    %123 = vector.shape_cast %122 : vector<1x8x32xf32> to vector<1x8x32xf32>
    %124 = vector.broadcast %123 : vector<1x8x32xf32> to vector<4x8x32xf32>
    %125 = vector.shape_cast %121 : vector<8x32xf32> to vector<1x8x32xf32>
    %126 = vector.shape_cast %125 : vector<1x8x32xf32> to vector<1x8x32xf32>
    %127 = vector.broadcast %126 : vector<1x8x32xf32> to vector<4x8x32xf32>
    %128 = vector.shape_cast %55 : vector<8x32xf32> to vector<1x8x32xf32>
    %129 = vector.shape_cast %128 : vector<1x8x32xf32> to vector<1x8x32xf32>
    %130 = vector.broadcast %129 : vector<1x8x32xf32> to vector<4x8x32xf32>
    "tpu.trace_start"() <{level = 10 : i32, message = "hsd,hde->hse"}> : () -> ()
    %cst_121 = arith.constant dense<0.000000e+00> : vector<4x8x8xf32>
    %131 = tpu.matmul %124, %17, %cst_121 {dimension_numbers = #tpu.dot_dimension_numbers<[2], [1], [1], [2], [0, 0, 0, 1, 1, 2], [0], [0]>} : vector<4x8x32xf32>, vector<4x32x8xf32>, vector<4x8x8xf32> -> vector<4x8x8xf32>
    "tpu.trace_stop"() : () -> ()
    %132 = vector.broadcast %19 : vector<4x1x8xf32> to vector<4x8x8xf32>
    %133 = arith.addf %131, %132 : vector<4x8x8xf32>
    "tpu.trace_start"() <{level = 10 : i32, message = "hsd,hde->hse"}> : () -> ()
    %cst_122 = arith.constant dense<0.000000e+00> : vector<4x8x8xf32>
    %134 = tpu.matmul %127, %21, %cst_122 {dimension_numbers = #tpu.dot_dimension_numbers<[2], [1], [1], [2], [0, 0, 0, 1, 1, 2], [0], [0]>} : vector<4x8x32xf32>, vector<4x32x8xf32>, vector<4x8x8xf32> -> vector<4x8x8xf32>
    "tpu.trace_stop"() : () -> ()
    %135 = vector.broadcast %23 : vector<4x1x8xf32> to vector<4x8x8xf32>
    %136 = arith.addf %134, %135 : vector<4x8x8xf32>
    "tpu.trace_start"() <{level = 10 : i32, message = "hsd,hde->hse"}> : () -> ()
    %cst_123 = arith.constant dense<0.000000e+00> : vector<4x8x8xf32>
    %137 = tpu.matmul %130, %25, %cst_123 {dimension_numbers = #tpu.dot_dimension_numbers<[2], [1], [1], [2], [0, 0, 0, 1, 1, 2], [0], [0]>} : vector<4x8x32xf32>, vector<4x32x8xf32>, vector<4x8x8xf32> -> vector<4x8x8xf32>
    "tpu.trace_stop"() : () -> ()
    %138 = vector.broadcast %27 : vector<4x1x8xf32> to vector<4x8x8xf32>
    %139 = arith.addf %137, %138 : vector<4x8x8xf32>
    %cst_124 = arith.constant 0.353553385 : f32
    %140 = vector.broadcast %cst_124 : f32 to vector<4x8x8xf32>
    %141 = arith.mulf %133, %140 : vector<4x8x8xf32>
    "tpu.trace_start"() <{level = 10 : i32, message = "hqe,hke->hqk"}> : () -> ()
    %cst_125 = arith.constant dense<0.000000e+00> : vector<4x8x8xf32>
    %142 = tpu.matmul %141, %136, %cst_125 {dimension_numbers = #tpu.dot_dimension_numbers<[2], [2], [1], [1], [0, 0, 0, 1, 1, 1], [0], [0]>} : vector<4x8x8xf32>, vector<4x8x8xf32>, vector<4x8x8xf32> -> vector<4x8x8xf32>
    "tpu.trace_stop"() : () -> ()
    %cst_126 = arith.constant dense<0xFF800000> : vector<4x8xf32>
    %143 = vector.multi_reduction <maximumf>, %142, %cst_126 [2] : vector<4x8x8xf32> to vector<4x8xf32>
    %144 = vector.shape_cast %143 : vector<4x8xf32> to vector<4x8x1xf32>
    %145 = vector.broadcast %144 : vector<4x8x1xf32> to vector<4x8x8xf32>
    %146 = arith.subf %142, %145 : vector<4x8x8xf32>
    %147 = math.exp %146 : vector<4x8x8xf32>
    %cst_127 = arith.constant dense<0.000000e+00> : vector<4x8xf32>
    %148 = vector.multi_reduction <add>, %147, %cst_127 [2] : vector<4x8x8xf32> to vector<4x8xf32>
    %149 = vector.shape_cast %148 : vector<4x8xf32> to vector<4x8x1xf32>
    %150 = tpu.reciprocal %149 {approx = true} : vector<4x8x1xf32> -> vector<4x8x1xf32>
    %151 = vector.broadcast %150 : vector<4x8x1xf32> to vector<4x8x8xf32>
    %152 = arith.mulf %147, %151 : vector<4x8x8xf32>
    "tpu.trace_start"() <{level = 10 : i32, message = "hqk,hke->hqe"}> : () -> ()
    %cst_128 = arith.constant dense<0.000000e+00> : vector<4x8x8xf32>
    %153 = tpu.matmul %152, %139, %cst_128 {dimension_numbers = #tpu.dot_dimension_numbers<[2], [1], [1], [2], [0, 0, 0, 1, 1, 2], [0], [0]>} : vector<4x8x8xf32>, vector<4x8x8xf32>, vector<4x8x8xf32> -> vector<4x8x8xf32>
    "tpu.trace_stop"() : () -> ()
    "tpu.trace_start"() <{level = 10 : i32, message = "hqe,hed->hqd"}> : () -> ()
    %cst_129 = arith.constant dense<0.000000e+00> : vector<4x8x32xf32>
    %154 = tpu.matmul %153, %29, %cst_129 {dimension_numbers = #tpu.dot_dimension_numbers<[2], [1], [1], [2], [0, 0, 0, 1, 1, 2], [0], [0]>} : vector<4x8x8xf32>, vector<4x8x32xf32>, vector<4x8x32xf32> -> vector<4x8x32xf32>
    "tpu.trace_stop"() : () -> ()
    %cst_130 = arith.constant dense<0.000000e+00> : vector<8x32xf32>
    %155 = vector.multi_reduction <add>, %154, %cst_130 [0] : vector<4x8x32xf32> to vector<8x32xf32>
    %156 = vector.broadcast %31 : vector<1x32xf32> to vector<8x32xf32>
    %157 = arith.addf %155, %156 : vector<8x32xf32>
    %158 = arith.addf %119, %157 : vector<8x32xf32>
    %cst_131 = arith.constant dense<0.000000e+00> : vector<8xf32>
    %159 = vector.multi_reduction <add>, %158, %cst_131 [1] : vector<8x32xf32> to vector<8xf32>
    %160 = vector.shape_cast %159 : vector<8xf32> to vector<8x1xf32>
    %cst_132 = arith.constant 3.200000e+01 : f32
    %161 = vector.broadcast %cst_132 : f32 to vector<8x1xf32>
    %162 = arith.divf %160, %161 : vector<8x1xf32>
    %163 = vector.broadcast %162 : vector<8x1xf32> to vector<8x32xf32>
    %164 = arith.subf %158, %163 : vector<8x32xf32>
    %165 = arith.mulf %164, %164 : vector<8x32xf32>
    %cst_133 = arith.constant dense<0.000000e+00> : vector<8xf32>
    %166 = vector.multi_reduction <add>, %165, %cst_133 [1] : vector<8x32xf32> to vector<8xf32>
    %167 = vector.shape_cast %166 : vector<8xf32> to vector<8x1xf32>
    %cst_134 = arith.constant 3.200000e+01 : f32
    %168 = vector.broadcast %cst_134 : f32 to vector<8x1xf32>
    %169 = arith.divf %167, %168 : vector<8x1xf32>
    %170 = vector.broadcast %162 : vector<8x1xf32> to vector<8x32xf32>
    %171 = arith.subf %158, %170 : vector<8x32xf32>
    %cst_135 = arith.constant 9.99999974E-6 : f32
    %172 = vector.broadcast %cst_135 : f32 to vector<8x1xf32>
    %173 = arith.addf %169, %172 : vector<8x1xf32>
    %174 = math.rsqrt %173 : vector<8x1xf32>
    %175 = vector.broadcast %174 : vector<8x1xf32> to vector<8x32xf32>
    %176 = arith.mulf %171, %175 : vector<8x32xf32>
    %177 = vector.broadcast %45 : vector<1x32xf32> to vector<8x32xf32>
    %178 = arith.mulf %176, %177 : vector<8x32xf32>
    %179 = vector.broadcast %47 : vector<1x32xf32> to vector<8x32xf32>
    %180 = arith.addf %178, %179 : vector<8x32xf32>
    %cst_136 = arith.constant dense<0.000000e+00> : vector<8x64xf32>
    %181 = tpu.matmul %180, %33, %cst_136 {dimension_numbers = #tpu.dot_dimension_numbers<[1], [0], [0], [1], [0, 0, 1, 1], [], []>} : vector<8x32xf32>, vector<32x64xf32>, vector<8x64xf32> -> vector<8x64xf32>
    %182 = vector.broadcast %35 : vector<1x64xf32> to vector<8x64xf32>
    %183 = arith.addf %181, %182 : vector<8x64xf32>
    %cst_137 = arith.constant 0.000000e+00 : f32
    %184 = vector.broadcast %cst_137 : f32 to vector<8x64xf32>
    %185 = arith.maximumf %183, %184 : vector<8x64xf32>
    %cst_138 = arith.constant dense<0.000000e+00> : vector<8x32xf32>
    %186 = tpu.matmul %185, %37, %cst_138 {dimension_numbers = #tpu.dot_dimension_numbers<[1], [0], [0], [1], [0, 0, 1, 1], [], []>} : vector<8x64xf32>, vector<64x32xf32>, vector<8x32xf32> -> vector<8x32xf32>
    %187 = vector.broadcast %39 : vector<1x32xf32> to vector<8x32xf32>
    %188 = arith.addf %186, %187 : vector<8x32xf32>
    %189 = arith.addf %180, %188 : vector<8x32xf32>
    %cst_139 = arith.constant dense<0.000000e+00> : vector<8xf32>
    %190 = vector.multi_reduction <add>, %189, %cst_139 [1] : vector<8x32xf32> to vector<8xf32>
    %191 = vector.shape_cast %190 : vector<8xf32> to vector<8x1xf32>
    %cst_140 = arith.constant 3.200000e+01 : f32
    %192 = vector.broadcast %cst_140 : f32 to vector<8x1xf32>
    %193 = arith.divf %191, %192 : vector<8x1xf32>
    %194 = vector.broadcast %193 : vector<8x1xf32> to vector<8x32xf32>
    %195 = arith.subf %189, %194 : vector<8x32xf32>
    %196 = arith.mulf %195, %195 : vector<8x32xf32>
    %cst_141 = arith.constant dense<0.000000e+00> : vector<8xf32>
    %197 = vector.multi_reduction <add>, %196, %cst_141 [1] : vector<8x32xf32> to vector<8xf32>
    %198 = vector.shape_cast %197 : vector<8xf32> to vector<8x1xf32>
    %cst_142 = arith.constant 3.200000e+01 : f32
    %199 = vector.broadcast %cst_142 : f32 to vector<8x1xf32>
    %200 = arith.divf %198, %199 : vector<8x1xf32>
    %201 = vector.broadcast %193 : vector<8x1xf32> to vector<8x32xf32>
    %202 = arith.subf %189, %201 : vector<8x32xf32>
    %cst_143 = arith.constant 9.99999974E-6 : f32
    %203 = vector.broadcast %cst_143 : f32 to vector<8x1xf32>
    %204 = arith.addf %200, %203 : vector<8x1xf32>
    %205 = math.rsqrt %204 : vector<8x1xf32>
    %206 = vector.broadcast %205 : vector<8x1xf32> to vector<8x32xf32>
    %207 = arith.mulf %202, %206 : vector<8x32xf32>
    %208 = vector.broadcast %49 : vector<1x32xf32> to vector<8x32xf32>
    %209 = arith.mulf %207, %208 : vector<8x32xf32>
    %210 = vector.broadcast %51 : vector<1x32xf32> to vector<8x32xf32>
    %211 = arith.addf %209, %210 : vector<8x32xf32>
    %c0_144 = arith.constant 0 : index
    %c0_145 = arith.constant 0 : index
    %c0_146 = arith.constant 0 : index
    %c0_147 = arith.constant 0 : index
    %212 = vector.load %arg31[%c0_144, %c0_145, %c0_146, %c0_147] : memref<1x2x8x32xf32, #tpu.memory_space<vmem>>, vector<1x1x8x32xf32>
    %213 = vector.shape_cast %212 : vector<1x1x8x32xf32> to vector<8x32xf32>
    %214 = vector.shape_cast %211 : vector<8x32xf32> to vector<1x1x8x32xf32>
    tpu.vector_store %arg31[%c0_144, %c0_145, %c0_146, %c0_147], %214 {strides = array<i32>} : memref<1x2x8x32xf32, #tpu.memory_space<vmem>>, vector<1x1x8x32xf32>,
    %c0_148 = arith.constant 0 : index
    %c1 = arith.constant 1 : index
    %c0_149 = arith.constant 0 : index
    %c0_150 = arith.constant 0 : index
    %215 = vector.load %arg1[%c0_148, %c1, %c0_149, %c0_150] : memref<1x2x8x32xf32, #tpu.memory_space<vmem>>, vector<1x1x8x32xf32>
    %216 = vector.shape_cast %215 : vector<1x1x8x32xf32> to vector<8x32xf32>
    %c0_151 = arith.constant 0 : index
    %c1_152 = arith.constant 1 : index
    %c0_153 = arith.constant 0 : index
    %c0_154 = arith.constant 0 : index
    %217 = vector.load %arg2[%c0_151, %c1_152, %c0_153, %c0_154] : memref<1x2x8x32xf32, #tpu.memory_space<vmem>>, vector<1x1x8x32xf32>
    %218 = vector.shape_cast %217 : vector<1x1x8x32xf32> to vector<8x32xf32>
    %c0_155 = arith.constant 0 : index
    %c1_156 = arith.constant 1 : index
    %c0_157 = arith.constant 0 : index
    %c0_158 = arith.constant 0 : index
    %219 = vector.load %arg3[%c0_155, %c1_156, %c0_157, %c0_158] : memref<1x2x8x32xf32, #tpu.memory_space<vmem>>, vector<1x1x8x32xf32>
    %220 = vector.shape_cast %219 : vector<1x1x8x32xf32> to vector<8x32xf32>
    %c0_159 = arith.constant 0 : index
    %c1_160 = arith.constant 1 : index
    %c0_161 = arith.constant 0 : index
    %c0_162 = arith.constant 0 : index
    %221 = vector.load %arg4[%c0_159, %c1_160, %c0_161, %c0_162] : memref<1x2x8x32xf32, #tpu.memory_space<vmem>>, vector<1x1x8x32xf32>
    %222 = vector.shape_cast %221 : vector<1x1x8x32xf32> to vector<8x32xf32>
    %223 = arith.addf %216, %220 : vector<8x32xf32>
    %224 = vector.shape_cast %223 : vector<8x32xf32> to vector<1x8x32xf32>
    %225 = vector.shape_cast %224 : vector<1x8x32xf32> to vector<1x8x32xf32>
    %226 = vector.broadcast %225 : vector<1x8x32xf32> to vector<4x8x32xf32>
    %227 = vector.shape_cast %223 : vector<8x32xf32> to vector<1x8x32xf32>
    %228 = vector.shape_cast %227 : vector<1x8x32xf32> to vector<1x8x32xf32>
    %229 = vector.broadcast %228 : vector<1x8x32xf32> to vector<4x8x32xf32>
    %230 = vector.shape_cast %216 : vector<8x32xf32> to vector<1x8x32xf32>
    %231 = vector.shape_cast %230 : vector<1x8x32xf32> to vector<1x8x32xf32>
    %232 = vector.broadcast %231 : vector<1x8x32xf32> to vector<4x8x32xf32>
    "tpu.trace_start"() <{level = 10 : i32, message = "hsd,hde->hse"}> : () -> ()
    %cst_163 = arith.constant dense<0.000000e+00> : vector<4x8x8xf32>
    %233 = tpu.matmul %226, %1, %cst_163 {dimension_numbers = #tpu.dot_dimension_numbers<[2], [1], [1], [2], [0, 0, 0, 1, 1, 2], [0], [0]>} : vector<4x8x32xf32>, vector<4x32x8xf32>, vector<4x8x8xf32> -> vector<4x8x8xf32>
    "tpu.trace_stop"() : () -> ()
    %234 = vector.broadcast %3 : vector<4x1x8xf32> to vector<4x8x8xf32>
    %235 = arith.addf %233, %234 : vector<4x8x8xf32>
    "tpu.trace_start"() <{level = 10 : i32, message = "hsd,hde->hse"}> : () -> ()
    %cst_164 = arith.constant dense<0.000000e+00> : vector<4x8x8xf32>
    %236 = tpu.matmul %229, %5, %cst_164 {dimension_numbers = #tpu.dot_dimension_numbers<[2], [1], [1], [2], [0, 0, 0, 1, 1, 2], [0], [0]>} : vector<4x8x32xf32>, vector<4x32x8xf32>, vector<4x8x8xf32> -> vector<4x8x8xf32>
    "tpu.trace_stop"() : () -> ()
    %237 = vector.broadcast %7 : vector<4x1x8xf32> to vector<4x8x8xf32>
    %238 = arith.addf %236, %237 : vector<4x8x8xf32>
    "tpu.trace_start"() <{level = 10 : i32, message = "hsd,hde->hse"}> : () -> ()
    %cst_165 = arith.constant dense<0.000000e+00> : vector<4x8x8xf32>
    %239 = tpu.matmul %232, %9, %cst_165 {dimension_numbers = #tpu.dot_dimension_numbers<[2], [1], [1], [2], [0, 0, 0, 1, 1, 2], [0], [0]>} : vector<4x8x32xf32>, vector<4x32x8xf32>, vector<4x8x8xf32> -> vector<4x8x8xf32>
    "tpu.trace_stop"() : () -> ()
    %240 = vector.broadcast %11 : vector<4x1x8xf32> to vector<4x8x8xf32>
    %241 = arith.addf %239, %240 : vector<4x8x8xf32>
    %cst_166 = arith.constant 0.353553385 : f32
    %242 = vector.broadcast %cst_166 : f32 to vector<4x8x8xf32>
    %243 = arith.mulf %235, %242 : vector<4x8x8xf32>
    "tpu.trace_start"() <{level = 10 : i32, message = "hqe,hke->hqk"}> : () -> ()
    %cst_167 = arith.constant dense<0.000000e+00> : vector<4x8x8xf32>
    %244 = tpu.matmul %243, %238, %cst_167 {dimension_numbers = #tpu.dot_dimension_numbers<[2], [2], [1], [1], [0, 0, 0, 1, 1, 1], [0], [0]>} : vector<4x8x8xf32>, vector<4x8x8xf32>, vector<4x8x8xf32> -> vector<4x8x8xf32>
    "tpu.trace_stop"() : () -> ()
    %cst_168 = arith.constant dense<0xFF800000> : vector<4x8xf32>
    %245 = vector.multi_reduction <maximumf>, %244, %cst_168 [2] : vector<4x8x8xf32> to vector<4x8xf32>
    %246 = vector.shape_cast %245 : vector<4x8xf32> to vector<4x8x1xf32>
    %247 = vector.broadcast %246 : vector<4x8x1xf32> to vector<4x8x8xf32>
    %248 = arith.subf %244, %247 : vector<4x8x8xf32>
    %249 = math.exp %248 : vector<4x8x8xf32>
    %cst_169 = arith.constant dense<0.000000e+00> : vector<4x8xf32>
    %250 = vector.multi_reduction <add>, %249, %cst_169 [2] : vector<4x8x8xf32> to vector<4x8xf32>
    %251 = vector.shape_cast %250 : vector<4x8xf32> to vector<4x8x1xf32>
    %252 = tpu.reciprocal %251 {approx = true} : vector<4x8x1xf32> -> vector<4x8x1xf32>
    %253 = vector.broadcast %252 : vector<4x8x1xf32> to vector<4x8x8xf32>
    %254 = arith.mulf %249, %253 : vector<4x8x8xf32>
    "tpu.trace_start"() <{level = 10 : i32, message = "hqk,hke->hqe"}> : () -> ()
    %cst_170 = arith.constant dense<0.000000e+00> : vector<4x8x8xf32>
    %255 = tpu.matmul %254, %241, %cst_170 {dimension_numbers = #tpu.dot_dimension_numbers<[2], [1], [1], [2], [0, 0, 0, 1, 1, 2], [0], [0]>} : vector<4x8x8xf32>, vector<4x8x8xf32>, vector<4x8x8xf32> -> vector<4x8x8xf32>
    "tpu.trace_stop"() : () -> ()
    "tpu.trace_start"() <{level = 10 : i32, message = "hqe,hed->hqd"}> : () -> ()
    %cst_171 = arith.constant dense<0.000000e+00> : vector<4x8x32xf32>
    %256 = tpu.matmul %255, %13, %cst_171 {dimension_numbers = #tpu.dot_dimension_numbers<[2], [1], [1], [2], [0, 0, 0, 1, 1, 2], [0], [0]>} : vector<4x8x8xf32>, vector<4x8x32xf32>, vector<4x8x32xf32> -> vector<4x8x32xf32>
    "tpu.trace_stop"() : () -> ()
    %cst_172 = arith.constant dense<0.000000e+00> : vector<8x32xf32>
    %257 = vector.multi_reduction <add>, %256, %cst_172 [0] : vector<4x8x32xf32> to vector<8x32xf32>
    %258 = vector.broadcast %15 : vector<1x32xf32> to vector<8x32xf32>
    %259 = arith.addf %257, %258 : vector<8x32xf32>
    %260 = arith.addf %216, %259 : vector<8x32xf32>
    %cst_173 = arith.constant dense<0.000000e+00> : vector<8xf32>
    %261 = vector.multi_reduction <add>, %260, %cst_173 [1] : vector<8x32xf32> to vector<8xf32>
    %262 = vector.shape_cast %261 : vector<8xf32> to vector<8x1xf32>
    %cst_174 = arith.constant 3.200000e+01 : f32
    %263 = vector.broadcast %cst_174 : f32 to vector<8x1xf32>
    %264 = arith.divf %262, %263 : vector<8x1xf32>
    %265 = vector.broadcast %264 : vector<8x1xf32> to vector<8x32xf32>
    %266 = arith.subf %260, %265 : vector<8x32xf32>
    %267 = arith.mulf %266, %266 : vector<8x32xf32>
    %cst_175 = arith.constant dense<0.000000e+00> : vector<8xf32>
    %268 = vector.multi_reduction <add>, %267, %cst_175 [1] : vector<8x32xf32> to vector<8xf32>
    %269 = vector.shape_cast %268 : vector<8xf32> to vector<8x1xf32>
    %cst_176 = arith.constant 3.200000e+01 : f32
    %270 = vector.broadcast %cst_176 : f32 to vector<8x1xf32>
    %271 = arith.divf %269, %270 : vector<8x1xf32>
    %272 = vector.broadcast %264 : vector<8x1xf32> to vector<8x32xf32>
    %273 = arith.subf %260, %272 : vector<8x32xf32>
    %cst_177 = arith.constant 9.99999974E-6 : f32
    %274 = vector.broadcast %cst_177 : f32 to vector<8x1xf32>
    %275 = arith.addf %271, %274 : vector<8x1xf32>
    %276 = math.rsqrt %275 : vector<8x1xf32>
    %277 = vector.broadcast %276 : vector<8x1xf32> to vector<8x32xf32>
    %278 = arith.mulf %273, %277 : vector<8x32xf32>
    %279 = vector.broadcast %41 : vector<1x32xf32> to vector<8x32xf32>
    %280 = arith.mulf %278, %279 : vector<8x32xf32>
    %281 = vector.broadcast %43 : vector<1x32xf32> to vector<8x32xf32>
    %282 = arith.addf %280, %281 : vector<8x32xf32>
    %283 = arith.addf %282, %220 : vector<8x32xf32>
    %284 = arith.addf %218, %222 : vector<8x32xf32>
    %285 = vector.shape_cast %283 : vector<8x32xf32> to vector<1x8x32xf32>
    %286 = vector.shape_cast %285 : vector<1x8x32xf32> to vector<1x8x32xf32>
    %287 = vector.broadcast %286 : vector<1x8x32xf32> to vector<4x8x32xf32>
    %288 = vector.shape_cast %284 : vector<8x32xf32> to vector<1x8x32xf32>
    %289 = vector.shape_cast %288 : vector<1x8x32xf32> to vector<1x8x32xf32>
    %290 = vector.broadcast %289 : vector<1x8x32xf32> to vector<4x8x32xf32>
    %291 = vector.shape_cast %218 : vector<8x32xf32> to vector<1x8x32xf32>
    %292 = vector.shape_cast %291 : vector<1x8x32xf32> to vector<1x8x32xf32>
    %293 = vector.broadcast %292 : vector<1x8x32xf32> to vector<4x8x32xf32>
    "tpu.trace_start"() <{level = 10 : i32, message = "hsd,hde->hse"}> : () -> ()
    %cst_178 = arith.constant dense<0.000000e+00> : vector<4x8x8xf32>
    %294 = tpu.matmul %287, %17, %cst_178 {dimension_numbers = #tpu.dot_dimension_numbers<[2], [1], [1], [2], [0, 0, 0, 1, 1, 2], [0], [0]>} : vector<4x8x32xf32>, vector<4x32x8xf32>, vector<4x8x8xf32> -> vector<4x8x8xf32>
    "tpu.trace_stop"() : () -> ()
    %295 = vector.broadcast %19 : vector<4x1x8xf32> to vector<4x8x8xf32>
    %296 = arith.addf %294, %295 : vector<4x8x8xf32>
    "tpu.trace_start"() <{level = 10 : i32, message = "hsd,hde->hse"}> : () -> ()
    %cst_179 = arith.constant dense<0.000000e+00> : vector<4x8x8xf32>
    %297 = tpu.matmul %290, %21, %cst_179 {dimension_numbers = #tpu.dot_dimension_numbers<[2], [1], [1], [2], [0, 0, 0, 1, 1, 2], [0], [0]>} : vector<4x8x32xf32>, vector<4x32x8xf32>, vector<4x8x8xf32> -> vector<4x8x8xf32>
    "tpu.trace_stop"() : () -> ()
    %298 = vector.broadcast %23 : vector<4x1x8xf32> to vector<4x8x8xf32>
    %299 = arith.addf %297, %298 : vector<4x8x8xf32>
    "tpu.trace_start"() <{level = 10 : i32, message = "hsd,hde->hse"}> : () -> ()
    %cst_180 = arith.constant dense<0.000000e+00> : vector<4x8x8xf32>
    %300 = tpu.matmul %293, %25, %cst_180 {dimension_numbers = #tpu.dot_dimension_numbers<[2], [1], [1], [2], [0, 0, 0, 1, 1, 2], [0], [0]>} : vector<4x8x32xf32>, vector<4x32x8xf32>, vector<4x8x8xf32> -> vector<4x8x8xf32>
    "tpu.trace_stop"() : () -> ()
    %301 = vector.broadcast %27 : vector<4x1x8xf32> to vector<4x8x8xf32>
    %302 = arith.addf %300, %301 : vector<4x8x8xf32>
    %cst_181 = arith.constant 0.353553385 : f32
    %303 = vector.broadcast %cst_181 : f32 to vector<4x8x8xf32>
    %304 = arith.mulf %296, %303 : vector<4x8x8xf32>
    "tpu.trace_start"() <{level = 10 : i32, message = "hqe,hke->hqk"}> : () -> ()
    %cst_182 = arith.constant dense<0.000000e+00> : vector<4x8x8xf32>
    %305 = tpu.matmul %304, %299, %cst_182 {dimension_numbers = #tpu.dot_dimension_numbers<[2], [2], [1], [1], [0, 0, 0, 1, 1, 1], [0], [0]>} : vector<4x8x8xf32>, vector<4x8x8xf32>, vector<4x8x8xf32> -> vector<4x8x8xf32>
    "tpu.trace_stop"() : () -> ()
    %cst_183 = arith.constant dense<0xFF800000> : vector<4x8xf32>
    %306 = vector.multi_reduction <maximumf>, %305, %cst_183 [2] : vector<4x8x8xf32> to vector<4x8xf32>
    %307 = vector.shape_cast %306 : vector<4x8xf32> to vector<4x8x1xf32>
    %308 = vector.broadcast %307 : vector<4x8x1xf32> to vector<4x8x8xf32>
    %309 = arith.subf %305, %308 : vector<4x8x8xf32>
    %310 = math.exp %309 : vector<4x8x8xf32>
    %cst_184 = arith.constant dense<0.000000e+00> : vector<4x8xf32>
    %311 = vector.multi_reduction <add>, %310, %cst_184 [2] : vector<4x8x8xf32> to vector<4x8xf32>
    %312 = vector.shape_cast %311 : vector<4x8xf32> to vector<4x8x1xf32>
    %313 = tpu.reciprocal %312 {approx = true} : vector<4x8x1xf32> -> vector<4x8x1xf32>
    %314 = vector.broadcast %313 : vector<4x8x1xf32> to vector<4x8x8xf32>
    %315 = arith.mulf %310, %314 : vector<4x8x8xf32>
    "tpu.trace_start"() <{level = 10 : i32, message = "hqk,hke->hqe"}> : () -> ()
    %cst_185 = arith.constant dense<0.000000e+00> : vector<4x8x8xf32>
    %316 = tpu.matmul %315, %302, %cst_185 {dimension_numbers = #tpu.dot_dimension_numbers<[2], [1], [1], [2], [0, 0, 0, 1, 1, 2], [0], [0]>} : vector<4x8x8xf32>, vector<4x8x8xf32>, vector<4x8x8xf32> -> vector<4x8x8xf32>
    "tpu.trace_stop"() : () -> ()
    "tpu.trace_start"() <{level = 10 : i32, message = "hqe,hed->hqd"}> : () -> ()
    %cst_186 = arith.constant dense<0.000000e+00> : vector<4x8x32xf32>
    %317 = tpu.matmul %316, %29, %cst_186 {dimension_numbers = #tpu.dot_dimension_numbers<[2], [1], [1], [2], [0, 0, 0, 1, 1, 2], [0], [0]>} : vector<4x8x8xf32>, vector<4x8x32xf32>, vector<4x8x32xf32> -> vector<4x8x32xf32>
    "tpu.trace_stop"() : () -> ()
    %cst_187 = arith.constant dense<0.000000e+00> : vector<8x32xf32>
    %318 = vector.multi_reduction <add>, %317, %cst_187 [0] : vector<4x8x32xf32> to vector<8x32xf32>
    %319 = vector.broadcast %31 : vector<1x32xf32> to vector<8x32xf32>
    %320 = arith.addf %318, %319 : vector<8x32xf32>
    %321 = arith.addf %282, %320 : vector<8x32xf32>
    %cst_188 = arith.constant dense<0.000000e+00> : vector<8xf32>
    %322 = vector.multi_reduction <add>, %321, %cst_188 [1] : vector<8x32xf32> to vector<8xf32>
    %323 = vector.shape_cast %322 : vector<8xf32> to vector<8x1xf32>
    %cst_189 = arith.constant 3.200000e+01 : f32
    %324 = vector.broadcast %cst_189 : f32 to vector<8x1xf32>
    %325 = arith.divf %323, %324 : vector<8x1xf32>
    %326 = vector.broadcast %325 : vector<8x1xf32> to vector<8x32xf32>
    %327 = arith.subf %321, %326 : vector<8x32xf32>
    %328 = arith.mulf %327, %327 : vector<8x32xf32>
    %cst_190 = arith.constant dense<0.000000e+00> : vector<8xf32>
    %329 = vector.multi_reduction <add>, %328, %cst_190 [1] : vector<8x32xf32> to vector<8xf32>
    %330 = vector.shape_cast %329 : vector<8xf32> to vector<8x1xf32>
    %cst_191 = arith.constant 3.200000e+01 : f32
    %331 = vector.broadcast %cst_191 : f32 to vector<8x1xf32>
    %332 = arith.divf %330, %331 : vector<8x1xf32>
    %333 = vector.broadcast %325 : vector<8x1xf32> to vector<8x32xf32>
    %334 = arith.subf %321, %333 : vector<8x32xf32>
    %cst_192 = arith.constant 9.99999974E-6 : f32
    %335 = vector.broadcast %cst_192 : f32 to vector<8x1xf32>
    %336 = arith.addf %332, %335 : vector<8x1xf32>
    %337 = math.rsqrt %336 : vector<8x1xf32>
    %338 = vector.broadcast %337 : vector<8x1xf32> to vector<8x32xf32>
    %339 = arith.mulf %334, %338 : vector<8x32xf32>
    %340 = vector.broadcast %45 : vector<1x32xf32> to vector<8x32xf32>
    %341 = arith.mulf %339, %340 : vector<8x32xf32>
    %342 = vector.broadcast %47 : vector<1x32xf32> to vector<8x32xf32>
    %343 = arith.addf %341, %342 : vector<8x32xf32>
    %cst_193 = arith.constant dense<0.000000e+00> : vector<8x64xf32>
    %344 = tpu.matmul %343, %33, %cst_193 {dimension_numbers = #tpu.dot_dimension_numbers<[1], [0], [0], [1], [0, 0, 1, 1], [], []>} : vector<8x32xf32>, vector<32x64xf32>, vector<8x64xf32> -> vector<8x64xf32>
    %345 = vector.broadcast %35 : vector<1x64xf32> to vector<8x64xf32>
    %346 = arith.addf %344, %345 : vector<8x64xf32>
    %cst_194 = arith.constant 0.000000e+00 : f32
    %347 = vector.broadcast %cst_194 : f32 to vector<8x64xf32>
    %348 = arith.maximumf %346, %347 : vector<8x64xf32>
    %cst_195 = arith.constant dense<0.000000e+00> : vector<8x32xf32>
    %349 = tpu.matmul %348, %37, %cst_195 {dimension_numbers = #tpu.dot_dimension_numbers<[1], [0], [0], [1], [0, 0, 1, 1], [], []>} : vector<8x64xf32>, vector<64x32xf32>, vector<8x32xf32> -> vector<8x32xf32>
    %350 = vector.broadcast %39 : vector<1x32xf32> to vector<8x32xf32>
    %351 = arith.addf %349, %350 : vector<8x32xf32>
    %352 = arith.addf %343, %351 : vector<8x32xf32>
    %cst_196 = arith.constant dense<0.000000e+00> : vector<8xf32>
    %353 = vector.multi_reduction <add>, %352, %cst_196 [1] : vector<8x32xf32> to vector<8xf32>
    %354 = vector.shape_cast %353 : vector<8xf32> to vector<8x1xf32>
    %cst_197 = arith.constant 3.200000e+01 : f32
    %355 = vector.broadcast %cst_197 : f32 to vector<8x1xf32>
    %356 = arith.divf %354, %355 : vector<8x1xf32>
    %357 = vector.broadcast %356 : vector<8x1xf32> to vector<8x32xf32>
    %358 = arith.subf %352, %357 : vector<8x32xf32>
    %359 = arith.mulf %358, %358 : vector<8x32xf32>
    %cst_198 = arith.constant dense<0.000000e+00> : vector<8xf32>
    %360 = vector.multi_reduction <add>, %359, %cst_198 [1] : vector<8x32xf32> to vector<8xf32>
    %361 = vector.shape_cast %360 : vector<8xf32> to vector<8x1xf32>
    %cst_199 = arith.constant 3.200000e+01 : f32
    %362 = vector.broadcast %cst_199 : f32 to vector<8x1xf32>
    %363 = arith.divf %361, %362 : vector<8x1xf32>
    %364 = vector.broadcast %356 : vector<8x1xf32> to vector<8x32xf32>
    %365 = arith.subf %352, %364 : vector<8x32xf32>
    %cst_200 = arith.constant 9.99999974E-6 : f32
    %366 = vector.broadcast %cst_200 : f32 to vector<8x1xf32>
    %367 = arith.addf %363, %366 : vector<8x1xf32>
    %368 = math.rsqrt %367 : vector<8x1xf32>
    %369 = vector.broadcast %368 : vector<8x1xf32> to vector<8x32xf32>
    %370 = arith.mulf %365, %369 : vector<8x32xf32>
    %371 = vector.broadcast %49 : vector<1x32xf32> to vector<8x32xf32>
    %372 = arith.mulf %370, %371 : vector<8x32xf32>
    %373 = vector.broadcast %51 : vector<1x32xf32> to vector<8x32xf32>
    %374 = arith.addf %372, %373 : vector<8x32xf32>
    %c0_201 = arith.constant 0 : index
    %c1_202 = arith.constant 1 : index
    %c0_203 = arith.constant 0 : index
    %c0_204 = arith.constant 0 : index
    %375 = vector.load %arg31[%c0_201, %c1_202, %c0_203, %c0_204] : memref<1x2x8x32xf32, #tpu.memory_space<vmem>>, vector<1x1x8x32xf32>
    %376 = vector.shape_cast %375 : vector<1x1x8x32xf32> to vector<8x32xf32>
    %377 = vector.shape_cast %374 : vector<8x32xf32> to vector<1x1x8x32xf32>
    tpu.vector_store %arg31[%c0_201, %c1_202, %c0_203, %c0_204], %377 {strides = array<i32>} : memref<1x2x8x32xf32, #tpu.memory_space<vmem>>, vector<1x1x8x32xf32>,
    return
  }
  func.func @transform_0(%arg0: i32) -> (i32, i32, i32, i32) {
    %c0_i32 = arith.constant 0 : i32
    %c0_i32_0 = arith.constant 0 : i32
    %c0_i32_1 = arith.constant 0 : i32
    %c0_i32_2 = arith.constant 0 : i32
    return %arg0, %c0_i32, %c0_i32_0, %c0_i32_1 : i32, i32, i32, i32
  }
  func.func @transform_1(%arg0: i32) -> (i32, i32, i32, i32) {
    %c1_i32 = arith.constant 1 : i32
    %0 = arith.subi %c1_i32, %arg0 : i32
    %c0_i32 = arith.constant 0 : i32
    %c0_i32_0 = arith.constant 0 : i32
    %c0_i32_1 = arith.constant 0 : i32
    %c0_i32_2 = arith.constant 0 : i32
    return %0, %c0_i32, %c0_i32_0, %c0_i32_1 : i32, i32, i32, i32
  }
  func.func @transform_2(%arg0: i32) -> (i32, i32, i32, i32) {
    %c0_i32 = arith.constant 0 : i32
    %c0_i32_0 = arith.constant 0 : i32
    %c0_i32_1 = arith.constant 0 : i32
    %c0_i32_2 = arith.constant 0 : i32
    return %arg0, %c0_i32, %c0_i32_0, %c0_i32_1 : i32, i32, i32, i32
  }
  func.func @transform_3(%arg0: i32) -> (i32, i32, i32, i32) {
    %c1_i32 = arith.constant 1 : i32
    %0 = arith.subi %c1_i32, %arg0 : i32
    %c0_i32 = arith.constant 0 : i32
    %c0_i32_0 = arith.constant 0 : i32
    %c0_i32_1 = arith.constant 0 : i32
    %c0_i32_2 = arith.constant 0 : i32
    return %0, %c0_i32, %c0_i32_0, %c0_i32_1 : i32, i32, i32, i32
  }
  func.func @transform_4(%arg0: i32) -> (i32, i32, i32, i32) {
    %c0_i32 = arith.constant 0 : i32
    %c0_i32_0 = arith.constant 0 : i32
    %c0_i32_1 = arith.constant 0 : i32
    %c0_i32_2 = arith.constant 0 : i32
    return %arg0, %c0_i32, %c0_i32_0, %c0_i32_1 : i32, i32, i32, i32
  }
  func.func @transform_5(%arg0: i32) -> (i32, i32, i32, i32) {
    %c0_i32 = arith.constant 0 : i32
    %c0_i32_0 = arith.constant 0 : i32
    %c0_i32_1 = arith.constant 0 : i32
    %c0_i32_2 = arith.constant 0 : i32
    return %arg0, %c0_i32, %c0_i32_0, %c0_i32_1 : i32, i32, i32, i32
  }
  func.func @transform_6(%arg0: i32) -> (i32, i32, i32, i32) {
    %c0_i32 = arith.constant 0 : i32
    %c0_i32_0 = arith.constant 0 : i32
    %c0_i32_1 = arith.constant 0 : i32
    %c0_i32_2 = arith.constant 0 : i32
    return %arg0, %c0_i32, %c0_i32_0, %c0_i32_1 : i32, i32, i32, i32
  }
  func.func @transform_7(%arg0: i32) -> (i32, i32, i32, i32) {
    %c0_i32 = arith.constant 0 : i32
    %c0_i32_0 = arith.constant 0 : i32
    %c0_i32_1 = arith.constant 0 : i32
    %c0_i32_2 = arith.constant 0 : i32
    return %arg0, %c0_i32, %c0_i32_0, %c0_i32_1 : i32, i32, i32, i32
  }
  func.func @transform_8(%arg0: i32) -> (i32, i32, i32, i32) {
    %c0_i32 = arith.constant 0 : i32
    %c0_i32_0 = arith.constant 0 : i32
    %c0_i32_1 = arith.constant 0 : i32
    %c0_i32_2 = arith.constant 0 : i32
    return %arg0, %c0_i32, %c0_i32_0, %c0_i32_1 : i32, i32, i32, i32
  }
  func.func @transform_9(%arg0: i32) -> (i32, i32, i32, i32) {
    %c0_i32 = arith.constant 0 : i32
    %c0_i32_0 = arith.constant 0 : i32
    %c0_i32_1 = arith.constant 0 : i32
    %c0_i32_2 = arith.constant 0 : i32
    return %arg0, %c0_i32, %c0_i32_0, %c0_i32_1 : i32, i32, i32, i32
  }
  func.func @transform_10(%arg0: i32) -> (i32, i32, i32, i32) {
    %c0_i32 = arith.constant 0 : i32
    %c0_i32_0 = arith.constant 0 : i32
    %c0_i32_1 = arith.constant 0 : i32
    %c0_i32_2 = arith.constant 0 : i32
    return %arg0, %c0_i32, %c0_i32_0, %c0_i32_1 : i32, i32, i32, i32
  }
  func.func @transform_11(%arg0: i32) -> (i32, i32, i32) {
    %c0_i32 = arith.constant 0 : i32
    %c0_i32_0 = arith.constant 0 : i32
    %c0_i32_1 = arith.constant 0 : i32
    return %arg0, %c0_i32, %c0_i32_0 : i32, i32, i32
  }
  func.func @transform_12(%arg0: i32) -> (i32, i32, i32, i32) {
    %c0_i32 = arith.constant 0 : i32
    %c0_i32_0 = arith.constant 0 : i32
    %c0_i32_1 = arith.constant 0 : i32
    %c0_i32_2 = arith.constant 0 : i32
    return %arg0, %c0_i32, %c0_i32_0, %c0_i32_1 : i32, i32, i32, i32
  }
  func.func @transform_13(%arg0: i32) -> (i32, i32, i32, i32) {
    %c0_i32 = arith.constant 0 : i32
    %c0_i32_0 = arith.constant 0 : i32
    %c0_i32_1 = arith.constant 0 : i32
    %c0_i32_2 = arith.constant 0 : i32
    return %arg0, %c0_i32, %c0_i32_0, %c0_i32_1 : i32, i32, i32, i32
  }
  func.func @transform_14(%arg0: i32) -> (i32, i32, i32, i32) {
    %c0_i32 = arith.constant 0 : i32
    %c0_i32_0 = arith.constant 0 : i32
    %c0_i32_1 = arith.constant 0 : i32
    %c0_i32_2 = arith.constant 0 : i32
    return %arg0, %c0_i32, %c0_i32_0, %c0_i32_1 : i32, i32, i32, i32
  }
  func.func @transform_15(%arg0: i32) -> (i32, i32, i32, i32) {
    %c0_i32 = arith.constant 0 : i32
    %c0_i32_0 = arith.constant 0 : i32
    %c0_i32_1 = arith.constant 0 : i32
    %c0_i32_2 = arith.constant 0 : i32
    return %arg0, %c0_i32, %c0_i32_0, %c0_i32_1 : i32, i32, i32, i32
  }
  func.func @transform_16(%arg0: i32) -> (i32, i32, i32, i32) {
    %c0_i32 = arith.constant 0 : i32
    %c0_i32_0 = arith.constant 0 : i32
    %c0_i32_1 = arith.constant 0 : i32
    %c0_i32_2 = arith.constant 0 : i32
    return %arg0, %c0_i32, %c0_i32_0, %c0_i32_1 : i32, i32, i32, i32
  }
  func.func @transform_17(%arg0: i32) -> (i32, i32, i32, i32) {
    %c0_i32 = arith.constant 0 : i32
    %c0_i32_0 = arith.constant 0 : i32
    %c0_i32_1 = arith.constant 0 : i32
    %c0_i32_2 = arith.constant 0 : i32
    return %arg0, %c0_i32, %c0_i32_0, %c0_i32_1 : i32, i32, i32, i32
  }
  func.func @transform_18(%arg0: i32) -> (i32, i32, i32, i32) {
    %c0_i32 = arith.constant 0 : i32
    %c0_i32_0 = arith.constant 0 : i32
    %c0_i32_1 = arith.constant 0 : i32
    %c0_i32_2 = arith.constant 0 : i32
    return %arg0, %c0_i32, %c0_i32_0, %c0_i32_1 : i32, i32, i32, i32
  }
  func.func @transform_19(%arg0: i32) -> (i32, i32, i32) {
    %c0_i32 = arith.constant 0 : i32
    %c0_i32_0 = arith.constant 0 : i32
    %c0_i32_1 = arith.constant 0 : i32
    return %arg0, %c0_i32, %c0_i32_0 : i32, i32, i32
  }
  func.func @transform_20(%arg0: i32) -> (i32, i32, i32) {
    %c0_i32 = arith.constant 0 : i32
    %c0_i32_0 = arith.constant 0 : i32
    %c0_i32_1 = arith.constant 0 : i32
    return %arg0, %c0_i32, %c0_i32_0 : i32, i32, i32
  }
  func.func @transform_21(%arg0: i32) -> (i32, i32, i32) {
    %c0_i32 = arith.constant 0 : i32
    %c0_i32_0 = arith.constant 0 : i32
    %c0_i32_1 = arith.constant 0 : i32
    return %arg0, %c0_i32, %c0_i32_0 : i32, i32, i32
  }
  func.func @transform_22(%arg0: i32) -> (i32, i32, i32) {
    %c0_i32 = arith.constant 0 : i32
    %c0_i32_0 = arith.constant 0 : i32
    %c0_i32_1 = arith.constant 0 : i32
    return %arg0, %c0_i32, %c0_i32_0 : i32, i32, i32
  }
  func.func @transform_23(%arg0: i32) -> (i32, i32, i32) {
    %c0_i32 = arith.constant 0 : i32
    %c0_i32_0 = arith.constant 0 : i32
    %c0_i32_1 = arith.constant 0 : i32
    return %arg0, %c0_i32, %c0_i32_0 : i32, i32, i32
  }
  func.func @transform_24(%arg0: i32) -> (i32, i32, i32) {
    %c0_i32 = arith.constant 0 : i32
    %c0_i32_0 = arith.constant 0 : i32
    %c0_i32_1 = arith.constant 0 : i32
    return %arg0, %c0_i32, %c0_i32_0 : i32, i32, i32
  }
  func.func @transform_25(%arg0: i32) -> (i32, i32, i32) {
    %c0_i32 = arith.constant 0 : i32
    %c0_i32_0 = arith.constant 0 : i32
    %c0_i32_1 = arith.constant 0 : i32
    return %arg0, %c0_i32, %c0_i32_0 : i32, i32, i32
  }
  func.func @transform_26(%arg0: i32) -> (i32, i32, i32) {
    %c0_i32 = arith.constant 0 : i32
    %c0_i32_0 = arith.constant 0 : i32
    %c0_i32_1 = arith.constant 0 : i32
    return %arg0, %c0_i32, %c0_i32_0 : i32, i32, i32
  }
  func.func @transform_27(%arg0: i32) -> (i32, i32, i32) {
    %c0_i32 = arith.constant 0 : i32
    %c0_i32_0 = arith.constant 0 : i32
    %c0_i32_1 = arith.constant 0 : i32
    return %arg0, %c0_i32, %c0_i32_0 : i32, i32, i32
  }
  func.func @transform_28(%arg0: i32) -> (i32, i32, i32) {
    %c0_i32 = arith.constant 0 : i32
    %c0_i32_0 = arith.constant 0 : i32
    %c0_i32_1 = arith.constant 0 : i32
    return %arg0, %c0_i32, %c0_i32_0 : i32, i32, i32
  }
  func.func @transform_29(%arg0: i32) -> (i32, i32, i32) {
    %c0_i32 = arith.constant 0 : i32
    %c0_i32_0 = arith.constant 0 : i32
    %c0_i32_1 = arith.constant 0 : i32
    return %arg0, %c0_i32, %c0_i32_0 : i32, i32, i32
  }
  func.func @transform_30(%arg0: i32) -> (i32, i32, i32, i32) {
    %c0_i32 = arith.constant 0 : i32
    %c0_i32_0 = arith.constant 0 : i32
    %c0_i32_1 = arith.constant 0 : i32
    %c0_i32_2 = arith.constant 0 : i32
    return %arg0, %c0_i32, %c0_i32_0, %c0_i32_1 : i32, i32, i32, i32
  }
}

</mosaic_0001>

<bundles_post_ra>
// kernel: _lambda_.3
= control target key start
LH: loop header
LB: loop body
LE: loop exit
PB: predicated region body
PF: predicated region fallthrough
CT: control target
= control target key end

     0   :  { %s5164_s6 = smov 1   ;;  %s5165_s10 = smov 2   ;;  %s6253_s0 = inlined_call_operand.smem [shape: u32[31], index: -1, kind: input, shape index: {}] }
   0x1   :  { %s5203_s5 = sld [smem:[%s6253_s0]]   ;;  %s5166_s14 = smov 3  }
   0x2   :  { %s5208_s9 = sld [smem:[%s6253_s0 + %s5164_s6]]   ;;  %s5167_s18 = smov 4  }
   0x3   :  { %s5213_s13 = sld [smem:[%s6253_s0 + %s5165_s10]]   ;;  %s5168_s22 = smov 5  }
   0x4   :  { %s5218_s17 = sld [smem:[%s6253_s0 + %s5166_s14]]   ;;  %s5169_s26 = smov 6  }
   0x5   :  { %s5223_s21 = sld [smem:[%s6253_s0 + %s5167_s18]]   ;;  %s5170_s30 = smov 7  }
   0x6   :  { %s5228_s25 = sld [smem:[%s6253_s0 + %s5168_s22]]   ;;  %s5171_s4 = smov 8  }
   0x7   :  { %6278 = sst [smem:[#allocation2_spill]] %s5203_s5  ;;  %s5172_s10 = smov 9  }
   0x8   :  { %6279 = sst [smem:[#allocation3_spill]] %s5208_s9  ;;  %s5173_s15 = smov 10  }
   0x9   :  { %6280 = sst [smem:[#allocation4_spill]] %s5213_s13  ;;  %s5174_s20 = smov 11  }
   0xa   :  { %6281 = sst [smem:[#allocation5_spill]] %s5218_s17  ;;  %s5176_s1 = smov 13  }
   0xb   :  { %6282 = sst [smem:[#allocation6_spill]] %s5223_s21  ;;  %s5177_s7 = smov 14  }
   0xc   :  { %6283 = sst [smem:[#allocation7_spill]] %s5228_s25  ;;  %s5179_s22 = smov 16  }
   0xd   :  { %s5233_s29 = sld [smem:[%s6253_s0 + %s5169_s26]]   ;;  %s5175_s26 = smov 12  }
   0xe   :  { %s5238_s3 = sld [smem:[%s6253_s0 + %s5170_s30]]   ;;  %s5180_s28 = smov 17  }
   0xf   :  { %s5243_s8 = sld [smem:[%s6253_s0 + %s5171_s4]]  }
  0x10   :  { %s5248_s14 = sld [smem:[%s6253_s0 + %s5172_s10]]  }
  0x11   :  { %s5253_s19 = sld [smem:[%s6253_s0 + %s5173_s15]]   ;;  %s5178_s15 = smov 15  }
  0x12   :  { %s5258_s24 = sld [smem:[%s6253_s0 + %s5174_s20]]  }
  0x13   :  { %6284 = sst [smem:[#allocation8_spill]] %s5233_s29 }
  0x14   :  { %6285 = sst [smem:[#allocation9_spill]] %s5238_s3 }
  0x15   :  { %6286 = sst [smem:[#allocation10_spill]] %s5243_s8 }
  0x16   :  { %6287 = sst [smem:[#allocation11_spill]] %s5248_s14 }
  0x17   :  { %6288 = sst [smem:[#allocation12_spill]] %s5253_s19 }
  0x18   :  { %6289 = sst [smem:[#allocation13_spill]] %s5258_s24 }
  0x19   :  { %s5263_s30 = sld [smem:[%s6253_s0 + %s5175_s26]]  }
  0x1a   :  { %s5268_s6 = sld [smem:[%s6253_s0 + %s5176_s1]]  }
  0x1b   :  { %s5273_s12 = sld [smem:[%s6253_s0 + %s5177_s7]]   ;;  %s5181_s7 = smov 18  }
  0x1c   :  { %s5278_s20 = sld [smem:[%s6253_s0 + %s5178_s15]]   ;;  %s5182_s15 = smov 19  }
  0x1d   :  { %s5283_s27 = sld [smem:[%s6253_s0 + %s5179_s22]]   ;;  %s5183_s22 = smov 20  }
  0x1e   :  { %s5288_s4 = sld [smem:[%s6253_s0 + %s5180_s28]]   ;;  %s5184_s28 = smov 21  }
  0x1f   :  { %6290 = sst [smem:[#allocation14_spill]] %s5263_s30 }
  0x20   :  { %6291 = sst [smem:[#allocation15_spill]] %s5268_s6 }
  0x21   :  { %6292 = sst [smem:[#allocation16_spill]] %s5273_s12 }
  0x22   :  { %6293 = sst [smem:[#allocation17_spill]] %s5278_s20 }
  0x23   :  { %6294 = sst [smem:[#allocation18_spill]] %s5283_s27 }
  0x24   :  { %6295 = sst [smem:[#allocation19_spill]] %s5288_s4 }
  0x25   :  { %s5293_s17 = sld [smem:[%s6253_s0 + %s5181_s7]]   ;;  %s5185_s7 = smov 22  }
  0x26   :  { %s5298_s20 = sld [smem:[%s6253_s0 + %s5182_s15]]   ;;  %s5186_s15 = smov 23  }
  0x27   :  { %s5303_s9 = sld [smem:[%s6253_s0 + %s5183_s22]]   ;;  %s5187_s22 = smov 24  }
  0x28   :  { %s5308_s4 = sld [smem:[%s6253_s0 + %s5184_s28]]   ;;  %s5188_s28 = smov 25  }
  0x2b   :  { %6296 = sst [smem:[#allocation20_spill]] %s5293_s17 }
  0x2c   :  { %6297 = sst [smem:[#allocation21_spill]] %s5298_s20 }
  0x2d   :  { %6298 = sst [smem:[#allocation22_spill]] %s5303_s9 }
  0x2e   :  { %6299 = sst [smem:[#allocation23_spill]] %s5308_s4 }
  0x2f   :  { %s5313_s17 = sld [smem:[%s6253_s0 + %s5185_s7]]   ;;  %s5189_s7 = smov 26  }
  0x30   :  { %s5318_s20 = sld [smem:[%s6253_s0 + %s5186_s15]]   ;;  %s5190_s15 = smov 27  }
  0x31   :  { %s5323_s9 = sld [smem:[%s6253_s0 + %s5187_s22]]   ;;  %s5191_s22 = smov 28  }
  0x32   :  { %s5328_s4 = sld [smem:[%s6253_s0 + %s5188_s28]]   ;;  %s5192_s28 = smov 29  }
  0x33   :  { %s5343_s27 = sld [smem:[%s6253_s0 + %s5191_s22]]  }
  0x34   :  { %s5348_s12 = sld [smem:[%s6253_s0 + %s5192_s28]]  }
  0x35   :  { %6300 = sst [smem:[#allocation24_spill]] %s5313_s17 }
  0x36   :  { %6301 = sst [smem:[#allocation25_spill]] %s5318_s20 }
  0x37   :  { %6302 = sst [smem:[#allocation26_spill]] %s5323_s9 }
  0x38   :  { %6303 = sst [smem:[#allocation27_spill]] %s5328_s4 }
  0x39   :  { %s5333_s17 = sld [smem:[%s6253_s0 + %s5189_s7]]   ;;  %s5193_s7 = smov 30  }
  0x3a   :  { %s5338_s20 = sld [smem:[%s6253_s0 + %s5190_s15]]   ;;  %s5355_s15 = smov 0  }
  0x3f   :  { %6304 = sst [smem:[#allocation28_spill]] %s5333_s17 }
  0x40   :  { %s5353_s17 = sld [smem:[%s6253_s0 + %s5193_s7]]  }
  0x46   :  { %6305 = sst [smem:[#allocation29_spill]] %s5353_s17 }
  0x47 LB: > { %6306 = sst [smem:[#allocation30_spill]] %s5162_s15  ;;  %s5361_s16 = sadd.s32 4294967295, %s5162_s15   ;;  %s5162_s15 = sphi %s5355_s15, %s71_s15  }
  0x48   : > { %p4747_p0 = scmp.ge.s32.totalorder %s5162_s15, 1  ;;  %p1115_p1 = scmp.lt.s32.totalorder %s5162_s15, 3 }
  0x4a   : > { %p1116_p2 = pnand %p4747_p0, %p1115_p1 }
  0x4c   : > { %1119 = sbr.rel (%p1116_p2) target bundleno = 5043 (0x13b3), region = 140 }
  0x51   : > { %s6307_s21 = sld [smem:[#allocation6_spill]]  ;;  %p1314_p3 = scmp.lt.s32.totalorder %s5361_s16, 1  ;;  %vm1614_vm0 = vcmask 261120   ;;  %vm1889_vm1 = vcmask 64512   ;;  %vm2966_vm9 = vcmask 523264  }
  0x52   : > { %s6308_s29 = sld [smem:[#allocation8_spill]] }
  0x53   : > { %s5367_s0 = scalar_select %p1314_p3, %s5361_s16, 1 }
  0x54   : > { %s6310_s5 = sld [smem:[#allocation2_spill]] }
  0x55   : > { %s5370_s18 = sshll.u32 %s5367_s0, 7  ;;  %s5373_s22 = sshll.u32 %s5367_s0, 4 }
  0x56   : > { %6309 = sst [smem:[#allocation31_spill]] %s5373_s22  ;;  %s5426_s7 = sshll.u32 %s5367_s0, 2 }
  0x57   : > { %s5377_s23 = scalar_lea.vmem %s6307_s21, %s5370_s18  ;;  %s6311_s13 = sld [smem:[#allocation4_spill]] }
  0x58   : > { %s5381_s26 = scalar_lea.vmem %s6308_s29, %s5370_s18  ;;  %v1450_v0 = vld [vmem:[%s5377_s23 + $0x18] sm:$0xff]  ;;  %v1449_v4 = vld [vmem:[%s5377_s23 + $0x10] sm:$0xff]  ;;  %v1448_v8 = vld [vmem:[%s5377_s23 + $0x8] sm:$0xff]  ;;  %s6312_s8 = sld [smem:[#allocation10_spill]] }
  0x59   : > { %v1458_v1 = vld [vmem:[%s5377_s23 + $0x58] sm:$0xff]  ;;  %1630 = vmatpush.msra.mxu1 %v1450_v0  ;;  %v1457_v5 = vld [vmem:[%s5377_s23 + $0x50] sm:$0xff]  ;;  %v1456_v9 = vld [vmem:[%s5377_s23 + $0x48] sm:$0xff]  ;;  %s6313_s25 = sld [smem:[#allocation7_spill]] }
  0x5a   : > { %v1462_v2 = vld [vmem:[%s5377_s23 + $0x78] sm:$0xff]  ;;  %1670 = vmatpush.msra.mxu2 %v1458_v1  ;;  %v1461_v6 = vld [vmem:[%s5377_s23 + $0x70] sm:$0xff]  ;;  %s5394_s28 = scalar_lea.vmem %s6310_s5, %s5373_s22  ;;  %v1460_v10 = vld [vmem:[%s5377_s23 + $0x68] sm:$0xff]  ;;  %s6314_s3 = sld [smem:[#allocation9_spill]] }
  0x5b   : > { %v1470_v3 = vld [vmem:[%s5381_s26 + $0x18] sm:$0xff]  ;;  %1690 = vmatpush.msra.mxu3 %v1462_v2  ;;  %v1469_v7 = vld [vmem:[%s5381_s26 + $0x10] sm:$0xff]  ;;  %1631 = vmatpush.msra.mxu1 %v1449_v4  ;;  %v1468_v11 = vld [vmem:[%s5381_s26 + $0x8] sm:$0xff]  ;;  %s6315_s14 = sld [smem:[#allocation11_spill]]  ;;  %s5515_s5 = sshll.u32 %s5367_s0, 5 }
  0x5c   : > { %1722 = vmatpush.msra.mxu0 %v1470_v3  ;;  %1671 = vmatpush.msra.mxu2 %v1457_v5  ;;  %v1447_v12 = vld [vmem:[%s5377_s23] sm:$0xff]  ;;  %v1454_v19 = vld [vmem:[%s5377_s23 + $0x38] sm:$0xff]  ;;  %v1453_v22 = vld [vmem:[%s5377_s23 + $0x30] sm:$0xff]  ;;  %s6316_s19 = sld [smem:[#allocation12_spill]] }
  0x5d   : > { %s5398_s1 = scalar_lea.vmem %s6311_s13, %s5373_s22  ;;  %1691 = vmatpush.msra.mxu3 %v1461_v6  ;;  %v1455_v13 = vld [vmem:[%s5377_s23 + $0x40] sm:$0xff]  ;;  %1632 = vmatpush.msra.mxu1 %v1448_v8  ;;  %v1478_v20 = vld [vmem:[%s5381_s26 + $0x58] sm:$0xff]  ;;  %v1477_v23 = vld [vmem:[%s5381_s26 + $0x50] sm:$0xff]  ;;  %s6317_s24 = sld [smem:[#allocation13_spill]] }
  0x5e   : > { %1723 = vmatpush.msra.mxu0 %v1469_v7  ;;  %v1459_v14 = vld [vmem:[%s5377_s23 + $0x60] sm:$0xff]  ;;  %1672 = vmatpush.msra.mxu2 %v1456_v9  ;;  %s5419_s2 = scalar_lea.vmem %s6312_s8, %s5370_s18  ;;  %v1482_v21 = vld [vmem:[%s5381_s26 + $0x78] sm:$0xff]  ;;  %v1481_v24 = vld [vmem:[%s5381_s26 + $0x70] sm:$0xff]  ;;  %s6318_s9 = sld [smem:[#allocation26_spill]] }
  0x5f   : > { %v1467_v15 = vld [vmem:[%s5381_s26] sm:$0xff]  ;;  %1692 = vmatpush.msra.mxu3 %v1460_v10  ;;  %1633 = vmatpush.msra.mxu1 %v1447_v12  ;;  %v1452_v25 = vld [vmem:[%s5377_s23 + $0x28] sm:$0xff]  ;;  %v1490_v28 = vld [vmem:[%s5419_s2 + $0x18] sm:$0xff]  ;;  %s5441_s10 = scalar_lea.vmem %s6313_s25, %s5426_s7  ;;  %s6319_s4 = sld [smem:[#allocation27_spill]] }
  0x60   : > { %v5408_v16 = vld [vmem:[%s5394_s28] sm:$0xff]  ;;  %1724 = vmatpush.msra.mxu0 %v1468_v11  ;;  %1673 = vmatpush.msra.mxu2 %v1455_v13  ;;  %v1476_v26 = vld [vmem:[%s5381_s26 + $0x48] sm:$0xff]  ;;  %v1489_v31 = vld [vmem:[%s5419_s2 + $0x10] sm:$0xff]  ;;  %s5445_s11 = scalar_lea.vmem %s6314_s3, %s5426_s7  ;;  %s6320_s6 = sld [smem:[#allocation15_spill]] }
  0x61   : > { %v5411_v17 = vld [vmem:[%s5398_s1] sm:$0xff]  ;;  %1693 = vmatpush.msra.mxu3 %v1459_v14  ;;  %1650 = vmatpush.msrb.mxu1 %v1454_v19  ;;  %v1480_v27 = vld [vmem:[%s5381_s26 + $0x68] sm:$0xff]  ;;  %v1474_v34 = vld [vmem:[%s5381_s26 + $0x38] sm:$0xff]  ;;  %s5462_s3 = scalar_lea.vmem %s6315_s14, %s5426_s7  ;;  %s6321_s30 = sld [smem:[#allocation14_spill]] }
  0x62   : > { %v1601_v18 = vadd.f32 %v5411_v17, %v5408_v16  ;;  %1725 = vmatpush.msra.mxu0 %v1467_v15  ;;  %1762 = vmatpush.msrb.mxu2 %v1478_v20  ;;  %v1451_v29 = vld [vmem:[%s5377_s23 + $0x20] sm:$0xff]  ;;  %v1488_v33 = vld [vmem:[%s5419_s2 + $0x8] sm:$0xff]  ;;  %v1473_v36 = vld [vmem:[%s5381_s26 + $0x30] sm:$0xff]  ;;  %s5519_s8 = scalar_lea.vmem %s6316_s19, %s5515_s5  ;;  %s6324_s25 = sld [smem:[#allocation3_spill]] }
  0x63   : > { %1782 = vmatpush.msrb.mxu3 %v1482_v21  ;;  %v1475_v30 = vld [vmem:[%s5381_s26 + $0x40] sm:$0xff]  ;;  %1651 = vmatpush.msrb.mxu1 %v1453_v22  ;;  %v1472_v37 = vld [vmem:[%s5381_s26 + $0x28] sm:$0xff]  ;;  %v1498_v39 = vld [vmem:[%s5419_s2 + $0x58] sm:$0xff]  ;;  %s5536_s13 = scalar_lea.vmem %s6317_s24, %s5367_s0  ;;  %s6323_s24 = sld [smem:[#allocation18_spill]] }
  0x64   : > { %4784 = vmatmul.msk.f32.vlgmr.msra.gmra.mxu1 %vm1614_vm0, %v1601_v18  ;;  %4786 = vmatmul.msk.f32.vlgmr.msra.gmra.mxu2 %vm1614_vm0, %v1601_v18  ;;  %v1479_v32 = vld [vmem:[%s5381_s26 + $0x60] sm:$0xff]  ;;  %v1502_v40 = vld [vmem:[%s5419_s2 + $0x78] sm:$0xff]  ;;  %v1497_v42 = vld [vmem:[%s5419_s2 + $0x50] sm:$0xff]  ;;  %s5546_s14 = scalar_lea.vmem %s6318_s9, %s5367_s0  ;;  %s6325_s29 = sld [smem:[#allocation5_spill]] }
  0x65   : > { %4787 = vmatmul.msk.f32.vlgmr.msra.gmra.mxu3 %vm1614_vm0, %v1601_v18  ;;  %4788 = vmatmul.msk.f32.vlgmr.msra.gmra.mxu0 %vm1614_vm0, %v1601_v18  ;;  %v1487_v35 = vld [vmem:[%s5419_s2] sm:$0xff]  ;;  %v1494_v41 = vld [vmem:[%s5419_s2 + $0x38] sm:$0xff]  ;;  %v1501_v43 = vld [vmem:[%s5419_s2 + $0x70] sm:$0xff]  ;;  %s5550_s19 = scalar_lea.vmem %s6319_s4, %s5367_s0 }
  0x66   : > { %1817 = vmatpush.msrb.mxu0 %v1490_v28  ;;  %1763 = vmatpush.msrb.mxu2 %v1477_v23  ;;  %v1471_v38 = vld [vmem:[%s5381_s26 + $0x20] sm:$0xff]  ;;  %v1493_v44 = vld [vmem:[%s5419_s2 + $0x30] sm:$0xff]  ;;  %v1496_v45 = vld [vmem:[%s5419_s2 + $0x48] sm:$0xff]  ;;  %s5564_s4 = scalar_lea.vmem %s6320_s6, %s5426_s7  ;;  %s6322_s6 = sld [smem:[#allocation16_spill]] }
  0x67   : > { %1783 = vmatpush.msrb.mxu3 %v1481_v24  ;;  %1652 = vmatpush.msrb.mxu1 %v1452_v25  ;;  %v1500_v46 = vld [vmem:[%s5419_s2 + $0x68] sm:$0xff]  ;;  %v1495_v48 = vld [vmem:[%s5419_s2 + $0x40] sm:$0xff]  ;;  %s5568_s9 = scalar_lea.vmem %s6321_s30, %s5370_s18 }
  0x68   : > { %1818 = vmatpush.msrb.mxu0 %v1489_v31  ;;  %1764 = vmatpush.msrb.mxu2 %v1476_v26  ;;  %v1492_v47 = vld [vmem:[%s5419_s2 + $0x28] sm:$0xff]  ;;  %v1499_v49 = vld [vmem:[%s5419_s2 + $0x60] sm:$0xff] }
  0x69   : > { %1784 = vmatpush.msrb.mxu3 %v1480_v27  ;;  %1653 = vmatpush.msrb.mxu1 %v1451_v29  ;;  %v1491_v50 = vld [vmem:[%s5419_s2 + $0x20] sm:$0xff]  ;;  %s5666_s15 = scalar_lea.vmem %s6323_s24, %s5370_s18  ;;  %s6330_s24 = sld [smem:[#allocation20_spill]] }
  0x6a   : > { %1819 = vmatpush.msrb.mxu0 %v1488_v33  ;;  %1765 = vmatpush.msrb.mxu2 %v1475_v30  ;;  %v4961_v51 = vld [vmem:[%s5441_s10] ss:$0 sm:$0xff]  ;;  %v4964_v62 = vld [vmem:[%s5441_s10 + $0x3] ss:$0 sm:$0xff]  ;;  %v4963_v63 = vld [vmem:[%s5441_s10 + $0x2] ss:$0 sm:$0xff] }
  0x6b   : > { %1785 = vmatpush.msrb.mxu3 %v1479_v32  ;;  %1742 = vmatpush.msra.mxu1 %v1474_v34  ;;  %v4962_v52 = vld [vmem:[%s5445_s11] ss:$0 sm:$0xff]  ;;  %v4965_v0 = vld [vmem:[%s5441_s10 + $0x1] ss:$0 sm:$0xff]  ;;  %v4966_v2 = vld [vmem:[%s5445_s11 + $0x2] ss:$0 sm:$0xff] }
  0x6c   : > { %4785 = vmatmul.msk.f32.vlgmr.msrb.gmra.mxu1 %vm1614_vm0, %v1601_v18  ;;  %4790 = vmatmul.msk.f32.vlgmr.msrb.gmra.mxu2 %vm1614_vm0, %v1601_v18  ;;  %v4969_v61 = vld [vmem:[%s5462_s3] ss:$0 sm:$0xff]  ;;  %v4967_v3 = vld [vmem:[%s5445_s11 + $0x3] ss:$0 sm:$0xff]  ;;  %v4968_v6 = vld [vmem:[%s5445_s11 + $0x1] ss:$0 sm:$0xff]  ;;  %s5607_s21 = scalar_lea.vmem %s6322_s6, %s5370_s18 }
  0x6d   : > { %4791 = vmatmul.msk.f32.vlgmr.msrb.gmra.mxu3 %vm1614_vm0, %v1601_v18  ;;  %1820 = vmatpush.msrb.mxu0 %v1487_v35  ;;  %v4970_v20 = vld [vmem:[%s5462_s3 + $0x1] ss:$0 sm:$0xff]  ;;  %v4971_v23 = vld [vmem:[%s5462_s3 + $0x2] ss:$0 sm:$0xff]  ;;  %v4972_v24 = vld [vmem:[%s5462_s3 + $0x3] ss:$0 sm:$0xff] }
  0x6e   : > { %4792 = vmatmul.msk.f32.vlgmr.msrb.gmra.mxu0 %vm1614_vm0, %v5408_v16  ;;  %1743 = vmatpush.msra.mxu1 %v1473_v36  ;;  %s1319_s6 = ssub.s32 1, %s5361_s16  ;;  %s6326_s16 = sld [smem:[#allocation17_spill]] }
  0x6f   : > { %1857 = vmatpush.msra.mxu2 %v1498_v39  ;;  %1877 = vmatpush.msra.mxu3 %v1502_v40  ;;  %p1320_p4 = scmp.lt.s32.totalorder %s1319_s6, 1 }
  0x70   : > { %1744 = vmatpush.msra.mxu1 %v1472_v37 }
  0x71   : > { %1858 = vmatpush.msra.mxu2 %v1497_v42  ;;  %1878 = vmatpush.msra.mxu3 %v1501_v43  ;;  %s6377_s6 = smov (!%p1320_p4, %s1319_s6), 1 }
  0x72   : > { %1745 = vmatpush.msra.mxu1 %v1471_v38  ;;  %s4908_s30 = sshll.u32 %s6377_s6, 4  ;;  %s6327_s6 = sld [smem:[#allocation19_spill]] }
  0x73   : > { %1859 = vmatpush.msra.mxu2 %v1496_v45  ;;  %1879 = vmatpush.msra.mxu3 %v1500_v46  ;;  %s5671_s17 = scalar_lea.vmem %s6324_s25, %s4908_s30  ;;  %s5674_s22 = scalar_lea.vmem %s6325_s29, %s4908_s30 }
  0x74   : > { %4789 = vmatmul.msk.f32.vlgmr.msra.gmra.mxu1 %vm1614_vm0, %v1601_v18  ;;  %s5686_s25 = scalar_lea.vmem %s6326_s16, %s5426_s7  ;;  %s1404_s30 = scalar_lea.vmem %s6330_s24, %s5515_s5 }
  0x75   : > { %1837 = vmatpush.msrb.mxu1 %v1494_v41  ;;  %1860 = vmatpush.msra.mxu2 %v1495_v48  ;;  %s4920_s24 = sshll.u32 %s5367_s0, 6 }
  0x76   : > { %1880 = vmatpush.msra.mxu3 %v1499_v49  ;;  %4794 = vmatmul.msk.f32.vlgmr.msra.gmra.mxu2 %vm1614_vm0, %v5408_v16 }
  0x77   : > { %1838 = vmatpush.msrb.mxu1 %v1493_v44  ;;  %4795 = vmatmul.msk.f32.vlgmr.msra.gmra.mxu3 %vm1614_vm0, %v5408_v16 }
  0x78   : > { %s5694_s29 = scalar_lea.vmem %s6327_s6, %s5426_s7  ;;  %s6333_s7 = sld [smem:[#allocation28_spill]] }
  0x79   : > { %1839 = vmatpush.msrb.mxu1 %v1492_v47  ;;  %s1435_s6 = scalar_lea.vmem %s5338_s20, %s5367_s0 }
  0x7b   : > { %1840 = vmatpush.msrb.mxu1 %v1491_v50 }
  0x7c   : > { %4793 = vmatmul.msk.f32.vlgmr.msrb.gmra.mxu1 %vm1614_vm0, %v5408_v16 }
  0x7e   : > { %s1432_s16 = scalar_lea.vmem %s6333_s7, %s5367_s0 }
  0xe1   : > { %v1635_v53 = vpop.f32.mrf.mxu1 }
  0xe2   : > { %v1636_v54 = vadd.f32 %v4961_v51, %v1635_v53  ;;  %v1727_v55 = vpop.f32.mrf.mxu0 }
  0xe3   : > { %v1728_v56 = vadd.f32 %v4962_v52, %v1727_v55 }
  0xe4   : > { %v1885_v57 = vmul.f32 0.35355338, %v1636_v54 }
  0xe5   : > { %4796 = vmatpush.xpose.msk.msra.mxu0 %vm1889_vm1, %v1728_v56 }
  0xe7   : > { %v1675_v58 = vpop.f32.mrf.mxu2 }
  0xe8   : > { %v1695_v59 = vpop.f32.mrf.mxu3  ;;  %4797 = vmatmul.msk.f32.vlgmr.msra.gmra.mxu0 %vm1889_vm1, %v1885_v57  ;;  %v1676_v7 = vadd.f32 %v4963_v63, %v1675_v58 }
  0xe9   : > { %v1655_v60 = vpop.f32.mrf.mxu1  ;;  %v1696_v5 = vadd.f32 %v4964_v62, %v1695_v59 }
  0xea   : > { %v1656_v8 = vadd.f32 %v4965_v0, %v1655_v60  ;;  %v1887_v18 = vmul.f32 0.35355338, %v1676_v7  ;;  %v1509_v7 = vld [vmem:[%s5519_s8 + $0x10] sm:$0xff] }
  0xeb   : > { %v1822_v1 = vpop.f32.mrf.mxu0  ;;  %v1888_v13 = vmul.f32 0.35355338, %v1696_v5  ;;  %v5522_v5 = vld [vmem:[%s5519_s8] sm:$0xff] }
  0xec   : > { %v1823_v4 = vadd.f32 %v4969_v61, %v1822_v1  ;;  %v1886_v19 = vmul.f32 0.35355338, %v1656_v8  ;;  %v5528_v8 = vld [vmem:[%s5519_s8 + $0x18] sm:$0xff] }
  0xee   : > { %2056 = vmatpush.msrb.mxu0 %v1823_v4 }
  0xef   : > { %v1767_v9 = vpop.f32.mrf.mxu2 }
  0xf0   : > { %v1787_v10 = vpop.f32.mrf.mxu3  ;;  %v1768_v11 = vadd.f32 %v4966_v2, %v1767_v9  ;;  %2148 = vmatpush.msra.mxu0 %v5522_v5 }
  0xf1   : > { %v1788_v12 = vadd.f32 %v4967_v3, %v1787_v10  ;;  %v1747_v14 = vpop.f32.mrf.mxu1 }
  0xf2   : > { %v1748_v15 = vadd.f32 %v4968_v6, %v1747_v14  ;;  %4800 = vmatpush.xpose.msk.msrb.mxu2 %vm1889_vm1, %v1768_v11  ;;  %v1508_v6 = vld [vmem:[%s5519_s8 + $0x8] sm:$0xff] }
  0xf3   : > { %4802 = vmatpush.xpose.msk.msrb.mxu3 %vm1889_vm1, %v1788_v12 }
  0xf4   : > { %4798 = vmatpush.xpose.msk.msra.mxu1 %vm1889_vm1, %v1748_v15 }
  0xf5   : > { %4801 = vmatmul.msk.f32.vlgmr.msrb.gmra.mxu2 %vm1889_vm1, %v1887_v18 }
  0xf6   : > { %4803 = vmatmul.msk.f32.vlgmr.msrb.gmra.mxu3 %vm1889_vm1, %v1888_v13 }
  0xf7   : > { %4799 = vmatmul.msk.f32.vlgmr.msra.gmra.mxu1 %vm1889_vm1, %v1886_v19 }
  0xf9   : > { %v1842_v21 = vpop.f32.mrf.mxu1  ;;  %v1862_v25 = vpop.f32.mrf.mxu2 }
  0xfa   : > { %v1843_v22 = vadd.f32 %v4970_v20, %v1842_v21  ;;  %v1863_v26 = vadd.f32 %v4971_v23, %v1862_v25  ;;  %v1882_v27 = vpop.f32.mrf.mxu3 }
  0xfb   : > { %v1883_v28 = vadd.f32 %v4972_v24, %v1882_v27  ;;  %v4973_v24 = vld [vmem:[%s5536_s13] ss:$0 sm:$0xff] }
  0xfc   : > { %2079 = vmatpush.msrb.mxu1 %v1843_v22  ;;  %2102 = vmatpush.msra.mxu2 %v1863_v26 }
  0xfd   : > { %2125 = vmatpush.msra.mxu3 %v1883_v28 }
  0xfe   : > { %2171 = vmatpush.msra.mxu1 %v1508_v6  ;;  %2194 = vmatpush.msrb.mxu2 %v1509_v7  ;;  %v1537_v6 = vld [vmem:[%s5607_s21 + $0x28] sm:$0xff] }
  0xff   : > { %2217 = vmatpush.msrb.mxu3 %v5528_v8  ;;  %v1541_v7 = vld [vmem:[%s5607_s21 + $0x48] sm:$0xff] }
 0x165   : > { %v1913_v29 = vpop.f32.mrf.mxu0 }
 0x166   : > { %v1994_v30 = vsel %vm1889_vm1, %v1913_v29, -inf }
 0x167   : > { %1995 = vmax.xlane.f32.xlu1 %v1994_v30  ;;  %v5194_v30 = vmov 32.0  }
 0x174   : > { %v1939_v31 = vpop.f32.mrf.mxu1 }
 0x175   : > { %v1997_v32 = vsel %vm1889_vm1, %v1939_v31, -inf }
 0x176   : > { %1998 = vmax.xlane.f32.xlu1 %v1997_v32 }
 0x178   : > { %v1965_v33 = vpop.f32.mrf.mxu2 }
 0x179   : > { %v2000_v34 = vsel %vm1889_vm1, %v1965_v33, -inf  ;;  %v1991_v35 = vpop.f32.mrf.mxu3 }
 0x17a   : > { %2001 = vmax.xlane.f32.xlu0 %v2000_v34  ;;  %v2003_v36 = vsel %vm1889_vm1, %v1991_v35, -inf }
 0x182   : > { %2004 = vmax.xlane.f32.xlu0 %v2003_v36 }
 0x1da   : > { %v1996_v37 = vpop.xlane.xlu1 %1995 }
 0x1db   : > { %v2006_v38 = vsub.f32 %v1913_v29, %v1996_v37 }
 0x1dd   : > { %v2010_v39 = vmul.f32 1.442695, %v2006_v38 }
 0x1df   : > { %4995 = vpow2.f32 %v2010_v39 }
 0x1e5   : > { %v4996_v40 = vpop.eup %4995 }
 0x1e6   : > { %v2018_v41 = vsel %vm1889_vm1, %v4996_v40, 0.0 }
 0x1e7   : > { %2019 = vadd.xlane.f32.xlu0 %v2018_v41  ;;  %v5571_v41 = vld [vmem:[%s5568_s9 + $0x18] sm:$0xff] }
 0x1e9   : > { %v1999_v42 = vpop.xlane.xlu1 %1998 }
 0x1ea   : > { %v2007_v43 = vsub.f32 %v1939_v31, %v1999_v42  ;;  %v1519_v42 = vld [vmem:[%s5568_s9 + $0x38] sm:$0xff] }
 0x1ec   : > { %v2012_v44 = vmul.f32 1.442695, %v2007_v43  ;;  %v1523_v43 = vld [vmem:[%s5568_s9 + $0x58] sm:$0xff] }
 0x1ed   : > { %v2002_v45 = vpop.xlane.xlu0 %2001 }
 0x1ee   : > { %4997 = vpow2.f32 %v2012_v44  ;;  %v2008_v46 = vsub.f32 %v1965_v33, %v2002_v45  ;;  %v1527_v44 = vld [vmem:[%s5568_s9 + $0x78] sm:$0xff]  ;;  %v5578_v45 = vld [vmem:[%s5568_s9 + $0x10] sm:$0xff] }
 0x1f0   : > { %v2014_v47 = vmul.f32 1.442695, %v2008_v46  ;;  %v1518_v46 = vld [vmem:[%s5568_s9 + $0x30] sm:$0xff] }
 0x1f2   : > { %4999 = vpow2.f32 %v2014_v47  ;;  %v1522_v47 = vld [vmem:[%s5568_s9 + $0x50] sm:$0xff] }
 0x1f4   : > { %v4998_v48 = vpop.eup %4997 }
 0x1f5   : > { %v2005_v49 = vpop.xlane.xlu0 %2004  ;;  %v2021_v50 = vsel %vm1889_vm1, %v4998_v48, 0.0 }
 0x1f6   : > { %v2009_v51 = vsub.f32 %v1991_v35, %v2005_v49  ;;  %2022 = vadd.xlane.f32.xlu1 %v2021_v50  ;;  %v5588_v49 = vld [vmem:[%s5568_s9 + $0x8] sm:$0xff] }
 0x1f7   : > { %v1517_v50 = vld [vmem:[%s5568_s9 + $0x28] sm:$0xff] }
 0x1f8   : > { %v5000_v52 = vpop.eup %4999  ;;  %v2016_v53 = vmul.f32 1.442695, %v2009_v51  ;;  %v1521_v51 = vld [vmem:[%s5568_s9 + $0x48] sm:$0xff] }
 0x1f9   : > { %v2024_v54 = vsel %vm1889_vm1, %v5000_v52, 0.0 }
 0x1fa   : > { %5001 = vpow2.f32 %v2016_v53  ;;  %2025 = vadd.xlane.f32.xlu2 %v2024_v54  ;;  %v5597_v53 = vld [vmem:[%s5568_s9] sm:$0xff] }
 0x1fb   : > { %v1516_v54 = vld [vmem:[%s5568_s9 + $0x20] sm:$0xff] }
 0x200   : > { %v5002_v55 = vpop.eup %5001 }
 0x201   : > { %v2027_v56 = vsel %vm1889_vm1, %v5002_v55, 0.0 }
 0x202   : > { %2028 = vadd.xlane.f32.xlu2 %v2027_v56  ;;  %v5603_v56 = vld [vmem:[%s5568_s9 + $0x60] sm:$0xff] }
 0x25a   : > { %v2020_v57 = vpop.xlane.xlu0 %2019 }
 0x25b   : > { %5003 = vrcp.f32 %v2020_v57 }
 0x261   : > { %v5004_v58 = vpop.eup %5003 }
 0x262   : > { %v2034_v59 = vmul.f32 %v5004_v58, %v4996_v40  ;;  %v5612_v58 = vld [vmem:[%s5607_s21 + $0x18] sm:$0xff] }
 0x264   : > { %4804 = vmatmul.msk.f32.vlgmr.msrb.gmra.mxu0 %vm1889_vm1, %v2034_v59  ;;  %v1539_v59 = vld [vmem:[%s5607_s21 + $0x38] sm:$0xff] }
 0x265   : > { %2300 = vmatpush.msrb.mxu0 %v5571_v41 }
 0x267   : > { %2301 = vmatpush.msrb.mxu0 %v5578_v45 }
 0x269   : > { %v2023_v60 = vpop.xlane.xlu1 %2022  ;;  %2302 = vmatpush.msrb.mxu0 %v5588_v49 }
 0x26a   : > { %5005 = vrcp.f32 %v2023_v60  ;;  %v1543_v60 = vld [vmem:[%s5607_s21 + $0x58] sm:$0xff] }
 0x26b   : > { %2303 = vmatpush.msrb.mxu0 %v5597_v53 }
 0x26d   : > { %v2026_v61 = vpop.xlane.xlu2 %2025 }
 0x26e   : > { %5007 = vrcp.f32 %v2026_v61 }
 0x270   : > { %v5006_v62 = vpop.eup %5005 }
 0x271   : > { %v2035_v63 = vmul.f32 %v5006_v62, %v4998_v48  ;;  %v5584_v48 = vld [vmem:[%s5568_s9 + $0x70] sm:$0xff]  ;;  %v5619_v62 = vld [vmem:[%s5607_s21 + $0x78] sm:$0xff] }
 0x273   : > { %4805 = vmatmul.msk.f32.vlgmr.msrb.gmra.mxu1 %vm1889_vm1, %v2035_v63  ;;  %v5622_v63 = vld [vmem:[%s5607_s21 + $0x10] sm:$0xff] }
 0x274   : > { %v5008_v0 = vpop.eup %5007  ;;  %2320 = vmatpush.msrb.mxu1 %v1519_v42  ;;  %v5728_v42 = vld [vmem:[%s5666_s15 + $0x50] sm:$0xff] }
 0x275   : > { %v2036_v1 = vmul.f32 %v5008_v0, %v5000_v52  ;;  %v2029_v2 = vpop.xlane.xlu2 %2028  ;;  %v5594_v52 = vld [vmem:[%s5568_s9 + $0x68] sm:$0xff]  ;;  %v1538_v0 = vld [vmem:[%s5607_s21 + $0x30] sm:$0xff] }
 0x276   : > { %5009 = vrcp.f32 %v2029_v2  ;;  %2321 = vmatpush.msrb.mxu1 %v1518_v46  ;;  %v5628_v2 = vld [vmem:[%s5607_s21 + $0x70] sm:$0xff]  ;;  %v5739_v46 = vld [vmem:[%s5666_s15 + $0x68] sm:$0xff] }
 0x277   : > { %4806 = vmatmul.msk.f32.vlgmr.msra.gmra.mxu2 %vm1889_vm1, %v2036_v1  ;;  %5011 = vrcp.f32 %v5194_v30  ;;  %v1542_v1 = vld [vmem:[%s5607_s21 + $0x50] sm:$0xff]  ;;  %v1559_v30 = vld [vmem:[%s5666_s15 + $0x38] sm:$0xff] }
 0x278   : > { %2340 = vmatpush.msra.mxu2 %v1523_v43  ;;  %2322 = vmatpush.msrb.mxu1 %v1517_v50  ;;  %v5731_v43 = vld [vmem:[%s5666_s15 + $0x70] sm:$0xff]  ;;  %v5747_v50 = vld [vmem:[%s5666_s15 + $0x60] sm:$0xff] }
 0x27a   : > { %2341 = vmatpush.msra.mxu2 %v1522_v47  ;;  %2323 = vmatpush.msrb.mxu1 %v1516_v54  ;;  %v5744_v47 = vld [vmem:[%s5666_s15 + $0x40] sm:$0xff] }
 0x27c   : > { %v5010_v3 = vpop.eup %5009  ;;  %2342 = vmatpush.msra.mxu2 %v1521_v51 }
 0x27d   : > { %v2037_v4 = vmul.f32 %v5010_v3, %v5002_v55  ;;  %v5012_v31 = vpop.eup %5011  ;;  %v1520_v55 = vld [vmem:[%s5568_s9 + $0x40] sm:$0xff]  ;;  %v5631_v3 = vld [vmem:[%s5607_s21 + $0x8] sm:$0xff] }
 0x27e   : > { %v2238_v32 = vmul.f32 32.0, %v5012_v31  ;;  %vm2242_vm2 = vweird.f32 %v5012_v31  ;;  %2343 = vmatpush.msra.mxu2 %v1520_v55  ;;  %v5754_v55 = vld [vmem:[%s5564_s4] ss:$0 sm:$0xff] }
 0x27f   : > { %4807 = vmatmul.msk.f32.vlgmr.msra.gmra.mxu3 %vm1889_vm1, %v2037_v4 }
 0x280   : > { %v2239_v33 = vsub.f32 1.0, %v2238_v32  ;;  %2360 = vmatpush.msra.mxu3 %v1527_v44  ;;  %v5736_v44 = vld [vmem:[%s5666_s15 + $0x48] sm:$0xff] }
 0x282   : > { %v2240_v34 = vmul.f32 %v5012_v31, %v2239_v33  ;;  %2361 = vmatpush.msra.mxu3 %v5584_v48  ;;  %v5697_v33 = vld [vmem:[%s5666_s15 + $0x10] sm:$0xff] }
 0x284   : > { %v2241_v35 = vadd.f32 %v5012_v31, %v2240_v34  ;;  %2362 = vmatpush.msra.mxu3 %v5594_v52  ;;  %v5700_v34 = vld [vmem:[%s5666_s15 + $0x30] sm:$0xff] }
 0x286   : > { %v5554_v36 = vsel %vm2242_vm2, %v5012_v31, %v2241_v35  ;;  %2363 = vmatpush.msra.mxu3 %v5603_v56  ;;  %v1600_v31 = vld [vmem:[%s5674_s22] sm:$0xff]  ;;  %v5705_v35 = vld [vmem:[%s5666_s15 + $0x8] sm:$0xff] }
 0x2e1   : > { %v2058_v9 = vpop.f32.mrf.mxu0 }
 0x2e2   : > { %4808 = vmatmul.msk.f32.vlgmr.msra.gmra.mxu0 %vm1889_vm1, %v2058_v9  ;;  %v5637_v9 = vld [vmem:[%s5607_s21 + $0x68] sm:$0xff] }
 0x2e3   : > { %2395 = vmatpush.msra.mxu0 %v5612_v58 }
 0x2e5   : > { %2396 = vmatpush.msra.mxu0 %v5622_v63 }
 0x2e7   : > { %2397 = vmatpush.msra.mxu0 %v5631_v3 }
 0x2f0   : > { %v2081_v10 = vpop.f32.mrf.mxu1 }
 0x2f1   : > { %4809 = vmatmul.msk.f32.vlgmr.msra.gmra.mxu1 %vm1889_vm1, %v2081_v10  ;;  %v5641_v10 = vld [vmem:[%s5607_s21] sm:$0xff] }
 0x2f2   : > { %2415 = vmatpush.msra.mxu1 %v1539_v59  ;;  %2398 = vmatpush.msra.mxu0 %v5641_v10  ;;  %v5760_v59 = vld [vmem:[%s5686_s25] ss:$0 sm:$0xff] }
 0x2f4   : > { %2416 = vmatpush.msra.mxu1 %v1538_v0 }
 0x2f6   : > { %2417 = vmatpush.msra.mxu1 %v1537_v6 }
 0x2fa   : > { %v2104_v11 = vpop.f32.mrf.mxu2 }
 0x2fb   : > { %4810 = vmatmul.msk.f32.vlgmr.msrb.gmra.mxu2 %vm1889_vm1, %v2104_v11  ;;  %v5644_v11 = vld [vmem:[%s5607_s21 + $0x20] sm:$0xff] }
 0x2fc   : > { %2435 = vmatpush.msrb.mxu2 %v1543_v60  ;;  %2418 = vmatpush.msra.mxu1 %v5644_v11  ;;  %v5763_v60 = vld [vmem:[%s5686_s25 + $0x1] ss:$0 sm:$0xff] }
 0x2fe   : > { %2436 = vmatpush.msrb.mxu2 %v1542_v1 }
 0x300   : > { %2437 = vmatpush.msrb.mxu2 %v1541_v7 }
 0x302   : > { %v2127_v12 = vpop.f32.mrf.mxu3 }
 0x303   : > { %4811 = vmatmul.msk.f32.vlgmr.msrb.gmra.mxu3 %vm1889_vm1, %v2127_v12  ;;  %v5648_v12 = vld [vmem:[%s5607_s21 + $0x40] sm:$0xff] }
 0x304   : > { %2455 = vmatpush.msrb.mxu3 %v5619_v62  ;;  %2438 = vmatpush.msrb.mxu2 %v5648_v12 }
 0x306   : > { %2456 = vmatpush.msrb.mxu3 %v5628_v2 }
 0x308   : > { %2457 = vmatpush.msrb.mxu3 %v5637_v9 }
 0x35f   : > { %v2150_v14 = vpop.f32.mrf.mxu0 }
 0x360   : > { %v2222_v19 = vsel %vm1614_vm0, %v2150_v14, 0.0 }
 0x36e   : > { %v2173_v13 = vpop.f32.mrf.mxu1 }
 0x36f   : > { %v2223_v18 = vsel %vm1614_vm0, %v2173_v13, 0.0  ;;  %v5651_v13 = vld [vmem:[%s5607_s21 + $0x60] sm:$0xff] }
 0x370   : > { %v2224_v21 = vadd.f32 %v2223_v18, %v2222_v19  ;;  %2458 = vmatpush.msrb.mxu3 %v5651_v13 }
 0x37e   : > { %v2196_v15 = vpop.f32.mrf.mxu2 }
 0x37f   : > { %v2225_v20 = vsel %vm1614_vm0, %v2196_v15, 0.0 }
 0x380   : > { %v2226_v22 = vadd.f32 %v2225_v20, %v2224_v21 }
 0x386   : > { %v2219_v23 = vpop.f32.mrf.mxu3 }
 0x387   : > { %v2227_v25 = vsel %vm1614_vm0, %v2219_v23, 0.0 }
 0x388   : > { %v2228_v26 = vadd.f32 %v2227_v25, %v2226_v22  ;;  %v4974_v22 = vld [vmem:[%s5546_s14] ss:$0 sm:$0xff] }
 0x38a   : > { %v2232_v27 = vadd.f32 %v4973_v24, %v2228_v26  ;;  %v4975_v24 = vld [vmem:[%s5550_s19] ss:$0 sm:$0xff] }
 0x38c   : > { %v2233_v28 = vadd.f32 %v2232_v27, %v5408_v16 }
 0x38e   : > { %v2234_v29 = vsel %vm1614_vm0, %v2233_v28, 0.0 }
 0x38f   : > { %2235 = vadd.xlane.f32.xlu2 %v2234_v29  ;;  %v1555_v29 = vld [vmem:[%s5666_s15 + $0x18] sm:$0xff] }
 0x402   : > { %v2236_v37 = vpop.xlane.xlu2 %2235 }
 0x403   : > { %v2244_v16 = vmul.f32 %v5554_v36, %v2236_v37  ;;  %v5708_v37 = vld [vmem:[%s5666_s15 + $0x28] sm:$0xff] }
 0x405   : > { %v5557_v38 = vsub.f32 %v2233_v28, %v2244_v16  ;;  %v1552_v16 = vld [vmem:[%s5666_s15] sm:$0xff] }
 0x407   : > { %v2246_v39 = vmul.f32 %v5557_v38, %v5557_v38 }
 0x409   : > { %v2247_v40 = vsel %vm1614_vm0, %v2246_v39, 0.0  ;;  %v5717_v39 = vld [vmem:[%s5666_s15 + $0x58] sm:$0xff] }
 0x40a   : > { %2248 = vadd.xlane.f32.xlu0 %v2247_v40  ;;  %v5720_v40 = vld [vmem:[%s5666_s15 + $0x78] sm:$0xff] }
 0x47d   : > { %v2249_v57 = vpop.xlane.xlu0 %2248 }
 0x47e   : > { %v2250_v61 = vmul.f32 %v2249_v57, %v5554_v36  ;;  %v5757_v57 = vld [vmem:[%s5564_s4 + $0x1] ss:$0 sm:$0xff] }
 0x480   : > { %v2251_v4 = vadd.f32 1e-05, %v2250_v61 }
 0x482   : > { %5013 = vrsqrt.f32 %v2251_v4  ;;  %vm2258_vm4 = vweird.f32 %v2251_v4 }
 0x488   : > { %v5014_v14 = vpop.eup %5013 }
 0x489   : > { %v2253_v15 = vmul.f32 %v5014_v14, %v2251_v4  ;;  %vm2259_vm3 = vweird.f32 %v5014_v14 }
 0x48a   : > { %vm2260_vm5 = vmor %vm2258_vm4, %vm2259_vm3 }
 0x48b   : > { %v2254_v18 = vmul.f32 %v5014_v14, %v2253_v15 }
 0x48d   : > { %v2255_v19 = vmul.f32 0.5, %v2254_v18  ;;  %v5770_v18 = vld [vmem:[%s5564_s4 + $0x2] ss:$0 sm:$0xff] }
 0x48f   : > { %v2256_v20 = vsub.f32 1.5, %v2255_v19  ;;  %v5773_v19 = vld [vmem:[%s5564_s4 + $0x3] ss:$0 sm:$0xff]  ;;  %s6332_s4 = sld [smem:[#allocation21_spill]] }
 0x491   : > { %v2257_v21 = vmul.f32 %v5014_v14, %v2256_v20  ;;  %v5778_v20 = vld [vmem:[%s5686_s25 + $0x2] ss:$0 sm:$0xff] }
 0x493   : > { %v2261_v23 = vsel %vm2260_vm5, %v5014_v14, %v2257_v21 }
 0x494   : > { %v2262_v25 = vmul.f32 %v2261_v23, %v5557_v38  ;;  %v5714_v38 = vld [vmem:[%s5666_s15 + $0x20] sm:$0xff] }
 0x495   : > { %v5781_v23 = vld [vmem:[%s5686_s25 + $0x3] ss:$0 sm:$0xff]  ;;  %s1407_s18 = scalar_lea.vmem %s6332_s4, %s5367_s0 }
 0x496   : > { %v2266_v26 = vmul.f32 %v4974_v22, %v2262_v25 }
 0x498   : > { %v5662_v27 = vadd.f32 %v4975_v24, %v2266_v26 }
 0x49a   : > { %v2271_v28 = vadd.f32 %v5662_v27, %v5411_v17  ;;  %v1598_v17 = vld [vmem:[%s5671_s17] sm:$0xff] }
 0x49b   : > { %v2272_v32 = vadd.f32 %v1600_v31, %v1598_v17 }
 0x49c   : > { %4812 = vmatmul.msk.f32.vlgmr.msrb.gmra.mxu0 %vm1614_vm0, %v2271_v28  ;;  %4813 = vmatmul.msk.f32.vlgmr.msrb.gmra.mxu1 %vm1614_vm0, %v2271_v28 }
 0x49d   : > { %4814 = vmatmul.msk.f32.vlgmr.msra.gmra.mxu2 %vm1614_vm0, %v2271_v28  ;;  %4815 = vmatmul.msk.f32.vlgmr.msra.gmra.mxu3 %vm1614_vm0, %v2271_v28 }
 0x49e   : > { %2490 = vmatpush.msrb.mxu0 %v1555_v29  ;;  %2510 = vmatpush.msrb.mxu1 %v1559_v30 }
 0x49f   : > { %2530 = vmatpush.msra.mxu2 %v5717_v39  ;;  %2550 = vmatpush.msra.mxu3 %v5720_v40 }
 0x4a0   : > { %2491 = vmatpush.msrb.mxu0 %v5697_v33  ;;  %2511 = vmatpush.msrb.mxu1 %v5700_v34 }
 0x4a1   : > { %2531 = vmatpush.msra.mxu2 %v5728_v42  ;;  %2551 = vmatpush.msra.mxu3 %v5731_v43 }
 0x4a2   : > { %2492 = vmatpush.msrb.mxu0 %v5705_v35  ;;  %2512 = vmatpush.msrb.mxu1 %v5708_v37 }
 0x4a3   : > { %2532 = vmatpush.msra.mxu2 %v5736_v44  ;;  %2552 = vmatpush.msra.mxu3 %v5739_v46 }
 0x4a4   : > { %4816 = vmatmul.msk.f32.vlgmr.msra.gmra.mxu0 %vm1614_vm0, %v2272_v32  ;;  %4817 = vmatmul.msk.f32.vlgmr.msra.gmra.mxu1 %vm1614_vm0, %v2272_v32 }
 0x4a5   : > { %4818 = vmatmul.msk.f32.vlgmr.msrb.gmra.mxu2 %vm1614_vm0, %v2272_v32  ;;  %4819 = vmatmul.msk.f32.vlgmr.msrb.gmra.mxu3 %vm1614_vm0, %v2272_v32  ;;  %v5794_v32 = vld [vmem:[%s5694_s29] ss:$0 sm:$0xff] }
 0x4a6   : > { %2493 = vmatpush.msrb.mxu0 %v1552_v16  ;;  %2513 = vmatpush.msrb.mxu1 %v5714_v38  ;;  %6328 = vst [vmem:[#allocation32_spill] sm:$0xff] %v5794_v32  ;;  %v5797_v16 = vld [vmem:[%s5694_s29 + $0x1] ss:$0 sm:$0xff] }
 0x4a7   : > { %2533 = vmatpush.msra.mxu2 %v5744_v47  ;;  %2553 = vmatpush.msra.mxu3 %v5747_v50 }
 0x4ac   : > { %4820 = vmatmul.msk.f32.vlgmr.msrb.gmra.mxu0 %vm1614_vm0, %v1598_v17  ;;  %4821 = vmatmul.msk.f32.vlgmr.msrb.gmra.mxu1 %vm1614_vm0, %v1598_v17 }
 0x4ad   : > { %4822 = vmatmul.msk.f32.vlgmr.msra.gmra.mxu2 %vm1614_vm0, %v1598_v17  ;;  %4823 = vmatmul.msk.f32.vlgmr.msra.gmra.mxu3 %vm1614_vm0, %v1598_v17 }
 0x519   : > { %v2305_v51 = vpop.f32.mrf.mxu0  ;;  %v2325_v54 = vpop.f32.mrf.mxu1 }
 0x51a   : > { %v2306_v1 = vadd.f32 %v5754_v55, %v2305_v51  ;;  %v2326_v4 = vadd.f32 %v5757_v57, %v2325_v54 }
 0x51c   : > { %v2558_v21 = vmul.f32 0.35355338, %v2306_v1  ;;  %v2559_v22 = vmul.f32 0.35355338, %v2326_v4  ;;  %v5802_v1 = vld [vmem:[%s5694_s29 + $0x2] ss:$0 sm:$0xff] }
 0x51d   : > { %v5805_v4 = vld [vmem:[%s5694_s29 + $0x3] ss:$0 sm:$0xff] }
 0x51e   : > { %6329 = vst [vmem:[#allocation33_spill] sm:$0xff] %v5805_v4 }
 0x520   : > { %v2345_v61 = vpop.f32.mrf.mxu2  ;;  %v2365_v0 = vpop.f32.mrf.mxu3 }
 0x521   : > { %v2400_v6 = vpop.f32.mrf.mxu0  ;;  %v2420_v7 = vpop.f32.mrf.mxu1  ;;  %v2346_v24 = vadd.f32 %v5770_v18, %v2345_v61  ;;  %v2366_v25 = vadd.f32 %v5773_v19, %v2365_v0 }
 0x522   : > { %v2401_v14 = vadd.f32 %v5760_v59, %v2400_v6  ;;  %v2421_v15 = vadd.f32 %v5763_v60, %v2420_v7 }
 0x523   : > { %v2560_v17 = vmul.f32 0.35355338, %v2346_v24  ;;  %v2561_v31 = vmul.f32 0.35355338, %v2366_v25 }
 0x524   : > { %4824 = vmatpush.xpose.msk.msra.mxu0 %vm1889_vm1, %v2401_v14  ;;  %4826 = vmatpush.xpose.msk.msra.mxu1 %vm1889_vm1, %v2421_v15 }
 0x527   : > { %4825 = vmatmul.msk.f32.vlgmr.msra.gmra.mxu0 %vm1889_vm1, %v2558_v21  ;;  %4827 = vmatmul.msk.f32.vlgmr.msra.gmra.mxu1 %vm1889_vm1, %v2559_v22 }
 0x528   : > { %v2440_v26 = vpop.f32.mrf.mxu2  ;;  %v2460_v28 = vpop.f32.mrf.mxu3 }
 0x529   : > { %v2441_v29 = vadd.f32 %v5778_v20, %v2440_v26  ;;  %v2461_v30 = vadd.f32 %v5781_v23, %v2460_v28  ;;  %v2495_v51 = vpop.f32.mrf.mxu0  ;;  %v2515_v54 = vpop.f32.mrf.mxu1 }
 0x52a   : > { %v2496_v61 = vadd.f32 %v5794_v32, %v2495_v51  ;;  %v2516_v0 = vadd.f32 %v5797_v16, %v2515_v54 }
 0x52b   : > { %4828 = vmatpush.xpose.msk.msrb.mxu2 %vm1889_vm1, %v2441_v29  ;;  %4830 = vmatpush.xpose.msk.msrb.mxu3 %vm1889_vm1, %v2461_v30 }
 0x52c   : > { %2728 = vmatpush.msrb.mxu0 %v2496_v61  ;;  %2751 = vmatpush.msrb.mxu1 %v2516_v0 }
 0x52e   : > { %4829 = vmatmul.msk.f32.vlgmr.msrb.gmra.mxu2 %vm1889_vm1, %v2560_v17  ;;  %4831 = vmatmul.msk.f32.vlgmr.msrb.gmra.mxu3 %vm1889_vm1, %v2561_v31 }
 0x530   : > { %v2535_v6 = vpop.f32.mrf.mxu2  ;;  %v2555_v7 = vpop.f32.mrf.mxu3 }
 0x531   : > { %v2536_v14 = vadd.f32 %v5802_v1, %v2535_v6  ;;  %v2556_v15 = vadd.f32 %v5805_v4, %v2555_v7 }
 0x533   : > { %2774 = vmatpush.msra.mxu2 %v2536_v14  ;;  %2797 = vmatpush.msra.mxu3 %v2556_v15 }
 0x5a4   : > { %v2585_v21 = vpop.f32.mrf.mxu0  ;;  %v2611_v29 = vpop.f32.mrf.mxu1 }
 0x5a5   : > { %v2666_v22 = vsel %vm1889_vm1, %v2585_v21, -inf  ;;  %v2669_v30 = vsel %vm1889_vm1, %v2611_v29, -inf }
 0x5a6   : > { %2667 = vmax.xlane.f32.xlu0 %v2666_v22 }
 0x5b1   : > { %v2637_v24 = vpop.f32.mrf.mxu2  ;;  %v2663_v25 = vpop.f32.mrf.mxu3 }
 0x5b2   : > { %v2675_v26 = vsel %vm1889_vm1, %v2663_v25, -inf  ;;  %v2672_v28 = vsel %vm1889_vm1, %v2637_v24, -inf }
 0x5b3   : > { %2676 = vmax.xlane.f32.xlu2 %v2675_v26  ;;  %2673 = vmax.xlane.f32.xlu1 %v2672_v28 }
 0x5bb   : > { %2670 = vmax.xlane.f32.xlu1 %v2669_v30 }
 0x619   : > { %v2668_v17 = vpop.xlane.xlu0 %2667 }
 0x61a   : > { %v2678_v31 = vsub.f32 %v2585_v21, %v2668_v17 }
 0x61c   : > { %v2682_v51 = vmul.f32 1.442695, %v2678_v31 }
 0x61e   : > { %5015 = vpow2.f32 %v2682_v51 }
 0x624   : > { %v5016_v54 = vpop.eup %5015 }
 0x625   : > { %v2690_v61 = vsel %vm1889_vm1, %v5016_v54, 0.0 }
 0x626   : > { %v2677_v0 = vpop.xlane.xlu2 %2676  ;;  %v2674_v6 = vpop.xlane.xlu1 %2673  ;;  %2691 = vadd.xlane.f32.xlu1 %v2690_v61 }
 0x627   : > { %v2681_v7 = vsub.f32 %v2663_v25, %v2677_v0  ;;  %v2680_v14 = vsub.f32 %v2637_v24, %v2674_v6 }
 0x629   : > { %v2688_v15 = vmul.f32 1.442695, %v2681_v7  ;;  %v2686_v22 = vmul.f32 1.442695, %v2680_v14 }
 0x62b   : > { %5017 = vpow2.f32 %v2688_v15 }
 0x62c   : > { %5019 = vpow2.f32 %v2686_v22 }
 0x62e   : > { %v2671_v26 = vpop.xlane.xlu1 %2670 }
 0x62f   : > { %v2679_v28 = vsub.f32 %v2611_v29, %v2671_v26 }
 0x631   : > { %v5018_v4 = vpop.eup %5017  ;;  %v2684_v30 = vmul.f32 1.442695, %v2679_v28  ;;  %v5823_v28 = vld [vmem:[%s1404_s30] sm:$0xff] }
 0x632   : > { %v5020_v32 = vpop.eup %5019  ;;  %v2699_v21 = vsel %vm1889_vm1, %v5018_v4, 0.0  ;;  %2820 = vmatpush.msra.mxu0 %v5823_v28 }
 0x633   : > { %5021 = vpow2.f32 %v2684_v30  ;;  %v2696_v17 = vsel %vm1889_vm1, %v5020_v32, 0.0  ;;  %2700 = vadd.xlane.f32.xlu0 %v2699_v21  ;;  %v5074_v30 = vld [vmem:[%s5377_s23 + $0x10] sm:$0xff]  ;;  %v5075_v21 = vld [vmem:[%s5377_s23 + $0x8] sm:$0xff] }
 0x634   : > { %2697 = vadd.xlane.f32.xlu2 %v2696_v17  ;;  %v5076_v17 = vld [vmem:[%s5377_s23] sm:$0xff] }
 0x639   : > { %v5022_v31 = vpop.eup %5021 }
 0x63a   : > { %v2693_v25 = vsel %vm1889_vm1, %v5022_v31, 0.0 }
 0x63c   : > { %2694 = vadd.xlane.f32.xlu2 %v2693_v25  ;;  %v5836_v25 = vld [vmem:[%s1404_s30 + $0x8] sm:$0xff] }
 0x63d   : > { %2843 = vmatpush.msra.mxu1 %v5836_v25 }
 0x699   : > { %v2692_v24 = vpop.xlane.xlu1 %2691 }
 0x69a   : > { %5023 = vrcp.f32 %v2692_v24  ;;  %v5077_v24 = vld [vmem:[%s5377_s23 + $0x38] sm:$0xff] }
 0x6a0   : > { %v5024_v51 = vpop.eup %5023 }
 0x6a1   : > { %v2706_v61 = vmul.f32 %v5024_v51, %v5016_v54  ;;  %v5078_v51 = vld [vmem:[%s5377_s23 + $0x30] sm:$0xff] }
 0x6a3   : > { %4832 = vmatmul.msk.f32.vlgmr.msrb.gmra.mxu0 %vm1889_vm1, %v2706_v61  ;;  %v5079_v61 = vld [vmem:[%s5377_s23 + $0x28] sm:$0xff] }
 0x6a6   : > { %v2701_v29 = vpop.xlane.xlu0 %2700 }
 0x6a7   : > { %v2698_v0 = vpop.xlane.xlu2 %2697  ;;  %5025 = vrcp.f32 %v2701_v29  ;;  %v5080_v29 = vld [vmem:[%s5377_s23 + $0x20] sm:$0xff] }
 0x6a8   : > { %5027 = vrcp.f32 %v2698_v0 }
 0x6ad   : > { %v5026_v6 = vpop.eup %5025 }
 0x6ae   : > { %v5028_v7 = vpop.eup %5027  ;;  %v2709_v14 = vmul.f32 %v5026_v6, %v5018_v4  ;;  %v5826_v4 = vld [vmem:[%s1404_s30 + $0x10] sm:$0xff] }
 0x6af   : > { %v2708_v15 = vmul.f32 %v5028_v7, %v5020_v32  ;;  %v2695_v22 = vpop.xlane.xlu2 %2694  ;;  %2866 = vmatpush.msrb.mxu2 %v5826_v4  ;;  %v5073_v32 = vld [vmem:[%s5377_s23 + $0x18] sm:$0xff] }
 0x6b0   : > { %5029 = vrcp.f32 %v2695_v22  ;;  %4835 = vmatmul.msk.f32.vlgmr.msra.gmra.mxu3 %vm1889_vm1, %v2709_v14  ;;  %v5081_v14 = vld [vmem:[%s5381_s26 + $0x18] sm:$0xff] }
 0x6b1   : > { %4834 = vmatmul.msk.f32.vlgmr.msra.gmra.mxu2 %vm1889_vm1, %v2708_v15  ;;  %v5082_v22 = vld [vmem:[%s5377_s23 + $0x78] sm:$0xff] }
 0x6b2   : > { %3046 = vmatpush.msra.mxu2 %v5073_v32  ;;  %v5085_v32 = vld [vmem:[%s5381_s26 + $0x8] sm:$0xff] }
 0x6b4   : > { %3047 = vmatpush.msra.mxu2 %v5074_v30  ;;  %v5086_v30 = vld [vmem:[%s5377_s23 + $0x68] sm:$0xff] }
 0x6b6   : > { %v5030_v54 = vpop.eup %5029  ;;  %3048 = vmatpush.msra.mxu2 %v5075_v21  ;;  %v5087_v21 = vld [vmem:[%s5381_s26] sm:$0xff] }
 0x6b7   : > { %v2707_v26 = vmul.f32 %v5030_v54, %v5022_v31  ;;  %v5833_v31 = vld [vmem:[%s1404_s30 + $0x18] sm:$0xff]  ;;  %v5083_v54 = vld [vmem:[%s5381_s26 + $0x10] sm:$0xff] }
 0x6b8   : > { %3049 = vmatpush.msra.mxu2 %v5076_v17  ;;  %6331 = vst [vmem:[#allocation34_spill] sm:$0xff] %v5833_v31  ;;  %2889 = vmatpush.msrb.mxu3 %v5833_v31  ;;  %v5088_v17 = vld [vmem:[%s5377_s23 + $0x60] sm:$0xff] }
 0x6b9   : > { %4833 = vmatmul.msk.f32.vlgmr.msrb.gmra.mxu1 %vm1889_vm1, %v2707_v26  ;;  %v5084_v26 = vld [vmem:[%s5377_s23 + $0x70] sm:$0xff] }
 0x6ba   : > { %3066 = vmatpush.msra.mxu3 %v5077_v24 }
 0x6bc   : > { %3067 = vmatpush.msra.mxu3 %v5078_v51 }
 0x6be   : > { %3068 = vmatpush.msra.mxu3 %v5079_v61 }
 0x6c0   : > { %3069 = vmatpush.msra.mxu3 %v5080_v29 }
 0x720   : > { %v2730_v0 = vpop.f32.mrf.mxu0 }
 0x721   : > { %4836 = vmatmul.msk.f32.vlgmr.msra.gmra.mxu0 %vm1889_vm1, %v2730_v0 }
 0x733   : > { %v2799_v6 = vpop.f32.mrf.mxu3 }
 0x734   : > { %v2776_v7 = vpop.f32.mrf.mxu2  ;;  %4839 = vmatmul.msk.f32.vlgmr.msrb.gmra.mxu3 %vm1889_vm1, %v2799_v6 }
 0x735   : > { %4838 = vmatmul.msk.f32.vlgmr.msrb.gmra.mxu2 %vm1889_vm1, %v2776_v7  ;;  %3126 = vmatpush.msrb.mxu3 %v5081_v14 }
 0x736   : > { %v2753_v15 = vpop.f32.mrf.mxu1  ;;  %3106 = vmatpush.msrb.mxu2 %v5082_v22  ;;  %v5860_v22 = vld [vmem:[%s1407_s18] ss:$0 sm:$0xff] }
 0x737   : > { %4837 = vmatmul.msk.f32.vlgmr.msra.gmra.mxu1 %vm1889_vm1, %v2753_v15  ;;  %3127 = vmatpush.msrb.mxu3 %v5083_v54  ;;  %6334 = vst [vmem:[#allocation35_spill] sm:$0xff] %v5860_v22 }
 0x738   : > { %3107 = vmatpush.msrb.mxu2 %v5084_v26 }
 0x739   : > { %3128 = vmatpush.msrb.mxu3 %v5085_v32 }
 0x73a   : > { %3108 = vmatpush.msrb.mxu2 %v5086_v30 }
 0x73b   : > { %3129 = vmatpush.msrb.mxu3 %v5087_v21 }
 0x73c   : > { %3109 = vmatpush.msrb.mxu2 %v5088_v17  ;;  %v5869_v17 = vld [vmem:[%s5394_s28 + $0x8] sm:$0xff]  ;;  %s6335_s28 = sld [smem:[#allocation23_spill]] }
 0x742   : > { %s1415_s25 = scalar_lea.vmem %s6335_s28, %s5367_s0 }
 0x79e   : > { %v2822_v24 = vpop.f32.mrf.mxu0 }
 0x79f   : > { %v2894_v29 = vsel %vm1614_vm0, %v2822_v24, 0.0  ;;  %v5872_v24 = vld [vmem:[%s5398_s1 + $0x8] sm:$0xff]  ;;  %s6336_s1 = sld [smem:[#allocation22_spill]] }
 0x7a5   : > { %s1412_s29 = scalar_lea.vmem %s6336_s1, %s5515_s5  ;;  %s6341_s5 = sld [smem:[#allocation24_spill]] }
 0x7ab   : > { %s5944_s30 = scalar_lea.vmem %s6341_s5, %s4920_s24 }
 0x7b4   : > { %v2845_v51 = vpop.f32.mrf.mxu1 }
 0x7b5   : > { %v2895_v61 = vsel %vm1614_vm0, %v2845_v51, 0.0  ;;  %v5876_v51 = vadd.f32 %v5872_v24, %v5869_v17 }
 0x7b6   : > { %v2896_v0 = vadd.f32 %v2895_v61, %v2894_v29  ;;  %v5090_v61 = vld [vmem:[%s5419_s2 + $0x18] sm:$0xff]  ;;  %v5091_v29 = vld [vmem:[%s5381_s26 + $0x70] sm:$0xff] }
 0x7b7   : > { %v2891_v7 = vpop.f32.mrf.mxu3  ;;  %4847 = vmatmul.msk.f32.vlgmr.msra.gmra.mxu3 %vm1614_vm0, %v5876_v51  ;;  %4846 = vmatmul.msk.f32.vlgmr.msra.gmra.mxu2 %vm1614_vm0, %v5876_v51 }
 0x7b8   : > { %v2868_v6 = vpop.f32.mrf.mxu2  ;;  %v2899_v54 = vsel %vm1614_vm0, %v2891_v7, 0.0  ;;  %3209 = vmatpush.msra.mxu3 %v5090_v61  ;;  %v5094_v7 = vld [vmem:[%s5419_s2 + $0x8] sm:$0xff] }
 0x7b9   : > { %v2897_v14 = vsel %vm1614_vm0, %v2868_v6, 0.0  ;;  %v5093_v6 = vld [vmem:[%s5381_s26 + $0x68] sm:$0xff] }
 0x7ba   : > { %v2898_v15 = vadd.f32 %v2897_v14, %v2896_v0  ;;  %v5092_v0 = vld [vmem:[%s5419_s2 + $0x10] sm:$0xff]  ;;  %v5095_v14 = vld [vmem:[%s5381_s26 + $0x60] sm:$0xff] }
 0x7bb   : > { %3210 = vmatpush.msra.mxu3 %v5092_v0 }
 0x7bc   : > { %v2900_v26 = vadd.f32 %v2899_v54, %v2898_v15  ;;  %v5096_v15 = vld [vmem:[%s5419_s2] sm:$0xff]  ;;  %v5097_v54 = vld [vmem:[%s5419_s2 + $0x78] sm:$0xff] }
 0x7bd   : > { %3211 = vmatpush.msra.mxu3 %v5094_v7 }
 0x7be   : > { %v2904_v32 = vadd.f32 %v5860_v22, %v2900_v26  ;;  %v5098_v26 = vld [vmem:[%s5419_s2 + $0x70] sm:$0xff]  ;;  %v5106_v22 = vld [vmem:[%s5377_s23 + $0x40] sm:$0xff] }
 0x7bf   : > { %3212 = vmatpush.msra.mxu3 %v5096_v15  ;;  %4849 = vmatmul.msk.f32.vlgmr.msrb.gmra.mxu2 %vm1614_vm0, %v5876_v51  ;;  %v5101_v15 = vld [vmem:[%s5445_s11] ss:$0 sm:$0xff] }
 0x7c0   : > { %v2905_v30 = vadd.f32 %v2904_v32, %v5662_v27  ;;  %v5089_v27 = vld [vmem:[%s5381_s26 + $0x78] sm:$0xff]  ;;  %4850 = vmatmul.msk.f32.vlgmr.msrb.gmra.mxu3 %vm1614_vm0, %v5876_v51  ;;  %v5099_v32 = vld [vmem:[%s5419_s2 + $0x68] sm:$0xff] }
 0x7c1   : > { %3186 = vmatpush.msra.mxu2 %v5089_v27 }
 0x7c2   : > { %v2906_v21 = vsel %vm1614_vm0, %v2905_v30, 0.0 }
 0x7c3   : > { %2907 = vadd.xlane.f32.xlu0 %v2906_v21  ;;  %3187 = vmatpush.msra.mxu2 %v5091_v29  ;;  %v5100_v21 = vld [vmem:[%s5419_s2 + $0x60] sm:$0xff] }
 0x7c5   : > { %3188 = vmatpush.msra.mxu2 %v5093_v6 }
 0x7c7   : > { %3189 = vmatpush.msra.mxu2 %v5095_v14 }
 0x7c8   : > { %4853 = vmatmul.msk.f32.vlgmr.msra.gmra.mxu2 %vm1614_vm0, %v5876_v51  ;;  %4854 = vmatmul.msk.f32.vlgmr.msra.gmra.mxu3 %vm1614_vm0, %v5869_v17 }
 0x7c9   : > { %3269 = vmatpush.msrb.mxu2 %v5097_v54 }
 0x7cb   : > { %3270 = vmatpush.msrb.mxu2 %v5098_v26 }
 0x7cd   : > { %3271 = vmatpush.msrb.mxu2 %v5099_v32  ;;  %v5102_v32 = vld [vmem:[%s5441_s10] ss:$0 sm:$0xff] }
 0x7cf   : > { %3272 = vmatpush.msrb.mxu2 %v5100_v21  ;;  %v5921_v21 = vld [vmem:[%s1412_s29 + $0x18] sm:$0xff] }
 0x7d0   : > { %4857 = vmatmul.msk.f32.vlgmr.msrb.gmra.mxu2 %vm1614_vm0, %v5869_v17  ;;  %6337 = vst [vmem:[#allocation36_spill] sm:$0xff] %v5921_v21  ;;  %2954 = vmatpush.msrb.mxu0 %v5921_v21  ;;  %v5108_v21 = vld [vmem:[%s5445_s11 + $0x3] ss:$0 sm:$0xff] }
 0x836   : > { %v2908_v27 = vpop.xlane.xlu0 %2907 }
 0x837   : > { %v2909_v61 = vmul.f32 %v2908_v27, %v5554_v36 }
 0x839   : > { %v5905_v29 = vsub.f32 %v2905_v30, %v2909_v61  ;;  %v5924_v61 = vld [vmem:[%s1412_s29 + $0x10] sm:$0xff] }
 0x83a   : > { %v5914_v7 = vpop.f32.mrf.mxu3  ;;  %v3051_v26 = vpop.f32.mrf.mxu2  ;;  %6338 = vst [vmem:[#allocation37_spill] sm:$0xff] %v5924_v61  ;;  %2955 = vmatpush.msrb.mxu0 %v5924_v61  ;;  %v5107_v61 = vld [vmem:[%s5441_s10 + $0x3] ss:$0 sm:$0xff] }
 0x83b   : > { %v2911_v0 = vmul.f32 %v5905_v29, %v5905_v29  ;;  %v3052_v30 = vadd.f32 %v5102_v32, %v3051_v26 }
 0x83d   : > { %v2912_v6 = vsel %vm1614_vm0, %v2911_v0, 0.0  ;;  %v3277_v27 = vmul.f32 0.35355338, %v3052_v30  ;;  %v5928_v0 = vld [vmem:[%s1412_s29 + $0x8] sm:$0xff] }
 0x83e   : > { %2913 = vadd.xlane.f32.xlu1 %v2912_v6  ;;  %6339 = vst [vmem:[#allocation38_spill] sm:$0xff] %v5928_v0  ;;  %v5930_v6 = vld [vmem:[%s1412_s29] sm:$0xff]  ;;  %2956 = vmatpush.msrb.mxu0 %v5928_v0  ;;  %v5105_v30 = vld [vmem:[%s5377_s23 + $0x48] sm:$0xff] }
 0x83f   : > { %6340 = vst [vmem:[#allocation39_spill] sm:$0xff] %v5930_v6 }
 0x840   : > { %2957 = vmatpush.msrb.mxu0 %v5930_v6 }
 0x843   : > { %v3131_v14 = vpop.f32.mrf.mxu3 }
 0x844   : > { %v3132_v54 = vadd.f32 %v5101_v15, %v3131_v14  ;;  %v5103_v14 = vld [vmem:[%s5377_s23 + $0x58] sm:$0xff]  ;;  %v3111_v15 = vpop.f32.mrf.mxu2 }
 0x845   : > { %3086 = vmatpush.msra.mxu0 %v5103_v14  ;;  %v3112_v0 = vadd.f32 %v5107_v61, %v3111_v15  ;;  %v5948_v61 = vld [vmem:[%s5944_s30 + $0x38] sm:$0xff]  ;;  %v5951_v15 = vld [vmem:[%s5944_s30 + $0x30] sm:$0xff] }
 0x846   : > { %4858 = vmatpush.xpose.msk.msrb.mxu3 %vm1889_vm1, %v3132_v54  ;;  %v5104_v54 = vld [vmem:[%s5377_s23 + $0x50] sm:$0xff]  ;;  %6342 = vst [vmem:[#allocation40_spill] sm:$0xff] %v5948_v61  ;;  %2978 = vmatpush.msrb.mxu1 %v5948_v61  ;;  %s6349_s23 = sld [smem:[#allocation25_spill]] }
 0x847   : > { %3087 = vmatpush.msra.mxu0 %v5104_v54  ;;  %v3280_v31 = vmul.f32 0.35355338, %v3112_v0  ;;  %6343 = vst [vmem:[#allocation41_spill] sm:$0xff] %v5951_v15 }
 0x848   : > { %2979 = vmatpush.msrb.mxu1 %v5951_v15  ;;  %v5131_v15 = vld [vmem:[%s5441_s10 + $0x2] ss:$0 sm:$0xff] }
 0x849   : > { %4859 = vmatmul.msk.f32.vlgmr.msrb.gmra.mxu3 %vm1889_vm1, %v3277_v27  ;;  %3088 = vmatpush.msra.mxu0 %v5105_v30 }
 0x84b   : > { %3089 = vmatpush.msra.mxu0 %v5106_v22 }
 0x84c   : > { %v3191_v6 = vpop.f32.mrf.mxu2  ;;  %s1423_s4 = scalar_lea.vmem %s6349_s23, %s5367_s0 }
 0x84d   : > { %v3192_v14 = vadd.f32 %v5108_v21, %v3191_v6  ;;  %v3214_v21 = vpop.f32.mrf.mxu3  ;;  %v5109_v6 = vld [vmem:[%s5462_s3] ss:$0 sm:$0xff] }
 0x84f   : > { %4864 = vmatpush.xpose.msk.msra.mxu2 %vm1889_vm1, %v3192_v14 }
 0x852   : > { %4865 = vmatmul.msk.f32.vlgmr.msra.gmra.mxu2 %vm1889_vm1, %v3280_v31  ;;  %v5960_v31 = vld [vmem:[%s5944_s30 + $0x20] sm:$0xff] }
 0x853   : > { %6345 = vst [vmem:[#allocation43_spill] sm:$0xff] %v5960_v31 }
 0x8b1   : > { %v2914_v26 = vpop.xlane.xlu1 %2913 }
 0x8b2   : > { %v2915_v32 = vmul.f32 %v2914_v26, %v5554_v36  ;;  %v3215_v26 = vadd.f32 %v5109_v6, %v3214_v21 }
 0x8b4   : > { %v2916_v27 = vadd.f32 1e-05, %v2915_v32  ;;  %v5956_v32 = vld [vmem:[%s5944_s30 + $0x28] sm:$0xff]  ;;  %3447 = vmatpush.msra.mxu3 %v3215_v26  ;;  %v5978_v26 = vld [vmem:[%s1435_s6] ss:$0 sm:$0xff] }
 0x8b5   : > { %6344 = vst [vmem:[#allocation42_spill] sm:$0xff] %v5956_v32  ;;  %2980 = vmatpush.msrb.mxu1 %v5956_v32 }
 0x8b6   : > { %5031 = vrsqrt.f32 %v2916_v27  ;;  %3539 = vmatpush.msrb.mxu3 %v5522_v5  ;;  %vm2923_vm7 = vweird.f32 %v2916_v27  ;;  %6348 = vst [vmem:[#allocation46_spill] sm:$0xff] %v5978_v26 }
 0x8b7   : > { %2981 = vmatpush.msrb.mxu1 %v5960_v31  ;;  %v5127_v31 = vld [vmem:[%s5441_s10 + $0x1] ss:$0 sm:$0xff] }
 0x8bc   : > { %v5032_v54 = vpop.eup %5031 }
 0x8bd   : > { %v2918_v22 = vmul.f32 %v5032_v54, %v2916_v27  ;;  %vm2924_vm6 = vweird.f32 %v5032_v54 }
 0x8be   : > { %vm2925_vm8 = vmor %vm2923_vm7, %vm2924_vm6 }
 0x8bf   : > { %v2919_v0 = vmul.f32 %v5032_v54, %v2918_v22  ;;  %v5965_v22 = vld [vmem:[%s5944_s30 + $0x18] sm:$0xff] }
 0x8c0   : > { %6346 = vst [vmem:[#allocation44_spill] sm:$0xff] %v5965_v22  ;;  %2982 = vmatpush.msrb.mxu1 %v5965_v22 }
 0x8c1   : > { %v2920_v30 = vmul.f32 0.5, %v2919_v0  ;;  %v5971_v0 = vld [vmem:[%s1432_s16] ss:$0 sm:$0xff] }
 0x8c2   : > { %6347 = vst [vmem:[#allocation45_spill] sm:$0xff] %v5971_v0 }
 0x8c3   : > { %v2921_v14 = vsub.f32 1.5, %v2920_v30 }
 0x8c5   : > { %v2922_v21 = vmul.f32 %v5032_v54, %v2921_v14  ;;  %v5111_v14 = vld [vmem:[%s5381_s26 + $0x30] sm:$0xff] }
 0x8c7   : > { %v2926_v6 = vsel %vm2925_vm8, %v5032_v54, %v2922_v21  ;;  %v5110_v54 = vld [vmem:[%s5381_s26 + $0x38] sm:$0xff]  ;;  %v5113_v21 = vld [vmem:[%s5381_s26 + $0x20] sm:$0xff] }
 0x8c8   : > { %v2927_v5 = vmul.f32 %v2926_v6, %v5905_v29  ;;  %v5112_v29 = vld [vmem:[%s5381_s26 + $0x28] sm:$0xff]  ;;  %v5114_v6 = vld [vmem:[%s5419_s2 + $0x38] sm:$0xff] }
 0x8ca   : > { %v2931_v30 = vmul.f32 %v5971_v0, %v2927_v5  ;;  %v5115_v5 = vld [vmem:[%s5419_s2 + $0x30] sm:$0xff]  ;;  %v5121_v0 = vld [vmem:[%s5381_s26 + $0x40] sm:$0xff] }
 0x8cc   : > { %v5982_v27 = vadd.f32 %v5978_v26, %v2931_v30  ;;  %v5116_v30 = vld [vmem:[%s5419_s2 + $0x28] sm:$0xff] }
 0x8cd   : > { %v5120_v26 = vld [vmem:[%s5381_s26 + $0x48] sm:$0xff] }
 0x8ce   : > { %4840 = vmatmul.msk.f32.vlgmr.msrb.gmra.mxu0 %vm1614_vm0, %v5982_v27 }
 0x8cf   : > { %3146 = vmatpush.msrb.mxu0 %v5110_v54  ;;  %v5117_v54 = vld [vmem:[%s5419_s2 + $0x20] sm:$0xff] }
 0x8d1   : > { %3147 = vmatpush.msrb.mxu0 %v5111_v14  ;;  %v6003_v14 = vld [vmem:[%s5944_s30 + $0x10] sm:$0xff] }
 0x8d2   : > { %6350 = vst [vmem:[#allocation47_spill] sm:$0xff] %v6003_v14  ;;  %2983 = vmatpush.msrb.mxu1 %v6003_v14  ;;  %v3274_v14 = vpop.f32.mrf.mxu2 }
 0x8d3   : > { %3148 = vmatpush.msrb.mxu0 %v5112_v29  ;;  %v3304_v29 = vpop.f32.mrf.mxu3 }
 0x8d5   : > { %3149 = vmatpush.msrb.mxu0 %v5113_v21  ;;  %v6007_v21 = vld [vmem:[%s5944_s30 + $0x8] sm:$0xff] }
 0x8d6   : > { %4848 = vmatmul.msk.f32.vlgmr.msra.gmra.mxu0 %vm1614_vm0, %v5876_v51  ;;  %6351 = vst [vmem:[#allocation48_spill] sm:$0xff] %v6007_v21  ;;  %2984 = vmatpush.msrb.mxu1 %v6007_v21  ;;  %v5122_v21 = vld [vmem:[%s5462_s3 + $0x3] ss:$0 sm:$0xff] }
 0x8d7   : > { %3229 = vmatpush.msra.mxu0 %v5114_v6  ;;  %v3385_v6 = vsel %vm1889_vm1, %v3304_v29, -inf  ;;  %v3275_v22 = vadd.f32 %v5122_v21, %v3274_v14  ;;  %v5124_v14 = vld [vmem:[%s5419_s2 + $0x50] sm:$0xff]  ;;  %v5125_v21 = vld [vmem:[%s5419_s2 + $0x48] sm:$0xff] }
 0x8d8   : > { %3386 = vmax.xlane.f32.xlu2 %v3385_v6 }
 0x8d9   : > { %3230 = vmatpush.msra.mxu0 %v5115_v5  ;;  %v6012_v5 = vld [vmem:[%s5944_s30] sm:$0xff]  ;;  %3516 = vmatpush.msrb.mxu2 %v3275_v22  ;;  %v5123_v22 = vld [vmem:[%s5419_s2 + $0x58] sm:$0xff] }
 0x8da   : > { %6352 = vst [vmem:[#allocation49_spill] sm:$0xff] %v6012_v5  ;;  %2985 = vmatpush.msrb.mxu1 %v6012_v5  ;;  %v3382_v6 = vpop.f32.mrf.mxu2 }
 0x8db   : > { %3231 = vmatpush.msra.mxu0 %v5116_v30  ;;  %v5118_v30 = vld [vmem:[%s5381_s26 + $0x58] sm:$0xff]  ;;  %3608 = vmatpush.msra.mxu2 %v5528_v8  ;;  %v3394_v5 = vsel %vm1889_vm1, %v3382_v6, -inf }
 0x8dc   : > { %3166 = vmatpush.msra.mxu1 %v5118_v30  ;;  %3395 = vmax.xlane.f32.xlu0 %v3394_v5  ;;  %v6025_v30 = vld [vmem:[%s1415_s25] ss:$0 sm:$0xff] }
 0x8dd   : > { %3232 = vmatpush.msra.mxu0 %v5117_v54  ;;  %v5119_v54 = vld [vmem:[%s5381_s26 + $0x50] sm:$0xff]  ;;  %6353 = vst [vmem:[#allocation50_spill] sm:$0xff] %v6025_v30  ;;  %v5126_v5 = vld [vmem:[%s5419_s2 + $0x40] sm:$0xff] }
 0x8de   : > { %4851 = vmatmul.msk.f32.vlgmr.msrb.gmra.mxu0 %vm1614_vm0, %v5876_v51  ;;  %3167 = vmatpush.msra.mxu1 %v5119_v54 }
 0x8e0   : > { %3168 = vmatpush.msra.mxu1 %v5120_v26 }
 0x8e2   : > { %3169 = vmatpush.msra.mxu1 %v5121_v0 }
 0x8e6   : > { %4855 = vmatmul.msk.f32.vlgmr.msra.gmra.mxu0 %vm1614_vm0, %v5869_v17 }
 0x94b   : > { %v2959_v26 = vpop.f32.mrf.mxu0 }
 0x94c   : > { %v2960_v0 = vadd.f32 %v6025_v30, %v2959_v26  ;;  %v3072_v26 = vadd.f32 %v5127_v31, %v5914_v7 }
 0x94e   : > { %v2962_v54 = vmax.f32 %v2960_v0, 0.0  ;;  %v5128_v0 = vld [vmem:[%s5445_s11 + $0x1] ss:$0 sm:$0xff] }
 0x950   : > { %4841 = vmatmul.msk.f32.vlgmr.msrb.gmra.mxu1 %vm2966_vm9, %v2962_v54  ;;  %v3278_v54 = vmul.f32 0.35355338, %v3072_v26 }
 0x951   : > { %3249 = vmatpush.msrb.mxu1 %v5123_v22  ;;  %v3387_v22 = vpop.xlane.xlu2 %3386 }
 0x953   : > { %v3091_v8 = vpop.f32.mrf.mxu0  ;;  %3250 = vmatpush.msrb.mxu1 %v5124_v14  ;;  %v3397_v14 = vsub.f32 %v3304_v29, %v3387_v22  ;;  %v5132_v22 = vld [vmem:[%s5445_s11 + $0x2] ss:$0 sm:$0xff] }
 0x954   : > { %v3092_v61 = vadd.f32 %v5131_v15, %v3091_v8  ;;  %v5133_v8 = vld [vmem:[%s5462_s3 + $0x2] ss:$0 sm:$0xff] }
 0x955   : > { %3251 = vmatpush.msrb.mxu1 %v5125_v21  ;;  %v5129_v21 = vld [vmem:[%s5462_s3 + $0x1] ss:$0 sm:$0xff] }
 0x957   : > { %3252 = vmatpush.msrb.mxu1 %v5126_v5 }
 0x958   : > { %4852 = vmatmul.msk.f32.vlgmr.msra.gmra.mxu1 %vm1614_vm0, %v5876_v51  ;;  %v3401_v51 = vmul.f32 1.442695, %v3397_v14 }
 0x95a   : > { %5033 = vpow2.f32 %v3401_v51 }
 0x95b   : > { %v3151_v30 = vpop.f32.mrf.mxu0 }
 0x95c   : > { %v3152_v32 = vadd.f32 %v5128_v0, %v3151_v30  ;;  %v3396_v0 = vpop.xlane.xlu0 %3395 }
 0x95e   : > { %4860 = vmatpush.xpose.msk.msrb.mxu0 %vm1889_vm1, %v3152_v32  ;;  %v5130_v32 = vld [vmem:[%s5519_s8 + $0x8] sm:$0xff] }
 0x960   : > { %4856 = vmatmul.msk.f32.vlgmr.msrb.gmra.mxu1 %vm1614_vm0, %v5869_v17  ;;  %v5034_v7 = vpop.eup %5033 }
 0x961   : > { %4861 = vmatmul.msk.f32.vlgmr.msrb.gmra.mxu0 %vm1889_vm1, %v3278_v54  ;;  %v3409_v31 = vsel %vm1889_vm1, %v5034_v7, 0.0  ;;  %v3400_v54 = vsub.f32 %v3382_v6, %v3396_v0  ;;  %v5134_v0 = vld [vmem:[%s5519_s8 + $0x10] sm:$0xff] }
 0x962   : > { %3410 = vadd.xlane.f32.xlu0 %v3409_v31  ;;  %v3279_v31 = vmul.f32 0.35355338, %v3092_v61 }
 0x963   : > { %v3234_v30 = vpop.f32.mrf.mxu0  ;;  %v3407_v51 = vmul.f32 1.442695, %v3400_v54 }
 0x964   : > { %v3235_v5 = vadd.f32 %v5129_v21, %v3234_v30 }
 0x965   : > { %5035 = vpow2.f32 %v3407_v51 }
 0x966   : > { %3470 = vmatpush.msra.mxu0 %v3235_v5 }
 0x968   : > { %3562 = vmatpush.msrb.mxu0 %v5130_v32 }
 0x96b   : > { %v5036_v5 = vpop.eup %5035 }
 0x96c   : > { %v3418_v6 = vsel %vm1889_vm1, %v5036_v5, 0.0 }
 0x9cd   : > { %v6045_v26 = vpop.f32.mrf.mxu1 }
 0x9d5   : > { %v3171_v29 = vpop.f32.mrf.mxu1 }
 0x9d6   : > { %v3172_v14 = vadd.f32 %v5132_v22, %v3171_v29  ;;  %v3411_v29 = vpop.xlane.xlu0 %3410 }
 0x9d7   : > { %5037 = vrcp.f32 %v3411_v29 }
 0x9d8   : > { %4862 = vmatpush.xpose.msk.msra.mxu1 %vm1889_vm1, %v3172_v14 }
 0x9db   : > { %4863 = vmatmul.msk.f32.vlgmr.msra.gmra.mxu1 %vm1889_vm1, %v3279_v31 }
 0x9dd   : > { %v3254_v15 = vpop.f32.mrf.mxu1  ;;  %v5038_v61 = vpop.eup %5037 }
 0x9de   : > { %v3330_v30 = vpop.f32.mrf.mxu0  ;;  %v3255_v32 = vadd.f32 %v5133_v8, %v3254_v15  ;;  %v3425_v54 = vmul.f32 %v5038_v61, %v5034_v7 }
 0x9df   : > { %v3388_v21 = vsel %vm1889_vm1, %v3330_v30, -inf }
 0x9e0   : > { %3389 = vmax.xlane.f32.xlu1 %v3388_v21  ;;  %3493 = vmatpush.msrb.mxu1 %v3255_v32 }
 0x9e1   : > { %4866 = vmatmul.msk.f32.vlgmr.msra.gmra.mxu3 %vm1889_vm1, %v3425_v54 }
 0x9e2   : > { %3585 = vmatpush.msra.mxu1 %v5134_v0  ;;  %3663 = vmatpush.msra.mxu3 %v5571_v41  ;;  %v5139_v0 = vld [vmem:[%s5568_s9 + $0x20] sm:$0xff] }
 0x9e4   : > { %3664 = vmatpush.msra.mxu3 %v5578_v45 }
 0x9e6   : > { %3665 = vmatpush.msra.mxu3 %v5588_v49  ;;  %v5135_v49 = vld [vmem:[%s5568_s9 + $0x78] sm:$0xff] }
 0x9e8   : > { %3419 = vadd.xlane.f32.xlu1 %v3418_v6  ;;  %3666 = vmatpush.msra.mxu3 %v5597_v53 }
 0xa53   : > { %v3390_v22 = vpop.xlane.xlu1 %3389 }
 0xa54   : > { %v3398_v14 = vsub.f32 %v3330_v30, %v3390_v22 }
 0xa56   : > { %v3403_v51 = vmul.f32 1.442695, %v3398_v14  ;;  %v5140_v14 = vld [vmem:[%s5568_s9 + $0x58] sm:$0xff] }
 0xa58   : > { %5039 = vpow2.f32 %v3403_v51  ;;  %v3356_v31 = vpop.f32.mrf.mxu1  ;;  %v5141_v51 = vld [vmem:[%s5568_s9 + $0x50] sm:$0xff] }
 0xa59   : > { %v3391_v21 = vsel %vm1889_vm1, %v3356_v31, -inf }
 0xa5a   : > { %3392 = vmax.xlane.f32.xlu2 %v3391_v21  ;;  %v5146_v21 = vld [vmem:[%s5607_s21 + $0x28] sm:$0xff] }
 0xa5b   : > { %v3420_v7 = vpop.xlane.xlu1 %3419 }
 0xa5c   : > { %5041 = vrcp.f32 %v3420_v7 }
 0xa5e   : > { %v5040_v6 = vpop.eup %5039 }
 0xa5f   : > { %v3412_v41 = vsel %vm1889_vm1, %v5040_v6, 0.0 }
 0xa62   : > { %v5042_v15 = vpop.eup %5041  ;;  %3413 = vadd.xlane.f32.xlu2 %v3412_v41  ;;  %v5148_v41 = vld [vmem:[%s5607_s21 + $0x50] sm:$0xff] }
 0xa63   : > { %v3428_v45 = vmul.f32 %v5042_v15, %v5036_v5  ;;  %v5149_v15 = vld [vmem:[%s5607_s21 + $0x48] sm:$0xff] }
 0xa64   : > { %v3449_v53 = vpop.f32.mrf.mxu3 }
 0xa65   : > { %4869 = vmatmul.msk.f32.vlgmr.msrb.gmra.mxu2 %vm1889_vm1, %v3428_v45  ;;  %4870 = vmatmul.msk.f32.vlgmr.msrb.gmra.mxu3 %vm1889_vm1, %v3449_v53 }
 0xa66   : > { %3723 = vmatpush.msrb.mxu2 %v5135_v49  ;;  %3746 = vmatpush.msrb.mxu3 %v5612_v58 }
 0xa68   : > { %3724 = vmatpush.msrb.mxu2 %v5584_v48  ;;  %3747 = vmatpush.msrb.mxu3 %v5622_v63  ;;  %v5136_v63 = vld [vmem:[%s5568_s9 + $0x38] sm:$0xff] }
 0xa6a   : > { %3725 = vmatpush.msrb.mxu2 %v5594_v52  ;;  %3748 = vmatpush.msrb.mxu3 %v5631_v3  ;;  %v5137_v3 = vld [vmem:[%s5568_s9 + $0x30] sm:$0xff] }
 0xa6c   : > { %3726 = vmatpush.msrb.mxu2 %v5603_v56  ;;  %3749 = vmatpush.msrb.mxu3 %v5641_v10  ;;  %v5138_v10 = vld [vmem:[%s5568_s9 + $0x28] sm:$0xff] }
 0xacd   : > { %v3393_v30 = vpop.xlane.xlu2 %3392 }
 0xace   : > { %v3399_v48 = vsub.f32 %v3356_v31, %v3393_v30  ;;  %v5145_v31 = vld [vmem:[%s5607_s21 + $0x30] sm:$0xff] }
 0xad0   : > { %v3405_v5 = vmul.f32 1.442695, %v3399_v48 }
 0xad2   : > { %5043 = vpow2.f32 %v3405_v5 }
 0xad5   : > { %v3414_v52 = vpop.xlane.xlu2 %3413 }
 0xad6   : > { %5045 = vrcp.f32 %v3414_v52 }
 0xad8   : > { %v5044_v56 = vpop.eup %5043 }
 0xad9   : > { %v3415_v8 = vsel %vm1889_vm1, %v5044_v56, 0.0 }
 0xada   : > { %3416 = vadd.xlane.f32.xlu0 %v3415_v8 }
 0xadc   : > { %v5046_v58 = vpop.eup %5045 }
 0xadd   : > { %v3426_v32 = vmul.f32 %v5046_v58, %v5040_v6  ;;  %v5147_v6 = vld [vmem:[%s5607_s21 + $0x58] sm:$0xff] }
 0xadf   : > { %4867 = vmatmul.msk.f32.vlgmr.msra.gmra.mxu0 %vm1889_vm1, %v3426_v32  ;;  %v5150_v32 = vld [vmem:[%s5536_s13] ss:$0 sm:$0xff]  ;;  %s1441_s13 = scalar_lea.vmem %s5348_s12, %s5367_s0 }
 0xae0   : > { %3683 = vmatpush.msra.mxu0 %v5136_v63 }
 0xae2   : > { %3684 = vmatpush.msra.mxu0 %v5137_v3 }
 0xae4   : > { %3685 = vmatpush.msra.mxu0 %v5138_v10 }
 0xae6   : > { %3686 = vmatpush.msra.mxu0 %v5139_v0 }
 0xae8   : > { %v3518_v29 = vpop.f32.mrf.mxu2  ;;  %v3541_v49 = vpop.f32.mrf.mxu3 }
 0xae9   : > { %4873 = vmatmul.msk.f32.vlgmr.msra.gmra.mxu2 %vm1889_vm1, %v3518_v29  ;;  %v3613_v30 = vsel %vm1614_vm0, %v3541_v49, 0.0 }
 0xaea   : > { %3806 = vmatpush.msra.mxu2 %v5619_v62 }
 0xaec   : > { %3807 = vmatpush.msra.mxu2 %v5628_v2  ;;  %v5142_v2 = vld [vmem:[%s5568_s9 + $0x48] sm:$0xff] }
 0xaee   : > { %3808 = vmatpush.msra.mxu2 %v5637_v9  ;;  %v5143_v9 = vld [vmem:[%s5568_s9 + $0x40] sm:$0xff]  ;;  %s1438_s9 = scalar_lea.vmem %s5343_s27, %s5367_s0 }
 0xaf0   : > { %3809 = vmatpush.msra.mxu2 %v5651_v13  ;;  %v5144_v13 = vld [vmem:[%s5607_s21 + $0x38] sm:$0xff]  ;;  %s6371_s21 = sld [smem:[#allocation29_spill]] }
 0xb4d   : > { %v3417_v61 = vpop.xlane.xlu0 %3416 }
 0xb4e   : > { %5047 = vrcp.f32 %v3417_v61 }
 0xb54   : > { %v5048_v54 = vpop.eup %5047 }
 0xb55   : > { %v3427_v22 = vmul.f32 %v5048_v54, %v5044_v56 }
 0xb57   : > { %4868 = vmatmul.msk.f32.vlgmr.msrb.gmra.mxu1 %vm1889_vm1, %v3427_v22 }
 0xb58   : > { %3703 = vmatpush.msrb.mxu1 %v5140_v14 }
 0xb5a   : > { %3704 = vmatpush.msrb.mxu1 %v5141_v51 }
 0xb5c   : > { %v3472_v62 = vpop.f32.mrf.mxu0  ;;  %3705 = vmatpush.msrb.mxu1 %v5142_v2 }
 0xb5d   : > { %4871 = vmatmul.msk.f32.vlgmr.msrb.gmra.mxu0 %vm1889_vm1, %v3472_v62 }
 0xb5e   : > { %3706 = vmatpush.msrb.mxu1 %v5143_v9  ;;  %3766 = vmatpush.msrb.mxu0 %v5144_v13 }
 0xb60   : > { %3767 = vmatpush.msrb.mxu0 %v5145_v31 }
 0xb62   : > { %3768 = vmatpush.msrb.mxu0 %v5146_v21 }
 0xb64   : > { %3769 = vmatpush.msrb.mxu0 %v5644_v11 }
 0xb6c   : > { %v3610_v48 = vpop.f32.mrf.mxu2 }
 0xb6d   : > { %v3618_v8 = vsel %vm1614_vm0, %v3610_v48, 0.0  ;;  %v5153_v48 = vld [vmem:[%s5666_s15 + $0x38] sm:$0xff] }
 0xbd4   : > { %v3495_v7 = vpop.f32.mrf.mxu1 }
 0xbd5   : > { %4872 = vmatmul.msk.f32.vlgmr.msra.gmra.mxu1 %vm1889_vm1, %v3495_v7 }
 0xbd6   : > { %3786 = vmatpush.msra.mxu1 %v5147_v6  ;;  %v5151_v6 = vld [vmem:[%s5546_s14] ss:$0 sm:$0xff] }
 0xbd8   : > { %3787 = vmatpush.msra.mxu1 %v5148_v41 }
 0xbda   : > { %3788 = vmatpush.msra.mxu1 %v5149_v15  ;;  %v3564_v45 = vpop.f32.mrf.mxu0  ;;  %v5152_v15 = vld [vmem:[%s5550_s19] ss:$0 sm:$0xff] }
 0xbdb   : > { %v3614_v53 = vsel %vm1614_vm0, %v3564_v45, 0.0 }
 0xbdc   : > { %3789 = vmatpush.msra.mxu1 %v5648_v12  ;;  %v3615_v11 = vadd.f32 %v3614_v53, %v3613_v30  ;;  %v4843_v53 = vld [vmem:[%s5671_s17 + $0x8] sm:$0xff]  ;;  %s6370_s17 = sld [smem:[#allocation31_spill]] }
 0xbdd   : > { %v4845_v30 = vld [vmem:[%s5674_s22 + $0x8] sm:$0xff] }
 0xbe2   : > { %s6237_s3 = scalar_lea.vmem %s6371_s21, %s6370_s17 }
 0xc52   : > { %v3587_v5 = vpop.f32.mrf.mxu1 }
 0xc53   : > { %v3616_v52 = vsel %vm1614_vm0, %v3587_v5, 0.0 }
 0xc54   : > { %v3617_v56 = vadd.f32 %v3616_v52, %v3615_v11  ;;  %v5154_v11 = vld [vmem:[%s5666_s15 + $0x18] sm:$0xff] }
 0xc56   : > { %v3619_v58 = vadd.f32 %v3618_v8, %v3617_v56 }
 0xc58   : > { %v3620_v63 = vadd.f32 %v5150_v32, %v3619_v58 }
 0xc5a   : > { %v3621_v3 = vadd.f32 %v5869_v17, %v3620_v63 }
 0xc5c   : > { %v3622_v12 = vsel %vm1614_vm0, %v3621_v3, 0.0 }
 0xc5d   : > { %3623 = vadd.xlane.f32.xlu1 %v3622_v12 }
 0xcd0   : > { %v3624_v10 = vpop.xlane.xlu1 %3623 }
 0xcd1   : > { %v3625_v0 = vmul.f32 %v3624_v10, %v5554_v36 }
 0xcd3   : > { %v3626_v29 = vsub.f32 %v3621_v3, %v3625_v0  ;;  %v6355_v3 = vld [vmem:[#allocation33_spill] sm:$0xff] }
 0xcd5   : > { %v3627_v61 = vmul.f32 %v3626_v29, %v3626_v29 }
 0xcd7   : > { %v3628_v54 = vsel %vm1614_vm0, %v3627_v61, 0.0 }
 0xcd8   : > { %3629 = vadd.xlane.f32.xlu2 %v3628_v54 }
 0xd4b   : > { %v3630_v22 = vpop.xlane.xlu2 %3629 }
 0xd4c   : > { %v3631_v14 = vmul.f32 %v3630_v22, %v5554_v36 }
 0xd4e   : > { %v3632_v51 = vadd.f32 1e-05, %v3631_v14 }
 0xd50   : > { %5049 = vrsqrt.f32 %v3632_v51  ;;  %vm3639_vm11 = vweird.f32 %v3632_v51 }
 0xd56   : > { %v5050_v62 = vpop.eup %5049 }
 0xd57   : > { %v3634_v17 = vmul.f32 %v5050_v62, %v3632_v51  ;;  %vm3640_vm10 = vweird.f32 %v5050_v62 }
 0xd58   : > { %vm3641_vm12 = vmor %vm3639_vm11, %vm3640_vm10 }
 0xd59   : > { %v3635_v2 = vmul.f32 %v5050_v62, %v3634_v17 }
 0xd5b   : > { %v3636_v9 = vmul.f32 0.5, %v3635_v2 }
 0xd5d   : > { %v3637_v13 = vsub.f32 1.5, %v3636_v9 }
 0xd5f   : > { %v3638_v31 = vmul.f32 %v5050_v62, %v3637_v13 }
 0xd61   : > { %v3642_v21 = vsel %vm3641_vm12, %v5050_v62, %v3638_v31 }
 0xd62   : > { %v3643_v7 = vmul.f32 %v3642_v21, %v3626_v29 }
 0xd64   : > { %v3644_v41 = vmul.f32 %v5151_v6, %v3643_v7 }
 0xd66   : > { %v6110_v45 = vadd.f32 %v5152_v15, %v3644_v41 }
 0xd68   : > { %v3646_v49 = vadd.f32 %v5872_v24, %v6110_v45  ;;  %v3647_v24 = vadd.f32 %v4845_v30, %v4843_v53 }
 0xd6a   : > { %4874 = vmatmul.msk.f32.vlgmr.msra.gmra.mxu3 %vm1614_vm0, %v3646_v49  ;;  %4875 = vmatmul.msk.f32.vlgmr.msra.gmra.mxu0 %vm1614_vm0, %v3646_v49 }
 0xd6b   : > { %4876 = vmatmul.msk.f32.vlgmr.msrb.gmra.mxu1 %vm1614_vm0, %v3646_v49  ;;  %4877 = vmatmul.msk.f32.vlgmr.msrb.gmra.mxu2 %vm1614_vm0, %v3646_v49 }
 0xd6c   : > { %3849 = vmatpush.msra.mxu0 %v5153_v48  ;;  %3869 = vmatpush.msrb.mxu1 %v5717_v39 }
 0xd6d   : > { %3829 = vmatpush.msra.mxu3 %v5154_v11  ;;  %3889 = vmatpush.msrb.mxu2 %v5720_v40  ;;  %v6178_v11 = vld [vmem:[%s1423_s4] ss:$0 sm:$0xff] }
 0xd6e   : > { %3850 = vmatpush.msra.mxu0 %v5700_v34  ;;  %3870 = vmatpush.msrb.mxu1 %v5728_v42 }
 0xd6f   : > { %3830 = vmatpush.msra.mxu3 %v5697_v33  ;;  %3890 = vmatpush.msrb.mxu2 %v5731_v43  ;;  %v5155_v33 = vld [vmem:[%s5666_s15] sm:$0xff] }
 0xd70   : > { %3851 = vmatpush.msra.mxu0 %v5708_v37  ;;  %3871 = vmatpush.msrb.mxu1 %v5736_v44 }
 0xd71   : > { %3831 = vmatpush.msra.mxu3 %v5705_v35  ;;  %3891 = vmatpush.msrb.mxu2 %v5739_v46 }
 0xd72   : > { %4878 = vmatmul.msk.f32.vlgmr.msrb.gmra.mxu3 %vm1614_vm0, %v3647_v24  ;;  %4879 = vmatmul.msk.f32.vlgmr.msrb.gmra.mxu0 %vm1614_vm0, %v3647_v24 }
 0xd73   : > { %4880 = vmatmul.msk.f32.vlgmr.msra.gmra.mxu1 %vm1614_vm0, %v3647_v24  ;;  %4881 = vmatmul.msk.f32.vlgmr.msra.gmra.mxu2 %vm1614_vm0, %v3647_v24 }
 0xd74   : > { %3852 = vmatpush.msra.mxu0 %v5714_v38  ;;  %3872 = vmatpush.msrb.mxu1 %v5744_v47 }
 0xd75   : > { %3832 = vmatpush.msra.mxu3 %v5155_v33  ;;  %3892 = vmatpush.msrb.mxu2 %v5747_v50  ;;  %v2988_v33 = vadd.f32 %v6178_v11, %v6045_v26 }
 0xd7a   : > { %4883 = vmatmul.msk.f32.vlgmr.msra.gmra.mxu0 %vm1614_vm0, %v4843_v53  ;;  %4882 = vmatmul.msk.f32.vlgmr.msra.gmra.mxu3 %vm1614_vm0, %v4843_v53 }
 0xd7b   : > { %4884 = vmatmul.msk.f32.vlgmr.msrb.gmra.mxu1 %vm1614_vm0, %v4843_v53  ;;  %4885 = vmatmul.msk.f32.vlgmr.msrb.gmra.mxu2 %vm1614_vm0, %v4843_v53 }
 0xde7   : > { %v3688_v34 = vpop.f32.mrf.mxu0 }
 0xde8   : > { %v3708_v35 = vpop.f32.mrf.mxu1  ;;  %v3689_v38 = vadd.f32 %v5757_v57, %v3688_v34 }
 0xde9   : > { %v3709_v42 = vadd.f32 %v5770_v18, %v3708_v35  ;;  %v6184_v35 = vadd.f32 %v2988_v33, %v5982_v27  ;;  %v6359_v27 = vld [vmem:[#allocation42_spill] sm:$0xff] }
 0xdea   : > { %v3898_v47 = vmul.f32 0.35355338, %v3689_v38 }
 0xdeb   : > { %v3899_v50 = vmul.f32 0.35355338, %v3709_v42  ;;  %v6357_v42 = vld [vmem:[#allocation40_spill] sm:$0xff] }
 0xded   : > { %v3668_v37 = vpop.f32.mrf.mxu3 }
 0xdee   : > { %v3728_v39 = vpop.f32.mrf.mxu2  ;;  %v3669_v5 = vadd.f32 %v5754_v55, %v3668_v37  ;;  %v2991_v37 = vsel %vm1614_vm0, %v6184_v35, 0.0 }
 0xdef   : > { %v3771_v40 = vpop.f32.mrf.mxu0  ;;  %v3729_v57 = vadd.f32 %v5773_v19, %v3728_v39 }
 0xdf0   : > { %v3772_v43 = vadd.f32 %v5763_v60, %v3771_v40  ;;  %v3791_v44 = vpop.f32.mrf.mxu1  ;;  %v3897_v32 = vmul.f32 0.35355338, %v3669_v5 }
 0xdf1   : > { %v3792_v46 = vadd.f32 %v5778_v20, %v3791_v44  ;;  %v3900_v63 = vmul.f32 0.35355338, %v3729_v57  ;;  %v6358_v44 = vld [vmem:[#allocation41_spill] sm:$0xff] }
 0xdf2   : > { %4888 = vmatpush.xpose.msk.msrb.mxu0 %vm1889_vm1, %v3772_v43 }
 0xdf3   : > { %4890 = vmatpush.xpose.msk.msra.mxu1 %vm1889_vm1, %v3792_v46  ;;  %v6360_v46 = vld [vmem:[#allocation43_spill] sm:$0xff] }
 0xdf5   : > { %v3751_v52 = vpop.f32.mrf.mxu3  ;;  %4889 = vmatmul.msk.f32.vlgmr.msrb.gmra.mxu0 %vm1889_vm1, %v3898_v47 }
 0xdf6   : > { %v3752_v18 = vadd.f32 %v5760_v59, %v3751_v52  ;;  %v3811_v56 = vpop.f32.mrf.mxu2  ;;  %4891 = vmatmul.msk.f32.vlgmr.msra.gmra.mxu1 %vm1889_vm1, %v3899_v50  ;;  %v6361_v50 = vld [vmem:[#allocation44_spill] sm:$0xff] }
 0xdf7   : > { %v3812_v60 = vadd.f32 %v5781_v23, %v3811_v56  ;;  %v3854_v20 = vpop.f32.mrf.mxu0  ;;  %v6354_v23 = vld [vmem:[#allocation32_spill] sm:$0xff]  ;;  %v6362_v56 = vld [vmem:[#allocation47_spill] sm:$0xff] }
 0xdf8   : > { %4886 = vmatpush.xpose.msk.msrb.mxu3 %vm1889_vm1, %v3752_v18  ;;  %v3855_v8 = vadd.f32 %v5797_v16, %v3854_v20  ;;  %v3874_v58 = vpop.f32.mrf.mxu1  ;;  %v6364_v20 = vld [vmem:[#allocation48_spill] sm:$0xff] }
 0xdf9   : > { %4892 = vmatpush.xpose.msk.msra.mxu2 %vm1889_vm1, %v3812_v60  ;;  %v3875_v55 = vadd.f32 %v5802_v1, %v3874_v58  ;;  %v6356_v1 = vld [vmem:[#allocation34_spill] sm:$0xff]  ;;  %v6363_v60 = vld [vmem:[#allocation36_spill] sm:$0xff]  ;;  %v6366_v58 = vld [vmem:[#allocation49_spill] sm:$0xff] }
 0xdfa   : > { %4090 = vmatpush.msra.mxu0 %v3855_v8  ;;  %v6365_v8 = vld [vmem:[#allocation37_spill] sm:$0xff] }
 0xdfb   : > { %4887 = vmatmul.msk.f32.vlgmr.msrb.gmra.mxu3 %vm1889_vm1, %v3897_v32  ;;  %4113 = vmatpush.msrb.mxu1 %v3875_v55  ;;  %v6367_v55 = vld [vmem:[#allocation38_spill] sm:$0xff] }
 0xdfc   : > { %4893 = vmatmul.msk.f32.vlgmr.msra.gmra.mxu2 %vm1889_vm1, %v3900_v63  ;;  %4182 = vmatpush.msrb.mxu0 %v5836_v25 }
 0xdfd   : > { %4205 = vmatpush.msra.mxu1 %v5826_v4  ;;  %v3834_v59 = vpop.f32.mrf.mxu3 }
 0xdfe   : > { %v3894_v19 = vpop.f32.mrf.mxu2  ;;  %v3835_v16 = vadd.f32 %v6354_v23, %v3834_v59  ;;  %v6368_v59 = vld [vmem:[#allocation39_spill] sm:$0xff] }
 0xdff   : > { %v3895_v12 = vadd.f32 %v6355_v3, %v3894_v19 }
 0xe00   : > { %4067 = vmatpush.msra.mxu3 %v3835_v16 }
 0xe01   : > { %4136 = vmatpush.msrb.mxu2 %v3895_v12 }
 0xe02   : > { %4159 = vmatpush.msrb.mxu3 %v5823_v28 }
 0xe03   : > { %4228 = vmatpush.msra.mxu2 %v6356_v1 }
 0xe72   : > { %v3950_v10 = vpop.f32.mrf.mxu0 }
 0xe73   : > { %v4008_v0 = vsel %vm1889_vm1, %v3950_v10, -inf  ;;  %v3976_v54 = vpop.f32.mrf.mxu1 }
 0xe74   : > { %4009 = vmax.xlane.f32.xlu2 %v4008_v0  ;;  %v4011_v22 = vsel %vm1889_vm1, %v3976_v54, -inf }
 0xe7e   : > { %v3924_v29 = vpop.f32.mrf.mxu3 }
 0xe7f   : > { %v4002_v25 = vpop.f32.mrf.mxu2  ;;  %v4005_v4 = vsel %vm1889_vm1, %v3924_v29, -inf }
 0xe80   : > { %v4014_v61 = vsel %vm1889_vm1, %v4002_v25, -inf  ;;  %4006 = vmax.xlane.f32.xlu0 %v4005_v4 }
 0xe81   : > { %4015 = vmax.xlane.f32.xlu1 %v4014_v61 }
 0xe88   : > { %4012 = vmax.xlane.f32.xlu0 %v4011_v22 }
 0xee7   : > { %v4010_v14 = vpop.xlane.xlu2 %4009 }
 0xee8   : > { %v4018_v28 = vsub.f32 %v3950_v10, %v4010_v14 }
 0xeea   : > { %v4023_v51 = vmul.f32 1.442695, %v4018_v28  ;;  %v6369_v28 = vld [vmem:[#allocation35_spill] sm:$0xff] }
 0xeec   : > { %5051 = vpow2.f32 %v4023_v51 }
 0xef2   : > { %v5052_v62 = vpop.eup %5051 }
 0xef3   : > { %v4007_v17 = vpop.xlane.xlu0 %4006  ;;  %v4032_v2 = vsel %vm1889_vm1, %v5052_v62, 0.0 }
 0xef4   : > { %v4016_v9 = vpop.xlane.xlu1 %4015  ;;  %v4017_v13 = vsub.f32 %v3924_v29, %v4007_v17  ;;  %4033 = vadd.xlane.f32.xlu0 %v4032_v2 }
 0xef5   : > { %v4020_v31 = vsub.f32 %v4002_v25, %v4016_v9 }
 0xef6   : > { %v4021_v21 = vmul.f32 1.442695, %v4017_v13 }
 0xef7   : > { %v4027_v7 = vmul.f32 1.442695, %v4020_v31 }
 0xef8   : > { %5053 = vpow2.f32 %v4021_v21 }
 0xef9   : > { %5055 = vpow2.f32 %v4027_v7 }
 0xefb   : > { %v4013_v6 = vpop.xlane.xlu0 %4012 }
 0xefc   : > { %v4019_v41 = vsub.f32 %v3976_v54, %v4013_v6 }
 0xefe   : > { %v5054_v15 = vpop.eup %5053  ;;  %v4025_v49 = vmul.f32 1.442695, %v4019_v41 }
 0xeff   : > { %v5056_v53 = vpop.eup %5055  ;;  %v4029_v30 = vsel %vm1889_vm1, %v5054_v15, 0.0 }
 0xf00   : > { %5057 = vpow2.f32 %v4025_v49  ;;  %v4038_v48 = vsel %vm1889_vm1, %v5056_v53, 0.0  ;;  %4030 = vadd.xlane.f32.xlu1 %v4029_v30 }
 0xf01   : > { %4039 = vadd.xlane.f32.xlu2 %v4038_v48 }
 0xf06   : > { %v5058_v24 = vpop.eup %5057 }
 0xf07   : > { %v4035_v34 = vsel %vm1889_vm1, %v5058_v24, 0.0 }
 0xf08   : > { %4036 = vadd.xlane.f32.xlu1 %v4035_v34 }
 0xf10   : > { %2992 = vadd.xlane.f32.xlu1 %v2991_v37 }
 0xf67   : > { %v4034_v39 = vpop.xlane.xlu0 %4033 }
 0xf68   : > { %5059 = vrcp.f32 %v4034_v39 }
 0xf6e   : > { %v5060_v38 = vpop.eup %5059 }
 0xf6f   : > { %v4046_v40 = vmul.f32 %v5060_v38, %v5052_v62 }
 0xf71   : > { %4895 = vmatmul.msk.f32.vlgmr.msra.gmra.mxu0 %vm1889_vm1, %v4046_v40 }
 0xf72   : > { %4301 = vmatpush.msra.mxu0 %v6357_v42 }
 0xf73   : > { %v4031_v43 = vpop.xlane.xlu1 %4030 }
 0xf74   : > { %v4040_v26 = vpop.xlane.xlu2 %4039  ;;  %5061 = vrcp.f32 %v4031_v43  ;;  %4302 = vmatpush.msra.mxu0 %v6358_v44 }
 0xf75   : > { %5063 = vrcp.f32 %v4040_v26 }
 0xf76   : > { %4303 = vmatpush.msra.mxu0 %v6359_v27 }
 0xf78   : > { %4304 = vmatpush.msra.mxu0 %v6360_v46 }
 0xf7a   : > { %v5062_v47 = vpop.eup %5061  ;;  %4305 = vmatpush.msra.mxu0 %v6361_v50 }
 0xf7b   : > { %v5064_v5 = vpop.eup %5063  ;;  %v4045_v52 = vmul.f32 %v5062_v47, %v5054_v15  ;;  %v4037_v57 = vpop.xlane.xlu1 %4036  ;;  %v6372_v47 = vld [vmem:[#allocation45_spill] sm:$0xff] }
 0xf7c   : > { %v4048_v18 = vmul.f32 %v5064_v5, %v5056_v53  ;;  %5065 = vrcp.f32 %v4037_v57  ;;  %4306 = vmatpush.msra.mxu0 %v6362_v56  ;;  %v4993_v56 = vld [vmem:[%s1438_s9] ss:$0 sm:$0xff] }
 0xf7d   : > { %4894 = vmatmul.msk.f32.vlgmr.msra.gmra.mxu3 %vm1889_vm1, %v4045_v52  ;;  %v6373_v52 = vld [vmem:[#allocation46_spill] sm:$0xff] }
 0xf7e   : > { %4897 = vmatmul.msk.f32.vlgmr.msrb.gmra.mxu2 %vm1889_vm1, %v4048_v18  ;;  %4281 = vmatpush.msra.mxu3 %v6363_v60 }
 0xf7f   : > { %4307 = vmatpush.msra.mxu0 %v6364_v20  ;;  %v4994_v20 = vld [vmem:[%s1441_s13] ss:$0 sm:$0xff] }
 0xf80   : > { %4282 = vmatpush.msra.mxu3 %v6365_v8 }
 0xf81   : > { %4308 = vmatpush.msra.mxu0 %v6366_v58 }
 0xf82   : > { %v5066_v32 = vpop.eup %5065  ;;  %4283 = vmatpush.msra.mxu3 %v6367_v55 }
 0xf83   : > { %v4047_v63 = vmul.f32 %v5066_v32, %v5058_v24  ;;  %v2993_v2 = vpop.xlane.xlu1 %2992 }
 0xf84   : > { %4284 = vmatpush.msra.mxu3 %v6368_v59  ;;  %v2994_v31 = vmul.f32 %v2993_v2, %v5554_v36 }
 0xf85   : > { %4896 = vmatmul.msk.f32.vlgmr.msrb.gmra.mxu1 %vm1889_vm1, %v4047_v63  ;;  %v6374_v63 = vld [vmem:[#allocation50_spill] sm:$0xff] }
 0xf86   : > { %v2995_v6 = vsub.f32 %v6184_v35, %v2994_v31 }
 0xf88   : > { %v2996_v15 = vmul.f32 %v2995_v6, %v2995_v6 }
 0xfee   : > { %v4092_v19 = vpop.f32.mrf.mxu0 }
 0xfef   : > { %4899 = vmatmul.msk.f32.vlgmr.msrb.gmra.mxu0 %vm1889_vm1, %v4092_v19 }
0x1000   : > { %v4069_v23 = vpop.f32.mrf.mxu3 }
0x1001   : > { %v4138_v16 = vpop.f32.mrf.mxu2  ;;  %4898 = vmatmul.msk.f32.vlgmr.msrb.gmra.mxu3 %vm1889_vm1, %v4069_v23 }
0x1002   : > { %4901 = vmatmul.msk.f32.vlgmr.msra.gmra.mxu2 %vm1889_vm1, %v4138_v16  ;;  %v4115_v3 = vpop.f32.mrf.mxu1 }
0x1003   : > { %4900 = vmatmul.msk.f32.vlgmr.msra.gmra.mxu1 %vm1889_vm1, %v4115_v3 }
0x106c   : > { %v4184_v12 = vpop.f32.mrf.mxu0 }
0x106d   : > { %v4234_v0 = vsel %vm1614_vm0, %v4184_v12, 0.0 }
0x1080   : > { %v4207_v1 = vpop.f32.mrf.mxu1 }
0x1081   : > { %v4236_v61 = vsel %vm1614_vm0, %v4207_v1, 0.0 }
0x1084   : > { %v4161_v10 = vpop.f32.mrf.mxu3 }
0x1085   : > { %v4233_v29 = vsel %vm1614_vm0, %v4161_v10, 0.0  ;;  %v4230_v4 = vpop.f32.mrf.mxu2 }
0x1086   : > { %v4235_v25 = vadd.f32 %v4234_v0, %v4233_v29  ;;  %v4238_v22 = vsel %vm1614_vm0, %v4230_v4, 0.0 }
0x1088   : > { %v4237_v54 = vadd.f32 %v4236_v61, %v4235_v25 }
0x108a   : > { %v4239_v14 = vadd.f32 %v4238_v22, %v4237_v54 }
0x108c   : > { %v4240_v51 = vadd.f32 %v6369_v28, %v4239_v14 }
0x108e   : > { %v4241_v62 = vadd.f32 %v4240_v51, %v6110_v45  ;;  %v2997_v45 = vsel %vm1614_vm0, %v2996_v15, 0.0 }
0x1090   : > { %v4242_v17 = vsel %vm1614_vm0, %v4241_v62, 0.0 }
0x1091   : > { %4243 = vadd.xlane.f32.xlu2 %v4242_v17 }
0x1104   : > { %v4244_v9 = vpop.xlane.xlu2 %4243 }
0x1105   : > { %v4245_v13 = vmul.f32 %v4244_v9, %v5554_v36 }
0x1107   : > { %v4246_v21 = vsub.f32 %v4241_v62, %v4245_v13 }
0x1109   : > { %v4247_v7 = vmul.f32 %v4246_v21, %v4246_v21 }
0x110b   : > { %v4248_v41 = vsel %vm1614_vm0, %v4247_v7, 0.0 }
0x110c   : > { %4249 = vadd.xlane.f32.xlu0 %v4248_v41 }
0x1114   : > { %2998 = vadd.xlane.f32.xlu0 %v2997_v45 }
0x117f   : > { %v4250_v49 = vpop.xlane.xlu0 %4249 }
0x1180   : > { %v4251_v53 = vmul.f32 %v4250_v49, %v5554_v36 }
0x1182   : > { %v4252_v30 = vadd.f32 1e-05, %v4251_v53 }
0x1184   : > { %5067 = vrsqrt.f32 %v4252_v30  ;;  %vm4259_vm14 = vweird.f32 %v4252_v30 }
0x1187   : > { %v2999_v48 = vpop.xlane.xlu0 %2998 }
0x1188   : > { %v3000_v24 = vmul.f32 %v2999_v48, %v5554_v36 }
0x118a   : > { %v5068_v33 = vpop.eup %5067  ;;  %v3001_v34 = vadd.f32 1e-05, %v3000_v24 }
0x118b   : > { %v4254_v35 = vmul.f32 %v5068_v33, %v4252_v30  ;;  %vm4260_vm13 = vweird.f32 %v5068_v33 }
0x118c   : > { %5069 = vrsqrt.f32 %v3001_v34  ;;  %vm4261_vm15 = vmor %vm4259_vm14, %vm4260_vm13  ;;  %vm3008_vm2 = vweird.f32 %v3001_v34 }
0x118d   : > { %v4255_v37 = vmul.f32 %v5068_v33, %v4254_v35 }
0x118f   : > { %v4256_v39 = vmul.f32 0.5, %v4255_v37 }
0x1191   : > { %v4257_v38 = vsub.f32 1.5, %v4256_v39 }
0x1192   : > { %v5070_v40 = vpop.eup %5069 }
0x1193   : > { %v4258_v42 = vmul.f32 %v5068_v33, %v4257_v38  ;;  %v3003_v43 = vmul.f32 %v5070_v40, %v3001_v34  ;;  %vm3009_vm1 = vweird.f32 %v5070_v40 }
0x1194   : > { %vm3010_vm3 = vmor %vm3008_vm2, %vm3009_vm1 }
0x1195   : > { %v4262_v26 = vsel %vm4261_vm15, %v5068_v33, %v4258_v42  ;;  %v3004_v44 = vmul.f32 %v5070_v40, %v3003_v43 }
0x1196   : > { %v4263_v27 = vmul.f32 %v4262_v26, %v4246_v21 }
0x1197   : > { %v3005_v46 = vmul.f32 0.5, %v3004_v44 }
0x1198   : > { %v4264_v50 = vmul.f32 %v6372_v47, %v4263_v27 }
0x1199   : > { %v3006_v5 = vsub.f32 1.5, %v3005_v46 }
0x119a   : > { %v4265_v57 = vadd.f32 %v6373_v52, %v4264_v50 }
0x119b   : > { %v3007_v18 = vmul.f32 %v5070_v40, %v3006_v5 }
0x119c   : > { %4902 = vmatmul.msk.f32.vlgmr.msra.gmra.mxu3 %vm1614_vm0, %v4265_v57 }
0x119d   : > { %v3011_v60 = vsel %vm3010_vm3, %v5070_v40, %v3007_v18 }
0x119e   : > { %v3012_v8 = vmul.f32 %v3011_v60, %v2995_v6 }
0x11a0   : > { %v3016_v58 = vmul.f32 %v4993_v56, %v3012_v8 }
0x11a2   : > { %v3020_v32 = vadd.f32 %v4994_v20, %v3016_v58 }
0x11a4   : > { %3021 = vst.msk [vmem:[%s6237_s3] sm:$0xff] %vm1614_vm0, %v3020_v32 }
0x121f   : > { %v4286_v55 = vpop.f32.mrf.mxu3 }
0x1220   : > { %v4287_v59 = vadd.f32 %v6374_v63, %v4286_v55 }
0x1222   : > { %v4289_v19 = vmax.f32 %v4287_v59, 0.0 }
0x1224   : > { %4903 = vmatmul.msk.f32.vlgmr.msra.gmra.mxu0 %vm2966_vm9, %v4289_v19 }
0x12a1   : > { %v4310_v23 = vpop.f32.mrf.mxu0 }
0x12a2   : > { %v4311_v16 = vadd.f32 %v6178_v11, %v4310_v23 }
0x12a4   : > { %v4313_v3 = vadd.f32 %v4311_v16, %v4265_v57 }
0x12a6   : > { %v4314_v12 = vsel %vm1614_vm0, %v4313_v3, 0.0 }
0x12a7   : > { %4315 = vadd.xlane.f32.xlu2 %v4314_v12 }
0x131a   : > { %v4316_v1 = vpop.xlane.xlu2 %4315 }
0x131b   : > { %v4317_v10 = vmul.f32 %v4316_v1, %v5554_v36 }
0x131d   : > { %v4318_v0 = vsub.f32 %v4313_v3, %v4317_v10 }
0x131f   : > { %v4319_v29 = vmul.f32 %v4318_v0, %v4318_v0 }
0x1321   : > { %v4320_v25 = vsel %vm1614_vm0, %v4319_v29, 0.0 }
0x1322   : > { %4321 = vadd.xlane.f32.xlu1 %v4320_v25 }
0x1395   : > { %v4322_v4 = vpop.xlane.xlu1 %4321 }
0x1396   : > { %v4323_v61 = vmul.f32 %v4322_v4, %v5554_v36 }
0x1398   : > { %v4324_v54 = vadd.f32 1e-05, %v4323_v61 }
0x139a   : > { %5071 = vrsqrt.f32 %v4324_v54  ;;  %vm4331_vm5 = vweird.f32 %v4324_v54 }
0x13a0   : > { %v5072_v22 = vpop.eup %5071 }
0x13a1   : > { %v4326_v11 = vmul.f32 %v5072_v22, %v4324_v54  ;;  %vm4332_vm4 = vweird.f32 %v5072_v22 }
0x13a2   : > { %vm4333_vm6 = vmor %vm4331_vm5, %vm4332_vm4 }
0x13a3   : > { %v4327_v14 = vmul.f32 %v5072_v22, %v4326_v11 }
0x13a5   : > { %v4328_v28 = vmul.f32 0.5, %v4327_v14 }
0x13a7   : > { %v4329_v51 = vsub.f32 1.5, %v4328_v28 }
0x13a9   : > { %v4330_v62 = vmul.f32 %v5072_v22, %v4329_v51 }
0x13ab   : > { %v4334_v17 = vsel %vm4333_vm6, %v5072_v22, %v4330_v62 }
0x13ac   : > { %v4335_v2 = vmul.f32 %v4334_v17, %v4318_v0 }
0x13ae   : > { %v4336_v9 = vmul.f32 %v4993_v56, %v4335_v2 }
0x13b0   : > { %v4337_v13 = vadd.f32 %v4994_v20, %v4336_v9 }
0x13b2   : > { %4904 = vst.msk [vmem:[%s6237_s3 + $0x8] sm:$0xff] %vm1614_vm0, %v4337_v13 }
0x13b3 PF: > { %s6375_s8 = sld [smem:[#allocation30_spill]] }
0x13b9   : > { %s71_s15 = sadd.s32 1, %s6375_s8  }
0x13ba   : > { %p68_p5 = scmp.ge.s32.totalorder %s71_s15, 4  }
0x13bc   :  { %70 = sbr.rel (!%p68_p5) target bundleno = 71 (0x47), region = 292 }

// kernel: _lambda_.2
= control target key start
LH: loop header
LB: loop body
LE: loop exit
PB: predicated region body
PF: predicated region fallthrough
CT: control target
= control target key end

     0   :  { %s5563_s6 = smov 1   ;;  %s5564_s10 = smov 2   ;;  %s6613_s0 = inlined_call_operand.smem [shape: u32[35], index: -1, kind: input, shape index: {}] }
   0x1   :  { %s5606_s5 = sld [smem:[%s6613_s0]]   ;;  %s5565_s14 = smov 3  }
   0x2   :  { %s5611_s9 = sld [smem:[%s6613_s0 + %s5563_s6]]   ;;  %s5566_s18 = smov 4  }
   0x3   :  { %s5616_s13 = sld [smem:[%s6613_s0 + %s5564_s10]]   ;;  %s5567_s22 = smov 5  }
   0x4   :  { %s5621_s17 = sld [smem:[%s6613_s0 + %s5565_s14]]   ;;  %s5568_s26 = smov 6  }
   0x5   :  { %s5626_s21 = sld [smem:[%s6613_s0 + %s5566_s18]]   ;;  %s5569_s30 = smov 7  }
   0x6   :  { %s5631_s25 = sld [smem:[%s6613_s0 + %s5567_s22]]   ;;  %s5570_s4 = smov 8  }
   0x7   :  { %6622 = sst [smem:[#allocation2_spill]] %s5606_s5  ;;  %s5571_s10 = smov 9  }
   0x8   :  { %6623 = sst [smem:[#allocation3_spill]] %s5611_s9  ;;  %s5572_s15 = smov 10  }
   0x9   :  { %6624 = sst [smem:[#allocation4_spill]] %s5616_s13  ;;  %s5573_s20 = smov 11  }
   0xa   :  { %6625 = sst [smem:[#allocation5_spill]] %s5621_s17  ;;  %s5575_s1 = smov 13  }
   0xb   :  { %6626 = sst [smem:[#allocation6_spill]] %s5626_s21  ;;  %s5576_s7 = smov 14  }
   0xc   :  { %6627 = sst [smem:[#allocation7_spill]] %s5631_s25  ;;  %s5578_s22 = smov 16  }
   0xd   :  { %s5636_s29 = sld [smem:[%s6613_s0 + %s5568_s26]]   ;;  %s5574_s26 = smov 12  }
   0xe   :  { %s5641_s3 = sld [smem:[%s6613_s0 + %s5569_s30]]   ;;  %s5579_s28 = smov 17  }
   0xf   :  { %s5646_s8 = sld [smem:[%s6613_s0 + %s5570_s4]]  }
  0x10   :  { %s5651_s14 = sld [smem:[%s6613_s0 + %s5571_s10]]  }
  0x11   :  { %s5656_s19 = sld [smem:[%s6613_s0 + %s5572_s15]]   ;;  %s5577_s15 = smov 15  }
  0x12   :  { %s5661_s24 = sld [smem:[%s6613_s0 + %s5573_s20]]  }
  0x13   :  { %6628 = sst [smem:[#allocation8_spill]] %s5636_s29 }
  0x14   :  { %6629 = sst [smem:[#allocation9_spill]] %s5641_s3 }
  0x15   :  { %6630 = sst [smem:[#allocation10_spill]] %s5646_s8 }
  0x16   :  { %6631 = sst [smem:[#allocation11_spill]] %s5651_s14 }
  0x17   :  { %6632 = sst [smem:[#allocation12_spill]] %s5656_s19 }
  0x18   :  { %6633 = sst [smem:[#allocation13_spill]] %s5661_s24 }
  0x19   :  { %s5666_s30 = sld [smem:[%s6613_s0 + %s5574_s26]]  }
  0x1a   :  { %s5671_s6 = sld [smem:[%s6613_s0 + %s5575_s1]]  }
  0x1b   :  { %s5676_s12 = sld [smem:[%s6613_s0 + %s5576_s7]]   ;;  %s5580_s7 = smov 18  }
  0x1c   :  { %s5681_s20 = sld [smem:[%s6613_s0 + %s5577_s15]]   ;;  %s5581_s15 = smov 19  }
  0x1d   :  { %s5686_s27 = sld [smem:[%s6613_s0 + %s5578_s22]]   ;;  %s5582_s22 = smov 20  }
  0x1e   :  { %s5691_s4 = sld [smem:[%s6613_s0 + %s5579_s28]]   ;;  %s5583_s28 = smov 21  }
  0x1f   :  { %6634 = sst [smem:[#allocation14_spill]] %s5666_s30 }
  0x20   :  { %6635 = sst [smem:[#allocation15_spill]] %s5671_s6 }
  0x21   :  { %6636 = sst [smem:[#allocation16_spill]] %s5676_s12 }
  0x22   :  { %6637 = sst [smem:[#allocation17_spill]] %s5681_s20 }
  0x23   :  { %6638 = sst [smem:[#allocation18_spill]] %s5686_s27 }
  0x24   :  { %6639 = sst [smem:[#allocation19_spill]] %s5691_s4 }
  0x25   :  { %s5696_s17 = sld [smem:[%s6613_s0 + %s5580_s7]]   ;;  %s5584_s7 = smov 22  }
  0x26   :  { %s5701_s20 = sld [smem:[%s6613_s0 + %s5581_s15]]   ;;  %s5585_s15 = smov 23  }
  0x27   :  { %s5706_s27 = sld [smem:[%s6613_s0 + %s5582_s22]]   ;;  %s5586_s22 = smov 24  }
  0x28   :  { %s5711_s4 = sld [smem:[%s6613_s0 + %s5583_s28]]   ;;  %s5587_s28 = smov 25  }
  0x2b   :  { %6640 = sst [smem:[#allocation20_spill]] %s5696_s17 }
  0x2c   :  { %6641 = sst [smem:[#allocation21_spill]] %s5701_s20 }
  0x2d   :  { %6642 = sst [smem:[#allocation22_spill]] %s5706_s27 }
  0x2e   :  { %6643 = sst [smem:[#allocation23_spill]] %s5711_s4 }
  0x2f   :  { %s5716_s17 = sld [smem:[%s6613_s0 + %s5584_s7]]   ;;  %s5588_s7 = smov 26  }
  0x30   :  { %s5721_s20 = sld [smem:[%s6613_s0 + %s5585_s15]]   ;;  %s5589_s15 = smov 27  }
  0x31   :  { %s5726_s27 = sld [smem:[%s6613_s0 + %s5586_s22]]   ;;  %s5590_s22 = smov 28  }
  0x32   :  { %s5731_s4 = sld [smem:[%s6613_s0 + %s5587_s28]]   ;;  %s5591_s28 = smov 29  }
  0x35   :  { %6644 = sst [smem:[#allocation24_spill]] %s5716_s17 }
  0x36   :  { %6645 = sst [smem:[#allocation25_spill]] %s5721_s20 }
  0x37   :  { %6646 = sst [smem:[#allocation26_spill]] %s5726_s27 }
  0x38   :  { %6647 = sst [smem:[#allocation27_spill]] %s5731_s4 }
  0x39   :  { %s5736_s17 = sld [smem:[%s6613_s0 + %s5588_s7]]   ;;  %s5592_s7 = smov 30  }
  0x3a   :  { %s5741_s20 = sld [smem:[%s6613_s0 + %s5589_s15]]   ;;  %s5593_s15 = smov 31  }
  0x3b   :  { %s5746_s27 = sld [smem:[%s6613_s0 + %s5590_s22]]   ;;  %s5594_s22 = smov 32  }
  0x3c   :  { %s5751_s4 = sld [smem:[%s6613_s0 + %s5591_s28]]   ;;  %s5595_s28 = smov 33  }
  0x3f   :  { %6648 = sst [smem:[#allocation28_spill]] %s5736_s17 }
  0x40   :  { %6649 = sst [smem:[#allocation29_spill]] %s5741_s20 }
  0x41   :  { %6650 = sst [smem:[#allocation30_spill]] %s5746_s27 }
  0x42   :  { %6651 = sst [smem:[#allocation31_spill]] %s5751_s4 }
  0x43   :  { %s5756_s17 = sld [smem:[%s6613_s0 + %s5592_s7]]   ;;  %s5596_s7 = smov 34  }
  0x44   :  { %s5761_s20 = sld [smem:[%s6613_s0 + %s5593_s15]]   ;;  %s5778_s15 = smov 0  }
  0x45   :  { %s5766_s27 = sld [smem:[%s6613_s0 + %s5594_s22]]  }
  0x46   :  { %s5771_s4 = sld [smem:[%s6613_s0 + %s5595_s28]]  }
  0x49   :  { %6652 = sst [smem:[#allocation32_spill]] %s5756_s17 }
  0x4a   :  { %s5776_s17 = sld [smem:[%s6613_s0 + %s5596_s7]]  }
  0x4b   :  { %6653 = sst [smem:[#allocation33_spill]] %s5766_s27 }
  0x4c   :  { %6654 = sst [smem:[#allocation34_spill]] %s5771_s4 }
  0x50   :  { %6655 = sst [smem:[#allocation35_spill]] %s5776_s17 }
  0x51 LB: > { %6656 = sst [smem:[#allocation36_spill]] %s5561_s15  ;;  %s5784_s16 = sadd.s32 4294967295, %s5561_s15   ;;  %s5561_s15 = sphi %s5778_s15, %s79_s15  }
  0x52   : > { %p5081_p0 = scmp.ge.s32.totalorder %s5561_s15, 1  ;;  %p1259_p1 = scmp.lt.s32.totalorder %s5561_s15, 3 }
  0x54   : > { %p1260_p2 = pnand %p5081_p0, %p1259_p1 }
  0x56   : > { %1263 = sbr.rel (%p1260_p2) target bundleno = 5313 (0x14c1), region = 156 }
  0x5b   : > { %s6657_s21 = sld [smem:[#allocation6_spill]]  ;;  %p1480_p3 = scmp.lt.s32.totalorder %s5784_s16, 1  ;;  %vm1787_vm0 = vcmask 261120   ;;  %v5597_v2 = vmov 32.0   ;;  %vm2142_vm5 = vcmask 64512  }
  0x5c   : > { %s6658_s5 = sld [smem:[#allocation2_spill]]  ;;  %5337 = vrcp.f32 %v5597_v2 }
  0x5d   : > { %s6659_s25 = sld [smem:[#allocation7_spill]] }
  0x5e   : > { %s5790_s0 = scalar_select %p1480_p3, %s5784_s16, 1 }
  0x5f   : > { %s6661_s14 = sld [smem:[#allocation11_spill]] }
  0x60   : > { %s5793_s18 = sshll.u32 %s5790_s0, 4  ;;  %s6662_s8 = sld [smem:[#allocation10_spill]] }
  0x61   : > { %6660 = sst [smem:[#allocation37_spill]] %s5793_s18  ;;  %s5797_s22 = scalar_lea.vmem %s6657_s21, %s5790_s0 }
  0x62   : > { %s5801_s23 = scalar_lea.vmem %s6658_s5, %s5793_s18  ;;  %v5338_v3 = vpop.eup %5337  ;;  %s6663_s19 = sld [smem:[#allocation12_spill]]  ;;  %v5299_v55 = vld [vmem:[%s5797_s22] ss:$0 sm:$0xff] }
  0x63   : > { %v1783_v0 = vld [vmem:[%s5801_s23] sm:$0xff]  ;;  %s5806_s26 = scalar_lea.vmem %s6659_s25, %s5790_s0  ;;  %v1792_v4 = vmul.f32 32.0, %v5338_v3  ;;  %vm1796_vm1 = vweird.f32 %v5338_v3  ;;  %s5818_s28 = sshll.u32 %s5790_s0, 2 }
  0x64   : > { %v1788_v1 = vsel %vm1787_vm0, %v1783_v0, 0.0  ;;  %s5825_s2 = sshll.u32 %s5790_s0, 7  ;;  %s6664_s30 = sld [smem:[#allocation14_spill]]  ;;  %v5300_v57 = vld [vmem:[%s5806_s26] ss:$0 sm:$0xff] }
  0x65   : > { %1789 = vadd.xlane.f32.xlu0 %v1788_v1  ;;  %v1793_v5 = vsub.f32 1.0, %v1792_v4  ;;  %s5822_s1 = scalar_lea.vmem %s6661_s14, %s5818_s28  ;;  %s6665_s13 = sld [smem:[#allocation4_spill]] }
  0x66   : > { %s5829_s7 = scalar_lea.vmem %s6662_s8, %s5825_s2  ;;  %s6666_s24 = sld [smem:[#allocation13_spill]] }
  0x67   : > { %v1794_v6 = vmul.f32 %v5338_v3, %v1793_v5  ;;  %v1636_v14 = vld [vmem:[%s5829_s7 + $0x18] sm:$0xff]  ;;  %v1635_v18 = vld [vmem:[%s5829_s7 + $0x10] sm:$0xff]  ;;  %v1634_v22 = vld [vmem:[%s5829_s7 + $0x8] sm:$0xff]  ;;  %s6667_s6 = sld [smem:[#allocation15_spill]]  ;;  %s5970_s21 = sshll.u32 %s5790_s0, 5 }
  0x68   : > { %s5833_s10 = scalar_lea.vmem %s6663_s19, %s5825_s2  ;;  %v1644_v15 = vld [vmem:[%s5829_s7 + $0x58] sm:$0xff]  ;;  %1883 = vmatpush.msra.mxu1 %v1636_v14  ;;  %v1643_v19 = vld [vmem:[%s5829_s7 + $0x50] sm:$0xff]  ;;  %v1642_v23 = vld [vmem:[%s5829_s7 + $0x48] sm:$0xff]  ;;  %s6668_s29 = sld [smem:[#allocation8_spill]] }
  0x69   : > { %v1795_v7 = vadd.f32 %v5338_v3, %v1794_v6  ;;  %v1648_v16 = vld [vmem:[%s5829_s7 + $0x78] sm:$0xff]  ;;  %1923 = vmatpush.msra.mxu2 %v1644_v15  ;;  %v1647_v20 = vld [vmem:[%s5829_s7 + $0x70] sm:$0xff]  ;;  %v1646_v24 = vld [vmem:[%s5829_s7 + $0x68] sm:$0xff]  ;;  %s6669_s3 = sld [smem:[#allocation9_spill]] }
  0x6a   : > { %v1656_v17 = vld [vmem:[%s5833_s10 + $0x18] sm:$0xff]  ;;  %1943 = vmatpush.msra.mxu3 %v1648_v16  ;;  %1884 = vmatpush.msra.mxu1 %v1635_v18  ;;  %v1655_v21 = vld [vmem:[%s5833_s10 + $0x10] sm:$0xff]  ;;  %v1654_v25 = vld [vmem:[%s5833_s10 + $0x8] sm:$0xff]  ;;  %s5853_s11 = scalar_lea.vmem %s6664_s30, %s5825_s2  ;;  %s6670_s12 = sld [smem:[#allocation16_spill]] }
  0x6b   : > { %v5809_v8 = vsel %vm1796_vm1, %v5338_v3, %v1795_v7  ;;  %1975 = vmatpush.msra.mxu0 %v1656_v17  ;;  %1924 = vmatpush.msra.mxu2 %v1643_v19  ;;  %v1633_v26 = vld [vmem:[%s5829_s7] sm:$0xff]  ;;  %v1640_v31 = vld [vmem:[%s5829_s7 + $0x38] sm:$0xff]  ;;  %v1639_v36 = vld [vmem:[%s5829_s7 + $0x30] sm:$0xff]  ;;  %s5875_s5 = scalar_lea.vmem %s6665_s13, %s5793_s18  ;;  %s6671_s9 = sld [smem:[#allocation3_spill]] }
  0x6c   : > { %1944 = vmatpush.msra.mxu3 %v1647_v20  ;;  %1885 = vmatpush.msra.mxu1 %v1634_v22  ;;  %v1641_v27 = vld [vmem:[%s5829_s7 + $0x40] sm:$0xff]  ;;  %v1664_v32 = vld [vmem:[%s5833_s10 + $0x58] sm:$0xff]  ;;  %v1663_v37 = vld [vmem:[%s5833_s10 + $0x50] sm:$0xff]  ;;  %s5886_s8 = scalar_lea.vmem %s6666_s24, %s5818_s28 }
  0x6d   : > { %1976 = vmatpush.msra.mxu0 %v1655_v21  ;;  %1925 = vmatpush.msra.mxu2 %v1642_v23  ;;  %v1645_v28 = vld [vmem:[%s5829_s7 + $0x60] sm:$0xff]  ;;  %v1668_v33 = vld [vmem:[%s5833_s10 + $0x78] sm:$0xff]  ;;  %v1667_v38 = vld [vmem:[%s5833_s10 + $0x70] sm:$0xff]  ;;  %s5905_s13 = scalar_lea.vmem %s6667_s6, %s5818_s28  ;;  %s1485_s6 = ssub.s32 1, %s5784_s16 }
  0x6e   : > { %1945 = vmatpush.msra.mxu3 %v1646_v24  ;;  %v1653_v29 = vld [vmem:[%s5833_s10] sm:$0xff]  ;;  %1886 = vmatpush.msra.mxu1 %v1633_v26  ;;  %v1676_v35 = vld [vmem:[%s5853_s11 + $0x18] sm:$0xff]  ;;  %v1675_v39 = vld [vmem:[%s5853_s11 + $0x10] sm:$0xff]  ;;  %p1486_p4 = scmp.lt.s32.totalorder %s1485_s6, 1  ;;  %s6672_s16 = sld [smem:[#allocation17_spill]] }
  0x6f   : > { %1977 = vmatpush.msra.mxu0 %v1654_v25  ;;  %1926 = vmatpush.msra.mxu2 %v1641_v27  ;;  %v1638_v40 = vld [vmem:[%s5829_s7 + $0x28] sm:$0xff]  ;;  %v1637_v45 = vld [vmem:[%s5829_s7 + $0x20] sm:$0xff]  ;;  %v1660_v63 = vld [vmem:[%s5833_s10 + $0x38] sm:$0xff] }
  0x70   : > { %1946 = vmatpush.msra.mxu3 %v1645_v28  ;;  %1903 = vmatpush.msrb.mxu1 %v1640_v31  ;;  %v1662_v42 = vld [vmem:[%s5833_s10 + $0x48] sm:$0xff]  ;;  %v1661_v46 = vld [vmem:[%s5833_s10 + $0x40] sm:$0xff]  ;;  %v1688_v1 = vld [vmem:[%s5853_s11 + $0x78] sm:$0xff]  ;;  %s6696_s6 = smov (!%p1486_p4, %s1485_s6), 1  ;;  %s5974_s24 = scalar_lea.vmem %s6670_s12, %s5970_s21 }
  0x71   : > { %1978 = vmatpush.msra.mxu0 %v1653_v29  ;;  %2015 = vmatpush.msrb.mxu2 %v1664_v32  ;;  %v1666_v43 = vld [vmem:[%s5833_s10 + $0x68] sm:$0xff]  ;;  %v1665_v47 = vld [vmem:[%s5833_s10 + $0x60] sm:$0xff]  ;;  %v1659_v2 = vld [vmem:[%s5833_s10 + $0x30] sm:$0xff]  ;;  %s5963_s14 = scalar_lea.vmem %s6668_s29, %s6696_s6  ;;  %s5967_s19 = scalar_lea.vmem %s6669_s3, %s6696_s6 }
  0x72   : > { %2035 = vmatpush.msrb.mxu3 %v1668_v33  ;;  %1904 = vmatpush.msrb.mxu1 %v1639_v36  ;;  %v1674_v44 = vld [vmem:[%s5853_s11 + $0x8] sm:$0xff]  ;;  %v1673_v48 = vld [vmem:[%s5853_s11] sm:$0xff]  ;;  %v1683_v3 = vld [vmem:[%s5853_s11 + $0x50] sm:$0xff]  ;;  %s6617_s25 = sshll.u32 %s6696_s6, 4  ;;  %s6676_s29 = sld [smem:[#allocation18_spill]] }
  0x73   : > { %2070 = vmatpush.msrb.mxu0 %v1676_v35  ;;  %2016 = vmatpush.msrb.mxu2 %v1663_v37  ;;  %v5880_v60 = vld [vmem:[%s5875_s5] sm:$0xff]  ;;  %v1687_v4 = vld [vmem:[%s5853_s11 + $0x70] sm:$0xff]  ;;  %v1658_v5 = vld [vmem:[%s5833_s10 + $0x28] sm:$0xff]  ;;  %s5984_s3 = scalar_lea.vmem %s6671_s9, %s6617_s25  ;;  %s6673_s25 = sld [smem:[#allocation30_spill]] }
  0x74   : > { %2036 = vmatpush.msrb.mxu3 %v1667_v38  ;;  %1905 = vmatpush.msrb.mxu1 %v1638_v40  ;;  %v1682_v6 = vld [vmem:[%s5853_s11 + $0x48] sm:$0xff]  ;;  %v1677_v15 = vld [vmem:[%s5853_s11 + $0x20] sm:$0xff]  ;;  %s5993_s12 = scalar_lea.vmem %s6672_s16, %s5790_s0  ;;  %s6674_s16 = sld [smem:[#allocation31_spill]] }
  0x75   : > { %2071 = vmatpush.msrb.mxu0 %v1675_v39  ;;  %2017 = vmatpush.msrb.mxu2 %v1662_v42  ;;  %v1686_v7 = vld [vmem:[%s5853_s11 + $0x68] sm:$0xff]  ;;  %v5301_v16 = vld [vmem:[%s5822_s1] ss:$0 sm:$0xff]  ;;  %v5303_v28 = vld [vmem:[%s5822_s1 + $0x2] ss:$0 sm:$0xff]  ;;  %s6675_s9 = sld [smem:[#allocation19_spill]] }
  0x76   : > { %2037 = vmatpush.msrb.mxu3 %v1666_v43  ;;  %1906 = vmatpush.msrb.mxu1 %v1637_v45  ;;  %v1678_v14 = vld [vmem:[%s5853_s11 + $0x28] sm:$0xff]  ;;  %v5302_v17 = vld [vmem:[%s5886_s8] ss:$0 sm:$0xff]  ;;  %v5307_v31 = vld [vmem:[%s5886_s8 + $0x2] ss:$0 sm:$0xff]  ;;  %s6680_s4 = sshll.u32 %s6696_s6, 4 }
  0x77   : > { %2072 = vmatpush.msrb.mxu0 %v1674_v44  ;;  %2018 = vmatpush.msrb.mxu2 %v1661_v46  ;;  %v5306_v24 = vld [vmem:[%s5905_s13] ss:$0 sm:$0xff]  ;;  %v5305_v32 = vld [vmem:[%s5822_s1 + $0x1] ss:$0 sm:$0xff]  ;;  %v5308_v33 = vld [vmem:[%s5886_s8 + $0x3] ss:$0 sm:$0xff] }
  0x78   : > { %2038 = vmatpush.msrb.mxu3 %v1665_v47  ;;  %v5310_v46 = vld [vmem:[%s5905_s13 + $0x2] ss:$0 sm:$0xff]  ;;  %s6681_s6 = sld [smem:[#allocation21_spill]] }
  0x79   : > { %2073 = vmatpush.msrb.mxu0 %v1673_v48  ;;  %v5311_v48 = vld [vmem:[%s5905_s13 + $0x3] ss:$0 sm:$0xff]  ;;  %s6011_s30 = scalar_lea.vmem %s6673_s25, %s5790_s0  ;;  %s6032_s25 = scalar_lea.vmem %s6676_s29, %s5825_s2 }
  0x7a   : > { %s6015_s15 = scalar_lea.vmem %s6674_s16, %s5790_s0  ;;  %s6678_s16 = sld [smem:[#allocation22_spill]] }
  0x7b   : > { %s6025_s17 = scalar_lea.vmem %s6675_s9, %s5818_s28  ;;  %s6677_s9 = sld [smem:[#allocation20_spill]] }
  0x80   : > { %s6090_s18 = scalar_lea.vmem %s6678_s16, %s5825_s2 }
  0x81   : > { %s6053_s29 = scalar_lea.vmem %s6677_s9, %s5825_s2  ;;  %s6679_s9 = sld [smem:[#allocation5_spill]] }
  0x82   : > { %s6682_s2 = sld [smem:[#allocation23_spill]] }
  0x87   : > { %s6100_s27 = scalar_lea.vmem %s6679_s9, %s6680_s4  ;;  %s6119_s4 = scalar_lea.vmem %s6681_s6, %s5818_s28 }
  0x88   : > { %s6131_s16 = scalar_lea.vmem %s6682_s2, %s5818_s28  ;;  %s6683_s28 = sld [smem:[#allocation24_spill]] }
  0x89   : > { %s6684_s6 = sld [smem:[#allocation25_spill]] }
  0x8a   : > { %s6685_s2 = sld [smem:[#allocation32_spill]] }
  0x8e   : > { %s1586_s9 = scalar_lea.vmem %s6683_s28, %s5970_s21 }
  0x90   : > { %s1614_s28 = scalar_lea.vmem %s6685_s2, %s5790_s0 }
  0xd8   : > { %v1790_v9 = vpop.xlane.xlu0 %1789 }
  0xd9   : > { %v1798_v10 = vmul.f32 %v5809_v8, %v1790_v9  ;;  %v1657_v9 = vld [vmem:[%s5833_s10 + $0x20] sm:$0xff] }
  0xdb   : > { %v5812_v11 = vsub.f32 %v1783_v0, %v1798_v10  ;;  %v1684_v0 = vld [vmem:[%s5853_s11 + $0x58] sm:$0xff]  ;;  %v1681_v10 = vld [vmem:[%s5853_s11 + $0x40] sm:$0xff] }
  0xdd   : > { %v1800_v12 = vmul.f32 %v5812_v11, %v5812_v11 }
  0xdf   : > { %v1801_v13 = vsel %vm1787_vm0, %v1800_v12, 0.0  ;;  %v1680_v12 = vld [vmem:[%s5853_s11 + $0x38] sm:$0xff] }
  0xe0   : > { %1802 = vadd.xlane.f32.xlu0 %v1801_v13  ;;  %v1679_v13 = vld [vmem:[%s5853_s11 + $0x30] sm:$0xff] }
 0x153   : > { %v1803_v30 = vpop.xlane.xlu0 %1802 }
 0x154   : > { %v1804_v34 = vmul.f32 %v1803_v30, %v5809_v8  ;;  %v5304_v30 = vld [vmem:[%s5822_s1 + $0x3] ss:$0 sm:$0xff] }
 0x156   : > { %v1805_v41 = vadd.f32 1e-05, %v1804_v34  ;;  %v5309_v34 = vld [vmem:[%s5886_s8 + $0x1] ss:$0 sm:$0xff] }
 0x158   : > { %5339 = vrsqrt.f32 %v1805_v41  ;;  %vm1812_vm3 = vweird.f32 %v1805_v41 }
 0x15e   : > { %v5340_v49 = vpop.eup %5339 }
 0x15f   : > { %v1807_v50 = vmul.f32 %v5340_v49, %v1805_v41  ;;  %vm1813_vm2 = vweird.f32 %v5340_v49 }
 0x160   : > { %vm1814_vm4 = vmor %vm1812_vm3, %vm1813_vm2  ;;  %vm3212_vm3 = vcmask 523264  }
 0x161   : > { %v1808_v51 = vmul.f32 %v5340_v49, %v1807_v50 }
 0x163   : > { %v1809_v52 = vmul.f32 0.5, %v1808_v51 }
 0x165   : > { %v1810_v53 = vsub.f32 1.5, %v1809_v52 }
 0x167   : > { %v1811_v54 = vmul.f32 %v5340_v49, %v1810_v53 }
 0x169   : > { %v1815_v56 = vsel %vm1814_vm4, %v5340_v49, %v1811_v54  ;;  %v5312_v49 = vld [vmem:[%s5905_s13 + $0x1] ss:$0 sm:$0xff] }
 0x16a   : > { %v1816_v58 = vmul.f32 %v1815_v56, %v5812_v11  ;;  %v1685_v11 = vld [vmem:[%s5853_s11 + $0x60] sm:$0xff] }
 0x16c   : > { %v1820_v59 = vmul.f32 %v5299_v55, %v1816_v58 }
 0x16e   : > { %v5882_v61 = vadd.f32 %v5300_v57, %v1820_v59 }
 0x170   : > { %v1855_v62 = vadd.f32 %v5882_v61, %v5880_v60 }
 0x172   : > { %5118 = vmatmul.msk.f32.vlgmr.msra.gmra.mxu1 %vm1787_vm0, %v1855_v62  ;;  %5120 = vmatmul.msk.f32.vlgmr.msra.gmra.mxu2 %vm1787_vm0, %v1855_v62 }
 0x173   : > { %5121 = vmatmul.msk.f32.vlgmr.msra.gmra.mxu3 %vm1787_vm0, %v1855_v62  ;;  %5122 = vmatmul.msk.f32.vlgmr.msra.gmra.mxu0 %vm1787_vm0, %v1855_v62 }
 0x174   : > { %1995 = vmatpush.msra.mxu1 %v1660_v63  ;;  %2110 = vmatpush.msra.mxu2 %v1684_v0 }
 0x175   : > { %2130 = vmatpush.msra.mxu3 %v1688_v1 }
 0x176   : > { %1996 = vmatpush.msra.mxu1 %v1659_v2  ;;  %2111 = vmatpush.msra.mxu2 %v1683_v3 }
 0x177   : > { %2131 = vmatpush.msra.mxu3 %v1687_v4 }
 0x178   : > { %1997 = vmatpush.msra.mxu1 %v1658_v5  ;;  %2112 = vmatpush.msra.mxu2 %v1682_v6 }
 0x179   : > { %2132 = vmatpush.msra.mxu3 %v1686_v7 }
 0x17a   : > { %5119 = vmatmul.msk.f32.vlgmr.msrb.gmra.mxu1 %vm1787_vm0, %v1855_v62  ;;  %5124 = vmatmul.msk.f32.vlgmr.msrb.gmra.mxu2 %vm1787_vm0, %v1855_v62 }
 0x17b   : > { %5125 = vmatmul.msk.f32.vlgmr.msrb.gmra.mxu3 %vm1787_vm0, %v1855_v62  ;;  %5126 = vmatmul.msk.f32.vlgmr.msrb.gmra.mxu0 %vm1787_vm0, %v5882_v61 }
 0x17c   : > { %1998 = vmatpush.msra.mxu1 %v1657_v9  ;;  %2113 = vmatpush.msra.mxu2 %v1681_v10 }
 0x17d   : > { %2133 = vmatpush.msra.mxu3 %v1685_v11 }
 0x17e   : > { %2090 = vmatpush.msrb.mxu1 %v1680_v12 }
 0x180   : > { %2091 = vmatpush.msrb.mxu1 %v1679_v13 }
 0x182   : > { %2092 = vmatpush.msrb.mxu1 %v1678_v14  ;;  %5128 = vmatmul.msk.f32.vlgmr.msra.gmra.mxu2 %vm1787_vm0, %v5882_v61 }
 0x183   : > { %5123 = vmatmul.msk.f32.vlgmr.msra.gmra.mxu1 %vm1787_vm0, %v1855_v62  ;;  %5129 = vmatmul.msk.f32.vlgmr.msra.gmra.mxu3 %vm1787_vm0, %v5882_v61 }
 0x184   : > { %2093 = vmatpush.msrb.mxu1 %v1677_v15 }
 0x18b   : > { %5127 = vmatmul.msk.f32.vlgmr.msrb.gmra.mxu1 %vm1787_vm0, %v5882_v61 }
 0x1ef   : > { %v1888_v18 = vpop.f32.mrf.mxu1 }
 0x1f0   : > { %v1889_v19 = vadd.f32 %v5301_v16, %v1888_v18  ;;  %v1980_v20 = vpop.f32.mrf.mxu0 }
 0x1f1   : > { %v1981_v21 = vadd.f32 %v5302_v17, %v1980_v20 }
 0x1f2   : > { %v2138_v22 = vmul.f32 0.35355338, %v1889_v19 }
 0x1f3   : > { %5130 = vmatpush.xpose.msk.msra.mxu0 %vm2142_vm5, %v1981_v21 }
 0x1f5   : > { %v1928_v23 = vpop.f32.mrf.mxu2 }
 0x1f6   : > { %v1948_v25 = vpop.f32.mrf.mxu3  ;;  %5131 = vmatmul.msk.f32.vlgmr.msra.gmra.mxu0 %vm2142_vm5, %v2138_v22  ;;  %v1929_v35 = vadd.f32 %v5303_v28, %v1928_v23 }
 0x1f7   : > { %v1908_v26 = vpop.f32.mrf.mxu1  ;;  %v1949_v37 = vadd.f32 %v5304_v30, %v1948_v25 }
 0x1f8   : > { %v2075_v27 = vpop.f32.mrf.mxu0  ;;  %v1909_v40 = vadd.f32 %v5305_v32, %v1908_v26  ;;  %v2140_v44 = vmul.f32 0.35355338, %v1929_v35  ;;  %v1693_v35 = vld [vmem:[%s5974_s24] sm:$0xff] }
 0x1f9   : > { %v2076_v29 = vadd.f32 %v5306_v24, %v2075_v27  ;;  %v2141_v45 = vmul.f32 0.35355338, %v1949_v37  ;;  %v1694_v37 = vld [vmem:[%s5974_s24 + $0x8] sm:$0xff] }
 0x1fa   : > { %v2139_v47 = vmul.f32 0.35355338, %v1909_v40  ;;  %v1784_v40 = vld [vmem:[%s5984_s3] sm:$0xff] }
 0x1fb   : > { %2309 = vmatpush.msrb.mxu0 %v2076_v29 }
 0x1fd   : > { %v2020_v36 = vpop.f32.mrf.mxu2  ;;  %2401 = vmatpush.msra.mxu0 %v1693_v35  ;;  %v1724_v35 = vld [vmem:[%s6053_s29 + $0x30] sm:$0xff] }
 0x1fe   : > { %v2021_v38 = vadd.f32 %v5307_v31, %v2020_v36  ;;  %v2040_v39 = vpop.f32.mrf.mxu3  ;;  %v1695_v36 = vld [vmem:[%s5974_s24 + $0x10] sm:$0xff] }
 0x1ff   : > { %v2041_v41 = vadd.f32 %v5308_v33, %v2040_v39 }
 0x200   : > { %v2000_v42 = vpop.f32.mrf.mxu1  ;;  %5134 = vmatpush.xpose.msk.msrb.mxu2 %vm2142_vm5, %v2021_v38  ;;  %v1696_v38 = vld [vmem:[%s5974_s24 + $0x18] sm:$0xff] }
 0x201   : > { %v2001_v43 = vadd.f32 %v5309_v34, %v2000_v42  ;;  %5136 = vmatpush.xpose.msk.msrb.mxu3 %vm2142_vm5, %v2041_v41  ;;  %v1825_v41 = vsel %vm1787_vm0, %v1784_v40, 0.0 }
 0x203   : > { %5132 = vmatpush.xpose.msk.msra.mxu1 %vm2142_vm5, %v2001_v43  ;;  %5135 = vmatmul.msk.f32.vlgmr.msrb.gmra.mxu2 %vm2142_vm5, %v2140_v44 }
 0x204   : > { %5137 = vmatmul.msk.f32.vlgmr.msrb.gmra.mxu3 %vm2142_vm5, %v2141_v45 }
 0x205   : > { %v2115_v50 = vpop.f32.mrf.mxu2 }
 0x206   : > { %5133 = vmatmul.msk.f32.vlgmr.msra.gmra.mxu1 %vm2142_vm5, %v2139_v47  ;;  %v2116_v51 = vadd.f32 %v5310_v46, %v2115_v50  ;;  %v2135_v52 = vpop.f32.mrf.mxu3 }
 0x207   : > { %v2136_v53 = vadd.f32 %v5311_v48, %v2135_v52 }
 0x208   : > { %v2095_v54 = vpop.f32.mrf.mxu1  ;;  %2355 = vmatpush.msra.mxu2 %v2116_v51 }
 0x209   : > { %v2096_v55 = vadd.f32 %v5312_v49, %v2095_v54  ;;  %2378 = vmatpush.msra.mxu3 %v2136_v53 }
 0x20a   : > { %2447 = vmatpush.msrb.mxu2 %v1695_v36 }
 0x20b   : > { %2332 = vmatpush.msrb.mxu1 %v2096_v55  ;;  %2470 = vmatpush.msrb.mxu3 %v1696_v38  ;;  %v5315_v55 = vld [vmem:[%s5993_s12] ss:$0 sm:$0xff]  ;;  %v1732_v38 = vld [vmem:[%s6053_s29 + $0x70] sm:$0xff] }
 0x20d   : > { %2424 = vmatpush.msra.mxu1 %v1694_v37  ;;  %v1728_v37 = vld [vmem:[%s6053_s29 + $0x50] sm:$0xff] }
 0x273   : > { %v2166_v56 = vpop.f32.mrf.mxu0 }
 0x274   : > { %v2247_v57 = vsel %vm2142_vm5, %v2166_v56, -inf }
 0x275   : > { %2248 = vmax.xlane.f32.xlu2 %v2247_v57 }
 0x283   : > { %v2192_v58 = vpop.f32.mrf.mxu1 }
 0x284   : > { %v2250_v59 = vsel %vm2142_vm5, %v2192_v58, -inf }
 0x285   : > { %2251 = vmax.xlane.f32.xlu2 %v2250_v59 }
 0x286   : > { %v2218_v62 = vpop.f32.mrf.mxu2 }
 0x287   : > { %v2253_v63 = vsel %vm2142_vm5, %v2218_v62, -inf  ;;  %v2244_v0 = vpop.f32.mrf.mxu3 }
 0x288   : > { %2254 = vmax.xlane.f32.xlu1 %v2253_v63  ;;  %v2256_v1 = vsel %vm2142_vm5, %v2244_v0, -inf }
 0x290   : > { %2257 = vmax.xlane.f32.xlu1 %v2256_v1 }
 0x2e8   : > { %v2249_v2 = vpop.xlane.xlu2 %2248 }
 0x2e9   : > { %v2259_v3 = vsub.f32 %v2166_v56, %v2249_v2 }
 0x2eb   : > { %v2263_v4 = vmul.f32 1.442695, %v2259_v3 }
 0x2ed   : > { %5341 = vpow2.f32 %v2263_v4 }
 0x2f3   : > { %v5342_v5 = vpop.eup %5341 }
 0x2f4   : > { %v2271_v6 = vsel %vm2142_vm5, %v5342_v5, 0.0 }
 0x2f5   : > { %2272 = vadd.xlane.f32.xlu2 %v2271_v6 }
 0x2f8   : > { %v2252_v7 = vpop.xlane.xlu2 %2251 }
 0x2f9   : > { %v2260_v11 = vsub.f32 %v2192_v58, %v2252_v7 }
 0x2fb   : > { %v2255_v9 = vpop.xlane.xlu1 %2254  ;;  %v2265_v13 = vmul.f32 1.442695, %v2260_v11  ;;  %v1701_v11 = vld [vmem:[%s6032_s25 + $0x18] sm:$0xff] }
 0x2fc   : > { %v2261_v10 = vsub.f32 %v2218_v62, %v2255_v9 }
 0x2fd   : > { %1826 = vadd.xlane.f32.xlu2 %v1825_v41  ;;  %v1723_v41 = vld [vmem:[%s6053_s29 + $0x28] sm:$0xff] }
 0x2fe   : > { %v2267_v12 = vmul.f32 1.442695, %v2261_v10 }
 0x300   : > { %5343 = vpow2.f32 %v2267_v12  ;;  %v1705_v12 = vld [vmem:[%s6032_s25 + $0x38] sm:$0xff] }
 0x301   : > { %5345 = vpow2.f32 %v2265_v13  ;;  %v1709_v13 = vld [vmem:[%s6032_s25 + $0x58] sm:$0xff] }
 0x303   : > { %v2258_v14 = vpop.xlane.xlu1 %2257 }
 0x304   : > { %v2262_v15 = vsub.f32 %v2244_v0, %v2258_v14  ;;  %v1713_v14 = vld [vmem:[%s6032_s25 + $0x78] sm:$0xff] }
 0x306   : > { %v5344_v16 = vpop.eup %5343  ;;  %v2269_v17 = vmul.f32 1.442695, %v2262_v15  ;;  %v1700_v15 = vld [vmem:[%s6032_s25 + $0x10] sm:$0xff] }
 0x307   : > { %v2277_v18 = vsel %vm2142_vm5, %v5344_v16, 0.0  ;;  %v5346_v19 = vpop.eup %5345 }
 0x308   : > { %5347 = vpow2.f32 %v2269_v17  ;;  %2278 = vadd.xlane.f32.xlu0 %v2277_v18  ;;  %v2274_v22 = vsel %vm2142_vm5, %v5346_v19, 0.0  ;;  %v1708_v17 = vld [vmem:[%s6032_s25 + $0x50] sm:$0xff] }
 0x309   : > { %v1712_v18 = vld [vmem:[%s6032_s25 + $0x70] sm:$0xff] }
 0x30e   : > { %v5348_v20 = vpop.eup %5347 }
 0x30f   : > { %v2280_v21 = vsel %vm2142_vm5, %v5348_v20, 0.0 }
 0x310   : > { %2281 = vadd.xlane.f32.xlu1 %v2280_v21  ;;  %2275 = vadd.xlane.f32.xlu0 %v2274_v22  ;;  %v1707_v21 = vld [vmem:[%s6032_s25 + $0x48] sm:$0xff] }
 0x311   : > { %v1711_v22 = vld [vmem:[%s6032_s25 + $0x68] sm:$0xff] }
 0x368   : > { %v2273_v23 = vpop.xlane.xlu2 %2272 }
 0x369   : > { %5349 = vrcp.f32 %v2273_v23  ;;  %v1698_v23 = vld [vmem:[%s6032_s25] sm:$0xff] }
 0x36f   : > { %v5350_v24 = vpop.eup %5349 }
 0x370   : > { %v2287_v25 = vmul.f32 %v5350_v24, %v5342_v5  ;;  %v1827_v52 = vpop.xlane.xlu2 %1826  ;;  %v1702_v24 = vld [vmem:[%s6032_s25 + $0x20] sm:$0xff] }
 0x371   : > { %v1828_v58 = vmul.f32 %v1827_v52, %v5809_v8 }
 0x372   : > { %5138 = vmatmul.msk.f32.vlgmr.msrb.gmra.mxu0 %vm2142_vm5, %v2287_v25  ;;  %v1706_v25 = vld [vmem:[%s6032_s25 + $0x40] sm:$0xff] }
 0x373   : > { %v6003_v63 = vsub.f32 %v1784_v40, %v1828_v58  ;;  %2546 = vmatpush.msrb.mxu0 %v1701_v11  ;;  %v5316_v58 = vld [vmem:[%s6011_s30] ss:$0 sm:$0xff]  ;;  %v1753_v11 = vld [vmem:[%s6090_s18 + $0x78] sm:$0xff] }
 0x375   : > { %v1830_v1 = vmul.f32 %v6003_v63, %v6003_v63  ;;  %2547 = vmatpush.msrb.mxu0 %v1700_v15  ;;  %v1752_v15 = vld [vmem:[%s6090_s18 + $0x70] sm:$0xff] }
 0x377   : > { %v1831_v2 = vsel %vm1787_vm0, %v1830_v1, 0.0 }
 0x37b   : > { %v2279_v26 = vpop.xlane.xlu0 %2278 }
 0x37c   : > { %5351 = vrcp.f32 %v2279_v26  ;;  %v1710_v26 = vld [vmem:[%s6032_s25 + $0x60] sm:$0xff] }
 0x382   : > { %v5352_v27 = vpop.eup %5351 }
 0x383   : > { %v2289_v28 = vmul.f32 %v5352_v27, %v5344_v16  ;;  %v2282_v29 = vpop.xlane.xlu1 %2281  ;;  %v2276_v30 = vpop.xlane.xlu0 %2275  ;;  %v1704_v16 = vld [vmem:[%s6032_s25 + $0x30] sm:$0xff] }
 0x384   : > { %5353 = vrcp.f32 %v2282_v29  ;;  %v1721_v29 = vld [vmem:[%s6053_s29 + $0x18] sm:$0xff] }
 0x385   : > { %5355 = vrcp.f32 %v2276_v30  ;;  %5140 = vmatmul.msk.f32.vlgmr.msra.gmra.mxu2 %vm2142_vm5, %v2289_v28  ;;  %v1725_v30 = vld [vmem:[%s6053_s29 + $0x38] sm:$0xff] }
 0x386   : > { %2586 = vmatpush.msra.mxu2 %v1709_v13 }
 0x388   : > { %2587 = vmatpush.msra.mxu2 %v1708_v17  ;;  %v1739_v17 = vld [vmem:[%s6090_s18 + $0x8] sm:$0xff] }
 0x38a   : > { %v5354_v31 = vpop.eup %5353  ;;  %2588 = vmatpush.msra.mxu2 %v1707_v21 }
 0x38b   : > { %v5356_v32 = vpop.eup %5355  ;;  %v2290_v33 = vmul.f32 %v5354_v31, %v5348_v20  ;;  %v1703_v20 = vld [vmem:[%s6032_s25 + $0x28] sm:$0xff]  ;;  %v1729_v31 = vld [vmem:[%s6053_s29 + $0x58] sm:$0xff] }
 0x38c   : > { %v2288_v34 = vmul.f32 %v5356_v32, %v5346_v19  ;;  %v1699_v19 = vld [vmem:[%s6032_s25 + $0x8] sm:$0xff]  ;;  %2589 = vmatpush.msra.mxu2 %v1706_v25  ;;  %v1750_v25 = vld [vmem:[%s6090_s18 + $0x60] sm:$0xff] }
 0x38d   : > { %5141 = vmatmul.msk.f32.vlgmr.msra.gmra.mxu3 %vm2142_vm5, %v2290_v33  ;;  %2548 = vmatpush.msrb.mxu0 %v1699_v19  ;;  %v1733_v33 = vld [vmem:[%s6053_s29 + $0x78] sm:$0xff]  ;;  %v1747_v19 = vld [vmem:[%s6090_s18 + $0x48] sm:$0xff] }
 0x38e   : > { %5139 = vmatmul.msk.f32.vlgmr.msrb.gmra.mxu1 %vm2142_vm5, %v2288_v34  ;;  %2606 = vmatpush.msra.mxu3 %v1713_v14  ;;  %v1720_v34 = vld [vmem:[%s6053_s29 + $0x10] sm:$0xff] }
 0x38f   : > { %2566 = vmatpush.msrb.mxu1 %v1705_v12  ;;  %2549 = vmatpush.msrb.mxu0 %v1698_v23  ;;  %v1744_v12 = vld [vmem:[%s6090_s18 + $0x30] sm:$0xff]  ;;  %v1742_v23 = vld [vmem:[%s6090_s18 + $0x20] sm:$0xff] }
 0x390   : > { %2607 = vmatpush.msra.mxu3 %v1712_v18  ;;  %v1748_v14 = vld [vmem:[%s6090_s18 + $0x50] sm:$0xff]  ;;  %v1743_v18 = vld [vmem:[%s6090_s18 + $0x28] sm:$0xff] }
 0x391   : > { %2567 = vmatpush.msrb.mxu1 %v1704_v16  ;;  %v1786_v16 = vld [vmem:[%s6100_s27] sm:$0xff] }
 0x392   : > { %2608 = vmatpush.msra.mxu3 %v1711_v22  ;;  %v1738_v22 = vld [vmem:[%s6090_s18] sm:$0xff] }
 0x393   : > { %2568 = vmatpush.msrb.mxu1 %v1703_v20  ;;  %v1751_v20 = vld [vmem:[%s6090_s18 + $0x68] sm:$0xff] }
 0x394   : > { %2609 = vmatpush.msra.mxu3 %v1710_v26 }
 0x395   : > { %2569 = vmatpush.msrb.mxu1 %v1702_v24  ;;  %v1746_v24 = vld [vmem:[%s6090_s18 + $0x40] sm:$0xff] }
 0x3ef   : > { %v2311_v39 = vpop.f32.mrf.mxu0 }
 0x3f0   : > { %5142 = vmatmul.msk.f32.vlgmr.msra.gmra.mxu0 %vm2142_vm5, %v2311_v39  ;;  %v1719_v39 = vld [vmem:[%s6053_s29 + $0x8] sm:$0xff] }
 0x3f1   : > { %2641 = vmatpush.msra.mxu0 %v1721_v29  ;;  %v5319_v29 = vld [vmem:[%s6025_s17 + $0x1] ss:$0 sm:$0xff] }
 0x3f3   : > { %2642 = vmatpush.msra.mxu0 %v1720_v34 }
 0x3f5   : > { %2643 = vmatpush.msra.mxu0 %v1719_v39 }
 0x408   : > { %v2357_v42 = vpop.f32.mrf.mxu2 }
 0x409   : > { %5144 = vmatmul.msk.f32.vlgmr.msrb.gmra.mxu2 %vm2142_vm5, %v2357_v42  ;;  %v1727_v42 = vld [vmem:[%s6053_s29 + $0x48] sm:$0xff] }
 0x40a   : > { %2681 = vmatpush.msrb.mxu2 %v1729_v31  ;;  %v5323_v31 = vld [vmem:[%s6119_s4 + $0x1] ss:$0 sm:$0xff] }
 0x40b   : > { %v2334_v43 = vpop.f32.mrf.mxu1 }
 0x40c   : > { %5143 = vmatmul.msk.f32.vlgmr.msra.gmra.mxu1 %vm2142_vm5, %v2334_v43  ;;  %v1731_v43 = vld [vmem:[%s6053_s29 + $0x68] sm:$0xff]  ;;  %2682 = vmatpush.msrb.mxu2 %v1728_v37 }
 0x40d   : > { %2661 = vmatpush.msra.mxu1 %v1725_v30  ;;  %v5322_v30 = vld [vmem:[%s6119_s4] ss:$0 sm:$0xff] }
 0x40e   : > { %2683 = vmatpush.msrb.mxu2 %v1727_v42  ;;  %v5324_v42 = vld [vmem:[%s6119_s4 + $0x2] ss:$0 sm:$0xff] }
 0x40f   : > { %2662 = vmatpush.msra.mxu1 %v1724_v35 }
 0x410   : > { %v2380_v44 = vpop.f32.mrf.mxu3 }
 0x411   : > { %5145 = vmatmul.msk.f32.vlgmr.msrb.gmra.mxu3 %vm2142_vm5, %v2380_v44  ;;  %v1718_v44 = vld [vmem:[%s6053_s29] sm:$0xff]  ;;  %2663 = vmatpush.msra.mxu1 %v1723_v41 }
 0x412   : > { %2701 = vmatpush.msrb.mxu3 %v1733_v33  ;;  %2644 = vmatpush.msra.mxu0 %v1718_v44  ;;  %v5321_v41 = vld [vmem:[%s6025_s17 + $0x3] ss:$0 sm:$0xff] }
 0x414   : > { %2702 = vmatpush.msrb.mxu3 %v1732_v38 }
 0x416   : > { %2703 = vmatpush.msrb.mxu3 %v1731_v43 }
 0x46d   : > { %v2403_v46 = vpop.f32.mrf.mxu0 }
 0x46e   : > { %v2475_v49 = vsel %vm1787_vm0, %v2403_v46, 0.0  ;;  %v1726_v46 = vld [vmem:[%s6053_s29 + $0x40] sm:$0xff] }
 0x46f   : > { %2684 = vmatpush.msrb.mxu2 %v1726_v46  ;;  %v5326_v46 = vld [vmem:[%s6131_s16] ss:$0 sm:$0xff] }
 0x489   : > { %v2426_v45 = vpop.f32.mrf.mxu1 }
 0x48a   : > { %v2476_v48 = vsel %vm1787_vm0, %v2426_v45, 0.0  ;;  %v1722_v45 = vld [vmem:[%s6053_s29 + $0x20] sm:$0xff] }
 0x48b   : > { %v2477_v51 = vadd.f32 %v2476_v48, %v2475_v49  ;;  %2664 = vmatpush.msra.mxu1 %v1722_v45  ;;  %v5325_v45 = vld [vmem:[%s6119_s4 + $0x3] ss:$0 sm:$0xff] }
 0x48c   : > { %v2449_v47 = vpop.f32.mrf.mxu2 }
 0x48d   : > { %v2478_v50 = vsel %vm1787_vm0, %v2449_v47, 0.0  ;;  %v1730_v47 = vld [vmem:[%s6053_s29 + $0x60] sm:$0xff] }
 0x48e   : > { %v2479_v53 = vadd.f32 %v2478_v50, %v2477_v51  ;;  %2704 = vmatpush.msrb.mxu3 %v1730_v47  ;;  %v5327_v47 = vld [vmem:[%s6131_s16 + $0x1] ss:$0 sm:$0xff] }
 0x494   : > { %v2472_v54 = vpop.f32.mrf.mxu3 }
 0x495   : > { %v2480_v56 = vsel %vm1787_vm0, %v2472_v54, 0.0 }
 0x496   : > { %v2481_v57 = vadd.f32 %v2480_v56, %v2479_v53 }
 0x498   : > { %v2485_v59 = vadd.f32 %v5315_v55, %v2481_v57 }
 0x49a   : > { %v2486_v62 = vadd.f32 %v2485_v59, %v5882_v61 }
 0x49c   : > { %v2487_v0 = vsel %vm1787_vm0, %v2486_v62, 0.0 }
 0x49d   : > { %2488 = vadd.xlane.f32.xlu1 %v2487_v0  ;;  %v5317_v0 = vld [vmem:[%s6015_s15] ss:$0 sm:$0xff] }
 0x4a5   : > { %1832 = vadd.xlane.f32.xlu1 %v1831_v2  ;;  %v5313_v2 = vld [vmem:[%s5963_s14] ss:$0 sm:$0xff] }
 0x510   : > { %v2489_v3 = vpop.xlane.xlu1 %2488 }
 0x511   : > { %v2490_v61 = vmul.f32 %v2489_v3, %v5809_v8 }
 0x513   : > { %v6018_v4 = vsub.f32 %v2486_v62, %v2490_v61 }
 0x515   : > { %v2492_v5 = vmul.f32 %v6018_v4, %v6018_v4 }
 0x517   : > { %v2493_v6 = vsel %vm1787_vm0, %v2492_v5, 0.0 }
 0x518   : > { %2494 = vadd.xlane.f32.xlu0 %v2493_v6  ;;  %v1833_v7 = vpop.xlane.xlu1 %1832  ;;  %v5314_v6 = vld [vmem:[%s5967_s19] ss:$0 sm:$0xff] }
 0x519   : > { %v1834_v9 = vmul.f32 %v1833_v7, %v5809_v8 }
 0x51b   : > { %v6028_v10 = vadd.f32 1e-05, %v1834_v9  ;;  %v1741_v9 = vld [vmem:[%s6090_s18 + $0x18] sm:$0xff] }
 0x51d   : > { %5357 = vrsqrt.f32 %v6028_v10  ;;  %vm1842_vm6 = vweird.f32 %v6028_v10 }
 0x523   : > { %v6055_v27 = vpop.eup %5357 }
 0x524   : > { %v1837_v36 = vmul.f32 %v6055_v27, %v6028_v10  ;;  %vm1843_vm7 = vweird.f32 %v6055_v27  ;;  %v1749_v10 = vld [vmem:[%s6090_s18 + $0x58] sm:$0xff] }
 0x525   : > { %vm1844_vm9 = vmor %vm1842_vm6, %vm1843_vm7 }
 0x526   : > { %v1838_v48 = vmul.f32 %v6055_v27, %v1837_v36 }
 0x528   : > { %v1839_v49 = vmul.f32 0.5, %v1838_v48 }
 0x52a   : > { %v1840_v52 = vsub.f32 1.5, %v1839_v49 }
 0x52c   : > { %v1841_v55 = vmul.f32 %v6055_v27, %v1840_v52 }
 0x52e   : > { %v1845_v59 = vsel %vm1844_vm9, %v6055_v27, %v1841_v55 }
 0x52f   : > { %v1846_v3 = vmul.f32 %v1845_v59, %v6003_v63  ;;  %v1745_v63 = vld [vmem:[%s6090_s18 + $0x38] sm:$0xff] }
 0x531   : > { %v1850_v7 = vmul.f32 %v5313_v2, %v1846_v3 }
 0x533   : > { %v1854_v13 = vadd.f32 %v5314_v6, %v1850_v7 }
 0x535   : > { %v2518_v21 = vadd.f32 %v1854_v13, %v1786_v16 }
 0x58b   : > { %v2495_v28 = vpop.xlane.xlu0 %2494 }
 0x58c   : > { %v2496_v32 = vmul.f32 %v2495_v28, %v5809_v8  ;;  %v5318_v28 = vld [vmem:[%s6025_s17] ss:$0 sm:$0xff] }
 0x58e   : > { %v2497_v40 = vadd.f32 1e-05, %v2496_v32 }
 0x590   : > { %5359 = vrsqrt.f32 %v2497_v40  ;;  %vm2504_vm10 = vweird.f32 %v2497_v40 }
 0x596   : > { %v5360_v50 = vpop.eup %5359 }
 0x597   : > { %v2499_v51 = vmul.f32 %v5360_v50, %v2497_v40  ;;  %vm2505_vm8 = vweird.f32 %v5360_v50  ;;  %v5320_v40 = vld [vmem:[%s6025_s17 + $0x2] ss:$0 sm:$0xff] }
 0x598   : > { %vm2506_vm11 = vmor %vm2504_vm10, %vm2505_vm8 }
 0x599   : > { %v2500_v53 = vmul.f32 %v5360_v50, %v2499_v51 }
 0x59b   : > { %v2501_v54 = vmul.f32 0.5, %v2500_v53 }
 0x59d   : > { %v2502_v56 = vsub.f32 1.5, %v2501_v54 }
 0x59f   : > { %v2503_v57 = vmul.f32 %v5360_v50, %v2502_v56 }
 0x5a1   : > { %v2507_v62 = vsel %vm2506_vm11, %v5360_v50, %v2503_v57 }
 0x5a2   : > { %v2508_v1 = vmul.f32 %v2507_v62, %v6018_v4  ;;  %v5328_v62 = vld [vmem:[%s6131_s16 + $0x2] ss:$0 sm:$0xff] }
 0x5a4   : > { %v2512_v61 = vmul.f32 %v5316_v58, %v2508_v1 }
 0x5a6   : > { %v6086_v5 = vadd.f32 %v5317_v0, %v2512_v61  ;;  %v5329_v0 = vld [vmem:[%s6131_s16 + $0x3] ss:$0 sm:$0xff] }
 0x5a8   : > { %v2517_v4 = vadd.f32 %v6086_v5, %v5880_v60  ;;  %v1740_v60 = vld [vmem:[%s6090_s18 + $0x10] sm:$0xff] }
 0x5aa   : > { %5146 = vmatmul.msk.f32.vlgmr.msrb.gmra.mxu0 %vm1787_vm0, %v2517_v4  ;;  %5147 = vmatmul.msk.f32.vlgmr.msrb.gmra.mxu1 %vm1787_vm0, %v2517_v4 }
 0x5ab   : > { %5148 = vmatmul.msk.f32.vlgmr.msra.gmra.mxu2 %vm1787_vm0, %v2517_v4  ;;  %5149 = vmatmul.msk.f32.vlgmr.msra.gmra.mxu3 %vm1787_vm0, %v2517_v4 }
 0x5ac   : > { %2736 = vmatpush.msrb.mxu0 %v1741_v9  ;;  %2756 = vmatpush.msrb.mxu1 %v1745_v63 }
 0x5ad   : > { %2776 = vmatpush.msra.mxu2 %v1749_v10  ;;  %2796 = vmatpush.msra.mxu3 %v1753_v11 }
 0x5ae   : > { %2737 = vmatpush.msrb.mxu0 %v1740_v60  ;;  %2757 = vmatpush.msrb.mxu1 %v1744_v12 }
 0x5af   : > { %2777 = vmatpush.msra.mxu2 %v1748_v14  ;;  %2797 = vmatpush.msra.mxu3 %v1752_v15 }
 0x5b0   : > { %2738 = vmatpush.msrb.mxu0 %v1739_v17  ;;  %2758 = vmatpush.msrb.mxu1 %v1743_v18 }
 0x5b1   : > { %2778 = vmatpush.msra.mxu2 %v1747_v19  ;;  %2798 = vmatpush.msra.mxu3 %v1751_v20 }
 0x5b2   : > { %5150 = vmatmul.msk.f32.vlgmr.msra.gmra.mxu0 %vm1787_vm0, %v2518_v21  ;;  %5151 = vmatmul.msk.f32.vlgmr.msra.gmra.mxu1 %vm1787_vm0, %v2518_v21 }
 0x5b3   : > { %5152 = vmatmul.msk.f32.vlgmr.msrb.gmra.mxu2 %vm1787_vm0, %v2518_v21  ;;  %5153 = vmatmul.msk.f32.vlgmr.msrb.gmra.mxu3 %vm1787_vm0, %v2518_v21 }
 0x5b4   : > { %2739 = vmatpush.msrb.mxu0 %v1738_v22  ;;  %2759 = vmatpush.msrb.mxu1 %v1742_v23 }
 0x5b5   : > { %2779 = vmatpush.msra.mxu2 %v1746_v24  ;;  %2799 = vmatpush.msra.mxu3 %v1750_v25 }
 0x5ba   : > { %5154 = vmatmul.msk.f32.vlgmr.msrb.gmra.mxu0 %vm1787_vm0, %v1854_v13  ;;  %5155 = vmatmul.msk.f32.vlgmr.msrb.gmra.mxu1 %vm1787_vm0, %v1854_v13 }
 0x5bb   : > { %5156 = vmatmul.msk.f32.vlgmr.msra.gmra.mxu2 %vm1787_vm0, %v1854_v13  ;;  %5157 = vmatmul.msk.f32.vlgmr.msra.gmra.mxu3 %vm1787_vm0, %v1854_v13 }
 0x627   : > { %v2551_v26 = vpop.f32.mrf.mxu0  ;;  %v2571_v27 = vpop.f32.mrf.mxu1 }
 0x628   : > { %v2552_v34 = vadd.f32 %v5318_v28, %v2551_v26  ;;  %v2572_v35 = vadd.f32 %v5319_v29, %v2571_v27 }
 0x62a   : > { %v2804_v43 = vmul.f32 0.35355338, %v2552_v34  ;;  %v2805_v44 = vmul.f32 0.35355338, %v2572_v35 }
 0x62e   : > { %v2591_v32 = vpop.f32.mrf.mxu2  ;;  %v2611_v33 = vpop.f32.mrf.mxu3 }
 0x62f   : > { %v2646_v36 = vpop.f32.mrf.mxu0  ;;  %v2666_v37 = vpop.f32.mrf.mxu1  ;;  %v2592_v48 = vadd.f32 %v5320_v40, %v2591_v32  ;;  %v2612_v49 = vadd.f32 %v5321_v41, %v2611_v33 }
 0x630   : > { %v2647_v38 = vadd.f32 %v5322_v30, %v2646_v36  ;;  %v2667_v39 = vadd.f32 %v5323_v31, %v2666_v37 }
 0x631   : > { %v2806_v58 = vmul.f32 0.35355338, %v2592_v48  ;;  %v2807_v59 = vmul.f32 0.35355338, %v2612_v49  ;;  %v5425_v48 = vld [vmem:[%s5829_s7 + $0x8] sm:$0xff]  ;;  %v5426_v49 = vld [vmem:[%s5829_s7] sm:$0xff] }
 0x632   : > { %5158 = vmatpush.xpose.msk.msra.mxu0 %vm2142_vm5, %v2647_v38  ;;  %5160 = vmatpush.xpose.msk.msra.mxu1 %vm2142_vm5, %v2667_v39 }
 0x635   : > { %5159 = vmatmul.msk.f32.vlgmr.msra.gmra.mxu0 %vm2142_vm5, %v2804_v43  ;;  %5161 = vmatmul.msk.f32.vlgmr.msra.gmra.mxu1 %vm2142_vm5, %v2805_v44  ;;  %v6171_v44 = vld [vmem:[%s1586_s9] sm:$0xff] }
 0x636   : > { %v2686_v50 = vpop.f32.mrf.mxu2  ;;  %v2706_v51 = vpop.f32.mrf.mxu3 }
 0x637   : > { %v2687_v52 = vadd.f32 %v5324_v42, %v2686_v50  ;;  %v2707_v53 = vadd.f32 %v5325_v45, %v2706_v51  ;;  %v2741_v54 = vpop.f32.mrf.mxu0  ;;  %v2761_v55 = vpop.f32.mrf.mxu1  ;;  %v6174_v45 = vld [vmem:[%s1586_s9 + $0x10] sm:$0xff]  ;;  %v6181_v50 = vld [vmem:[%s1586_s9 + $0x18] sm:$0xff]  ;;  %v6184_v51 = vld [vmem:[%s1586_s9 + $0x8] sm:$0xff]  ;;  %s1617_s9 = scalar_lea.vmem %s5761_s20, %s5790_s0 }
 0x638   : > { %v2742_v56 = vadd.f32 %v5326_v46, %v2741_v54  ;;  %v2762_v57 = vadd.f32 %v5327_v47, %v2761_v55  ;;  %v5423_v46 = vld [vmem:[%s5829_s7 + $0x18] sm:$0xff]  ;;  %v5424_v47 = vld [vmem:[%s5829_s7 + $0x10] sm:$0xff] }
 0x639   : > { %5162 = vmatpush.xpose.msk.msrb.mxu2 %vm2142_vm5, %v2687_v52  ;;  %5164 = vmatpush.xpose.msk.msrb.mxu3 %vm2142_vm5, %v2707_v53  ;;  %v5427_v52 = vld [vmem:[%s5829_s7 + $0x38] sm:$0xff]  ;;  %v5176_v53 = vld [vmem:[%s5801_s23 + $0x8] sm:$0xff]  ;;  %v5428_v54 = vld [vmem:[%s5829_s7 + $0x30] sm:$0xff]  ;;  %s6204_s23 = scalar_lea.vmem %s6684_s6, %s5790_s0 }
 0x63a   : > { %2974 = vmatpush.msrb.mxu0 %v2742_v56  ;;  %2997 = vmatpush.msrb.mxu1 %v2762_v57  ;;  %v3276_v55 = vsel %vm1787_vm0, %v5176_v53, 0.0  ;;  %v5429_v56 = vld [vmem:[%s5829_s7 + $0x28] sm:$0xff]  ;;  %v5430_v57 = vld [vmem:[%s5829_s7 + $0x20] sm:$0xff] }
 0x63c   : > { %5163 = vmatmul.msk.f32.vlgmr.msrb.gmra.mxu2 %vm2142_vm5, %v2806_v58  ;;  %5165 = vmatmul.msk.f32.vlgmr.msrb.gmra.mxu3 %vm2142_vm5, %v2807_v59 }
 0x63d   : > { %3066 = vmatpush.msra.mxu0 %v6171_v44  ;;  %3089 = vmatpush.msra.mxu1 %v6184_v51 }
 0x63e   : > { %v2781_v1 = vpop.f32.mrf.mxu2  ;;  %v2801_v2 = vpop.f32.mrf.mxu3 }
 0x63f   : > { %v2782_v3 = vadd.f32 %v5328_v62, %v2781_v1  ;;  %v2802_v61 = vadd.f32 %v5329_v0, %v2801_v2  ;;  %v5431_v0 = vld [vmem:[%s5833_s10 + $0x18] sm:$0xff] }
 0x640   : > { %v5432_v2 = vld [vmem:[%s5829_s7 + $0x78] sm:$0xff] }
 0x641   : > { %3020 = vmatpush.msra.mxu2 %v2782_v3  ;;  %3043 = vmatpush.msra.mxu3 %v2802_v61  ;;  %v5433_v3 = vld [vmem:[%s5833_s10 + $0x10] sm:$0xff] }
 0x642   : > { %v5434_v61 = vld [vmem:[%s5829_s7 + $0x70] sm:$0xff] }
 0x643   : > { %3112 = vmatpush.msrb.mxu2 %v6174_v45  ;;  %3135 = vmatpush.msrb.mxu3 %v6181_v50 }
 0x6b2   : > { %v2831_v6 = vpop.f32.mrf.mxu0  ;;  %v2857_v11 = vpop.f32.mrf.mxu1 }
 0x6b3   : > { %v2912_v7 = vsel %vm2142_vm5, %v2831_v6, -inf  ;;  %v2915_v60 = vsel %vm2142_vm5, %v2857_v11, -inf }
 0x6b4   : > { %2913 = vmax.xlane.f32.xlu1 %v2912_v7  ;;  %v5436_v7 = vld [vmem:[%s5829_s7 + $0x68] sm:$0xff] }
 0x6bf   : > { %v2883_v4 = vpop.f32.mrf.mxu2  ;;  %v2909_v9 = vpop.f32.mrf.mxu3 }
 0x6c0   : > { %v2921_v63 = vsel %vm2142_vm5, %v2909_v9, -inf  ;;  %v2918_v10 = vsel %vm2142_vm5, %v2883_v4, -inf }
 0x6c1   : > { %2922 = vmax.xlane.f32.xlu0 %v2921_v63  ;;  %2919 = vmax.xlane.f32.xlu2 %v2918_v10 }
 0x6c9   : > { %2916 = vmax.xlane.f32.xlu2 %v2915_v60 }
 0x727   : > { %v2914_v12 = vpop.xlane.xlu1 %2913 }
 0x728   : > { %v2924_v13 = vsub.f32 %v2831_v6, %v2914_v12  ;;  %v5435_v6 = vld [vmem:[%s5833_s10 + $0x8] sm:$0xff] }
 0x72a   : > { %v2928_v14 = vmul.f32 1.442695, %v2924_v13 }
 0x72c   : > { %5361 = vpow2.f32 %v2928_v14 }
 0x732   : > { %v5362_v15 = vpop.eup %5361 }
 0x733   : > { %v2936_v16 = vsel %vm2142_vm5, %v5362_v15, 0.0 }
 0x734   : > { %v2923_v17 = vpop.xlane.xlu0 %2922  ;;  %v2920_v18 = vpop.xlane.xlu2 %2919  ;;  %2937 = vadd.xlane.f32.xlu2 %v2936_v16 }
 0x735   : > { %v2927_v19 = vsub.f32 %v2909_v9, %v2923_v17  ;;  %v2926_v20 = vsub.f32 %v2883_v4, %v2920_v18  ;;  %v5437_v4 = vld [vmem:[%s5833_s10] sm:$0xff] }
 0x736   : > { %v5438_v9 = vld [vmem:[%s5829_s7 + $0x60] sm:$0xff] }
 0x737   : > { %v2934_v21 = vmul.f32 1.442695, %v2927_v19  ;;  %v2932_v22 = vmul.f32 1.442695, %v2926_v20  ;;  %v5330_v18 = vld [vmem:[%s6204_s23] ss:$0 sm:$0xff] }
 0x739   : > { %5363 = vpow2.f32 %v2934_v21 }
 0x73a   : > { %5365 = vpow2.f32 %v2932_v22 }
 0x73c   : > { %v2917_v23 = vpop.xlane.xlu2 %2916 }
 0x73d   : > { %v2925_v24 = vsub.f32 %v2857_v11, %v2917_v23 }
 0x73f   : > { %v5364_v25 = vpop.eup %5363  ;;  %v2930_v26 = vmul.f32 1.442695, %v2925_v24 }
 0x740   : > { %v5366_v27 = vpop.eup %5365  ;;  %v2945_v28 = vsel %vm2142_vm5, %v5364_v25, 0.0 }
 0x741   : > { %5367 = vpow2.f32 %v2930_v26  ;;  %v2942_v29 = vsel %vm2142_vm5, %v5366_v27, 0.0  ;;  %2946 = vadd.xlane.f32.xlu1 %v2945_v28 }
 0x742   : > { %2943 = vadd.xlane.f32.xlu0 %v2942_v29 }
 0x747   : > { %v5368_v30 = vpop.eup %5367 }
 0x748   : > { %v2939_v31 = vsel %vm2142_vm5, %v5368_v30, 0.0 }
 0x74a   : > { %2940 = vadd.xlane.f32.xlu0 %v2939_v31 }
 0x752   : > { %3277 = vadd.xlane.f32.xlu0 %v3276_v55  ;;  %v5443_v55 = vld [vmem:[%s5833_s10 + $0x70] sm:$0xff] }
 0x7a7   : > { %v2938_v32 = vpop.xlane.xlu2 %2937 }
 0x7a8   : > { %5369 = vrcp.f32 %v2938_v32 }
 0x7ae   : > { %v5370_v33 = vpop.eup %5369 }
 0x7af   : > { %v2952_v34 = vmul.f32 %v5370_v33, %v5362_v15 }
 0x7b1   : > { %5166 = vmatmul.msk.f32.vlgmr.msrb.gmra.mxu0 %vm2142_vm5, %v2952_v34 }
 0x7b4   : > { %v2947_v35 = vpop.xlane.xlu1 %2946 }
 0x7b5   : > { %v2944_v36 = vpop.xlane.xlu0 %2943  ;;  %5371 = vrcp.f32 %v2947_v35 }
 0x7b6   : > { %5373 = vrcp.f32 %v2944_v36 }
 0x7bb   : > { %v5372_v37 = vpop.eup %5371 }
 0x7bc   : > { %v5374_v38 = vpop.eup %5373  ;;  %v2955_v39 = vmul.f32 %v5372_v37, %v5364_v25 }
 0x7bd   : > { %v2954_v40 = vmul.f32 %v5374_v38, %v5366_v27  ;;  %v2941_v41 = vpop.xlane.xlu0 %2940 }
 0x7be   : > { %5375 = vrcp.f32 %v2941_v41  ;;  %5169 = vmatmul.msk.f32.vlgmr.msra.gmra.mxu3 %vm2142_vm5, %v2955_v39 }
 0x7bf   : > { %5168 = vmatmul.msk.f32.vlgmr.msra.gmra.mxu2 %vm2142_vm5, %v2954_v40  ;;  %3360 = vmatpush.msra.mxu3 %v5427_v52 }
 0x7c0   : > { %3340 = vmatpush.msra.mxu2 %v5423_v46 }
 0x7c1   : > { %3361 = vmatpush.msra.mxu3 %v5428_v54  ;;  %v5442_v54 = vld [vmem:[%s5853_s11 + $0x18] sm:$0xff] }
 0x7c2   : > { %3341 = vmatpush.msra.mxu2 %v5424_v47  ;;  %v6231_v47 = vld [vmem:[%s5875_s5 + $0x8] sm:$0xff]  ;;  %s6686_s5 = sld [smem:[#allocation27_spill]] }
 0x7c3   : > { %3362 = vmatpush.msra.mxu3 %v5429_v56  ;;  %v5444_v56 = vld [vmem:[%s5853_s11 + $0x10] sm:$0xff] }
 0x7c4   : > { %v5376_v42 = vpop.eup %5375  ;;  %3342 = vmatpush.msra.mxu2 %v5425_v48  ;;  %v5440_v48 = vld [vmem:[%s5806_s26] ss:$0 sm:$0xff] }
 0x7c5   : > { %v2953_v43 = vmul.f32 %v5376_v42, %v5368_v30  ;;  %3363 = vmatpush.msra.mxu3 %v5430_v57  ;;  %v3278_v16 = vpop.xlane.xlu0 %3277  ;;  %v5445_v57 = vld [vmem:[%s5833_s10 + $0x68] sm:$0xff] }
 0x7c6   : > { %3343 = vmatpush.msra.mxu2 %v5426_v49  ;;  %v3279_v21 = vmul.f32 %v3278_v16, %v5809_v8 }
 0x7c7   : > { %5167 = vmatmul.msk.f32.vlgmr.msrb.gmra.mxu1 %vm2142_vm5, %v2953_v43  ;;  %v5439_v43 = vld [vmem:[%s5797_s22] ss:$0 sm:$0xff]  ;;  %s6687_s22 = sld [smem:[#allocation26_spill]] }
 0x7c8   : > { %v3280_v23 = vsub.f32 %v5176_v53, %v3279_v21  ;;  %v5441_v53 = vld [vmem:[%s5833_s10 + $0x78] sm:$0xff]  ;;  %s1597_s26 = scalar_lea.vmem %s6686_s5, %s5790_s0 }
 0x7ca   : > { %v3281_v26 = vmul.f32 %v3280_v23, %v3280_v23 }
 0x7cc   : > { %v3282_v27 = vsel %vm1787_vm0, %v3281_v26, 0.0  ;;  %v5457_v26 = vld [vmem:[%s5833_s10 + $0x38] sm:$0xff] }
 0x7cd   : > { %s1594_s6 = scalar_lea.vmem %s6687_s22, %s5970_s21  ;;  %s6688_s21 = sld [smem:[#allocation28_spill]] }
 0x82e   : > { %v2976_v58 = vpop.f32.mrf.mxu0 }
 0x82f   : > { %5170 = vmatmul.msk.f32.vlgmr.msra.gmra.mxu0 %vm2142_vm5, %v2976_v58  ;;  %v5446_v58 = vld [vmem:[%s5853_s11 + $0x8] sm:$0xff] }
 0x841   : > { %v3045_v59 = vpop.f32.mrf.mxu3 }
 0x842   : > { %v3022_v62 = vpop.f32.mrf.mxu2  ;;  %5173 = vmatmul.msk.f32.vlgmr.msrb.gmra.mxu3 %vm2142_vm5, %v3045_v59  ;;  %v5447_v59 = vld [vmem:[%s5833_s10 + $0x60] sm:$0xff] }
 0x843   : > { %5172 = vmatmul.msk.f32.vlgmr.msrb.gmra.mxu2 %vm2142_vm5, %v3022_v62  ;;  %3420 = vmatpush.msrb.mxu3 %v5431_v0  ;;  %v5448_v62 = vld [vmem:[%s5853_s11] sm:$0xff]  ;;  %v5449_v0 = vld [vmem:[%s5853_s11 + $0x78] sm:$0xff] }
 0x844   : > { %v2999_v1 = vpop.f32.mrf.mxu1  ;;  %3400 = vmatpush.msrb.mxu2 %v5432_v2  ;;  %v5451_v2 = vld [vmem:[%s5853_s11 + $0x68] sm:$0xff] }
 0x845   : > { %5171 = vmatmul.msk.f32.vlgmr.msra.gmra.mxu1 %vm2142_vm5, %v2999_v1  ;;  %3421 = vmatpush.msrb.mxu3 %v5433_v3  ;;  %v5450_v1 = vld [vmem:[%s5853_s11 + $0x70] sm:$0xff]  ;;  %v5452_v3 = vld [vmem:[%s5853_s11 + $0x60] sm:$0xff] }
 0x846   : > { %3401 = vmatpush.msrb.mxu2 %v5434_v61  ;;  %v6270_v61 = vld [vmem:[%s1594_s6 + $0x18] sm:$0xff] }
 0x847   : > { %3422 = vmatpush.msrb.mxu3 %v5435_v6  ;;  %3200 = vmatpush.msrb.mxu0 %v6270_v61  ;;  %v6273_v6 = vld [vmem:[%s1594_s6 + $0x10] sm:$0xff] }
 0x848   : > { %3402 = vmatpush.msrb.mxu2 %v5436_v7  ;;  %v6276_v7 = vld [vmem:[%s1594_s6 + $0x8] sm:$0xff] }
 0x849   : > { %3423 = vmatpush.msrb.mxu3 %v5437_v4  ;;  %3201 = vmatpush.msrb.mxu0 %v6273_v6  ;;  %v6278_v4 = vld [vmem:[%s1594_s6] sm:$0xff] }
 0x84a   : > { %3403 = vmatpush.msrb.mxu2 %v5438_v9  ;;  %v5453_v9 = vld [vmem:[%s5829_s7 + $0x58] sm:$0xff] }
 0x84b   : > { %3202 = vmatpush.msrb.mxu0 %v6276_v7 }
 0x84d   : > { %3203 = vmatpush.msrb.mxu0 %v6278_v4 }
 0x84f   : > { %3380 = vmatpush.msra.mxu0 %v5453_v9  ;;  %v5471_v9 = vld [vmem:[%s5905_s13 + $0x3] ss:$0 sm:$0xff] }
 0x8ac   : > { %v3068_v63 = vpop.f32.mrf.mxu0 }
 0x8ad   : > { %v3140_v60 = vsel %vm1787_vm0, %v3068_v63, 0.0  ;;  %v5454_v63 = vld [vmem:[%s5829_s7 + $0x50] sm:$0xff] }
 0x8ae   : > { %3381 = vmatpush.msra.mxu0 %v5454_v63 }
 0x8c2   : > { %v3091_v10 = vpop.f32.mrf.mxu1 }
 0x8c3   : > { %v3141_v11 = vsel %vm1787_vm0, %v3091_v10, 0.0 }
 0x8c4   : > { %v3142_v12 = vadd.f32 %v3141_v11, %v3140_v60  ;;  %v5455_v60 = vld [vmem:[%s5829_s7 + $0x48] sm:$0xff] }
 0x8c5   : > { %v3137_v14 = vpop.f32.mrf.mxu3  ;;  %3382 = vmatpush.msra.mxu0 %v5455_v60 }
 0x8c6   : > { %v3114_v13 = vpop.f32.mrf.mxu2  ;;  %v3145_v19 = vsel %vm1787_vm0, %v3137_v14, 0.0 }
 0x8c7   : > { %v3143_v15 = vsel %vm1787_vm0, %v3114_v13, 0.0  ;;  %v5456_v13 = vld [vmem:[%s5829_s7 + $0x40] sm:$0xff]  ;;  %s5254_s7 = sshll.u32 %s5790_s0, 6 }
 0x8c8   : > { %v3144_v17 = vadd.f32 %v3143_v15, %v3142_v12  ;;  %3383 = vmatpush.msra.mxu0 %v5456_v13  ;;  %v5473_v13 = vld [vmem:[%s5833_s10 + $0x58] sm:$0xff] }
 0x8ca   : > { %v3146_v20 = vadd.f32 %v3145_v19, %v3144_v17 }
 0x8cc   : > { %v3150_v22 = vadd.f32 %v5330_v18, %v3146_v20  ;;  %v6290_v20 = vld [vmem:[%s1614_s28] ss:$0 sm:$0xff]  ;;  %s6313_s28 = scalar_lea.vmem %s6688_s21, %s5254_s7 }
 0x8cd   : > { %v6363_v60 = vld [vmem:[%s6313_s28 + $0x8] sm:$0xff] }
 0x8ce   : > { %v3151_v24 = vadd.f32 %v3150_v22, %v6086_v5 }
 0x8d0   : > { %v3152_v25 = vsel %vm1787_vm0, %v3151_v24, 0.0 }
 0x8d1   : > { %3153 = vadd.xlane.f32.xlu1 %v3152_v25 }
 0x8d9   : > { %3283 = vadd.xlane.f32.xlu1 %v3282_v27  ;;  %v5458_v27 = vld [vmem:[%s5833_s10 + $0x30] sm:$0xff] }
 0x944   : > { %v3154_v28 = vpop.xlane.xlu1 %3153 }
 0x945   : > { %v3155_v29 = vmul.f32 %v3154_v28, %v5809_v8  ;;  %v5459_v28 = vld [vmem:[%s5833_s10 + $0x28] sm:$0xff] }
 0x947   : > { %v6221_v30 = vsub.f32 %v3151_v24, %v3155_v29  ;;  %v5460_v29 = vld [vmem:[%s5833_s10 + $0x20] sm:$0xff] }
 0x949   : > { %v3157_v31 = vmul.f32 %v6221_v30, %v6221_v30 }
 0x94b   : > { %v3158_v5 = vsel %vm1787_vm0, %v3157_v31, 0.0  ;;  %v5462_v31 = vld [vmem:[%s5853_s11 + $0x30] sm:$0xff] }
 0x94c   : > { %3159 = vadd.xlane.f32.xlu2 %v3158_v5  ;;  %v3284_v32 = vpop.xlane.xlu1 %3283  ;;  %v5463_v5 = vld [vmem:[%s5853_s11 + $0x28] sm:$0xff] }
 0x94d   : > { %v3285_v33 = vmul.f32 %v3284_v32, %v5809_v8  ;;  %v6318_v32 = vld [vmem:[%s6313_s28 + $0x38] sm:$0xff] }
 0x94e   : > { %3224 = vmatpush.msrb.mxu1 %v6318_v32 }
 0x94f   : > { %v3286_v34 = vadd.f32 1e-05, %v3285_v33  ;;  %v6321_v33 = vld [vmem:[%s6313_s28 + $0x30] sm:$0xff] }
 0x950   : > { %3225 = vmatpush.msrb.mxu1 %v6321_v33 }
 0x951   : > { %5377 = vrsqrt.f32 %v3286_v34  ;;  %vm3293_vm12 = vweird.f32 %v3286_v34 }
 0x957   : > { %v5378_v35 = vpop.eup %5377 }
 0x958   : > { %v3288_v36 = vmul.f32 %v5378_v35, %v3286_v34  ;;  %vm3294_vm13 = vweird.f32 %v5378_v35  ;;  %v5464_v34 = vld [vmem:[%s5853_s11 + $0x20] sm:$0xff] }
 0x959   : > { %vm3295_vm14 = vmor %vm3293_vm12, %vm3294_vm13 }
 0x95a   : > { %v3289_v37 = vmul.f32 %v5378_v35, %v3288_v36  ;;  %v6332_v36 = vld [vmem:[%s6313_s28 + $0x20] sm:$0xff] }
 0x95c   : > { %v3290_v38 = vmul.f32 0.5, %v3289_v37 }
 0x95e   : > { %v3291_v39 = vsub.f32 1.5, %v3290_v38 }
 0x960   : > { %v3292_v40 = vmul.f32 %v5378_v35, %v3291_v39  ;;  %v6338_v39 = vld [vmem:[%s6313_s28 + $0x18] sm:$0xff] }
 0x962   : > { %v3296_v41 = vsel %vm3295_vm14, %v5378_v35, %v3292_v40  ;;  %v6326_v35 = vld [vmem:[%s6313_s28 + $0x28] sm:$0xff]  ;;  %v5465_v40 = vld [vmem:[%s5822_s1] ss:$0 sm:$0xff] }
 0x963   : > { %v3297_v42 = vmul.f32 %v3296_v41, %v3280_v23  ;;  %v6296_v23 = vld [vmem:[%s1617_s9] ss:$0 sm:$0xff]  ;;  %3226 = vmatpush.msrb.mxu1 %v6326_v35  ;;  %s6689_s9 = sld [smem:[#allocation29_spill]] }
 0x965   : > { %v3298_v46 = vmul.f32 %v5439_v43, %v3297_v42  ;;  %3227 = vmatpush.msrb.mxu1 %v6332_v36 }
 0x967   : > { %v6234_v49 = vadd.f32 %v5440_v48, %v3298_v46  ;;  %3228 = vmatpush.msrb.mxu1 %v6338_v39  ;;  %v5466_v46 = vld [vmem:[%s5886_s8] ss:$0 sm:$0xff] }
 0x969   : > { %v6238_v52 = vadd.f32 %v6231_v47, %v6234_v49  ;;  %s1605_s22 = scalar_lea.vmem %s6689_s9, %s5790_s0 }
 0x96b   : > { %5180 = vmatmul.msk.f32.vlgmr.msra.gmra.mxu2 %vm1787_vm0, %v6238_v52  ;;  %5181 = vmatmul.msk.f32.vlgmr.msra.gmra.mxu3 %vm1787_vm0, %v6238_v52 }
 0x96c   : > { %3480 = vmatpush.msra.mxu2 %v5441_v53  ;;  %3503 = vmatpush.msra.mxu3 %v5442_v54  ;;  %v5467_v54 = vld [vmem:[%s5822_s1 + $0x3] ss:$0 sm:$0xff] }
 0x96e   : > { %3481 = vmatpush.msra.mxu2 %v5443_v55  ;;  %3504 = vmatpush.msra.mxu3 %v5444_v56 }
 0x970   : > { %3482 = vmatpush.msra.mxu2 %v5445_v57  ;;  %3505 = vmatpush.msra.mxu3 %v5446_v58  ;;  %v5468_v58 = vld [vmem:[%s5886_s8 + $0x3] ss:$0 sm:$0xff] }
 0x972   : > { %3483 = vmatpush.msra.mxu2 %v5447_v59  ;;  %3506 = vmatpush.msra.mxu3 %v5448_v62  ;;  %v5469_v62 = vld [vmem:[%s5905_s13] ss:$0 sm:$0xff] }
 0x973   : > { %5183 = vmatmul.msk.f32.vlgmr.msrb.gmra.mxu2 %vm1787_vm0, %v6238_v52  ;;  %5184 = vmatmul.msk.f32.vlgmr.msrb.gmra.mxu3 %vm1787_vm0, %v6238_v52 }
 0x974   : > { %3563 = vmatpush.msrb.mxu2 %v5449_v0 }
 0x976   : > { %3564 = vmatpush.msrb.mxu2 %v5450_v1 }
 0x978   : > { %3565 = vmatpush.msrb.mxu2 %v5451_v2  ;;  %v5470_v2 = vld [vmem:[%s5974_s24] sm:$0xff] }
 0x97a   : > { %3566 = vmatpush.msrb.mxu2 %v5452_v3 }
 0x97b   : > { %5187 = vmatmul.msk.f32.vlgmr.msra.gmra.mxu2 %vm1787_vm0, %v6238_v52  ;;  %5188 = vmatmul.msk.f32.vlgmr.msra.gmra.mxu3 %vm1787_vm0, %v6234_v49 }
 0x983   : > { %5191 = vmatmul.msk.f32.vlgmr.msrb.gmra.mxu2 %vm1787_vm0, %v6234_v49 }
 0x9bf   : > { %v3160_v10 = vpop.xlane.xlu2 %3159 }
 0x9c0   : > { %v3161_v11 = vmul.f32 %v3160_v10, %v5809_v8  ;;  %v5472_v10 = vld [vmem:[%s5974_s24 + $0x18] sm:$0xff] }
 0x9c2   : > { %v3162_v12 = vadd.f32 1e-05, %v3161_v11  ;;  %v6359_v11 = vld [vmem:[%s6313_s28 + $0x10] sm:$0xff] }
 0x9c3   : > { %3229 = vmatpush.msrb.mxu1 %v6359_v11 }
 0x9c4   : > { %5379 = vrsqrt.f32 %v3162_v12  ;;  %vm3169_vm1 = vweird.f32 %v3162_v12 }
 0x9c5   : > { %3230 = vmatpush.msrb.mxu1 %v6363_v60 }
 0x9ca   : > { %v5380_v14 = vpop.eup %5379 }
 0x9cb   : > { %v3164_v15 = vmul.f32 %v5380_v14, %v3162_v12  ;;  %vm3170_vm15 = vweird.f32 %v5380_v14  ;;  %v6367_v12 = vld [vmem:[%s6313_s28] sm:$0xff] }
 0x9cc   : > { %vm3171_vm2 = vmor %vm3169_vm1, %vm3170_vm15  ;;  %3231 = vmatpush.msrb.mxu1 %v6367_v12 }
 0x9cd   : > { %v3165_v16 = vmul.f32 %v5380_v14, %v3164_v15  ;;  %v5475_v15 = vld [vmem:[%s5833_s10 + $0x48] sm:$0xff] }
 0x9ce   : > { %3460 = vmatpush.msra.mxu1 %v5473_v13 }
 0x9cf   : > { %v3166_v17 = vmul.f32 0.5, %v3165_v16  ;;  %v5476_v16 = vld [vmem:[%s5833_s10 + $0x40] sm:$0xff] }
 0x9d1   : > { %v3167_v18 = vsub.f32 1.5, %v3166_v17  ;;  %v6377_v17 = vld [vmem:[%s1597_s26] ss:$0 sm:$0xff] }
 0x9d3   : > { %v3168_v19 = vmul.f32 %v5380_v14, %v3167_v18 }
 0x9d5   : > { %v3172_v21 = vsel %vm3171_vm2, %v5380_v14, %v3168_v19  ;;  %v5474_v14 = vld [vmem:[%s5833_s10 + $0x50] sm:$0xff] }
 0x9d6   : > { %v3173_v22 = vmul.f32 %v3172_v21, %v6221_v30  ;;  %v5461_v30 = vld [vmem:[%s5853_s11 + $0x38] sm:$0xff]  ;;  %3461 = vmatpush.msra.mxu1 %v5474_v14 }
 0x9d8   : > { %v3177_v24 = vmul.f32 %v6290_v20, %v3173_v22  ;;  %3462 = vmatpush.msra.mxu1 %v5475_v15  ;;  %v5477_v22 = vld [vmem:[%s5853_s11 + $0x58] sm:$0xff] }
 0x9da   : > { %v6300_v25 = vadd.f32 %v6296_v23, %v3177_v24  ;;  %3463 = vmatpush.msra.mxu1 %v5476_v16 }
 0x9dc   : > { %5174 = vmatmul.msk.f32.vlgmr.msrb.gmra.mxu0 %vm1787_vm0, %v6300_v25 }
 0x9dd   : > { %3440 = vmatpush.msrb.mxu0 %v5457_v26  ;;  %v5478_v26 = vld [vmem:[%s5853_s11 + $0x50] sm:$0xff] }
 0x9df   : > { %3441 = vmatpush.msrb.mxu0 %v5458_v27  ;;  %v5479_v27 = vld [vmem:[%s5853_s11 + $0x48] sm:$0xff] }
 0x9e1   : > { %3442 = vmatpush.msrb.mxu0 %v5459_v28  ;;  %v5480_v28 = vld [vmem:[%s5853_s11 + $0x40] sm:$0xff] }
 0x9e3   : > { %3443 = vmatpush.msrb.mxu0 %v5460_v29  ;;  %v5481_v29 = vld [vmem:[%s5822_s1 + $0x1] ss:$0 sm:$0xff] }
 0x9e4   : > { %5182 = vmatmul.msk.f32.vlgmr.msra.gmra.mxu0 %vm1787_vm0, %v6238_v52 }
 0x9e5   : > { %3523 = vmatpush.msra.mxu0 %v5461_v30 }
 0x9e7   : > { %3524 = vmatpush.msra.mxu0 %v5462_v31 }
 0x9e9   : > { %3525 = vmatpush.msra.mxu0 %v5463_v5  ;;  %v5482_v5 = vld [vmem:[%s5886_s8 + $0x1] ss:$0 sm:$0xff] }
 0x9eb   : > { %3526 = vmatpush.msra.mxu0 %v5464_v34 }
 0x9ec   : > { %5185 = vmatmul.msk.f32.vlgmr.msrb.gmra.mxu0 %vm1787_vm0, %v6238_v52 }
 0x9ee   : > { %v3345_v37 = vpop.f32.mrf.mxu2  ;;  %v6334_v38 = vpop.f32.mrf.mxu3 }
 0x9ef   : > { %v3346_v41 = vadd.f32 %v5465_v40, %v3345_v37  ;;  %v3366_v30 = vadd.f32 %v5481_v29, %v6334_v38 }
 0x9f1   : > { %v3571_v53 = vmul.f32 0.35355338, %v3346_v41  ;;  %v3572_v37 = vmul.f32 0.35355338, %v3366_v30  ;;  %v5483_v41 = vld [vmem:[%s5905_s13 + $0x1] ss:$0 sm:$0xff] }
 0x9f4   : > { %5189 = vmatmul.msk.f32.vlgmr.msra.gmra.mxu0 %vm1787_vm0, %v6234_v49 }
 0x9f6   : > { %v3405_v42 = vpop.f32.mrf.mxu2  ;;  %v3425_v43 = vpop.f32.mrf.mxu3 }
 0x9f7   : > { %v3426_v48 = vadd.f32 %v5466_v46, %v3425_v43  ;;  %v3406_v55 = vadd.f32 %v5467_v54, %v3405_v42  ;;  %v5485_v54 = vld [vmem:[%s5822_s1 + $0x2] ss:$0 sm:$0xff] }
 0x9f9   : > { %5192 = vmatpush.xpose.msk.msrb.mxu3 %vm2142_vm5, %v3426_v48  ;;  %v3574_v1 = vmul.f32 0.35355338, %v3406_v55 }
 0x9fc   : > { %5193 = vmatmul.msk.f32.vlgmr.msrb.gmra.mxu3 %vm2142_vm5, %v3571_v53 }
 0x9fe   : > { %v3485_v56 = vpop.f32.mrf.mxu2  ;;  %v3508_v57 = vpop.f32.mrf.mxu3 }
 0x9ff   : > { %v3486_v59 = vadd.f32 %v5468_v58, %v3485_v56  ;;  %v3509_v0 = vadd.f32 %v5469_v62, %v3508_v57  ;;  %v5486_v57 = vld [vmem:[%s5886_s8 + $0x2] ss:$0 sm:$0xff] }
 0xa01   : > { %5198 = vmatpush.xpose.msk.msra.mxu2 %vm2142_vm5, %v3486_v59  ;;  %3741 = vmatpush.msra.mxu3 %v3509_v0  ;;  %v5487_v0 = vld [vmem:[%s5905_s13 + $0x2] ss:$0 sm:$0xff]  ;;  %s6690_s13 = sld [smem:[#allocation33_spill]] }
 0xa03   : > { %3833 = vmatpush.msrb.mxu3 %v5470_v2 }
 0xa04   : > { %5199 = vmatmul.msk.f32.vlgmr.msra.gmra.mxu2 %vm2142_vm5, %v3574_v1 }
 0xa06   : > { %v3568_v3 = vpop.f32.mrf.mxu2 }
 0xa07   : > { %v3569_v63 = vadd.f32 %v5471_v9, %v3568_v3  ;;  %v5488_v9 = vld [vmem:[%s5974_s24 + $0x10] sm:$0xff] }
 0xa09   : > { %3810 = vmatpush.msrb.mxu2 %v3569_v63 }
 0xa0b   : > { %3902 = vmatpush.msra.mxu2 %v5472_v10 }
 0xa59   : > { %v3205_v18 = vpop.f32.mrf.mxu0 }
 0xa5a   : > { %v3206_v19 = vadd.f32 %v6377_v17, %v3205_v18 }
 0xa5c   : > { %v3208_v21 = vmax.f32 %v3206_v19, 0.0 }
 0xa5e   : > { %5175 = vmatmul.msk.f32.vlgmr.msrb.gmra.mxu1 %vm3212_vm3, %v3208_v21 }
 0xa5f   : > { %3543 = vmatpush.msrb.mxu1 %v5477_v22 }
 0xa61   : > { %v3385_v24 = vpop.f32.mrf.mxu0  ;;  %3544 = vmatpush.msrb.mxu1 %v5478_v26 }
 0xa62   : > { %v3386_v55 = vadd.f32 %v5485_v54, %v3385_v24  ;;  %v5494_v54 = vld [vmem:[%s6032_s25 + $0x70] sm:$0xff] }
 0xa63   : > { %3545 = vmatpush.msrb.mxu1 %v5479_v27 }
 0xa64   : > { %v3573_v59 = vmul.f32 0.35355338, %v3386_v55  ;;  %v5495_v55 = vld [vmem:[%s6032_s25 + $0x68] sm:$0xff] }
 0xa65   : > { %3546 = vmatpush.msrb.mxu1 %v5480_v28 }
 0xa66   : > { %5186 = vmatmul.msk.f32.vlgmr.msra.gmra.mxu1 %vm1787_vm0, %v6238_v52  ;;  %v5484_v52 = vld [vmem:[%s5974_s24 + $0x8] sm:$0xff] }
 0xa69   : > { %v3445_v31 = vpop.f32.mrf.mxu0 }
 0xa6a   : > { %v3446_v34 = vadd.f32 %v5482_v5, %v3445_v31 }
 0xa6c   : > { %5194 = vmatpush.xpose.msk.msrb.mxu0 %vm2142_vm5, %v3446_v34 }
 0xa6e   : > { %5190 = vmatmul.msk.f32.vlgmr.msrb.gmra.mxu1 %vm1787_vm0, %v6234_v49 }
 0xa6f   : > { %5195 = vmatmul.msk.f32.vlgmr.msrb.gmra.mxu0 %vm2142_vm5, %v3572_v37 }
 0xa71   : > { %v3528_v40 = vpop.f32.mrf.mxu0 }
 0xa72   : > { %v3529_v42 = vadd.f32 %v5483_v41, %v3528_v40  ;;  %v5489_v41 = vld [vmem:[%s6032_s25 + $0x18] sm:$0xff] }
 0xa74   : > { %3764 = vmatpush.msra.mxu0 %v3529_v42  ;;  %v5490_v42 = vld [vmem:[%s6032_s25 + $0x10] sm:$0xff] }
 0xa76   : > { %3856 = vmatpush.msrb.mxu0 %v5484_v52 }
 0xa7f   : > { %v3598_v38 = vpop.f32.mrf.mxu3 }
 0xa80   : > { %v3679_v43 = vsel %vm2142_vm5, %v3598_v38, -inf }
 0xa81   : > { %3680 = vmax.xlane.f32.xlu2 %v3679_v43 }
 0xa87   : > { %v3676_v46 = vpop.f32.mrf.mxu2 }
 0xa88   : > { %v3688_v48 = vsel %vm2142_vm5, %v3676_v46, -inf }
 0xa89   : > { %3689 = vmax.xlane.f32.xlu0 %v3688_v48  ;;  %v5493_v48 = vld [vmem:[%s6032_s25 + $0x78] sm:$0xff] }
 0xadb   : > { %v6398_v53 = vpop.f32.mrf.mxu1 }
 0xae3   : > { %v3465_v56 = vpop.f32.mrf.mxu1 }
 0xae4   : > { %v3466_v58 = vadd.f32 %v5486_v57, %v3465_v56  ;;  %v5496_v56 = vld [vmem:[%s6032_s25 + $0x60] sm:$0xff] }
 0xae6   : > { %5196 = vmatpush.xpose.msk.msra.mxu1 %vm2142_vm5, %v3466_v58 }
 0xae9   : > { %5197 = vmatmul.msk.f32.vlgmr.msra.gmra.mxu1 %vm2142_vm5, %v3573_v59 }
 0xaeb   : > { %v3548_v62 = vpop.f32.mrf.mxu1 }
 0xaec   : > { %v3549_v1 = vadd.f32 %v5487_v0, %v3548_v62  ;;  %v3624_v2 = vpop.f32.mrf.mxu0 }
 0xaed   : > { %v3682_v3 = vsel %vm2142_vm5, %v3624_v2, -inf }
 0xaee   : > { %3787 = vmatpush.msrb.mxu1 %v3549_v1  ;;  %3683 = vmax.xlane.f32.xlu1 %v3682_v3 }
 0xaf0   : > { %3879 = vmatpush.msra.mxu1 %v5488_v9  ;;  %v5497_v9 = vld [vmem:[%s6032_s25 + $0x38] sm:$0xff] }
 0xaf4   : > { %v3681_v63 = vpop.xlane.xlu2 %3680 }
 0xaf5   : > { %v3691_v10 = vsub.f32 %v3598_v38, %v3681_v63  ;;  %v5491_v38 = vld [vmem:[%s6032_s25 + $0x8] sm:$0xff]  ;;  %v5498_v63 = vld [vmem:[%s6032_s25 + $0x30] sm:$0xff] }
 0xaf7   : > { %v3695_v13 = vmul.f32 1.442695, %v3691_v10  ;;  %v5499_v10 = vld [vmem:[%s6032_s25 + $0x28] sm:$0xff] }
 0xaf9   : > { %5381 = vpow2.f32 %v3695_v13  ;;  %v5500_v13 = vld [vmem:[%s6032_s25 + $0x20] sm:$0xff] }
 0xafc   : > { %v3690_v14 = vpop.xlane.xlu0 %3689 }
 0xafd   : > { %v3694_v15 = vsub.f32 %v3676_v46, %v3690_v14  ;;  %v5492_v46 = vld [vmem:[%s6032_s25] sm:$0xff] }
 0xaff   : > { %v5382_v16 = vpop.eup %5381  ;;  %v3701_v18 = vmul.f32 1.442695, %v3694_v15  ;;  %v5501_v15 = vld [vmem:[%s6053_s29 + $0x18] sm:$0xff] }
 0xb00   : > { %v3703_v19 = vsel %vm2142_vm5, %v5382_v16, 0.0 }
 0xb01   : > { %5383 = vpow2.f32 %v3701_v18  ;;  %3704 = vadd.xlane.f32.xlu0 %v3703_v19  ;;  %v5503_v18 = vld [vmem:[%s6053_s29 + $0x8] sm:$0xff] }
 0xb07   : > { %v5384_v21 = vpop.eup %5383 }
 0xb08   : > { %v3712_v22 = vsel %vm2142_vm5, %v5384_v21, 0.0 }
 0xb09   : > { %3713 = vadd.xlane.f32.xlu1 %v3712_v22  ;;  %v5505_v22 = vld [vmem:[%s6053_s29 + $0x78] sm:$0xff] }
 0xb61   : > { %v3684_v24 = vpop.xlane.xlu1 %3683 }
 0xb62   : > { %v3692_v26 = vsub.f32 %v3624_v2, %v3684_v24  ;;  %v5506_v24 = vld [vmem:[%s6053_s29 + $0x70] sm:$0xff] }
 0xb64   : > { %v3697_v27 = vmul.f32 1.442695, %v3692_v26  ;;  %v5507_v26 = vld [vmem:[%s6053_s29 + $0x68] sm:$0xff] }
 0xb66   : > { %5385 = vpow2.f32 %v3697_v27  ;;  %v3650_v28 = vpop.f32.mrf.mxu1  ;;  %v5508_v27 = vld [vmem:[%s6053_s29 + $0x60] sm:$0xff] }
 0xb67   : > { %v3685_v29 = vsel %vm2142_vm5, %v3650_v28, -inf }
 0xb68   : > { %3686 = vmax.xlane.f32.xlu2 %v3685_v29 }
 0xb6c   : > { %v5386_v30 = vpop.eup %5385 }
 0xb6d   : > { %v3706_v31 = vsel %vm2142_vm5, %v5386_v30, 0.0 }
 0xb70   : > { %3707 = vadd.xlane.f32.xlu2 %v3706_v31  ;;  %v5509_v31 = vld [vmem:[%s6032_s25 + $0x58] sm:$0xff] }
 0xb74   : > { %v3705_v5 = vpop.xlane.xlu0 %3704 }
 0xb75   : > { %5387 = vrcp.f32 %v3705_v5  ;;  %v5510_v5 = vld [vmem:[%s6032_s25 + $0x50] sm:$0xff] }
 0xb7b   : > { %v5388_v34 = vpop.eup %5387 }
 0xb7c   : > { %v3719_v37 = vmul.f32 %v5388_v34, %v5382_v16  ;;  %v3714_v40 = vpop.xlane.xlu1 %3713  ;;  %v5502_v16 = vld [vmem:[%s6053_s29 + $0x10] sm:$0xff] }
 0xb7d   : > { %5389 = vrcp.f32 %v3714_v40  ;;  %v5512_v40 = vld [vmem:[%s6032_s25 + $0x40] sm:$0xff] }
 0xb7e   : > { %5200 = vmatmul.msk.f32.vlgmr.msra.gmra.mxu3 %vm2142_vm5, %v3719_v37  ;;  %v5511_v37 = vld [vmem:[%s6032_s25 + $0x48] sm:$0xff] }
 0xb7f   : > { %3957 = vmatpush.msra.mxu3 %v5489_v41  ;;  %v5513_v41 = vld [vmem:[%s6053_s29 + $0x38] sm:$0xff] }
 0xb81   : > { %3958 = vmatpush.msra.mxu3 %v5490_v42  ;;  %v5514_v42 = vld [vmem:[%s6053_s29 + $0x30] sm:$0xff] }
 0xb83   : > { %v5390_v52 = vpop.eup %5389  ;;  %3959 = vmatpush.msra.mxu3 %v5491_v38  ;;  %v5516_v38 = vld [vmem:[%s6053_s29 + $0x20] sm:$0xff] }
 0xb84   : > { %v3722_v43 = vmul.f32 %v5390_v52, %v5384_v21  ;;  %v5504_v21 = vld [vmem:[%s6053_s29] sm:$0xff]  ;;  %v5515_v52 = vld [vmem:[%s6053_s29 + $0x28] sm:$0xff] }
 0xb85   : > { %3960 = vmatpush.msra.mxu3 %v5492_v46 }
 0xb86   : > { %5203 = vmatmul.msk.f32.vlgmr.msrb.gmra.mxu2 %vm2142_vm5, %v3722_v43  ;;  %v5177_v43 = vld [vmem:[%s5984_s3 + $0x8] sm:$0xff]  ;;  %s1620_s3 = scalar_lea.vmem %s6690_s13, %s5790_s0 }
 0xb87   : > { %4017 = vmatpush.msrb.mxu2 %v5493_v48  ;;  %v3300_v46 = vsel %vm1787_vm0, %v5177_v43, 0.0 }
 0xb88   : > { %3301 = vadd.xlane.f32.xlu2 %v3300_v46 }
 0xb89   : > { %4018 = vmatpush.msrb.mxu2 %v5494_v54  ;;  %v5517_v54 = vld [vmem:[%s6053_s29 + $0x58] sm:$0xff] }
 0xb8b   : > { %4019 = vmatpush.msrb.mxu2 %v5495_v55  ;;  %v5518_v55 = vld [vmem:[%s6053_s29 + $0x50] sm:$0xff] }
 0xb8d   : > { %4020 = vmatpush.msrb.mxu2 %v5496_v56  ;;  %v5519_v56 = vld [vmem:[%s6053_s29 + $0x48] sm:$0xff] }
 0xbdb   : > { %v3687_v57 = vpop.xlane.xlu2 %3686 }
 0xbdc   : > { %v3693_v58 = vsub.f32 %v3650_v28, %v3687_v57  ;;  %v5520_v57 = vld [vmem:[%s6053_s29 + $0x40] sm:$0xff] }
 0xbde   : > { %v3699_v59 = vmul.f32 1.442695, %v3693_v58 }
 0xbe0   : > { %5391 = vpow2.f32 %v3699_v59 }
 0xbe3   : > { %v3708_v62 = vpop.xlane.xlu2 %3707 }
 0xbe4   : > { %5393 = vrcp.f32 %v3708_v62 }
 0xbe6   : > { %v5392_v0 = vpop.eup %5391 }
 0xbe7   : > { %v3709_v1 = vsel %vm2142_vm5, %v5392_v0, 0.0 }
 0xbe8   : > { %3710 = vadd.xlane.f32.xlu0 %v3709_v1 }
 0xbea   : > { %v5394_v2 = vpop.eup %5393 }
 0xbeb   : > { %v3720_v3 = vmul.f32 %v5394_v2, %v5386_v30 }
 0xbed   : > { %5201 = vmatmul.msk.f32.vlgmr.msra.gmra.mxu0 %vm2142_vm5, %v3720_v3 }
 0xbee   : > { %3977 = vmatpush.msra.mxu0 %v5497_v9 }
 0xbf0   : > { %3978 = vmatpush.msra.mxu0 %v5498_v63 }
 0xbf2   : > { %3979 = vmatpush.msra.mxu0 %v5499_v10 }
 0xbf4   : > { %3980 = vmatpush.msra.mxu0 %v5500_v13 }
 0xbfb   : > { %v3302_v63 = vpop.xlane.xlu2 %3301 }
 0xc01   : > { %v3743_v14 = vpop.f32.mrf.mxu3 }
 0xc02   : > { %5204 = vmatmul.msk.f32.vlgmr.msrb.gmra.mxu3 %vm2142_vm5, %v3743_v14 }
 0xc03   : > { %4040 = vmatpush.msrb.mxu3 %v5501_v15  ;;  %v3303_v15 = vmul.f32 %v3302_v63, %v5809_v8  ;;  %v5523_v63 = vld [vmem:[%s6015_s15] ss:$0 sm:$0xff] }
 0xc05   : > { %4041 = vmatpush.msrb.mxu3 %v5502_v16  ;;  %v5521_v16 = vld [vmem:[%s5993_s12] ss:$0 sm:$0xff] }
 0xc07   : > { %4042 = vmatpush.msrb.mxu3 %v5503_v18 }
 0xc09   : > { %v3812_v19 = vpop.f32.mrf.mxu2  ;;  %4043 = vmatpush.msrb.mxu3 %v5504_v21  ;;  %v3304_v21 = vsub.f32 %v5177_v43, %v3303_v15 }
 0xc0a   : > { %5207 = vmatmul.msk.f32.vlgmr.msra.gmra.mxu2 %vm2142_vm5, %v3812_v19 }
 0xc0b   : > { %4100 = vmatpush.msra.mxu2 %v5505_v22 }
 0xc0d   : > { %4101 = vmatpush.msra.mxu2 %v5506_v24  ;;  %v3305_v24 = vmul.f32 %v3304_v21, %v3304_v21 }
 0xc0f   : > { %4102 = vmatpush.msra.mxu2 %v5507_v26  ;;  %v3306_v26 = vsel %vm1787_vm0, %v3305_v24, 0.0  ;;  %v5529_v24 = vld [vmem:[%s6090_s18 + $0x78] sm:$0xff] }
 0xc11   : > { %4103 = vmatpush.msra.mxu2 %v5508_v27 }
 0xc5b   : > { %v3711_v28 = vpop.xlane.xlu0 %3710 }
 0xc5c   : > { %5395 = vrcp.f32 %v3711_v28 }
 0xc62   : > { %v5396_v29 = vpop.eup %5395 }
 0xc63   : > { %v3721_v30 = vmul.f32 %v5396_v29, %v5392_v0 }
 0xc65   : > { %5202 = vmatmul.msk.f32.vlgmr.msrb.gmra.mxu1 %vm2142_vm5, %v3721_v30 }
 0xc66   : > { %3997 = vmatpush.msrb.mxu1 %v5509_v31 }
 0xc68   : > { %3998 = vmatpush.msrb.mxu1 %v5510_v5 }
 0xc6a   : > { %v3766_v34 = vpop.f32.mrf.mxu0  ;;  %3999 = vmatpush.msrb.mxu1 %v5511_v37 }
 0xc6b   : > { %5205 = vmatmul.msk.f32.vlgmr.msrb.gmra.mxu0 %vm2142_vm5, %v3766_v34 }
 0xc6c   : > { %4000 = vmatpush.msrb.mxu1 %v5512_v40  ;;  %4060 = vmatpush.msrb.mxu0 %v5513_v41 }
 0xc6e   : > { %4061 = vmatpush.msrb.mxu0 %v5514_v42 }
 0xc70   : > { %4062 = vmatpush.msrb.mxu0 %v5515_v52 }
 0xc72   : > { %4063 = vmatpush.msrb.mxu0 %v5516_v38 }
 0xc85   : > { %v3835_v59 = vpop.f32.mrf.mxu3 }
 0xc86   : > { %v3907_v0 = vsel %vm1787_vm0, %v3835_v59, 0.0 }
 0xc8d   : > { %v3904_v1 = vpop.f32.mrf.mxu2 }
 0xc8e   : > { %v3912_v13 = vsel %vm1787_vm0, %v3904_v1, 0.0 }
 0xce2   : > { %v3789_v48 = vpop.f32.mrf.mxu1 }
 0xce3   : > { %5206 = vmatmul.msk.f32.vlgmr.msra.gmra.mxu1 %vm2142_vm5, %v3789_v48 }
 0xce4   : > { %4080 = vmatpush.msra.mxu1 %v5517_v54 }
 0xce6   : > { %4081 = vmatpush.msra.mxu1 %v5518_v55 }
 0xce8   : > { %4082 = vmatpush.msra.mxu1 %v5519_v56  ;;  %v3858_v58 = vpop.f32.mrf.mxu0 }
 0xce9   : > { %v3908_v62 = vsel %vm1787_vm0, %v3858_v58, 0.0 }
 0xcea   : > { %4083 = vmatpush.msra.mxu1 %v5520_v57  ;;  %v3909_v2 = vadd.f32 %v3908_v62, %v3907_v0 }
 0xd60   : > { %v3881_v3 = vpop.f32.mrf.mxu1 }
 0xd61   : > { %v3910_v9 = vsel %vm1787_vm0, %v3881_v3, 0.0  ;;  %v5522_v3 = vld [vmem:[%s6011_s30] ss:$0 sm:$0xff] }
 0xd62   : > { %v3911_v10 = vadd.f32 %v3910_v9, %v3909_v2 }
 0xd64   : > { %v3913_v14 = vadd.f32 %v3912_v13, %v3911_v10  ;;  %v5524_v13 = vld [vmem:[%s5963_s14] ss:$0 sm:$0xff]  ;;  %s6692_s14 = sld [smem:[#allocation37_spill]] }
 0xd66   : > { %v3914_v18 = vadd.f32 %v5521_v16, %v3913_v14  ;;  %v5525_v16 = vld [vmem:[%s5967_s19] ss:$0 sm:$0xff]  ;;  %s6693_s19 = sld [smem:[#allocation35_spill]] }
 0xd68   : > { %v3915_v19 = vadd.f32 %v3914_v18, %v6234_v49 }
 0xd6a   : > { %v3916_v22 = vsel %vm1787_vm0, %v3915_v19, 0.0 }
 0xd6b   : > { %3917 = vadd.xlane.f32.xlu1 %v3916_v22  ;;  %v5528_v22 = vld [vmem:[%s6090_s18 + $0x58] sm:$0xff] }
 0xd6c   : > { %s6597_s24 = scalar_lea.vmem %s6693_s19, %s6692_s14 }
 0xd73   : > { %3307 = vadd.xlane.f32.xlu1 %v3306_v26  ;;  %v5530_v26 = vld [vmem:[%s6090_s18 + $0x10] sm:$0xff] }
 0xdde   : > { %v3918_v27 = vpop.xlane.xlu1 %3917 }
 0xddf   : > { %v3919_v28 = vmul.f32 %v3918_v27, %v5809_v8  ;;  %v5531_v27 = vld [vmem:[%s6090_s18 + $0x30] sm:$0xff] }
 0xde1   : > { %v3920_v29 = vsub.f32 %v3915_v19, %v3919_v28  ;;  %v5526_v19 = vld [vmem:[%s6090_s18 + $0x18] sm:$0xff]  ;;  %v5532_v28 = vld [vmem:[%s6090_s18 + $0x50] sm:$0xff] }
 0xde3   : > { %v3921_v30 = vmul.f32 %v3920_v29, %v3920_v29 }
 0xde5   : > { %v3922_v31 = vsel %vm1787_vm0, %v3921_v30, 0.0 }
 0xde6   : > { %3923 = vadd.xlane.f32.xlu0 %v3922_v31  ;;  %v3308_v5 = vpop.xlane.xlu1 %3307  ;;  %v5534_v31 = vld [vmem:[%s6090_s18 + $0x8] sm:$0xff] }
 0xde7   : > { %v3309_v34 = vmul.f32 %v3308_v5, %v5809_v8  ;;  %v5535_v5 = vld [vmem:[%s6090_s18 + $0x28] sm:$0xff] }
 0xde9   : > { %v3310_v49 = vadd.f32 1e-05, %v3309_v34  ;;  %v5536_v34 = vld [vmem:[%s6090_s18 + $0x48] sm:$0xff] }
 0xdeb   : > { %5397 = vrsqrt.f32 %v3310_v49  ;;  %vm3317_vm4 = vweird.f32 %v3310_v49 }
 0xdf1   : > { %v5398_v37 = vpop.eup %5397 }
 0xdf2   : > { %v3312_v42 = vmul.f32 %v5398_v37, %v3310_v49  ;;  %vm3318_vm6 = vweird.f32 %v5398_v37  ;;  %v5537_v49 = vld [vmem:[%s6090_s18 + $0x68] sm:$0xff] }
 0xdf3   : > { %vm3319_vm8 = vmor %vm3317_vm4, %vm3318_vm6 }
 0xdf4   : > { %v3313_v38 = vmul.f32 %v5398_v37, %v3312_v42  ;;  %v5541_v42 = vld [vmem:[%s6090_s18 + $0x60] sm:$0xff] }
 0xdf6   : > { %v3314_v43 = vmul.f32 0.5, %v3313_v38 }
 0xdf8   : > { %v3315_v54 = vsub.f32 1.5, %v3314_v43 }
 0xdfa   : > { %v3316_v57 = vmul.f32 %v5398_v37, %v3315_v54 }
 0xdfc   : > { %v3320_v62 = vsel %vm3319_vm8, %v5398_v37, %v3316_v57  ;;  %v5538_v37 = vld [vmem:[%s6090_s18] sm:$0xff] }
 0xdfd   : > { %v3321_v2 = vmul.f32 %v3320_v62, %v3304_v21  ;;  %v5527_v21 = vld [vmem:[%s6090_s18 + $0x38] sm:$0xff] }
 0xdff   : > { %v3322_v14 = vmul.f32 %v5524_v13, %v3321_v2 }
 0xe01   : > { %v3323_v18 = vadd.f32 %v5525_v16, %v3322_v14  ;;  %v5547_v14 = vld [vmem:[%s6025_s17 + $0x3] ss:$0 sm:$0xff]  ;;  %v5548_v16 = vld [vmem:[%s6119_s4] ss:$0 sm:$0xff] }
 0xe59   : > { %v3924_v40 = vpop.xlane.xlu0 %3923 }
 0xe5a   : > { %v3925_v41 = vmul.f32 %v3924_v40, %v5809_v8  ;;  %v5539_v40 = vld [vmem:[%s6090_s18 + $0x20] sm:$0xff] }
 0xe5c   : > { %v3926_v52 = vadd.f32 1e-05, %v3925_v41  ;;  %v5540_v41 = vld [vmem:[%s6090_s18 + $0x40] sm:$0xff] }
 0xe5e   : > { %5399 = vrsqrt.f32 %v3926_v52  ;;  %vm3933_vm9 = vweird.f32 %v3926_v52 }
 0xe64   : > { %v5400_v46 = vpop.eup %5399 }
 0xe65   : > { %v3928_v48 = vmul.f32 %v5400_v46, %v3926_v52  ;;  %vm3934_vm7 = vweird.f32 %v5400_v46 }
 0xe66   : > { %vm3935_vm10 = vmor %vm3933_vm9, %vm3934_vm7 }
 0xe67   : > { %v3929_v55 = vmul.f32 %v5400_v46, %v3928_v48  ;;  %v5542_v48 = vld [vmem:[%s6025_s17 + $0x1] ss:$0 sm:$0xff] }
 0xe69   : > { %v3930_v56 = vmul.f32 0.5, %v3929_v55 }
 0xe6b   : > { %v3931_v58 = vsub.f32 1.5, %v3930_v56  ;;  %v5543_v56 = vld [vmem:[%s6025_s17 + $0x2] ss:$0 sm:$0xff] }
 0xe6d   : > { %v3932_v59 = vmul.f32 %v5400_v46, %v3931_v58  ;;  %v5544_v58 = vld [vmem:[%s6119_s4 + $0x1] ss:$0 sm:$0xff] }
 0xe6f   : > { %v3936_v0 = vsel %vm3935_vm10, %v5400_v46, %v3932_v59 }
 0xe70   : > { %v3937_v1 = vmul.f32 %v3936_v0, %v3920_v29  ;;  %v5533_v29 = vld [vmem:[%s6090_s18 + $0x70] sm:$0xff]  ;;  %v5545_v0 = vld [vmem:[%s6119_s4 + $0x2] ss:$0 sm:$0xff] }
 0xe72   : > { %v3938_v9 = vmul.f32 %v5522_v3, %v3937_v1 }
 0xe74   : > { %v6469_v10 = vadd.f32 %v5523_v63, %v3938_v9  ;;  %v5546_v9 = vld [vmem:[%s6025_s17] ss:$0 sm:$0xff]  ;;  %s6691_s17 = sld [smem:[#allocation34_spill]] }
 0xe76   : > { %v3940_v15 = vadd.f32 %v6231_v47, %v6469_v10  ;;  %v5179_v47 = vld [vmem:[%s6100_s27 + $0x8] sm:$0xff] }
 0xe77   : > { %v3941_v30 = vadd.f32 %v5179_v47, %v3323_v18 }
 0xe78   : > { %5208 = vmatmul.msk.f32.vlgmr.msra.gmra.mxu3 %vm1787_vm0, %v3940_v15  ;;  %5209 = vmatmul.msk.f32.vlgmr.msra.gmra.mxu0 %vm1787_vm0, %v3940_v15 }
 0xe79   : > { %5210 = vmatmul.msk.f32.vlgmr.msrb.gmra.mxu1 %vm1787_vm0, %v3940_v15  ;;  %5211 = vmatmul.msk.f32.vlgmr.msrb.gmra.mxu2 %vm1787_vm0, %v3940_v15 }
 0xe7a   : > { %4123 = vmatpush.msra.mxu3 %v5526_v19  ;;  %4143 = vmatpush.msra.mxu0 %v5527_v21  ;;  %v5549_v21 = vld [vmem:[%s6119_s4 + $0x3] ss:$0 sm:$0xff]  ;;  %s1623_s8 = scalar_lea.vmem %s6691_s17, %s5790_s0 }
 0xe7b   : > { %4163 = vmatpush.msrb.mxu1 %v5528_v22  ;;  %4183 = vmatpush.msrb.mxu2 %v5529_v24  ;;  %v5550_v24 = vld [vmem:[%s6131_s16 + $0x1] ss:$0 sm:$0xff] }
 0xe7c   : > { %4124 = vmatpush.msra.mxu3 %v5530_v26  ;;  %4144 = vmatpush.msra.mxu0 %v5531_v27 }
 0xe7d   : > { %4164 = vmatpush.msrb.mxu1 %v5532_v28  ;;  %4184 = vmatpush.msrb.mxu2 %v5533_v29  ;;  %v5551_v29 = vld [vmem:[%s6131_s16 + $0x2] ss:$0 sm:$0xff] }
 0xe7e   : > { %4125 = vmatpush.msra.mxu3 %v5534_v31  ;;  %4145 = vmatpush.msra.mxu0 %v5535_v5 }
 0xe7f   : > { %4165 = vmatpush.msrb.mxu1 %v5536_v34  ;;  %4185 = vmatpush.msrb.mxu2 %v5537_v49  ;;  %v5552_v34 = vld [vmem:[%s6131_s16] ss:$0 sm:$0xff] }
 0xe80   : > { %5212 = vmatmul.msk.f32.vlgmr.msrb.gmra.mxu3 %vm1787_vm0, %v3941_v30  ;;  %5213 = vmatmul.msk.f32.vlgmr.msrb.gmra.mxu0 %vm1787_vm0, %v3941_v30 }
 0xe81   : > { %5214 = vmatmul.msk.f32.vlgmr.msra.gmra.mxu1 %vm1787_vm0, %v3941_v30  ;;  %5215 = vmatmul.msk.f32.vlgmr.msra.gmra.mxu2 %vm1787_vm0, %v3941_v30 }
 0xe82   : > { %4126 = vmatpush.msra.mxu3 %v5538_v37  ;;  %4146 = vmatpush.msra.mxu0 %v5539_v40  ;;  %v5553_v40 = vld [vmem:[%s6131_s16 + $0x3] ss:$0 sm:$0xff] }
 0xe83   : > { %4166 = vmatpush.msrb.mxu1 %v5540_v41  ;;  %4186 = vmatpush.msrb.mxu2 %v5541_v42 }
 0xe88   : > { %5216 = vmatmul.msk.f32.vlgmr.msra.gmra.mxu3 %vm1787_vm0, %v3323_v18  ;;  %5217 = vmatmul.msk.f32.vlgmr.msra.gmra.mxu0 %vm1787_vm0, %v3323_v18 }
 0xe89   : > { %5218 = vmatmul.msk.f32.vlgmr.msrb.gmra.mxu1 %vm1787_vm0, %v3323_v18  ;;  %5219 = vmatmul.msk.f32.vlgmr.msrb.gmra.mxu2 %vm1787_vm0, %v3323_v18 }
 0xef5   : > { %v3982_v52 = vpop.f32.mrf.mxu0 }
 0xef6   : > { %v4002_v38 = vpop.f32.mrf.mxu1  ;;  %v3983_v54 = vadd.f32 %v5542_v48, %v3982_v52 }
 0xef7   : > { %v4003_v57 = vadd.f32 %v5543_v56, %v4002_v38 }
 0xef8   : > { %v4192_v2 = vmul.f32 0.35355338, %v3983_v54 }
 0xef9   : > { %v4193_v3 = vmul.f32 0.35355338, %v4003_v57 }
 0xefb   : > { %v3962_v43 = vpop.f32.mrf.mxu3 }
 0xefc   : > { %v4022_v46 = vpop.f32.mrf.mxu2  ;;  %v3963_v63 = vadd.f32 %v5546_v9, %v3962_v43 }
 0xefd   : > { %v4065_v55 = vpop.f32.mrf.mxu0  ;;  %v4023_v15 = vadd.f32 %v5547_v14, %v4022_v46 }
 0xefe   : > { %v4066_v59 = vadd.f32 %v5544_v58, %v4065_v55  ;;  %v4085_v62 = vpop.f32.mrf.mxu1  ;;  %v4191_v28 = vmul.f32 0.35355338, %v3963_v63 }
 0xeff   : > { %v4086_v1 = vadd.f32 %v5545_v0, %v4085_v62  ;;  %v4194_v31 = vmul.f32 0.35355338, %v4023_v15 }
 0xf00   : > { %5222 = vmatpush.xpose.msk.msrb.mxu0 %vm2142_vm5, %v4066_v59 }
 0xf01   : > { %5224 = vmatpush.xpose.msk.msra.mxu1 %vm2142_vm5, %v4086_v1 }
 0xf03   : > { %v4045_v13 = vpop.f32.mrf.mxu3  ;;  %5223 = vmatmul.msk.f32.vlgmr.msrb.gmra.mxu0 %vm2142_vm5, %v4192_v2 }
 0xf04   : > { %v4046_v18 = vadd.f32 %v5548_v16, %v4045_v13  ;;  %v4105_v19 = vpop.f32.mrf.mxu2  ;;  %5225 = vmatmul.msk.f32.vlgmr.msra.gmra.mxu1 %vm2142_vm5, %v4193_v3  ;;  %v6538_v16 = vld [vmem:[%s1605_s22] ss:$0 sm:$0xff] }
 0xf05   : > { %v4106_v47 = vadd.f32 %v5549_v21, %v4105_v19  ;;  %v4148_v22 = vpop.f32.mrf.mxu0  ;;  %v3234_v19 = vadd.f32 %v6538_v16, %v6398_v53 }
 0xf06   : > { %v4149_v26 = vadd.f32 %v5550_v24, %v4148_v22  ;;  %v4168_v27 = vpop.f32.mrf.mxu1  ;;  %5220 = vmatpush.xpose.msk.msrb.mxu3 %vm2142_vm5, %v4046_v18 }
 0xf07   : > { %v4169_v30 = vadd.f32 %v5551_v29, %v4168_v27  ;;  %5226 = vmatpush.xpose.msk.msra.mxu2 %vm2142_vm5, %v4106_v47  ;;  %v6544_v47 = vadd.f32 %v3234_v19, %v6300_v25 }
 0xf08   : > { %4384 = vmatpush.msra.mxu0 %v4149_v26 }
 0xf09   : > { %4407 = vmatpush.msrb.mxu1 %v4169_v30  ;;  %5221 = vmatmul.msk.f32.vlgmr.msrb.gmra.mxu3 %vm2142_vm5, %v4191_v28  ;;  %v3237_v22 = vsel %vm1787_vm0, %v6544_v47, 0.0 }
 0xf0a   : > { %5227 = vmatmul.msk.f32.vlgmr.msra.gmra.mxu2 %vm2142_vm5, %v4194_v31  ;;  %4476 = vmatpush.msrb.mxu0 %v6184_v51 }
 0xf0b   : > { %v4128_v5 = vpop.f32.mrf.mxu3  ;;  %4499 = vmatpush.msra.mxu1 %v6174_v45 }
 0xf0c   : > { %v4129_v49 = vadd.f32 %v5552_v34, %v4128_v5  ;;  %v4188_v37 = vpop.f32.mrf.mxu2 }
 0xf0d   : > { %v4189_v41 = vadd.f32 %v5553_v40, %v4188_v37 }
 0xf0e   : > { %4361 = vmatpush.msra.mxu3 %v4129_v49 }
 0xf0f   : > { %4430 = vmatpush.msrb.mxu2 %v4189_v41 }
 0xf10   : > { %4453 = vmatpush.msrb.mxu3 %v6171_v44 }
 0xf11   : > { %4522 = vmatpush.msra.mxu2 %v6181_v50 }
 0xf80   : > { %v4244_v42 = vpop.f32.mrf.mxu0 }
 0xf81   : > { %v4302_v52 = vsel %vm2142_vm5, %v4244_v42, -inf  ;;  %v4270_v46 = vpop.f32.mrf.mxu1 }
 0xf82   : > { %4303 = vmax.xlane.f32.xlu1 %v4302_v52  ;;  %v4305_v48 = vsel %vm2142_vm5, %v4270_v46, -inf }
 0xf8c   : > { %v4218_v38 = vpop.f32.mrf.mxu3 }
 0xf8d   : > { %v4296_v51 = vpop.f32.mrf.mxu2  ;;  %v4299_v43 = vsel %vm2142_vm5, %v4218_v38, -inf }
 0xf8e   : > { %v4308_v45 = vsel %vm2142_vm5, %v4296_v51, -inf  ;;  %4300 = vmax.xlane.f32.xlu2 %v4299_v43 }
 0xf8f   : > { %4309 = vmax.xlane.f32.xlu0 %v4308_v45 }
 0xf96   : > { %4306 = vmax.xlane.f32.xlu2 %v4305_v48 }
 0xff5   : > { %v4304_v54 = vpop.xlane.xlu1 %4303 }
 0xff6   : > { %v4312_v44 = vsub.f32 %v4244_v42, %v4304_v54  ;;  %v5554_v42 = vld [vmem:[%s6204_s23] ss:$0 sm:$0xff] }
 0xff8   : > { %v4317_v55 = vmul.f32 1.442695, %v4312_v44 }
 0xffa   : > { %5401 = vpow2.f32 %v4317_v55 }
0x1000   : > { %v5402_v50 = vpop.eup %5401 }
0x1001   : > { %v4301_v56 = vpop.xlane.xlu2 %4300  ;;  %v4326_v57 = vsel %vm2142_vm5, %v5402_v50, 0.0 }
0x1002   : > { %v4310_v58 = vpop.xlane.xlu0 %4309  ;;  %v4311_v59 = vsub.f32 %v4218_v38, %v4301_v56  ;;  %4327 = vadd.xlane.f32.xlu2 %v4326_v57 }
0x1003   : > { %v4314_v62 = vsub.f32 %v4296_v51, %v4310_v58 }
0x1004   : > { %v4315_v0 = vmul.f32 1.442695, %v4311_v59 }
0x1005   : > { %v4321_v1 = vmul.f32 1.442695, %v4314_v62 }
0x1006   : > { %5403 = vpow2.f32 %v4315_v0 }
0x1007   : > { %5405 = vpow2.f32 %v4321_v1 }
0x1009   : > { %v4307_v2 = vpop.xlane.xlu2 %4306 }
0x100a   : > { %v4313_v3 = vsub.f32 %v4270_v46, %v4307_v2 }
0x100c   : > { %v5404_v9 = vpop.eup %5403  ;;  %v4319_v63 = vmul.f32 1.442695, %v4313_v3 }
0x100d   : > { %v5406_v13 = vpop.eup %5405  ;;  %v4323_v14 = vsel %vm2142_vm5, %v5404_v9, 0.0 }
0x100e   : > { %5407 = vpow2.f32 %v4319_v63  ;;  %v4332_v15 = vsel %vm2142_vm5, %v5406_v13, 0.0  ;;  %4324 = vadd.xlane.f32.xlu0 %v4323_v14 }
0x100f   : > { %4333 = vadd.xlane.f32.xlu1 %v4332_v15 }
0x1014   : > { %v5408_v18 = vpop.eup %5407 }
0x1015   : > { %v4329_v21 = vsel %vm2142_vm5, %v5408_v18, 0.0 }
0x1016   : > { %4330 = vadd.xlane.f32.xlu0 %v4329_v21 }
0x101e   : > { %3238 = vadd.xlane.f32.xlu0 %v3237_v22 }
0x1075   : > { %v4328_v24 = vpop.xlane.xlu2 %4327 }
0x1076   : > { %5409 = vrcp.f32 %v4328_v24 }
0x107c   : > { %v5410_v26 = vpop.eup %5409 }
0x107d   : > { %v4340_v27 = vmul.f32 %v5410_v26, %v5402_v50 }
0x107f   : > { %5229 = vmatmul.msk.f32.vlgmr.msra.gmra.mxu0 %vm2142_vm5, %v4340_v27 }
0x1080   : > { %4595 = vmatpush.msra.mxu0 %v6318_v32 }
0x1081   : > { %v4325_v28 = vpop.xlane.xlu0 %4324 }
0x1082   : > { %v4334_v53 = vpop.xlane.xlu1 %4333  ;;  %5411 = vrcp.f32 %v4325_v28  ;;  %4596 = vmatpush.msra.mxu0 %v6321_v33 }
0x1083   : > { %5413 = vrcp.f32 %v4334_v53  ;;  %v5335_v53 = vld [vmem:[%s1620_s3] ss:$0 sm:$0xff] }
0x1084   : > { %4597 = vmatpush.msra.mxu0 %v6326_v35 }
0x1086   : > { %4598 = vmatpush.msra.mxu0 %v6332_v36 }
0x1088   : > { %v5412_v25 = vpop.eup %5411  ;;  %4599 = vmatpush.msra.mxu0 %v6338_v39 }
0x1089   : > { %v5414_v29 = vpop.eup %5413  ;;  %v4339_v30 = vmul.f32 %v5412_v25, %v5404_v9  ;;  %v4331_v31 = vpop.xlane.xlu0 %4330 }
0x108a   : > { %v4342_v5 = vmul.f32 %v5414_v29, %v5406_v13  ;;  %5415 = vrcp.f32 %v4331_v31  ;;  %4600 = vmatpush.msra.mxu0 %v6359_v11  ;;  %v5336_v29 = vld [vmem:[%s1623_s8] ss:$0 sm:$0xff] }
0x108b   : > { %5228 = vmatmul.msk.f32.vlgmr.msra.gmra.mxu3 %vm2142_vm5, %v4339_v30 }
0x108c   : > { %5231 = vmatmul.msk.f32.vlgmr.msrb.gmra.mxu2 %vm2142_vm5, %v4342_v5  ;;  %4575 = vmatpush.msra.mxu3 %v6270_v61 }
0x108d   : > { %4601 = vmatpush.msra.mxu0 %v6363_v60 }
0x108e   : > { %4576 = vmatpush.msra.mxu3 %v6273_v6 }
0x108f   : > { %4602 = vmatpush.msra.mxu0 %v6367_v12 }
0x1090   : > { %v5416_v32 = vpop.eup %5415  ;;  %4577 = vmatpush.msra.mxu3 %v6276_v7 }
0x1091   : > { %v4341_v33 = vmul.f32 %v5416_v32, %v5408_v18  ;;  %v3239_v43 = vpop.xlane.xlu0 %3238 }
0x1092   : > { %4578 = vmatpush.msra.mxu3 %v6278_v4  ;;  %v3240_v48 = vmul.f32 %v3239_v43, %v5809_v8 }
0x1093   : > { %5230 = vmatmul.msk.f32.vlgmr.msrb.gmra.mxu1 %vm2142_vm5, %v4341_v33 }
0x1094   : > { %v3241_v55 = vsub.f32 %v6544_v47, %v3240_v48 }
0x1096   : > { %v3242_v56 = vmul.f32 %v3241_v55, %v3241_v55 }
0x10fc   : > { %v4386_v35 = vpop.f32.mrf.mxu0 }
0x10fd   : > { %5233 = vmatmul.msk.f32.vlgmr.msrb.gmra.mxu0 %vm2142_vm5, %v4386_v35 }
0x110e   : > { %v4363_v36 = vpop.f32.mrf.mxu3 }
0x110f   : > { %v4432_v39 = vpop.f32.mrf.mxu2  ;;  %5232 = vmatmul.msk.f32.vlgmr.msrb.gmra.mxu3 %vm2142_vm5, %v4363_v36 }
0x1110   : > { %5235 = vmatmul.msk.f32.vlgmr.msra.gmra.mxu2 %vm2142_vm5, %v4432_v39  ;;  %v4409_v61 = vpop.f32.mrf.mxu1 }
0x1111   : > { %5234 = vmatmul.msk.f32.vlgmr.msra.gmra.mxu1 %vm2142_vm5, %v4409_v61 }
0x117a   : > { %v4478_v6 = vpop.f32.mrf.mxu0 }
0x117b   : > { %v4528_v4 = vsel %vm1787_vm0, %v4478_v6, 0.0 }
0x118e   : > { %v4501_v7 = vpop.f32.mrf.mxu1 }
0x118f   : > { %v4530_v49 = vsel %vm1787_vm0, %v4501_v7, 0.0 }
0x1192   : > { %v4455_v11 = vpop.f32.mrf.mxu3 }
0x1193   : > { %v4527_v60 = vsel %vm1787_vm0, %v4455_v11, 0.0  ;;  %v4524_v34 = vpop.f32.mrf.mxu2 }
0x1194   : > { %v4529_v12 = vadd.f32 %v4528_v4, %v4527_v60  ;;  %v4532_v40 = vsel %vm1787_vm0, %v4524_v34, 0.0 }
0x1196   : > { %v4531_v37 = vadd.f32 %v4530_v49, %v4529_v12 }
0x1198   : > { %v4533_v41 = vadd.f32 %v4532_v40, %v4531_v37 }
0x119a   : > { %v4534_v52 = vadd.f32 %v5554_v42, %v4533_v41 }
0x119c   : > { %v4535_v38 = vadd.f32 %v4534_v52, %v6469_v10  ;;  %v3243_v10 = vsel %vm1787_vm0, %v3242_v56, 0.0 }
0x119e   : > { %v4536_v51 = vsel %vm1787_vm0, %v4535_v38, 0.0 }
0x119f   : > { %4537 = vadd.xlane.f32.xlu1 %v4536_v51 }
0x1212   : > { %v4538_v45 = vpop.xlane.xlu1 %4537 }
0x1213   : > { %v4539_v46 = vmul.f32 %v4538_v45, %v5809_v8 }
0x1215   : > { %v4540_v54 = vsub.f32 %v4535_v38, %v4539_v46 }
0x1217   : > { %v4541_v44 = vmul.f32 %v4540_v54, %v4540_v54 }
0x1219   : > { %v4542_v50 = vsel %vm1787_vm0, %v4541_v44, 0.0 }
0x121a   : > { %4543 = vadd.xlane.f32.xlu2 %v4542_v50 }
0x1222   : > { %3244 = vadd.xlane.f32.xlu2 %v3243_v10 }
0x128d   : > { %v4544_v57 = vpop.xlane.xlu2 %4543 }
0x128e   : > { %v4545_v58 = vmul.f32 %v4544_v57, %v5809_v8 }
0x1290   : > { %v4546_v59 = vadd.f32 1e-05, %v4545_v58 }
0x1292   : > { %5417 = vrsqrt.f32 %v4546_v59  ;;  %vm4553_vm11 = vweird.f32 %v4546_v59 }
0x1295   : > { %v3245_v62 = vpop.xlane.xlu2 %3244 }
0x1296   : > { %v3246_v0 = vmul.f32 %v3245_v62, %v5809_v8 }
0x1298   : > { %v5418_v1 = vpop.eup %5417  ;;  %v3247_v2 = vadd.f32 1e-05, %v3246_v0 }
0x1299   : > { %v4548_v3 = vmul.f32 %v5418_v1, %v4546_v59  ;;  %vm4554_vm5 = vweird.f32 %v5418_v1 }
0x129a   : > { %5419 = vrsqrt.f32 %v3247_v2  ;;  %vm4555_vm12 = vmor %vm4553_vm11, %vm4554_vm5  ;;  %vm3254_vm14 = vweird.f32 %v3247_v2 }
0x129b   : > { %v4549_v9 = vmul.f32 %v5418_v1, %v4548_v3 }
0x129d   : > { %v4550_v63 = vmul.f32 0.5, %v4549_v9 }
0x129f   : > { %v4551_v13 = vsub.f32 1.5, %v4550_v63 }
0x12a0   : > { %v5420_v14 = vpop.eup %5419 }
0x12a1   : > { %v4552_v15 = vmul.f32 %v5418_v1, %v4551_v13  ;;  %v3249_v18 = vmul.f32 %v5420_v14, %v3247_v2  ;;  %vm3255_vm13 = vweird.f32 %v5420_v14 }
0x12a2   : > { %vm3256_vm15 = vmor %vm3254_vm14, %vm3255_vm13 }
0x12a3   : > { %v4556_v19 = vsel %vm4555_vm12, %v5418_v1, %v4552_v15  ;;  %v3250_v21 = vmul.f32 %v5420_v14, %v3249_v18 }
0x12a4   : > { %v4557_v47 = vmul.f32 %v4556_v19, %v4540_v54 }
0x12a5   : > { %v3251_v22 = vmul.f32 0.5, %v3250_v21 }
0x12a6   : > { %v4558_v24 = vmul.f32 %v6290_v20, %v4557_v47 }
0x12a7   : > { %v3252_v26 = vsub.f32 1.5, %v3251_v22 }
0x12a8   : > { %v4559_v27 = vadd.f32 %v6296_v23, %v4558_v24 }
0x12a9   : > { %v3253_v28 = vmul.f32 %v5420_v14, %v3252_v26 }
0x12aa   : > { %5236 = vmatmul.msk.f32.vlgmr.msra.gmra.mxu3 %vm1787_vm0, %v4559_v27 }
0x12ab   : > { %v3257_v25 = vsel %vm3256_vm15, %v5420_v14, %v3253_v28 }
0x12ac   : > { %v3258_v30 = vmul.f32 %v3257_v25, %v3241_v55 }
0x12ae   : > { %v3262_v31 = vmul.f32 %v5335_v53, %v3258_v30 }
0x12b0   : > { %v3266_v20 = vadd.f32 %v5336_v29, %v3262_v31 }
0x12b2   : > { %3267 = vst.msk [vmem:[%s6597_s24] sm:$0xff] %vm1787_vm0, %v3266_v20 }
0x132d   : > { %v4580_v5 = vpop.f32.mrf.mxu3 }
0x132e   : > { %v4581_v23 = vadd.f32 %v6377_v17, %v4580_v5 }
0x1330   : > { %v4583_v32 = vmax.f32 %v4581_v23, 0.0 }
0x1332   : > { %5237 = vmatmul.msk.f32.vlgmr.msra.gmra.mxu0 %vm3212_vm3, %v4583_v32 }
0x13af   : > { %v4604_v33 = vpop.f32.mrf.mxu0 }
0x13b0   : > { %v4605_v35 = vadd.f32 %v6538_v16, %v4604_v33 }
0x13b2   : > { %v4607_v36 = vadd.f32 %v4605_v35, %v4559_v27 }
0x13b4   : > { %v4608_v39 = vsel %vm1787_vm0, %v4607_v36, 0.0 }
0x13b5   : > { %4609 = vadd.xlane.f32.xlu1 %v4608_v39 }
0x1428   : > { %v4610_v61 = vpop.xlane.xlu1 %4609 }
0x1429   : > { %v4611_v6 = vmul.f32 %v4610_v61, %v5809_v8 }
0x142b   : > { %v4612_v7 = vsub.f32 %v4607_v36, %v4611_v6 }
0x142d   : > { %v4613_v11 = vmul.f32 %v4612_v7, %v4612_v7 }
0x142f   : > { %v4614_v4 = vsel %vm1787_vm0, %v4613_v11, 0.0 }
0x1430   : > { %4615 = vadd.xlane.f32.xlu0 %v4614_v4 }
0x14a3   : > { %v4616_v60 = vpop.xlane.xlu0 %4615 }
0x14a4   : > { %v4617_v17 = vmul.f32 %v4616_v60, %v5809_v8 }
0x14a6   : > { %v4618_v12 = vadd.f32 1e-05, %v4617_v17 }
0x14a8   : > { %5421 = vrsqrt.f32 %v4618_v12  ;;  %vm4625_vm2 = vweird.f32 %v4618_v12 }
0x14ae   : > { %v5422_v34 = vpop.eup %5421 }
0x14af   : > { %v4620_v16 = vmul.f32 %v5422_v34, %v4618_v12  ;;  %vm4626_vm1 = vweird.f32 %v5422_v34 }
0x14b0   : > { %vm4627_vm3 = vmor %vm4625_vm2, %vm4626_vm1 }
0x14b1   : > { %v4621_v49 = vmul.f32 %v5422_v34, %v4620_v16 }
0x14b3   : > { %v4622_v37 = vmul.f32 0.5, %v4621_v49 }
0x14b5   : > { %v4623_v40 = vsub.f32 1.5, %v4622_v37 }
0x14b7   : > { %v4624_v41 = vmul.f32 %v5422_v34, %v4623_v40 }
0x14b9   : > { %v4628_v42 = vsel %vm4627_vm3, %v5422_v34, %v4624_v41 }
0x14ba   : > { %v4629_v52 = vmul.f32 %v4628_v42, %v4612_v7 }
0x14bc   : > { %v4630_v38 = vmul.f32 %v5335_v53, %v4629_v52 }
0x14be   : > { %v4631_v51 = vadd.f32 %v5336_v29, %v4630_v38 }
0x14c0   : > { %5238 = vst.msk [vmem:[%s6597_s24 + $0x8] sm:$0xff] %vm1787_vm0, %v4631_v51 }
0x14c1 PF: > { %s6694_s30 = sld [smem:[#allocation36_spill]] }
0x14c7   : > { %s79_s15 = sadd.s32 1, %s6694_s30  }
0x14c8   : > { %p76_p5 = scmp.ge.s32.totalorder %s79_s15, 4  }
0x14ca   :  { %78 = sbr.rel (!%p76_p5) target bundleno = 81 (0x51), region = 324 }

</bundles_post_ra>
